<compile_context>
chip_gen: v7x
topology: tpu7x:2x2x1
jax: 0.10.0
libtpu: 0.0.40
codegen_flags: <defaults>
</compile_context>

<pallas_src>
import math
import functools

import jax
import jax.numpy as jnp
from jax.experimental import pallas as pl
from jax.experimental.pallas import tpu as pltpu

LANE = 128  # TPU vreg lane width; all channel-like dims are padded to this.


def _ceil_lane(n):
    return ((n + LANE - 1) // LANE) * LANE


def _mosaic(dims, est_bytes):
    # Size the scoped-VMEM limit from the actual blocks (x2 double buffering)
    # instead of the 16/32 MiB default; clamp to 64 MiB so it is legal on v7x.
    lim = int(min(64 << 20, max(8 << 20, 2 * int(est_bytes) + (2 << 20))))
    return pltpu.CompilerParams(dimension_semantics=dims, vmem_limit_bytes=lim)


# --------------------------------------------------------------------------
# Pallas kernels
# --------------------------------------------------------------------------

def _conv_kernel(*refs, n_in, kh, kw, stride, H, W, Wo, th, Cp, fuse_gn, act, eps):
    """Fused 3x3 conv (+bias) [+GroupNorm] [+ReLU] on one (batch, row-tile).

    ref layout: x_0..x_{n_in-1}, w(Kt,Cp) bf16, b(1,Cp),
                [gamma(1,Cp), beta(1,Cp), gavg(Cp,Cp)],
                out(1, th*Wo, Cp), [pad scratches (Hp,Wp,Cp) x n_in (stride 1)]
    """
    xs = refs[:n_in]
    w_ref = refs[n_in]
    b_ref = refs[n_in + 1]
    idx = n_in + 2
    if fuse_gn:
        g_ref, bt_ref, gavg_ref = refs[idx:idx + 3]
        idx += 3
    o_ref = refs[idx]
    pads = refs[idx + 1:]

    t = pl.program_id(1)
    r0 = t * th                                   # first output row of this tile

    windows = []
    for n in range(n_in):
        if stride == 1:
            pr = pads[n]
            # In-kernel zero-padded halo: no jnp.pad HBM round trip in XLA.
            pr[...] = jnp.zeros(pr.shape, jnp.float32)
            pr[pl.ds(1, H), pl.ds(1, W), :] = xs[n][0]
            for i in range(kh):
                for j in range(kw):
                    windows.append(pr[pl.ds(r0 + i, th), pl.ds(j, Wo), :])
        else:
            # stride 2: wrapper folded the padded input to
            # (1, Hp//2, 2, Wp//2, 2*Cp); every tap is a contiguous,
            # 128-aligned read (no sublane-strided loads).
            for i in range(kh):
                for j in range(kw):
                    windows.append(
                        xs[n][0, pl.ds(r0 + i // 2, th), i % 2,
                              pl.ds(j // 2, Wo),
                              (j % 2) * Cp:(j % 2) * Cp + Cp])

    # Fuse all taps into the contraction dim: ONE dot with K = n_in*kh*kw*Cp.
    lhs = jnp.concatenate(windows, axis=-1).reshape(th * Wo, n_in * kh * kw * Cp)
    acc = jnp.dot(lhs.astype(jnp.bfloat16), w_ref[...],
                  preferred_element_type=jnp.float32) + b_ref[...]

    if fuse_gn:
        # Centered two-pass GroupNorm (group stats via a tiny group-averaging
        # matmul; pad channels carry zero weights/gamma so they stay zero).
        inv_m = 1.0 / float(th * Wo)              # GN fused => T == 1 (full image)
        csum = jnp.sum(acc, axis=0, keepdims=True)                        # (1,Cp)
        mean_c = jnp.dot(csum, gavg_ref[...],
                         preferred_element_type=jnp.float32) * inv_m
        d = acc - mean_c
        csq = jnp.sum(d * d, axis=0, keepdims=True)
        var_c = jnp.dot(csq, gavg_ref[...],
                        preferred_element_type=jnp.float32) * inv_m
        acc = d * jax.lax.rsqrt(var_c + eps) * g_ref[...] + bt_ref[...]

    if act == "relu":
        acc = jnp.maximum(acc, 0.0)
    o_ref[0] = acc


def _attn_kernel(x_ref, g1_ref, b1_ref, wqkv_ref, bqkv_ref, wo_ref, bo_ref, o_ref,
                 *, d_real, dh_real, eps):
    """One (batch, head) grid step: LN1 -> per-head QKV -> softmax attention ->
    per-head output projection, accumulated into the residual output block."""
    h_idx = pl.program_id(1)
    dp = x_ref.shape[2]
    dhp = wo_ref.shape[1]

    x = x_ref[0]                                                     # (S, Dp) f32
    # LayerNorm over the d_real real channels (pad lanes are kept at zero).
    mask = (jax.lax.broadcasted_iota(jnp.int32, (1, dp), 1) < d_real
            ).astype(jnp.float32)
    mu = jnp.sum(x, axis=-1, keepdims=True) * (1.0 / d_real)
    xc = (x - mu) * mask
    var = jnp.sum(xc * xc, axis=-1, keepdims=True) * (1.0 / d_real)
    ln = xc * jax.lax.rsqrt(var + eps) * g1_ref[...] + b1_ref[...]

    qkv = jnp.dot(ln.astype(jnp.bfloat16), wqkv_ref[0],
                  preferred_element_type=jnp.float32) + bqkv_ref[0]  # (S, 3*Dhp)
    q = qkv[:, 0:dhp]
    k = qkv[:, dhp:2 * dhp]
    v = qkv[:, 2 * dhp:3 * dhp]

    # QK^T via dot_general contracting last dims (no explicit k transpose).
    s = jax.lax.dot_general(q.astype(jnp.bfloat16), k.astype(jnp.bfloat16),
                            (((1,), (1,)), ((), ())),
                            preferred_element_type=jnp.float32)
    s = s * (1.0 / math.sqrt(dh_real))
    s = s - jnp.max(s, axis=-1, keepdims=True)
    p = jnp.exp(s)
    p = p / jnp.sum(p, axis=-1, keepdims=True)
    ctx = jnp.dot(p.astype(jnp.bfloat16), v.astype(jnp.bfloat16),
                  preferred_element_type=jnp.float32)                # (S, Dhp)
    contrib = jnp.dot(ctx.astype(jnp.bfloat16), wo_ref[0],
                      preferred_element_type=jnp.float32)            # (S, Dp)

    @pl.when(h_idx == 0)
    def _():
        o_ref[0] = x + bo_ref[...] + contrib

    @pl.when(h_idx > 0)
    def _():
        o_ref[0] = o_ref[0] + contrib


def _mlp_kernel(x_ref, g_ref, b_ref, w1_ref, b1_ref, w2_ref, b2_ref, o_ref,
                *, d_real, eps):
    """Fused LN2 + Linear + GELU + Linear + residual on a row tile."""
    x = x_ref[...]                                                   # (tm, Dp)
    dp = x.shape[1]
    mask = (jax.lax.broadcasted_iota(jnp.int32, (1, dp), 1) < d_real
            ).astype(jnp.float32)
    mu = jnp.sum(x, axis=-1, keepdims=True) * (1.0 / d_real)
    xc = (x - mu) * mask
    var = jnp.sum(xc * xc, axis=-1, keepdims=True) * (1.0 / d_real)
    h = xc * jax.lax.rsqrt(var + eps) * g_ref[...] + b_ref[...]
    m = jnp.dot(h.astype(jnp.bfloat16), w1_ref[...],
                preferred_element_type=jnp.float32) + b1_ref[...]
    # TODO(synk): PyTorch nn.GELU default is exact erf; tanh approximation here.
    m = jax.nn.gelu(m)
    y = jnp.dot(m.astype(jnp.bfloat16), w2_ref[...],
                preferred_element_type=jnp.float32) + b2_ref[...]
    o_ref[...] = x + y


# --------------------------------------------------------------------------
# pallas_call wrappers
# --------------------------------------------------------------------------

def conv_pallas(xs, pc, *, stride=1, act=None, eps=1e-5):
    """3x3 conv (padding 1) over NHWC activations with lane-padded channels.

    xs : list of (B, H, W, LANE) f32 inputs (len 2 fuses a channel concat)
    pc : prepared params {"w": (Kt, LANE) bf16, "b": (1, LANE), [GN tensors]}
    Returns (B, Ho, Wo, LANE) f32.
    """
    B, H, W, Cp = xs[0].shape
    assert Cp == LANE
    n_in = len(xs)
    fuse_gn = "gavg" in pc
    kh = kw = 3

    if stride == 1:
        Ho, Wo = H, W
    else:
        assert stride == 2 and H % 2 == 0 and W % 2 == 0
        Ho, Wo = H // 2, W // 2

    # Row tiling for pipeline depth / smaller output blocks. GroupNorm needs
    # full-image statistics, so GN-fused convs keep one tile per image.
    # TODO(synk): at large resolutions split GN into a second pass so these
    # convs can also be row-tiled (v7x 64 MiB VMEM).
    T = 1
    if (not fuse_gn) and stride == 1 and Ho % 2 == 0 and ((Ho // 2) * Wo) % 8 == 0:
        T = 2
    th = Ho // T

    inputs, in_specs, scratch = [], [], []
    if stride == 1:
        for x in xs:
            inputs.append(x)
            in_specs.append(pl.BlockSpec((1, H, W, Cp), lambda b, t: (b, 0, 0, 0)))
            scratch.append(pltpu.VMEM((H + 2, W + 2, Cp), jnp.float32))
    else:
        Hp2, Wp2 = (H + 2) // 2, (W + 2) // 2
        for x in xs:
            xp = jnp.pad(x, ((0, 0), (1, 1), (1, 1), (0, 0)))
            # Free reshape: fold the stride-2 parities into leading/lane dims.
            inputs.append(xp.reshape(B, Hp2, 2, Wp2, 2 * Cp))
            in_specs.append(pl.BlockSpec((1, Hp2, 2, Wp2, 2 * Cp),
                                         lambda b, t: (b, 0, 0, 0, 0)))

    inputs += [pc["w"], pc["b"]]
    Kt = pc["w"].shape[0]
    in_specs += [pl.BlockSpec((Kt, Cp), lambda b, t: (0, 0)),
                 pl.BlockSpec((1, Cp), lambda b, t: (0, 0))]
    if fuse_gn:
        inputs += [pc["gn_g"], pc["gn_b"], pc["gavg"]]
        in_specs += [pl.BlockSpec((1, Cp), lambda b, t: (0, 0)),
                     pl.BlockSpec((1, Cp), lambda b, t: (0, 0)),
                     pl.BlockSpec((Cp, Cp), lambda b, t: (0, 0))]

    est = (n_in * (H + 2) * (W + 2) * Cp * 4          # pad scratch / folded in
           + Kt * Cp * 2                              # bf16 weight
           + th * Wo * Cp * 4                         # output block
           + th * Wo * n_in * kh * kw * Cp * 4        # fused-K LHS temp
           + Cp * Cp * 4)

    out = pl.pallas_call(
        functools.partial(_conv_kernel, n_in=n_in, kh=kh, kw=kw, stride=stride,
                          H=H, W=W, Wo=Wo, th=th, Cp=Cp, fuse_gn=fuse_gn,
                          act=act, eps=eps),
        out_shape=jax.ShapeDtypeStruct((B, Ho * Wo, Cp), jnp.float32),
        grid=(B, T),
        in_specs=in_specs,
        out_specs=pl.BlockSpec((1, th * Wo, Cp), lambda b, t: (b, t, 0)),
        scratch_shapes=scratch,
        compiler_params=_mosaic(("parallel", "arbitrary"), est),
    )(*inputs)
    return out.reshape(B, Ho, Wo, Cp)


def _row_tile(M, cap=512):
    """~M/2 rows rounded to a multiple of 8 (cap raised to 512 per review)."""
    tm = min(cap, max(8, 8 * ((M + 15) // 16)))
    Mp = ((M + tm - 1) // tm) * tm
    return Mp, tm


def transformer_block(x, tp, *, num_heads, d_real, eps=1e-5):
    """Pre-LN transformer block on tokens x:(B, S, Dp). Two pallas_calls."""
    B, S, Dp = x.shape
    Dhp = tp["wo"].shape[1]
    dh_real = d_real // num_heads

    est = (4 * S * Dp * 4 + Dp * 3 * Dhp * 2 + Dhp * Dp * 2 + S * 3 * Dhp * 4)
    attn = pl.pallas_call(
        functools.partial(_attn_kernel, d_real=d_real, dh_real=dh_real, eps=eps),
        out_shape=jax.ShapeDtypeStruct((B, S, Dp), jnp.float32),
        grid=(B, num_heads),
        in_specs=[
            pl.BlockSpec((1, S, Dp), lambda b, h: (b, 0, 0)),
            pl.BlockSpec((1, Dp), lambda b, h: (0, 0)),
            pl.BlockSpec((1, Dp), lambda b, h: (0, 0)),
            pl.BlockSpec((1, Dp, 3 * Dhp), lambda b, h: (h, 0, 0)),
            pl.BlockSpec((1, 1, 3 * Dhp), lambda b, h: (h, 0, 0)),
            pl.BlockSpec((1, Dhp, Dp), lambda b, h: (h, 0, 0)),
            pl.BlockSpec((1, Dp), lambda b, h: (0, 0)),
        ],
        out_specs=pl.BlockSpec((1, S, Dp), lambda b, h: (b, 0, 0)),
        compiler_params=_mosaic(("parallel", "arbitrary"), est),
    )(x, tp["ln1_g"], tp["ln1_b"], tp["wqkv"], tp["bqkv"], tp["wo"], tp["bo"])

    Hidp = tp["w1"].shape[1]
    M = B * S
    Mp, tm = _row_tile(M)
    x2 = attn.reshape(M, Dp)
    if Mp != M:
        x2 = jnp.pad(x2, ((0, Mp - M), (0, 0)))   # padded rows sliced off below

    est = (4 * tm * Dp * 4 + 2 * Dp * Hidp * 2 + tm * Hidp * 4)
    y = pl.pallas_call(
        functools.partial(_mlp_kernel, d_real=d_real, eps=eps),
        out_shape=jax.ShapeDtypeStruct((Mp, Dp), jnp.float32),
        grid=(Mp // tm,),
        in_specs=[
            pl.BlockSpec((tm, Dp), lambda i: (i, 0)),
            pl.BlockSpec((1, Dp), lambda i: (0, 0)),
            pl.BlockSpec((1, Dp), lambda i: (0, 0)),
            pl.BlockSpec((Dp, Hidp), lambda i: (0, 0)),
            pl.BlockSpec((1, Hidp), lambda i: (0, 0)),
            pl.BlockSpec((Hidp, Dp), lambda i: (0, 0)),
            pl.BlockSpec((1, Dp), lambda i: (0, 0)),
        ],
        out_specs=pl.BlockSpec((tm, Dp), lambda i: (i, 0)),
        compiler_params=_mosaic(("parallel",), est),
    )(x2, tp["ln2_g"], tp["ln2_b"], tp["w1"], tp["b1"], tp["w2"], tp["b2"])
    return y[:M].reshape(B, S, Dp)


# --------------------------------------------------------------------------
# One-time parameter preparation (hoisted out of the forward pass)
# --------------------------------------------------------------------------

def _pad_row(v, n):
    out = jnp.zeros((1, n), jnp.float32)
    return out.at[0, :v.shape[0]].set(v.astype(jnp.float32))


def _stack_conv_w(ws, Cp):
    """ws: list of (O, Ci, 3, 3) PyTorch-layout weights (one per fused input).
    Returns (len(ws)*9*Cp, Cp) bf16, rows ordered (input, tap, cin), lane-padded."""
    blocks = []
    for w in ws:
        O, Ci, kh, kw = w.shape
        wt = jnp.transpose(w, (2, 3, 1, 0)).reshape(kh * kw, Ci, O).astype(jnp.float32)
        for t in range(kh * kw):
            blk = jnp.zeros((Cp, Cp), jnp.float32).at[:Ci, :O].set(wt[t])
            blocks.append(blk)
    return jnp.concatenate(blocks, axis=0).astype(jnp.bfloat16)


def _prep_conv(ws, b, gn=None):
    O = ws[0].shape[0]
    assert O <= LANE and all(w.shape[1] <= LANE for w in ws)
    pc = {"w": _stack_conv_w(ws, LANE), "b": _pad_row(b, LANE)}
    if gn is not None:
        gamma, beta, groups = gn
        Cg = O // groups
        cid = jnp.arange(LANE)
        real = cid < O
        grp = jnp.where(real, cid // Cg, -1)
        member = ((grp[:, None] == grp[None, :]) & real[:, None] & real[None, :]
                  ).astype(jnp.float32)
        pc["gavg"] = member / float(Cg)      # the 1/(H*W) factor applied in-kernel
        pc["gn_g"] = _pad_row(gamma, LANE)
        pc["gn_b"] = _pad_row(beta, LANE)
    return pc


def _prep_tblock(p, d, num_heads, hidden):
    dp = _ceil_lane(d)
    dh = d // num_heads
    dhp = _ceil_lane(dh)
    hidp = _ceil_lane(hidden)

    def qkv_head(h):
        cols = []
        for w in (p["wq"], p["wk"], p["wv"]):
            blk = jnp.zeros((dp, dhp), jnp.float32)
            cols.append(blk.at[:d, :dh].set(
                w[h * dh:(h + 1) * dh, :].T.astype(jnp.float32)))
        return jnp.concatenate(cols, axis=1)                       # (Dp, 3*Dhp)

    def qkv_bias_head(h):
        segs = []
        for b in (p["bq"], p["bk"], p["bv"]):
            segs.append(jnp.zeros((dhp,), jnp.float32).at[:dh].set(
                b[h * dh:(h + 1) * dh].astype(jnp.float32)))
        return jnp.concatenate(segs).reshape(1, 3 * dhp)

    wqkv = jnp.stack([qkv_head(h) for h in range(num_heads)]).astype(jnp.bfloat16)
    bqkv = jnp.stack([qkv_bias_head(h) for h in range(num_heads)])

    wo_t = p["wo"].T.astype(jnp.float32)                           # (D, D)
    wo = jnp.stack([jnp.zeros((dhp, dp), jnp.float32).at[:dh, :d].set(
        wo_t[h * dh:(h + 1) * dh, :]) for h in range(num_heads)]).astype(jnp.bfloat16)

    w1 = jnp.zeros((dp, hidp), jnp.float32).at[:d, :hidden].set(
        p["w1"].T.astype(jnp.float32)).astype(jnp.bfloat16)
    w2 = jnp.zeros((hidp, dp), jnp.float32).at[:hidden, :d].set(
        p["w2"].T.astype(jnp.float32)).astype(jnp.bfloat16)

    return {"ln1_g": _pad_row(p["ln1_g"], dp), "ln1_b": _pad_row(p["ln1_b"], dp),
            "ln2_g": _pad_row(p["ln2_g"], dp), "ln2_b": _pad_row(p["ln2_b"], dp),
            "wqkv": wqkv, "bqkv": bqkv, "wo": wo, "bo": _pad_row(p["bo"], dp),
            "w1": w1, "b1": _pad_row(p["b1"], hidp),
            "w2": w2, "b2": _pad_row(p["b2"], dp)}


def prepare_params(params, cfg):
    """Convert PyTorch-layout params into kernel-ready padded/stacked/bf16
    tensors ONCE (keeps per-step XLA glue out of the forward pass)."""
    groups = cfg["groups"]
    channels = cfg["channels"]
    enc_blocks = cfg["enc_blocks"]
    dec_blocks = cfg["dec_blocks"]
    num_heads = cfg["num_heads"]
    hidden = cfg["hidden_dim"]

    def cgn(p):
        return _prep_conv([p["w"]], p["b"], gn=(p["gn_g"], p["gn_b"], groups))

    prep = {"stem": cgn(params["stem"])}
    ch = channels
    for si, nb in enumerate(enc_blocks):
        for bi in range(nb):
            prep[f"enc{si}_{bi}"] = cgn(params[f"enc{si}_{bi}"])
        prep[f"down{si}"] = cgn(params[f"down{si}"])
        ch *= 2

    prep["tblocks"] = [_prep_tblock(p, ch, num_heads, hidden)
                       for p in params["tblocks"]]

    dch = ch
    for si, nb in enumerate(dec_blocks):
        up = params[f"up{si}"]
        prep[f"up{si}"] = _prep_conv([up["w"]], up["b"])
        half = dch // 2
        p0 = params[f"dec{si}_0"]
        # Split the first decoder conv's weight along input channels so the
        # upsample-path / skip-path concat is fused into the conv kernel.
        prep[f"dec{si}_0"] = _prep_conv([p0["w"][:, :half], p0["w"][:, half:]],
                                        p0["b"],
                                        gn=(p0["gn_g"], p0["gn_b"], groups))
        for bi in range(1, nb):
            prep[f"dec{si}_{bi}"] = cgn(params[f"dec{si}_{bi}"])
        dch //= 2
    fp = params["final"]
    prep["final"] = _prep_conv([fp["w"]], fp["b"])
    return prep


# --------------------------------------------------------------------------
# Model forward (XLA glue: one NCHW<->NHWC transpose pair, reshapes, upsample)
# --------------------------------------------------------------------------

def transunet_forward(x_nchw, prep, cfg):
    channels = cfg["channels"]
    enc_blocks = cfg["enc_blocks"]
    dec_blocks = cfg["dec_blocks"]
    num_heads = cfg["num_heads"]
    out_ch = cfg["out_ch"]
    with_conv = cfg.get("with_conv", True)

    # NCHW -> NHWC once; pad channels to the 128-lane width once.
    x = jnp.transpose(x_nchw, (0, 2, 3, 1)).astype(jnp.float32)
    cin = x.shape[-1]
    x = jnp.pad(x, ((0, 0), (0, 0), (0, 0), (0, LANE - cin)))

    # ----- Encoder -----
    out_e, out_e_real = [], []
    y = conv_pallas([x], prep["stem"], act="relu")
    out_e.append(y); out_e_real.append(channels)
    ch = channels
    for si, nb in enumerate(enc_blocks):
        for bi in range(nb):
            y = conv_pallas([y], prep[f"enc{si}_{bi}"], act="relu")
        y = conv_pallas([y], prep[f"down{si}"], stride=2, act="relu")
        ch *= 2
        out_e.append(y); out_e_real.append(ch)

    # ----- Transformer on bottleneck tokens -----
    d_real = ch
    B, Hb, Wb, _ = y.shape
    tokens = y.reshape(B, Hb * Wb, LANE)     # 'b c h w -> b (h w) c' (free in NHWC)
    for tp in prep["tblocks"]:
        tokens = transformer_block(tokens, tp, num_heads=num_heads, d_real=d_real)
    out_t = tokens.reshape(B, Hb, Wb, LANE)

    # ----- Decoder -----
    # TODO(synk): original `dec_in = out_e[1:].insert(0, out_t)` returns None
    # (PyTorch bug); reconstructed intended wiring: transformed bottleneck +
    # reversed encoder skips.
    yd = out_t
    skips = list(reversed(out_e[:-1]))
    for si, nb in enumerate(dec_blocks):
        # TODO(synk): nearest-x2 upsample still materializes in HBM via XLA; the
        # following channel concat IS fused into the conv (two-input conv).
        yd = jnp.repeat(jnp.repeat(yd, 2, axis=1), 2, axis=2)
        if with_conv:
            yd = conv_pallas([yd], prep[f"up{si}"])
        yd = conv_pallas([yd, skips[si]], prep[f"dec{si}_0"], act="relu")
        for bi in range(1, nb):
            yd = conv_pallas([yd], prep[f"dec{si}_{bi}"], act="relu")

    out = conv_pallas([yd], prep["final"])[..., :out_ch]
    out_nchw = jnp.transpose(out, (0, 3, 1, 2))
    out_e_nchw = [jnp.transpose(f[..., :c], (0, 3, 1, 2))
                  for f, c in zip(out_e, out_e_real)]
    return out_nchw, out_e_nchw


# --------------------------------------------------------------------------
# Deterministic parameter initialization (PyTorch weight layouts)
# --------------------------------------------------------------------------

def init_params(key, *, in_ch, channels, enc_blocks, dec_blocks, groups,
                trans_layers, hidden_dim, num_heads, out_ch):
    keys = iter(jax.random.split(key, 256))

    def nk():
        return next(keys)

    def conv_p(o, c, k=3):
        fan = c * k * k
        return {"w": jax.random.normal(nk(), (o, c, k, k), jnp.float32) / math.sqrt(fan),
                "b": 0.01 * jax.random.normal(nk(), (o,), jnp.float32)}

    def gn_p(c):
        return {"gn_g": jnp.ones((c,), jnp.float32) + 0.01 * jax.random.normal(nk(), (c,), jnp.float32),
                "gn_b": 0.01 * jax.random.normal(nk(), (c,), jnp.float32)}

    def lin_p(o, i):
        return (jax.random.normal(nk(), (o, i), jnp.float32) / math.sqrt(i),
                0.01 * jax.random.normal(nk(), (o,), jnp.float32))

    P = {}
    ch = channels
    P["stem"] = {**conv_p(ch, in_ch), **gn_p(ch)}
    enc_ch = ch
    for si, nb in enumerate(enc_blocks):
        for bi in range(nb):
            P[f"enc{si}_{bi}"] = {**conv_p(enc_ch, enc_ch), **gn_p(enc_ch)}
        P[f"down{si}"] = {**conv_p(enc_ch * 2, enc_ch), **gn_p(enc_ch * 2)}
        enc_ch *= 2
    dec_channels = enc_ch                      # channels * 2**len(enc_blocks)
    D = dec_channels

    P["tblocks"] = []
    for _ in range(trans_layers):
        wq, bq = lin_p(D, D)
        wk, bk = lin_p(D, D)
        wv, bv = lin_p(D, D)
        wo, bo = lin_p(D, D)
        w1, b1 = lin_p(hidden_dim, D)
        w2, b2 = lin_p(D, hidden_dim)
        P["tblocks"].append({
            "ln1_g": jnp.ones((D,), jnp.float32), "ln1_b": jnp.zeros((D,), jnp.float32),
            "ln2_g": jnp.ones((D,), jnp.float32), "ln2_b": jnp.zeros((D,), jnp.float32),
            "wq": wq, "bq": bq, "wk": wk, "bk": bk, "wv": wv, "bv": bv,
            "wo": wo, "bo": bo, "w1": w1, "b1": b1, "w2": w2, "b2": b2})

    dch = dec_channels
    for si, nb in enumerate(dec_blocks):
        P[f"up{si}"] = conv_p(dch // 2, dch)
        in_c = dch                                  # (dch//2 upsampled) + (dch//2 skip)
        cur = dch // 2
        for bi in range(nb):
            P[f"dec{si}_{bi}"] = {**conv_p(cur, in_c if bi == 0 else cur), **gn_p(cur)}
        dch = dch // 2
    P["final"] = conv_p(out_ch, dch)
    return P


# --------------------------------------------------------------------------
# Main
# --------------------------------------------------------------------------

if __name__ == "__main__":
    # Config consistent with transUNet.__init__ (dim='2D', trans_attn='spatial'):
    # image_size=(16,16), channels=4, enc_blocks=[1,1], dec_blocks=[1] ->
    # dec_channels=16, bottleneck tokens=(16/4)^2=16, hidden_dim=32, heads=2.
    cfg = dict(in_ch=4, channels=4, enc_blocks=[1, 1], dec_blocks=[1], groups=2,
               trans_layers=2, hidden_dim=32, num_heads=2, out_ch=2,
               with_conv=True)

    key = jax.random.PRNGKey(0)
    kx, kp = jax.random.split(key)
    x = jax.random.normal(kx, (2, 4, 16, 16), jnp.float32)

    init_kwargs = {k: cfg[k] for k in ("in_ch", "channels", "enc_blocks",
                                       "dec_blocks", "groups", "trans_layers",
                                       "hidden_dim", "num_heads", "out_ch")}
    params = init_params(kp, **init_kwargs)

    # One-time, out-of-forward weight preprocessing (pad/stack/bf16/GN matrix).
    prep = prepare_params(params, cfg)

    fwd = jax.jit(functools.partial(transunet_forward, cfg=cfg))
    out, out_e = fwd(x, prep)

    jax.block_until_ready(out)
    jax.block_until_ready(out_e[-1])
    assert out.shape == (2, cfg["out_ch"], 8, 8)
    assert out_e[-1].shape == (2, 16, 4, 4)
    assert bool(jnp.all(jnp.isfinite(out)))
    print("KERNEL_OK")
</pallas_src>

<mosaic_0001>
module attributes {stable_mosaic.version = 11 : i64} {
  func.func @_conv_kernel(%arg0: i32, %arg1: i32, %arg2: memref<1x16x16x128xf32, #tpu.memory_space<vmem>>, %arg3: memref<1152x128xbf16, #tpu.memory_space<vmem>>, %arg4: memref<1x128xf32, #tpu.memory_space<vmem>>, %arg5: memref<1x128xf32, #tpu.memory_space<vmem>>, %arg6: memref<1x128xf32, #tpu.memory_space<vmem>>, %arg7: memref<128x128xf32, #tpu.memory_space<vmem>>, %arg8: memref<1x256x128xf32, #tpu.memory_space<vmem>>, %arg9: memref<18x18x128xf32, #tpu.memory_space<vmem>>) attributes {dimension_semantics = [#tpu.dimension_semantics<parallel>, #tpu.dimension_semantics<arbitrary>], iteration_bounds = array<i64: 2, 1>, scalar_prefetch = 0 : i64, scratch_operands = 1 : i64, tpu.core_type = #tpu.core_type<tc>, window_params = [{transform_indices = @transform_0, window_bounds = array<i64: 1, 16, 16, 128>}, {pipeline_mode = #tpu.pipeline_mode<synchronous>, transform_indices = @transform_1, window_bounds = array<i64: 1152, 128>}, {pipeline_mode = #tpu.pipeline_mode<synchronous>, transform_indices = @transform_2, window_bounds = array<i64: 1, 128>}, {pipeline_mode = #tpu.pipeline_mode<synchronous>, transform_indices = @transform_3, window_bounds = array<i64: 1, 128>}, {pipeline_mode = #tpu.pipeline_mode<synchronous>, transform_indices = @transform_4, window_bounds = array<i64: 1, 128>}, {pipeline_mode = #tpu.pipeline_mode<synchronous>, transform_indices = @transform_5, window_bounds = array<i64: 128, 128>}, {transform_indices = @transform_6, window_bounds = array<i64: 1, 256, 128>}]} {
    %c16_i32 = arith.constant 16 : i32
    %0 = arith.muli %arg1, %c16_i32 : i32
    %cst = arith.constant 0.000000e+00 : f32
    %1 = vector.broadcast %cst : f32 to vector<18x18x128xf32>
    %c0 = arith.constant 0 : index
    %c0_0 = arith.constant 0 : index
    %c0_1 = arith.constant 0 : index
    %2 = vector.load %arg9[%c0, %c0_0, %c0_1] : memref<18x18x128xf32, #tpu.memory_space<vmem>>, vector<18x18x128xf32>
    tpu.vector_store %arg9[%c0, %c0_0, %c0_1], %1 {strides = array<i32>} : memref<18x18x128xf32, #tpu.memory_space<vmem>>, vector<18x18x128xf32>,
    %c0_2 = arith.constant 0 : index
    %c0_3 = arith.constant 0 : index
    %c0_4 = arith.constant 0 : index
    %c0_5 = arith.constant 0 : index
    %3 = vector.load %arg2[%c0_2, %c0_3, %c0_4, %c0_5] : memref<1x16x16x128xf32, #tpu.memory_space<vmem>>, vector<1x16x16x128xf32>
    %4 = vector.shape_cast %3 : vector<1x16x16x128xf32> to vector<16x16x128xf32>
    %c1 = arith.constant 1 : index
    %c1_6 = arith.constant 1 : index
    %c0_7 = arith.constant 0 : index
    %5 = vector.load %arg9[%c1, %c1_6, %c0_7] : memref<18x18x128xf32, #tpu.memory_space<vmem>>, vector<16x16x128xf32>
    tpu.vector_store %arg9[%c1, %c1_6, %c0_7], %4 {strides = array<i32>} : memref<18x18x128xf32, #tpu.memory_space<vmem>>, vector<16x16x128xf32>,
    %c0_i32 = arith.constant 0 : i32
    %6 = arith.addi %0, %c0_i32 : i32
    %7 = arith.index_cast %6 : i32 to index
    %c0_8 = arith.constant 0 : index
    %c0_9 = arith.constant 0 : index
    %8 = vector.load %arg9[%7, %c0_8, %c0_9] : memref<18x18x128xf32, #tpu.memory_space<vmem>>, vector<16x16x128xf32>
    %c0_i32_10 = arith.constant 0 : i32
    %9 = arith.addi %0, %c0_i32_10 : i32
    %10 = arith.index_cast %9 : i32 to index
    %c1_11 = arith.constant 1 : index
    %c0_12 = arith.constant 0 : index
    %11 = vector.load %arg9[%10, %c1_11, %c0_12] : memref<18x18x128xf32, #tpu.memory_space<vmem>>, vector<16x16x128xf32>
    %c0_i32_13 = arith.constant 0 : i32
    %12 = arith.addi %0, %c0_i32_13 : i32
    %13 = arith.index_cast %12 : i32 to index
    %c2 = arith.constant 2 : index
    %c0_14 = arith.constant 0 : index
    %14 = vector.load %arg9[%13, %c2, %c0_14] : memref<18x18x128xf32, #tpu.memory_space<vmem>>, vector<16x16x128xf32>
    %c1_i32 = arith.constant 1 : i32
    %15 = arith.addi %0, %c1_i32 : i32
    %16 = arith.index_cast %15 : i32 to index
    %c0_15 = arith.constant 0 : index
    %c0_16 = arith.constant 0 : index
    %17 = vector.load %arg9[%16, %c0_15, %c0_16] : memref<18x18x128xf32, #tpu.memory_space<vmem>>, vector<16x16x128xf32>
    %c1_i32_17 = arith.constant 1 : i32
    %18 = arith.addi %0, %c1_i32_17 : i32
    %19 = arith.index_cast %18 : i32 to index
    %c1_18 = arith.constant 1 : index
    %c0_19 = arith.constant 0 : index
    %20 = vector.load %arg9[%19, %c1_18, %c0_19] : memref<18x18x128xf32, #tpu.memory_space<vmem>>, vector<16x16x128xf32>
    %c1_i32_20 = arith.constant 1 : i32
    %21 = arith.addi %0, %c1_i32_20 : i32
    %22 = arith.index_cast %21 : i32 to index
    %c2_21 = arith.constant 2 : index
    %c0_22 = arith.constant 0 : index
    %23 = vector.load %arg9[%22, %c2_21, %c0_22] : memref<18x18x128xf32, #tpu.memory_space<vmem>>, vector<16x16x128xf32>
    %c2_i32 = arith.constant 2 : i32
    %24 = arith.addi %0, %c2_i32 : i32
    %25 = arith.index_cast %24 : i32 to index
    %c0_23 = arith.constant 0 : index
    %c0_24 = arith.constant 0 : index
    %26 = vector.load %arg9[%25, %c0_23, %c0_24] : memref<18x18x128xf32, #tpu.memory_space<vmem>>, vector<16x16x128xf32>
    %c2_i32_25 = arith.constant 2 : i32
    %27 = arith.addi %0, %c2_i32_25 : i32
    %28 = arith.index_cast %27 : i32 to index
    %c1_26 = arith.constant 1 : index
    %c0_27 = arith.constant 0 : index
    %29 = vector.load %arg9[%28, %c1_26, %c0_27] : memref<18x18x128xf32, #tpu.memory_space<vmem>>, vector<16x16x128xf32>
    %c2_i32_28 = arith.constant 2 : i32
    %30 = arith.addi %0, %c2_i32_28 : i32
    %31 = arith.index_cast %30 : i32 to index
    %c2_29 = arith.constant 2 : index
    %c0_30 = arith.constant 0 : index
    %32 = vector.load %arg9[%31, %c2_29, %c0_30] : memref<18x18x128xf32, #tpu.memory_space<vmem>>, vector<16x16x128xf32>
    %33 = tpu.concatenate %8, %11, %14, %17, %20, %23, %26, %29, %32 in 2 : vector<16x16x128xf32>, vector<16x16x128xf32>, vector<16x16x128xf32>, vector<16x16x128xf32>, vector<16x16x128xf32>, vector<16x16x128xf32>, vector<16x16x128xf32>, vector<16x16x128xf32>, vector<16x16x128xf32> -> vector<16x16x1152xf32>
    %34 = vector.shape_cast %33 : vector<16x16x1152xf32> to vector<256x1152xf32>
    %35 = arith.truncf %34 : vector<256x1152xf32> to vector<256x1152xbf16>
    %c0_31 = arith.constant 0 : index
    %c0_32 = arith.constant 0 : index
    %36 = vector.load %arg3[%c0_31, %c0_32] : memref<1152x128xbf16, #tpu.memory_space<vmem>>, vector<1152x128xbf16>
    %cst_33 = arith.constant dense<0.000000e+00> : vector<256x128xf32>
    %37 = tpu.matmul %35, %36, %cst_33 {dimension_numbers = #tpu.dot_dimension_numbers<[1], [0], [0], [1], [0, 0, 1, 1], [], []>} : vector<256x1152xbf16>, vector<1152x128xbf16>, vector<256x128xf32> -> vector<256x128xf32>
    %c0_34 = arith.constant 0 : index
    %c0_35 = arith.constant 0 : index
    %38 = vector.load %arg4[%c0_34, %c0_35] : memref<1x128xf32, #tpu.memory_space<vmem>>, vector<1x128xf32>
    %39 = vector.broadcast %38 : vector<1x128xf32> to vector<256x128xf32>
    %40 = arith.addf %37, %39 : vector<256x128xf32>
    %cst_36 = arith.constant dense<0.000000e+00> : vector<128xf32>
    %41 = vector.multi_reduction <add>, %40, %cst_36 [0] : vector<256x128xf32> to vector<128xf32>
    %42 = vector.shape_cast %41 : vector<128xf32> to vector<1x128xf32>
    %c0_37 = arith.constant 0 : index
    %c0_38 = arith.constant 0 : index
    %43 = vector.load %arg7[%c0_37, %c0_38] : memref<128x128xf32, #tpu.memory_space<vmem>>, vector<128x128xf32>
    %cst_39 = arith.constant dense<0.000000e+00> : vector<1x128xf32>
    %44 = tpu.matmul %42, %43, %cst_39 {dimension_numbers = #tpu.dot_dimension_numbers<[1], [0], [0], [1], [0, 0, 1, 1], [], []>} : vector<1x128xf32>, vector<128x128xf32>, vector<1x128xf32> -> vector<1x128xf32>
    %cst_40 = arith.constant 3.906250e-03 : f32
    %45 = vector.broadcast %cst_40 : f32 to vector<1x128xf32>
    %46 = arith.mulf %44, %45 : vector<1x128xf32>
    %47 = vector.broadcast %46 : vector<1x128xf32> to vector<256x128xf32>
    %48 = arith.subf %40, %47 : vector<256x128xf32>
    %49 = arith.mulf %48, %48 : vector<256x128xf32>
    %cst_41 = arith.constant dense<0.000000e+00> : vector<128xf32>
    %50 = vector.multi_reduction <add>, %49, %cst_41 [0] : vector<256x128xf32> to vector<128xf32>
    %51 = vector.shape_cast %50 : vector<128xf32> to vector<1x128xf32>
    %c0_42 = arith.constant 0 : index
    %c0_43 = arith.constant 0 : index
    %52 = vector.load %arg7[%c0_42, %c0_43] : memref<128x128xf32, #tpu.memory_space<vmem>>, vector<128x128xf32>
    %cst_44 = arith.constant dense<0.000000e+00> : vector<1x128xf32>
    %53 = tpu.matmul %51, %52, %cst_44 {dimension_numbers = #tpu.dot_dimension_numbers<[1], [0], [0], [1], [0, 0, 1, 1], [], []>} : vector<1x128xf32>, vector<128x128xf32>, vector<1x128xf32> -> vector<1x128xf32>
    %cst_45 = arith.constant 3.906250e-03 : f32
    %54 = vector.broadcast %cst_45 : f32 to vector<1x128xf32>
    %55 = arith.mulf %53, %54 : vector<1x128xf32>
    %cst_46 = arith.constant 9.99999974E-6 : f32
    %56 = vector.broadcast %cst_46 : f32 to vector<1x128xf32>
    %57 = arith.addf %55, %56 : vector<1x128xf32>
    %58 = math.rsqrt %57 : vector<1x128xf32>
    %59 = vector.broadcast %58 : vector<1x128xf32> to vector<256x128xf32>
    %60 = arith.mulf %48, %59 : vector<256x128xf32>
    %c0_47 = arith.constant 0 : index
    %c0_48 = arith.constant 0 : index
    %61 = vector.load %arg5[%c0_47, %c0_48] : memref<1x128xf32, #tpu.memory_space<vmem>>, vector<1x128xf32>
    %62 = vector.broadcast %61 : vector<1x128xf32> to vector<256x128xf32>
    %63 = arith.mulf %60, %62 : vector<256x128xf32>
    %c0_49 = arith.constant 0 : index
    %c0_50 = arith.constant 0 : index
    %64 = vector.load %arg6[%c0_49, %c0_50] : memref<1x128xf32, #tpu.memory_space<vmem>>, vector<1x128xf32>
    %65 = vector.broadcast %64 : vector<1x128xf32> to vector<256x128xf32>
    %66 = arith.addf %63, %65 : vector<256x128xf32>
    %cst_51 = arith.constant 0.000000e+00 : f32
    %67 = vector.broadcast %cst_51 : f32 to vector<256x128xf32>
    %68 = arith.maximumf %66, %67 : vector<256x128xf32>
    %c0_52 = arith.constant 0 : index
    %c0_53 = arith.constant 0 : index
    %c0_54 = arith.constant 0 : index
    %69 = vector.load %arg8[%c0_52, %c0_53, %c0_54] : memref<1x256x128xf32, #tpu.memory_space<vmem>>, vector<1x256x128xf32>
    %70 = vector.shape_cast %69 : vector<1x256x128xf32> to vector<256x128xf32>
    %71 = vector.shape_cast %68 : vector<256x128xf32> to vector<1x256x128xf32>
    tpu.vector_store %arg8[%c0_52, %c0_53, %c0_54], %71 {strides = array<i32>} : memref<1x256x128xf32, #tpu.memory_space<vmem>>, vector<1x256x128xf32>,
    return
  }
  func.func @transform_0(%arg0: i32, %arg1: i32) -> (i32, i32, i32, i32) {
    %c0_i32 = arith.constant 0 : i32
    %c0_i32_0 = arith.constant 0 : i32
    %c0_i32_1 = arith.constant 0 : i32
    %c0_i32_2 = arith.constant 0 : i32
    return %arg0, %c0_i32, %c0_i32_0, %c0_i32_1 : i32, i32, i32, i32
  }
  func.func @transform_1(%arg0: i32, %arg1: i32) -> (i32, i32) {
    %c0_i32 = arith.constant 0 : i32
    %c0_i32_0 = arith.constant 0 : i32
    %c0_i32_1 = arith.constant 0 : i32
    return %c0_i32, %c0_i32_0 : i32, i32
  }
  func.func @transform_2(%arg0: i32, %arg1: i32) -> (i32, i32) {
    %c0_i32 = arith.constant 0 : i32
    %c0_i32_0 = arith.constant 0 : i32
    %c0_i32_1 = arith.constant 0 : i32
    return %c0_i32, %c0_i32_0 : i32, i32
  }
  func.func @transform_3(%arg0: i32, %arg1: i32) -> (i32, i32) {
    %c0_i32 = arith.constant 0 : i32
    %c0_i32_0 = arith.constant 0 : i32
    %c0_i32_1 = arith.constant 0 : i32
    return %c0_i32, %c0_i32_0 : i32, i32
  }
  func.func @transform_4(%arg0: i32, %arg1: i32) -> (i32, i32) {
    %c0_i32 = arith.constant 0 : i32
    %c0_i32_0 = arith.constant 0 : i32
    %c0_i32_1 = arith.constant 0 : i32
    return %c0_i32, %c0_i32_0 : i32, i32
  }
  func.func @transform_5(%arg0: i32, %arg1: i32) -> (i32, i32) {
    %c0_i32 = arith.constant 0 : i32
    %c0_i32_0 = arith.constant 0 : i32
    %c0_i32_1 = arith.constant 0 : i32
    return %c0_i32, %c0_i32_0 : i32, i32
  }
  func.func @transform_6(%arg0: i32, %arg1: i32) -> (i32, i32, i32) {
    %c0_i32 = arith.constant 0 : i32
    %c0_i32_0 = arith.constant 0 : i32
    return %arg0, %arg1, %c0_i32 : i32, i32, i32
  }
}

module attributes {stable_mosaic.version = 11 : i64} {
  func.func @_conv_kernel(%arg0: i32, %arg1: i32, %arg2: memref<1x9x2x9x256xf32, #tpu.memory_space<vmem>>, %arg3: memref<1152x128xbf16, #tpu.memory_space<vmem>>, %arg4: memref<1x128xf32, #tpu.memory_space<vmem>>, %arg5: memref<1x128xf32, #tpu.memory_space<vmem>>, %arg6: memref<1x128xf32, #tpu.memory_space<vmem>>, %arg7: memref<128x128xf32, #tpu.memory_space<vmem>>, %arg8: memref<1x64x128xf32, #tpu.memory_space<vmem>>) attributes {dimension_semantics = [#tpu.dimension_semantics<parallel>, #tpu.dimension_semantics<arbitrary>], iteration_bounds = array<i64: 2, 1>, scalar_prefetch = 0 : i64, scratch_operands = 0 : i64, tpu.core_type = #tpu.core_type<tc>, window_params = [{transform_indices = @transform_0, window_bounds = array<i64: 1, 9, 2, 9, 256>}, {pipeline_mode = #tpu.pipeline_mode<synchronous>, transform_indices = @transform_1, window_bounds = array<i64: 1152, 128>}, {pipeline_mode = #tpu.pipeline_mode<synchronous>, transform_indices = @transform_2, window_bounds = array<i64: 1, 128>}, {pipeline_mode = #tpu.pipeline_mode<synchronous>, transform_indices = @transform_3, window_bounds = array<i64: 1, 128>}, {pipeline_mode = #tpu.pipeline_mode<synchronous>, transform_indices = @transform_4, window_bounds = array<i64: 1, 128>}, {pipeline_mode = #tpu.pipeline_mode<synchronous>, transform_indices = @transform_5, window_bounds = array<i64: 128, 128>}, {transform_indices = @transform_6, window_bounds = array<i64: 1, 64, 128>}]} {
    %c8_i32 = arith.constant 8 : i32
    %0 = arith.muli %arg1, %c8_i32 : i32
    %c0_i32 = arith.constant 0 : i32
    %1 = arith.addi %0, %c0_i32 : i32
    %c0 = arith.constant 0 : index
    %2 = arith.index_cast %1 : i32 to index
    %c0_0 = arith.constant 0 : index
    %c0_1 = arith.constant 0 : index
    %c0_2 = arith.constant 0 : index
    %3 = vector.load %arg2[%c0, %2, %c0_0, %c0_1, %c0_2] : memref<1x9x2x9x256xf32, #tpu.memory_space<vmem>>, vector<1x8x1x8x128xf32>
    %4 = vector.shape_cast %3 : vector<1x8x1x8x128xf32> to vector<8x8x128xf32>
    %c0_i32_3 = arith.constant 0 : i32
    %5 = arith.addi %0, %c0_i32_3 : i32
    %c0_4 = arith.constant 0 : index
    %6 = arith.index_cast %5 : i32 to index
    %c0_5 = arith.constant 0 : index
    %c0_6 = arith.constant 0 : index
    %c128 = arith.constant 128 : index
    %7 = vector.load %arg2[%c0_4, %6, %c0_5, %c0_6, %c128] : memref<1x9x2x9x256xf32, #tpu.memory_space<vmem>>, vector<1x8x1x8x128xf32>
    %8 = vector.shape_cast %7 : vector<1x8x1x8x128xf32> to vector<8x8x128xf32>
    %c0_i32_7 = arith.constant 0 : i32
    %9 = arith.addi %0, %c0_i32_7 : i32
    %c0_8 = arith.constant 0 : index
    %10 = arith.index_cast %9 : i32 to index
    %c0_9 = arith.constant 0 : index
    %c1 = arith.constant 1 : index
    %c0_10 = arith.constant 0 : index
    %11 = vector.load %arg2[%c0_8, %10, %c0_9, %c1, %c0_10] : memref<1x9x2x9x256xf32, #tpu.memory_space<vmem>>, vector<1x8x1x8x128xf32>
    %12 = vector.shape_cast %11 : vector<1x8x1x8x128xf32> to vector<8x8x128xf32>
    %c0_i32_11 = arith.constant 0 : i32
    %13 = arith.addi %0, %c0_i32_11 : i32
    %c0_12 = arith.constant 0 : index
    %14 = arith.index_cast %13 : i32 to index
    %c1_13 = arith.constant 1 : index
    %c0_14 = arith.constant 0 : index
    %c0_15 = arith.constant 0 : index
    %15 = vector.load %arg2[%c0_12, %14, %c1_13, %c0_14, %c0_15] : memref<1x9x2x9x256xf32, #tpu.memory_space<vmem>>, vector<1x8x1x8x128xf32>
    %16 = vector.shape_cast %15 : vector<1x8x1x8x128xf32> to vector<8x8x128xf32>
    %c0_i32_16 = arith.constant 0 : i32
    %17 = arith.addi %0, %c0_i32_16 : i32
    %c0_17 = arith.constant 0 : index
    %18 = arith.index_cast %17 : i32 to index
    %c1_18 = arith.constant 1 : index
    %c0_19 = arith.constant 0 : index
    %c128_20 = arith.constant 128 : index
    %19 = vector.load %arg2[%c0_17, %18, %c1_18, %c0_19, %c128_20] : memref<1x9x2x9x256xf32, #tpu.memory_space<vmem>>, vector<1x8x1x8x128xf32>
    %20 = vector.shape_cast %19 : vector<1x8x1x8x128xf32> to vector<8x8x128xf32>
    %c0_i32_21 = arith.constant 0 : i32
    %21 = arith.addi %0, %c0_i32_21 : i32
    %c0_22 = arith.constant 0 : index
    %22 = arith.index_cast %21 : i32 to index
    %c1_23 = arith.constant 1 : index
    %c1_24 = arith.constant 1 : index
    %c0_25 = arith.constant 0 : index
    %23 = vector.load %arg2[%c0_22, %22, %c1_23, %c1_24, %c0_25] : memref<1x9x2x9x256xf32, #tpu.memory_space<vmem>>, vector<1x8x1x8x128xf32>
    %24 = vector.shape_cast %23 : vector<1x8x1x8x128xf32> to vector<8x8x128xf32>
    %c1_i32 = arith.constant 1 : i32
    %25 = arith.addi %0, %c1_i32 : i32
    %c0_26 = arith.constant 0 : index
    %26 = arith.index_cast %25 : i32 to index
    %c0_27 = arith.constant 0 : index
    %c0_28 = arith.constant 0 : index
    %c0_29 = arith.constant 0 : index
    %27 = vector.load %arg2[%c0_26, %26, %c0_27, %c0_28, %c0_29] : memref<1x9x2x9x256xf32, #tpu.memory_space<vmem>>, vector<1x8x1x8x128xf32>
    %28 = vector.shape_cast %27 : vector<1x8x1x8x128xf32> to vector<8x8x128xf32>
    %c1_i32_30 = arith.constant 1 : i32
    %29 = arith.addi %0, %c1_i32_30 : i32
    %c0_31 = arith.constant 0 : index
    %30 = arith.index_cast %29 : i32 to index
    %c0_32 = arith.constant 0 : index
    %c0_33 = arith.constant 0 : index
    %c128_34 = arith.constant 128 : index
    %31 = vector.load %arg2[%c0_31, %30, %c0_32, %c0_33, %c128_34] : memref<1x9x2x9x256xf32, #tpu.memory_space<vmem>>, vector<1x8x1x8x128xf32>
    %32 = vector.shape_cast %31 : vector<1x8x1x8x128xf32> to vector<8x8x128xf32>
    %c1_i32_35 = arith.constant 1 : i32
    %33 = arith.addi %0, %c1_i32_35 : i32
    %c0_36 = arith.constant 0 : index
    %34 = arith.index_cast %33 : i32 to index
    %c0_37 = arith.constant 0 : index
    %c1_38 = arith.constant 1 : index
    %c0_39 = arith.constant 0 : index
    %35 = vector.load %arg2[%c0_36, %34, %c0_37, %c1_38, %c0_39] : memref<1x9x2x9x256xf32, #tpu.memory_space<vmem>>, vector<1x8x1x8x128xf32>
    %36 = vector.shape_cast %35 : vector<1x8x1x8x128xf32> to vector<8x8x128xf32>
    %37 = tpu.concatenate %4, %8, %12, %16, %20, %24, %28, %32, %36 in 2 : vector<8x8x128xf32>, vector<8x8x128xf32>, vector<8x8x128xf32>, vector<8x8x128xf32>, vector<8x8x128xf32>, vector<8x8x128xf32>, vector<8x8x128xf32>, vector<8x8x128xf32>, vector<8x8x128xf32> -> vector<8x8x1152xf32>
    %38 = vector.shape_cast %37 : vector<8x8x1152xf32> to vector<64x1152xf32>
    %39 = arith.truncf %38 : vector<64x1152xf32> to vector<64x1152xbf16>
    %c0_40 = arith.constant 0 : index
    %c0_41 = arith.constant 0 : index
    %40 = vector.load %arg3[%c0_40, %c0_41] : memref<1152x128xbf16, #tpu.memory_space<vmem>>, vector<1152x128xbf16>
    %cst = arith.constant dense<0.000000e+00> : vector<64x128xf32>
    %41 = tpu.matmul %39, %40, %cst {dimension_numbers = #tpu.dot_dimension_numbers<[1], [0], [0], [1], [0, 0, 1, 1], [], []>} : vector<64x1152xbf16>, vector<1152x128xbf16>, vector<64x128xf32> -> vector<64x128xf32>
    %c0_42 = arith.constant 0 : index
    %c0_43 = arith.constant 0 : index
    %42 = vector.load %arg4[%c0_42, %c0_43] : memref<1x128xf32, #tpu.memory_space<vmem>>, vector<1x128xf32>
    %43 = vector.broadcast %42 : vector<1x128xf32> to vector<64x128xf32>
    %44 = arith.addf %41, %43 : vector<64x128xf32>
    %cst_44 = arith.constant dense<0.000000e+00> : vector<128xf32>
    %45 = vector.multi_reduction <add>, %44, %cst_44 [0] : vector<64x128xf32> to vector<128xf32>
    %46 = vector.shape_cast %45 : vector<128xf32> to vector<1x128xf32>
    %c0_45 = arith.constant 0 : index
    %c0_46 = arith.constant 0 : index
    %47 = vector.load %arg7[%c0_45, %c0_46] : memref<128x128xf32, #tpu.memory_space<vmem>>, vector<128x128xf32>
    %cst_47 = arith.constant dense<0.000000e+00> : vector<1x128xf32>
    %48 = tpu.matmul %46, %47, %cst_47 {dimension_numbers = #tpu.dot_dimension_numbers<[1], [0], [0], [1], [0, 0, 1, 1], [], []>} : vector<1x128xf32>, vector<128x128xf32>, vector<1x128xf32> -> vector<1x128xf32>
    %cst_48 = arith.constant 1.562500e-02 : f32
    %49 = vector.broadcast %cst_48 : f32 to vector<1x128xf32>
    %50 = arith.mulf %48, %49 : vector<1x128xf32>
    %51 = vector.broadcast %50 : vector<1x128xf32> to vector<64x128xf32>
    %52 = arith.subf %44, %51 : vector<64x128xf32>
    %53 = arith.mulf %52, %52 : vector<64x128xf32>
    %cst_49 = arith.constant dense<0.000000e+00> : vector<128xf32>
    %54 = vector.multi_reduction <add>, %53, %cst_49 [0] : vector<64x128xf32> to vector<128xf32>
    %55 = vector.shape_cast %54 : vector<128xf32> to vector<1x128xf32>
    %c0_50 = arith.constant 0 : index
    %c0_51 = arith.constant 0 : index
    %56 = vector.load %arg7[%c0_50, %c0_51] : memref<128x128xf32, #tpu.memory_space<vmem>>, vector<128x128xf32>
    %cst_52 = arith.constant dense<0.000000e+00> : vector<1x128xf32>
    %57 = tpu.matmul %55, %56, %cst_52 {dimension_numbers = #tpu.dot_dimension_numbers<[1], [0], [0], [1], [0, 0, 1, 1], [], []>} : vector<1x128xf32>, vector<128x128xf32>, vector<1x128xf32> -> vector<1x128xf32>
    %cst_53 = arith.constant 1.562500e-02 : f32
    %58 = vector.broadcast %cst_53 : f32 to vector<1x128xf32>
    %59 = arith.mulf %57, %58 : vector<1x128xf32>
    %cst_54 = arith.constant 9.99999974E-6 : f32
    %60 = vector.broadcast %cst_54 : f32 to vector<1x128xf32>
    %61 = arith.addf %59, %60 : vector<1x128xf32>
    %62 = math.rsqrt %61 : vector<1x128xf32>
    %63 = vector.broadcast %62 : vector<1x128xf32> to vector<64x128xf32>
    %64 = arith.mulf %52, %63 : vector<64x128xf32>
    %c0_55 = arith.constant 0 : index
    %c0_56 = arith.constant 0 : index
    %65 = vector.load %arg5[%c0_55, %c0_56] : memref<1x128xf32, #tpu.memory_space<vmem>>, vector<1x128xf32>
    %66 = vector.broadcast %65 : vector<1x128xf32> to vector<64x128xf32>
    %67 = arith.mulf %64, %66 : vector<64x128xf32>
    %c0_57 = arith.constant 0 : index
    %c0_58 = arith.constant 0 : index
    %68 = vector.load %arg6[%c0_57, %c0_58] : memref<1x128xf32, #tpu.memory_space<vmem>>, vector<1x128xf32>
    %69 = vector.broadcast %68 : vector<1x128xf32> to vector<64x128xf32>
    %70 = arith.addf %67, %69 : vector<64x128xf32>
    %cst_59 = arith.constant 0.000000e+00 : f32
    %71 = vector.broadcast %cst_59 : f32 to vector<64x128xf32>
    %72 = arith.maximumf %70, %71 : vector<64x128xf32>
    %c0_60 = arith.constant 0 : index
    %c0_61 = arith.constant 0 : index
    %c0_62 = arith.constant 0 : index
    %73 = vector.load %arg8[%c0_60, %c0_61, %c0_62] : memref<1x64x128xf32, #tpu.memory_space<vmem>>, vector<1x64x128xf32>
    %74 = vector.shape_cast %73 : vector<1x64x128xf32> to vector<64x128xf32>
    %75 = vector.shape_cast %72 : vector<64x128xf32> to vector<1x64x128xf32>
    tpu.vector_store %arg8[%c0_60, %c0_61, %c0_62], %75 {strides = array<i32>} : memref<1x64x128xf32, #tpu.memory_space<vmem>>, vector<1x64x128xf32>,
    return
  }
  func.func @transform_0(%arg0: i32, %arg1: i32) -> (i32, i32, i32, i32, i32) {
    %c0_i32 = arith.constant 0 : i32
    %c0_i32_0 = arith.constant 0 : i32
    %c0_i32_1 = arith.constant 0 : i32
    %c0_i32_2 = arith.constant 0 : i32
    %c0_i32_3 = arith.constant 0 : i32
    return %arg0, %c0_i32, %c0_i32_0, %c0_i32_1, %c0_i32_2 : i32, i32, i32, i32, i32
  }
  func.func @transform_1(%arg0: i32, %arg1: i32) -> (i32, i32) {
    %c0_i32 = arith.constant 0 : i32
    %c0_i32_0 = arith.constant 0 : i32
    %c0_i32_1 = arith.constant 0 : i32
    return %c0_i32, %c0_i32_0 : i32, i32
  }
  func.func @transform_2(%arg0: i32, %arg1: i32) -> (i32, i32) {
    %c0_i32 = arith.constant 0 : i32
    %c0_i32_0 = arith.constant 0 : i32
    %c0_i32_1 = arith.constant 0 : i32
    return %c0_i32, %c0_i32_0 : i32, i32
  }
  func.func @transform_3(%arg0: i32, %arg1: i32) -> (i32, i32) {
    %c0_i32 = arith.constant 0 : i32
    %c0_i32_0 = arith.constant 0 : i32
    %c0_i32_1 = arith.constant 0 : i32
    return %c0_i32, %c0_i32_0 : i32, i32
  }
  func.func @transform_4(%arg0: i32, %arg1: i32) -> (i32, i32) {
    %c0_i32 = arith.constant 0 : i32
    %c0_i32_0 = arith.constant 0 : i32
    %c0_i32_1 = arith.constant 0 : i32
    return %c0_i32, %c0_i32_0 : i32, i32
  }
  func.func @transform_5(%arg0: i32, %arg1: i32) -> (i32, i32) {
    %c0_i32 = arith.constant 0 : i32
    %c0_i32_0 = arith.constant 0 : i32
    %c0_i32_1 = arith.constant 0 : i32
    return %c0_i32, %c0_i32_0 : i32, i32
  }
  func.func @transform_6(%arg0: i32, %arg1: i32) -> (i32, i32, i32) {
    %c0_i32 = arith.constant 0 : i32
    %c0_i32_0 = arith.constant 0 : i32
    return %arg0, %arg1, %c0_i32 : i32, i32, i32
  }
}

module attributes {stable_mosaic.version = 11 : i64} {
  func.func @_conv_kernel(%arg0: i32, %arg1: i32, %arg2: memref<1x8x8x128xf32, #tpu.memory_space<vmem>>, %arg3: memref<1152x128xbf16, #tpu.memory_space<vmem>>, %arg4: memref<1x128xf32, #tpu.memory_space<vmem>>, %arg5: memref<1x128xf32, #tpu.memory_space<vmem>>, %arg6: memref<1x128xf32, #tpu.memory_space<vmem>>, %arg7: memref<128x128xf32, #tpu.memory_space<vmem>>, %arg8: memref<1x64x128xf32, #tpu.memory_space<vmem>>, %arg9: memref<10x10x128xf32, #tpu.memory_space<vmem>>) attributes {dimension_semantics = [#tpu.dimension_semantics<parallel>, #tpu.dimension_semantics<arbitrary>], iteration_bounds = array<i64: 2, 1>, scalar_prefetch = 0 : i64, scratch_operands = 1 : i64, tpu.core_type = #tpu.core_type<tc>, window_params = [{transform_indices = @transform_0, window_bounds = array<i64: 1, 8, 8, 128>}, {pipeline_mode = #tpu.pipeline_mode<synchronous>, transform_indices = @transform_1, window_bounds = array<i64: 1152, 128>}, {pipeline_mode = #tpu.pipeline_mode<synchronous>, transform_indices = @transform_2, window_bounds = array<i64: 1, 128>}, {pipeline_mode = #tpu.pipeline_mode<synchronous>, transform_indices = @transform_3, window_bounds = array<i64: 1, 128>}, {pipeline_mode = #tpu.pipeline_mode<synchronous>, transform_indices = @transform_4, window_bounds = array<i64: 1, 128>}, {pipeline_mode = #tpu.pipeline_mode<synchronous>, transform_indices = @transform_5, window_bounds = array<i64: 128, 128>}, {transform_indices = @transform_6, window_bounds = array<i64: 1, 64, 128>}]} {
    %c8_i32 = arith.constant 8 : i32
    %0 = arith.muli %arg1, %c8_i32 : i32
    %cst = arith.constant 0.000000e+00 : f32
    %1 = vector.broadcast %cst : f32 to vector<10x10x128xf32>
    %c0 = arith.constant 0 : index
    %c0_0 = arith.constant 0 : index
    %c0_1 = arith.constant 0 : index
    %2 = vector.load %arg9[%c0, %c0_0, %c0_1] : memref<10x10x128xf32, #tpu.memory_space<vmem>>, vector<10x10x128xf32>
    tpu.vector_store %arg9[%c0, %c0_0, %c0_1], %1 {strides = array<i32>} : memref<10x10x128xf32, #tpu.memory_space<vmem>>, vector<10x10x128xf32>,
    %c0_2 = arith.constant 0 : index
    %c0_3 = arith.constant 0 : index
    %c0_4 = arith.constant 0 : index
    %c0_5 = arith.constant 0 : index
    %3 = vector.load %arg2[%c0_2, %c0_3, %c0_4, %c0_5] : memref<1x8x8x128xf32, #tpu.memory_space<vmem>>, vector<1x8x8x128xf32>
    %4 = vector.shape_cast %3 : vector<1x8x8x128xf32> to vector<8x8x128xf32>
    %c1 = arith.constant 1 : index
    %c1_6 = arith.constant 1 : index
    %c0_7 = arith.constant 0 : index
    %5 = vector.load %arg9[%c1, %c1_6, %c0_7] : memref<10x10x128xf32, #tpu.memory_space<vmem>>, vector<8x8x128xf32>
    tpu.vector_store %arg9[%c1, %c1_6, %c0_7], %4 {strides = array<i32>} : memref<10x10x128xf32, #tpu.memory_space<vmem>>, vector<8x8x128xf32>,
    %c0_i32 = arith.constant 0 : i32
    %6 = arith.addi %0, %c0_i32 : i32
    %7 = arith.index_cast %6 : i32 to index
    %c0_8 = arith.constant 0 : index
    %c0_9 = arith.constant 0 : index
    %8 = vector.load %arg9[%7, %c0_8, %c0_9] : memref<10x10x128xf32, #tpu.memory_space<vmem>>, vector<8x8x128xf32>
    %c0_i32_10 = arith.constant 0 : i32
    %9 = arith.addi %0, %c0_i32_10 : i32
    %10 = arith.index_cast %9 : i32 to index
    %c1_11 = arith.constant 1 : index
    %c0_12 = arith.constant 0 : index
    %11 = vector.load %arg9[%10, %c1_11, %c0_12] : memref<10x10x128xf32, #tpu.memory_space<vmem>>, vector<8x8x128xf32>
    %c0_i32_13 = arith.constant 0 : i32
    %12 = arith.addi %0, %c0_i32_13 : i32
    %13 = arith.index_cast %12 : i32 to index
    %c2 = arith.constant 2 : index
    %c0_14 = arith.constant 0 : index
    %14 = vector.load %arg9[%13, %c2, %c0_14] : memref<10x10x128xf32, #tpu.memory_space<vmem>>, vector<8x8x128xf32>
    %c1_i32 = arith.constant 1 : i32
    %15 = arith.addi %0, %c1_i32 : i32
    %16 = arith.index_cast %15 : i32 to index
    %c0_15 = arith.constant 0 : index
    %c0_16 = arith.constant 0 : index
    %17 = vector.load %arg9[%16, %c0_15, %c0_16] : memref<10x10x128xf32, #tpu.memory_space<vmem>>, vector<8x8x128xf32>
    %c1_i32_17 = arith.constant 1 : i32
    %18 = arith.addi %0, %c1_i32_17 : i32
    %19 = arith.index_cast %18 : i32 to index
    %c1_18 = arith.constant 1 : index
    %c0_19 = arith.constant 0 : index
    %20 = vector.load %arg9[%19, %c1_18, %c0_19] : memref<10x10x128xf32, #tpu.memory_space<vmem>>, vector<8x8x128xf32>
    %c1_i32_20 = arith.constant 1 : i32
    %21 = arith.addi %0, %c1_i32_20 : i32
    %22 = arith.index_cast %21 : i32 to index
    %c2_21 = arith.constant 2 : index
    %c0_22 = arith.constant 0 : index
    %23 = vector.load %arg9[%22, %c2_21, %c0_22] : memref<10x10x128xf32, #tpu.memory_space<vmem>>, vector<8x8x128xf32>
    %c2_i32 = arith.constant 2 : i32
    %24 = arith.addi %0, %c2_i32 : i32
    %25 = arith.index_cast %24 : i32 to index
    %c0_23 = arith.constant 0 : index
    %c0_24 = arith.constant 0 : index
    %26 = vector.load %arg9[%25, %c0_23, %c0_24] : memref<10x10x128xf32, #tpu.memory_space<vmem>>, vector<8x8x128xf32>
    %c2_i32_25 = arith.constant 2 : i32
    %27 = arith.addi %0, %c2_i32_25 : i32
    %28 = arith.index_cast %27 : i32 to index
    %c1_26 = arith.constant 1 : index
    %c0_27 = arith.constant 0 : index
    %29 = vector.load %arg9[%28, %c1_26, %c0_27] : memref<10x10x128xf32, #tpu.memory_space<vmem>>, vector<8x8x128xf32>
    %c2_i32_28 = arith.constant 2 : i32
    %30 = arith.addi %0, %c2_i32_28 : i32
    %31 = arith.index_cast %30 : i32 to index
    %c2_29 = arith.constant 2 : index
    %c0_30 = arith.constant 0 : index
    %32 = vector.load %arg9[%31, %c2_29, %c0_30] : memref<10x10x128xf32, #tpu.memory_space<vmem>>, vector<8x8x128xf32>
    %33 = tpu.concatenate %8, %11, %14, %17, %20, %23, %26, %29, %32 in 2 : vector<8x8x128xf32>, vector<8x8x128xf32>, vector<8x8x128xf32>, vector<8x8x128xf32>, vector<8x8x128xf32>, vector<8x8x128xf32>, vector<8x8x128xf32>, vector<8x8x128xf32>, vector<8x8x128xf32> -> vector<8x8x1152xf32>
    %34 = vector.shape_cast %33 : vector<8x8x1152xf32> to vector<64x1152xf32>
    %35 = arith.truncf %34 : vector<64x1152xf32> to vector<64x1152xbf16>
    %c0_31 = arith.constant 0 : index
    %c0_32 = arith.constant 0 : index
    %36 = vector.load %arg3[%c0_31, %c0_32] : memref<1152x128xbf16, #tpu.memory_space<vmem>>, vector<1152x128xbf16>
    %cst_33 = arith.constant dense<0.000000e+00> : vector<64x128xf32>
    %37 = tpu.matmul %35, %36, %cst_33 {dimension_numbers = #tpu.dot_dimension_numbers<[1], [0], [0], [1], [0, 0, 1, 1], [], []>} : vector<64x1152xbf16>, vector<1152x128xbf16>, vector<64x128xf32> -> vector<64x128xf32>
    %c0_34 = arith.constant 0 : index
    %c0_35 = arith.constant 0 : index
    %38 = vector.load %arg4[%c0_34, %c0_35] : memref<1x128xf32, #tpu.memory_space<vmem>>, vector<1x128xf32>
    %39 = vector.broadcast %38 : vector<1x128xf32> to vector<64x128xf32>
    %40 = arith.addf %37, %39 : vector<64x128xf32>
    %cst_36 = arith.constant dense<0.000000e+00> : vector<128xf32>
    %41 = vector.multi_reduction <add>, %40, %cst_36 [0] : vector<64x128xf32> to vector<128xf32>
    %42 = vector.shape_cast %41 : vector<128xf32> to vector<1x128xf32>
    %c0_37 = arith.constant 0 : index
    %c0_38 = arith.constant 0 : index
    %43 = vector.load %arg7[%c0_37, %c0_38] : memref<128x128xf32, #tpu.memory_space<vmem>>, vector<128x128xf32>
    %cst_39 = arith.constant dense<0.000000e+00> : vector<1x128xf32>
    %44 = tpu.matmul %42, %43, %cst_39 {dimension_numbers = #tpu.dot_dimension_numbers<[1], [0], [0], [1], [0, 0, 1, 1], [], []>} : vector<1x128xf32>, vector<128x128xf32>, vector<1x128xf32> -> vector<1x128xf32>
    %cst_40 = arith.constant 1.562500e-02 : f32
    %45 = vector.broadcast %cst_40 : f32 to vector<1x128xf32>
    %46 = arith.mulf %44, %45 : vector<1x128xf32>
    %47 = vector.broadcast %46 : vector<1x128xf32> to vector<64x128xf32>
    %48 = arith.subf %40, %47 : vector<64x128xf32>
    %49 = arith.mulf %48, %48 : vector<64x128xf32>
    %cst_41 = arith.constant dense<0.000000e+00> : vector<128xf32>
    %50 = vector.multi_reduction <add>, %49, %cst_41 [0] : vector<64x128xf32> to vector<128xf32>
    %51 = vector.shape_cast %50 : vector<128xf32> to vector<1x128xf32>
    %c0_42 = arith.constant 0 : index
    %c0_43 = arith.constant 0 : index
    %52 = vector.load %arg7[%c0_42, %c0_43] : memref<128x128xf32, #tpu.memory_space<vmem>>, vector<128x128xf32>
    %cst_44 = arith.constant dense<0.000000e+00> : vector<1x128xf32>
    %53 = tpu.matmul %51, %52, %cst_44 {dimension_numbers = #tpu.dot_dimension_numbers<[1], [0], [0], [1], [0, 0, 1, 1], [], []>} : vector<1x128xf32>, vector<128x128xf32>, vector<1x128xf32> -> vector<1x128xf32>
    %cst_45 = arith.constant 1.562500e-02 : f32
    %54 = vector.broadcast %cst_45 : f32 to vector<1x128xf32>
    %55 = arith.mulf %53, %54 : vector<1x128xf32>
    %cst_46 = arith.constant 9.99999974E-6 : f32
    %56 = vector.broadcast %cst_46 : f32 to vector<1x128xf32>
    %57 = arith.addf %55, %56 : vector<1x128xf32>
    %58 = math.rsqrt %57 : vector<1x128xf32>
    %59 = vector.broadcast %58 : vector<1x128xf32> to vector<64x128xf32>
    %60 = arith.mulf %48, %59 : vector<64x128xf32>
    %c0_47 = arith.constant 0 : index
    %c0_48 = arith.constant 0 : index
    %61 = vector.load %arg5[%c0_47, %c0_48] : memref<1x128xf32, #tpu.memory_space<vmem>>, vector<1x128xf32>
    %62 = vector.broadcast %61 : vector<1x128xf32> to vector<64x128xf32>
    %63 = arith.mulf %60, %62 : vector<64x128xf32>
    %c0_49 = arith.constant 0 : index
    %c0_50 = arith.constant 0 : index
    %64 = vector.load %arg6[%c0_49, %c0_50] : memref<1x128xf32, #tpu.memory_space<vmem>>, vector<1x128xf32>
    %65 = vector.broadcast %64 : vector<1x128xf32> to vector<64x128xf32>
    %66 = arith.addf %63, %65 : vector<64x128xf32>
    %cst_51 = arith.constant 0.000000e+00 : f32
    %67 = vector.broadcast %cst_51 : f32 to vector<64x128xf32>
    %68 = arith.maximumf %66, %67 : vector<64x128xf32>
    %c0_52 = arith.constant 0 : index
    %c0_53 = arith.constant 0 : index
    %c0_54 = arith.constant 0 : index
    %69 = vector.load %arg8[%c0_52, %c0_53, %c0_54] : memref<1x64x128xf32, #tpu.memory_space<vmem>>, vector<1x64x128xf32>
    %70 = vector.shape_cast %69 : vector<1x64x128xf32> to vector<64x128xf32>
    %71 = vector.shape_cast %68 : vector<64x128xf32> to vector<1x64x128xf32>
    tpu.vector_store %arg8[%c0_52, %c0_53, %c0_54], %71 {strides = array<i32>} : memref<1x64x128xf32, #tpu.memory_space<vmem>>, vector<1x64x128xf32>,
    return
  }
  func.func @transform_0(%arg0: i32, %arg1: i32) -> (i32, i32, i32, i32) {
    %c0_i32 = arith.constant 0 : i32
    %c0_i32_0 = arith.constant 0 : i32
    %c0_i32_1 = arith.constant 0 : i32
    %c0_i32_2 = arith.constant 0 : i32
    return %arg0, %c0_i32, %c0_i32_0, %c0_i32_1 : i32, i32, i32, i32
  }
  func.func @transform_1(%arg0: i32, %arg1: i32) -> (i32, i32) {
    %c0_i32 = arith.constant 0 : i32
    %c0_i32_0 = arith.constant 0 : i32
    %c0_i32_1 = arith.constant 0 : i32
    return %c0_i32, %c0_i32_0 : i32, i32
  }
  func.func @transform_2(%arg0: i32, %arg1: i32) -> (i32, i32) {
    %c0_i32 = arith.constant 0 : i32
    %c0_i32_0 = arith.constant 0 : i32
    %c0_i32_1 = arith.constant 0 : i32
    return %c0_i32, %c0_i32_0 : i32, i32
  }
  func.func @transform_3(%arg0: i32, %arg1: i32) -> (i32, i32) {
    %c0_i32 = arith.constant 0 : i32
    %c0_i32_0 = arith.constant 0 : i32
    %c0_i32_1 = arith.constant 0 : i32
    return %c0_i32, %c0_i32_0 : i32, i32
  }
  func.func @transform_4(%arg0: i32, %arg1: i32) -> (i32, i32) {
    %c0_i32 = arith.constant 0 : i32
    %c0_i32_0 = arith.constant 0 : i32
    %c0_i32_1 = arith.constant 0 : i32
    return %c0_i32, %c0_i32_0 : i32, i32
  }
  func.func @transform_5(%arg0: i32, %arg1: i32) -> (i32, i32) {
    %c0_i32 = arith.constant 0 : i32
    %c0_i32_0 = arith.constant 0 : i32
    %c0_i32_1 = arith.constant 0 : i32
    return %c0_i32, %c0_i32_0 : i32, i32
  }
  func.func @transform_6(%arg0: i32, %arg1: i32) -> (i32, i32, i32) {
    %c0_i32 = arith.constant 0 : i32
    %c0_i32_0 = arith.constant 0 : i32
    return %arg0, %arg1, %c0_i32 : i32, i32, i32
  }
}

module attributes {stable_mosaic.version = 11 : i64} {
  func.func @_conv_kernel(%arg0: i32, %arg1: i32, %arg2: memref<1x5x2x5x256xf32, #tpu.memory_space<vmem>>, %arg3: memref<1152x128xbf16, #tpu.memory_space<vmem>>, %arg4: memref<1x128xf32, #tpu.memory_space<vmem>>, %arg5: memref<1x128xf32, #tpu.memory_space<vmem>>, %arg6: memref<1x128xf32, #tpu.memory_space<vmem>>, %arg7: memref<128x128xf32, #tpu.memory_space<vmem>>, %arg8: memref<1x16x128xf32, #tpu.memory_space<vmem>>) attributes {dimension_semantics = [#tpu.dimension_semantics<parallel>, #tpu.dimension_semantics<arbitrary>], iteration_bounds = array<i64: 2, 1>, scalar_prefetch = 0 : i64, scratch_operands = 0 : i64, tpu.core_type = #tpu.core_type<tc>, window_params = [{transform_indices = @transform_0, window_bounds = array<i64: 1, 5, 2, 5, 256>}, {pipeline_mode = #tpu.pipeline_mode<synchronous>, transform_indices = @transform_1, window_bounds = array<i64: 1152, 128>}, {pipeline_mode = #tpu.pipeline_mode<synchronous>, transform_indices = @transform_2, window_bounds = array<i64: 1, 128>}, {pipeline_mode = #tpu.pipeline_mode<synchronous>, transform_indices = @transform_3, window_bounds = array<i64: 1, 128>}, {pipeline_mode = #tpu.pipeline_mode<synchronous>, transform_indices = @transform_4, window_bounds = array<i64: 1, 128>}, {pipeline_mode = #tpu.pipeline_mode<synchronous>, transform_indices = @transform_5, window_bounds = array<i64: 128, 128>}, {transform_indices = @transform_6, window_bounds = array<i64: 1, 16, 128>}]} {
    %c4_i32 = arith.constant 4 : i32
    %0 = arith.muli %arg1, %c4_i32 : i32
    %c0_i32 = arith.constant 0 : i32
    %1 = arith.addi %0, %c0_i32 : i32
    %c0 = arith.constant 0 : index
    %2 = arith.index_cast %1 : i32 to index
    %c0_0 = arith.constant 0 : index
    %c0_1 = arith.constant 0 : index
    %c0_2 = arith.constant 0 : index
    %3 = vector.load %arg2[%c0, %2, %c0_0, %c0_1, %c0_2] : memref<1x5x2x5x256xf32, #tpu.memory_space<vmem>>, vector<1x4x1x4x128xf32>
    %4 = vector.shape_cast %3 : vector<1x4x1x4x128xf32> to vector<4x4x128xf32>
    %c0_i32_3 = arith.constant 0 : i32
    %5 = arith.addi %0, %c0_i32_3 : i32
    %c0_4 = arith.constant 0 : index
    %6 = arith.index_cast %5 : i32 to index
    %c0_5 = arith.constant 0 : index
    %c0_6 = arith.constant 0 : index
    %c128 = arith.constant 128 : index
    %7 = vector.load %arg2[%c0_4, %6, %c0_5, %c0_6, %c128] : memref<1x5x2x5x256xf32, #tpu.memory_space<vmem>>, vector<1x4x1x4x128xf32>
    %8 = vector.shape_cast %7 : vector<1x4x1x4x128xf32> to vector<4x4x128xf32>
    %c0_i32_7 = arith.constant 0 : i32
    %9 = arith.addi %0, %c0_i32_7 : i32
    %c0_8 = arith.constant 0 : index
    %10 = arith.index_cast %9 : i32 to index
    %c0_9 = arith.constant 0 : index
    %c1 = arith.constant 1 : index
    %c0_10 = arith.constant 0 : index
    %11 = vector.load %arg2[%c0_8, %10, %c0_9, %c1, %c0_10] : memref<1x5x2x5x256xf32, #tpu.memory_space<vmem>>, vector<1x4x1x4x128xf32>
    %12 = vector.shape_cast %11 : vector<1x4x1x4x128xf32> to vector<4x4x128xf32>
    %c0_i32_11 = arith.constant 0 : i32
    %13 = arith.addi %0, %c0_i32_11 : i32
    %c0_12 = arith.constant 0 : index
    %14 = arith.index_cast %13 : i32 to index
    %c1_13 = arith.constant 1 : index
    %c0_14 = arith.constant 0 : index
    %c0_15 = arith.constant 0 : index
    %15 = vector.load %arg2[%c0_12, %14, %c1_13, %c0_14, %c0_15] : memref<1x5x2x5x256xf32, #tpu.memory_space<vmem>>, vector<1x4x1x4x128xf32>
    %16 = vector.shape_cast %15 : vector<1x4x1x4x128xf32> to vector<4x4x128xf32>
    %c0_i32_16 = arith.constant 0 : i32
    %17 = arith.addi %0, %c0_i32_16 : i32
    %c0_17 = arith.constant 0 : index
    %18 = arith.index_cast %17 : i32 to index
    %c1_18 = arith.constant 1 : index
    %c0_19 = arith.constant 0 : index
    %c128_20 = arith.constant 128 : index
    %19 = vector.load %arg2[%c0_17, %18, %c1_18, %c0_19, %c128_20] : memref<1x5x2x5x256xf32, #tpu.memory_space<vmem>>, vector<1x4x1x4x128xf32>
    %20 = vector.shape_cast %19 : vector<1x4x1x4x128xf32> to vector<4x4x128xf32>
    %c0_i32_21 = arith.constant 0 : i32
    %21 = arith.addi %0, %c0_i32_21 : i32
    %c0_22 = arith.constant 0 : index
    %22 = arith.index_cast %21 : i32 to index
    %c1_23 = arith.constant 1 : index
    %c1_24 = arith.constant 1 : index
    %c0_25 = arith.constant 0 : index
    %23 = vector.load %arg2[%c0_22, %22, %c1_23, %c1_24, %c0_25] : memref<1x5x2x5x256xf32, #tpu.memory_space<vmem>>, vector<1x4x1x4x128xf32>
    %24 = vector.shape_cast %23 : vector<1x4x1x4x128xf32> to vector<4x4x128xf32>
    %c1_i32 = arith.constant 1 : i32
    %25 = arith.addi %0, %c1_i32 : i32
    %c0_26 = arith.constant 0 : index
    %26 = arith.index_cast %25 : i32 to index
    %c0_27 = arith.constant 0 : index
    %c0_28 = arith.constant 0 : index
    %c0_29 = arith.constant 0 : index
    %27 = vector.load %arg2[%c0_26, %26, %c0_27, %c0_28, %c0_29] : memref<1x5x2x5x256xf32, #tpu.memory_space<vmem>>, vector<1x4x1x4x128xf32>
    %28 = vector.shape_cast %27 : vector<1x4x1x4x128xf32> to vector<4x4x128xf32>
    %c1_i32_30 = arith.constant 1 : i32
    %29 = arith.addi %0, %c1_i32_30 : i32
    %c0_31 = arith.constant 0 : index
    %30 = arith.index_cast %29 : i32 to index
    %c0_32 = arith.constant 0 : index
    %c0_33 = arith.constant 0 : index
    %c128_34 = arith.constant 128 : index
    %31 = vector.load %arg2[%c0_31, %30, %c0_32, %c0_33, %c128_34] : memref<1x5x2x5x256xf32, #tpu.memory_space<vmem>>, vector<1x4x1x4x128xf32>
    %32 = vector.shape_cast %31 : vector<1x4x1x4x128xf32> to vector<4x4x128xf32>
    %c1_i32_35 = arith.constant 1 : i32
    %33 = arith.addi %0, %c1_i32_35 : i32
    %c0_36 = arith.constant 0 : index
    %34 = arith.index_cast %33 : i32 to index
    %c0_37 = arith.constant 0 : index
    %c1_38 = arith.constant 1 : index
    %c0_39 = arith.constant 0 : index
    %35 = vector.load %arg2[%c0_36, %34, %c0_37, %c1_38, %c0_39] : memref<1x5x2x5x256xf32, #tpu.memory_space<vmem>>, vector<1x4x1x4x128xf32>
    %36 = vector.shape_cast %35 : vector<1x4x1x4x128xf32> to vector<4x4x128xf32>
    %37 = tpu.concatenate %4, %8, %12, %16, %20, %24, %28, %32, %36 in 2 : vector<4x4x128xf32>, vector<4x4x128xf32>, vector<4x4x128xf32>, vector<4x4x128xf32>, vector<4x4x128xf32>, vector<4x4x128xf32>, vector<4x4x128xf32>, vector<4x4x128xf32>, vector<4x4x128xf32> -> vector<4x4x1152xf32>
    %38 = vector.shape_cast %37 : vector<4x4x1152xf32> to vector<16x1152xf32>
    %39 = arith.truncf %38 : vector<16x1152xf32> to vector<16x1152xbf16>
    %c0_40 = arith.constant 0 : index
    %c0_41 = arith.constant 0 : index
    %40 = vector.load %arg3[%c0_40, %c0_41] : memref<1152x128xbf16, #tpu.memory_space<vmem>>, vector<1152x128xbf16>
    %cst = arith.constant dense<0.000000e+00> : vector<16x128xf32>
    %41 = tpu.matmul %39, %40, %cst {dimension_numbers = #tpu.dot_dimension_numbers<[1], [0], [0], [1], [0, 0, 1, 1], [], []>} : vector<16x1152xbf16>, vector<1152x128xbf16>, vector<16x128xf32> -> vector<16x128xf32>
    %c0_42 = arith.constant 0 : index
    %c0_43 = arith.constant 0 : index
    %42 = vector.load %arg4[%c0_42, %c0_43] : memref<1x128xf32, #tpu.memory_space<vmem>>, vector<1x128xf32>
    %43 = vector.broadcast %42 : vector<1x128xf32> to vector<16x128xf32>
    %44 = arith.addf %41, %43 : vector<16x128xf32>
    %cst_44 = arith.constant dense<0.000000e+00> : vector<128xf32>
    %45 = vector.multi_reduction <add>, %44, %cst_44 [0] : vector<16x128xf32> to vector<128xf32>
    %46 = vector.shape_cast %45 : vector<128xf32> to vector<1x128xf32>
    %c0_45 = arith.constant 0 : index
    %c0_46 = arith.constant 0 : index
    %47 = vector.load %arg7[%c0_45, %c0_46] : memref<128x128xf32, #tpu.memory_space<vmem>>, vector<128x128xf32>
    %cst_47 = arith.constant dense<0.000000e+00> : vector<1x128xf32>
    %48 = tpu.matmul %46, %47, %cst_47 {dimension_numbers = #tpu.dot_dimension_numbers<[1], [0], [0], [1], [0, 0, 1, 1], [], []>} : vector<1x128xf32>, vector<128x128xf32>, vector<1x128xf32> -> vector<1x128xf32>
    %cst_48 = arith.constant 6.250000e-02 : f32
    %49 = vector.broadcast %cst_48 : f32 to vector<1x128xf32>
    %50 = arith.mulf %48, %49 : vector<1x128xf32>
    %51 = vector.broadcast %50 : vector<1x128xf32> to vector<16x128xf32>
    %52 = arith.subf %44, %51 : vector<16x128xf32>
    %53 = arith.mulf %52, %52 : vector<16x128xf32>
    %cst_49 = arith.constant dense<0.000000e+00> : vector<128xf32>
    %54 = vector.multi_reduction <add>, %53, %cst_49 [0] : vector<16x128xf32> to vector<128xf32>
    %55 = vector.shape_cast %54 : vector<128xf32> to vector<1x128xf32>
    %c0_50 = arith.constant 0 : index
    %c0_51 = arith.constant 0 : index
    %56 = vector.load %arg7[%c0_50, %c0_51] : memref<128x128xf32, #tpu.memory_space<vmem>>, vector<128x128xf32>
    %cst_52 = arith.constant dense<0.000000e+00> : vector<1x128xf32>
    %57 = tpu.matmul %55, %56, %cst_52 {dimension_numbers = #tpu.dot_dimension_numbers<[1], [0], [0], [1], [0, 0, 1, 1], [], []>} : vector<1x128xf32>, vector<128x128xf32>, vector<1x128xf32> -> vector<1x128xf32>
    %cst_53 = arith.constant 6.250000e-02 : f32
    %58 = vector.broadcast %cst_53 : f32 to vector<1x128xf32>
    %59 = arith.mulf %57, %58 : vector<1x128xf32>
    %cst_54 = arith.constant 9.99999974E-6 : f32
    %60 = vector.broadcast %cst_54 : f32 to vector<1x128xf32>
    %61 = arith.addf %59, %60 : vector<1x128xf32>
    %62 = math.rsqrt %61 : vector<1x128xf32>
    %63 = vector.broadcast %62 : vector<1x128xf32> to vector<16x128xf32>
    %64 = arith.mulf %52, %63 : vector<16x128xf32>
    %c0_55 = arith.constant 0 : index
    %c0_56 = arith.constant 0 : index
    %65 = vector.load %arg5[%c0_55, %c0_56] : memref<1x128xf32, #tpu.memory_space<vmem>>, vector<1x128xf32>
    %66 = vector.broadcast %65 : vector<1x128xf32> to vector<16x128xf32>
    %67 = arith.mulf %64, %66 : vector<16x128xf32>
    %c0_57 = arith.constant 0 : index
    %c0_58 = arith.constant 0 : index
    %68 = vector.load %arg6[%c0_57, %c0_58] : memref<1x128xf32, #tpu.memory_space<vmem>>, vector<1x128xf32>
    %69 = vector.broadcast %68 : vector<1x128xf32> to vector<16x128xf32>
    %70 = arith.addf %67, %69 : vector<16x128xf32>
    %cst_59 = arith.constant 0.000000e+00 : f32
    %71 = vector.broadcast %cst_59 : f32 to vector<16x128xf32>
    %72 = arith.maximumf %70, %71 : vector<16x128xf32>
    %c0_60 = arith.constant 0 : index
    %c0_61 = arith.constant 0 : index
    %c0_62 = arith.constant 0 : index
    %73 = vector.load %arg8[%c0_60, %c0_61, %c0_62] : memref<1x16x128xf32, #tpu.memory_space<vmem>>, vector<1x16x128xf32>
    %74 = vector.shape_cast %73 : vector<1x16x128xf32> to vector<16x128xf32>
    %75 = vector.shape_cast %72 : vector<16x128xf32> to vector<1x16x128xf32>
    tpu.vector_store %arg8[%c0_60, %c0_61, %c0_62], %75 {strides = array<i32>} : memref<1x16x128xf32, #tpu.memory_space<vmem>>, vector<1x16x128xf32>,
    return
  }
  func.func @transform_0(%arg0: i32, %arg1: i32) -> (i32, i32, i32, i32, i32) {
    %c0_i32 = arith.constant 0 : i32
    %c0_i32_0 = arith.constant 0 : i32
    %c0_i32_1 = arith.constant 0 : i32
    %c0_i32_2 = arith.constant 0 : i32
    %c0_i32_3 = arith.constant 0 : i32
    return %arg0, %c0_i32, %c0_i32_0, %c0_i32_1, %c0_i32_2 : i32, i32, i32, i32, i32
  }
  func.func @transform_1(%arg0: i32, %arg1: i32) -> (i32, i32) {
    %c0_i32 = arith.constant 0 : i32
    %c0_i32_0 = arith.constant 0 : i32
    %c0_i32_1 = arith.constant 0 : i32
    return %c0_i32, %c0_i32_0 : i32, i32
  }
  func.func @transform_2(%arg0: i32, %arg1: i32) -> (i32, i32) {
    %c0_i32 = arith.constant 0 : i32
    %c0_i32_0 = arith.constant 0 : i32
    %c0_i32_1 = arith.constant 0 : i32
    return %c0_i32, %c0_i32_0 : i32, i32
  }
  func.func @transform_3(%arg0: i32, %arg1: i32) -> (i32, i32) {
    %c0_i32 = arith.constant 0 : i32
    %c0_i32_0 = arith.constant 0 : i32
    %c0_i32_1 = arith.constant 0 : i32
    return %c0_i32, %c0_i32_0 : i32, i32
  }
  func.func @transform_4(%arg0: i32, %arg1: i32) -> (i32, i32) {
    %c0_i32 = arith.constant 0 : i32
    %c0_i32_0 = arith.constant 0 : i32
    %c0_i32_1 = arith.constant 0 : i32
    return %c0_i32, %c0_i32_0 : i32, i32
  }
  func.func @transform_5(%arg0: i32, %arg1: i32) -> (i32, i32) {
    %c0_i32 = arith.constant 0 : i32
    %c0_i32_0 = arith.constant 0 : i32
    %c0_i32_1 = arith.constant 0 : i32
    return %c0_i32, %c0_i32_0 : i32, i32
  }
  func.func @transform_6(%arg0: i32, %arg1: i32) -> (i32, i32, i32) {
    %c0_i32 = arith.constant 0 : i32
    %c0_i32_0 = arith.constant 0 : i32
    return %arg0, %arg1, %c0_i32 : i32, i32, i32
  }
}

module attributes {stable_mosaic.version = 11 : i64} {
  func.func @_attn_kernel(%arg0: i32, %arg1: i32, %arg2: memref<1x16x128xf32, #tpu.memory_space<vmem>>, %arg3: memref<1x128xf32, #tpu.memory_space<vmem>>, %arg4: memref<1x128xf32, #tpu.memory_space<vmem>>, %arg5: memref<1x128x384xbf16, #tpu.memory_space<vmem>>, %arg6: memref<1x1x384xf32, #tpu.memory_space<vmem>>, %arg7: memref<1x128x128xbf16, #tpu.memory_space<vmem>>, %arg8: memref<1x128xf32, #tpu.memory_space<vmem>>, %arg9: memref<1x16x128xf32, #tpu.memory_space<vmem>>) attributes {dimension_semantics = [#tpu.dimension_semantics<parallel>, #tpu.dimension_semantics<arbitrary>], iteration_bounds = array<i64: 2, 2>, scalar_prefetch = 0 : i64, scratch_operands = 0 : i64, tpu.core_type = #tpu.core_type<tc>, window_params = [{transform_indices = @transform_0, window_bounds = array<i64: 1, 16, 128>}, {pipeline_mode = #tpu.pipeline_mode<synchronous>, transform_indices = @transform_1, window_bounds = array<i64: 1, 128>}, {pipeline_mode = #tpu.pipeline_mode<synchronous>, transform_indices = @transform_2, window_bounds = array<i64: 1, 128>}, {transform_indices = @transform_3, window_bounds = array<i64: 1, 128, 384>}, {transform_indices = @transform_4, window_bounds = array<i64: 1, 1, 384>}, {transform_indices = @transform_5, window_bounds = array<i64: 1, 128, 128>}, {pipeline_mode = #tpu.pipeline_mode<synchronous>, transform_indices = @transform_6, window_bounds = array<i64: 1, 128>}, {transform_indices = @transform_7, window_bounds = array<i64: 1, 16, 128>}]} {
    %c0 = arith.constant 0 : index
    %c0_0 = arith.constant 0 : index
    %c0_1 = arith.constant 0 : index
    %0 = vector.load %arg2[%c0, %c0_0, %c0_1] : memref<1x16x128xf32, #tpu.memory_space<vmem>>, vector<1x16x128xf32>
    %1 = vector.shape_cast %0 : vector<1x16x128xf32> to vector<16x128xf32>
    %2 = tpu.iota {dimensions = array<i32: 1>} : vector<1x128xi32>
    %c16_i32 = arith.constant 16 : i32
    %3 = vector.broadcast %c16_i32 : i32 to vector<1x128xi32>
    %4 = arith.cmpi slt, %2, %3 : vector<1x128xi32>
    %5 = arith.extui %4 : vector<1x128xi1> to vector<1x128xi32>
    %6 = arith.sitofp %5 : vector<1x128xi32> to vector<1x128xf32>
    %cst = arith.constant dense<0.000000e+00> : vector<16xf32>
    %7 = vector.multi_reduction <add>, %1, %cst [1] : vector<16x128xf32> to vector<16xf32>
    %8 = vector.shape_cast %7 : vector<16xf32> to vector<16x1xf32>
    %cst_2 = arith.constant 6.250000e-02 : f32
    %9 = vector.broadcast %cst_2 : f32 to vector<16x1xf32>
    %10 = arith.mulf %8, %9 : vector<16x1xf32>
    %11 = vector.broadcast %10 : vector<16x1xf32> to vector<16x128xf32>
    %12 = arith.subf %1, %11 : vector<16x128xf32>
    %13 = vector.broadcast %6 : vector<1x128xf32> to vector<16x128xf32>
    %14 = arith.mulf %12, %13 : vector<16x128xf32>
    %15 = arith.mulf %14, %14 : vector<16x128xf32>
    %cst_3 = arith.constant dense<0.000000e+00> : vector<16xf32>
    %16 = vector.multi_reduction <add>, %15, %cst_3 [1] : vector<16x128xf32> to vector<16xf32>
    %17 = vector.shape_cast %16 : vector<16xf32> to vector<16x1xf32>
    %cst_4 = arith.constant 6.250000e-02 : f32
    %18 = vector.broadcast %cst_4 : f32 to vector<16x1xf32>
    %19 = arith.mulf %17, %18 : vector<16x1xf32>
    %cst_5 = arith.constant 9.99999974E-6 : f32
    %20 = vector.broadcast %cst_5 : f32 to vector<16x1xf32>
    %21 = arith.addf %19, %20 : vector<16x1xf32>
    %22 = math.rsqrt %21 : vector<16x1xf32>
    %23 = vector.broadcast %22 : vector<16x1xf32> to vector<16x128xf32>
    %24 = arith.mulf %14, %23 : vector<16x128xf32>
    %c0_6 = arith.constant 0 : index
    %c0_7 = arith.constant 0 : index
    %25 = vector.load %arg3[%c0_6, %c0_7] : memref<1x128xf32, #tpu.memory_space<vmem>>, vector<1x128xf32>
    %26 = vector.broadcast %25 : vector<1x128xf32> to vector<16x128xf32>
    %27 = arith.mulf %24, %26 : vector<16x128xf32>
    %c0_8 = arith.constant 0 : index
    %c0_9 = arith.constant 0 : index
    %28 = vector.load %arg4[%c0_8, %c0_9] : memref<1x128xf32, #tpu.memory_space<vmem>>, vector<1x128xf32>
    %29 = vector.broadcast %28 : vector<1x128xf32> to vector<16x128xf32>
    %30 = arith.addf %27, %29 : vector<16x128xf32>
    %31 = arith.truncf %30 : vector<16x128xf32> to vector<16x128xbf16>
    %c0_10 = arith.constant 0 : index
    %c0_11 = arith.constant 0 : index
    %c0_12 = arith.constant 0 : index
    %32 = vector.load %arg5[%c0_10, %c0_11, %c0_12] : memref<1x128x384xbf16, #tpu.memory_space<vmem>>, vector<1x128x384xbf16>
    %33 = vector.shape_cast %32 : vector<1x128x384xbf16> to vector<128x384xbf16>
    %cst_13 = arith.constant dense<0.000000e+00> : vector<16x384xf32>
    %34 = tpu.matmul %31, %33, %cst_13 {dimension_numbers = #tpu.dot_dimension_numbers<[1], [0], [0], [1], [0, 0, 1, 1], [], []>} : vector<16x128xbf16>, vector<128x384xbf16>, vector<16x384xf32> -> vector<16x384xf32>
    %c0_14 = arith.constant 0 : index
    %c0_15 = arith.constant 0 : index
    %c0_16 = arith.constant 0 : index
    %35 = vector.load %arg6[%c0_14, %c0_15, %c0_16] : memref<1x1x384xf32, #tpu.memory_space<vmem>>, vector<1x1x384xf32>
    %36 = vector.shape_cast %35 : vector<1x1x384xf32> to vector<1x384xf32>
    %37 = vector.broadcast %36 : vector<1x384xf32> to vector<16x384xf32>
    %38 = arith.addf %34, %37 : vector<16x384xf32>
    %39 = vector.extract_strided_slice %38 {offsets = [0, 0], sizes = [16, 128], strides = [1, 1]} : vector<16x384xf32> to vector<16x128xf32>
    %40 = vector.extract_strided_slice %38 {offsets = [0, 128], sizes = [16, 128], strides = [1, 1]} : vector<16x384xf32> to vector<16x128xf32>
    %41 = vector.extract_strided_slice %38 {offsets = [0, 256], sizes = [16, 128], strides = [1, 1]} : vector<16x384xf32> to vector<16x128xf32>
    %42 = arith.truncf %39 : vector<16x128xf32> to vector<16x128xbf16>
    %43 = arith.truncf %40 : vector<16x128xf32> to vector<16x128xbf16>
    %cst_17 = arith.constant dense<0.000000e+00> : vector<16x16xf32>
    %44 = tpu.matmul %42, %43, %cst_17 {dimension_numbers = #tpu.dot_dimension_numbers<[1], [1], [0], [0], [0, 0, 1, 0], [], []>} : vector<16x128xbf16>, vector<16x128xbf16>, vector<16x16xf32> -> vector<16x16xf32>
    %cst_18 = arith.constant 0.353553385 : f32
    %45 = vector.broadcast %cst_18 : f32 to vector<16x16xf32>
    %46 = arith.mulf %44, %45 : vector<16x16xf32>
    %cst_19 = arith.constant dense<0xFF800000> : vector<16xf32>
    %47 = vector.multi_reduction <maximumf>, %46, %cst_19 [1] : vector<16x16xf32> to vector<16xf32>
    %48 = vector.shape_cast %47 : vector<16xf32> to vector<16x1xf32>
    %49 = vector.broadcast %48 : vector<16x1xf32> to vector<16x16xf32>
    %50 = arith.subf %46, %49 : vector<16x16xf32>
    %51 = math.exp %50 : vector<16x16xf32>
    %cst_20 = arith.constant dense<0.000000e+00> : vector<16xf32>
    %52 = vector.multi_reduction <add>, %51, %cst_20 [1] : vector<16x16xf32> to vector<16xf32>
    %53 = vector.shape_cast %52 : vector<16xf32> to vector<16x1xf32>
    %54 = vector.broadcast %53 : vector<16x1xf32> to vector<16x16xf32>
    %55 = arith.divf %51, %54 : vector<16x16xf32>
    %56 = arith.truncf %55 : vector<16x16xf32> to vector<16x16xbf16>
    %57 = arith.truncf %41 : vector<16x128xf32> to vector<16x128xbf16>
    %cst_21 = arith.constant dense<0.000000e+00> : vector<16x128xf32>
    %58 = tpu.matmul %56, %57, %cst_21 {dimension_numbers = #tpu.dot_dimension_numbers<[1], [0], [0], [1], [0, 0, 1, 1], [], []>} : vector<16x16xbf16>, vector<16x128xbf16>, vector<16x128xf32> -> vector<16x128xf32>
    %59 = arith.truncf %58 : vector<16x128xf32> to vector<16x128xbf16>
    %c0_22 = arith.constant 0 : index
    %c0_23 = arith.constant 0 : index
    %c0_24 = arith.constant 0 : index
    %60 = vector.load %arg7[%c0_22, %c0_23, %c0_24] : memref<1x128x128xbf16, #tpu.memory_space<vmem>>, vector<1x128x128xbf16>
    %61 = vector.shape_cast %60 : vector<1x128x128xbf16> to vector<128x128xbf16>
    %cst_25 = arith.constant dense<0.000000e+00> : vector<16x128xf32>
    %62 = tpu.matmul %59, %61, %cst_25 {dimension_numbers = #tpu.dot_dimension_numbers<[1], [0], [0], [1], [0, 0, 1, 1], [], []>} : vector<16x128xbf16>, vector<128x128xbf16>, vector<16x128xf32> -> vector<16x128xf32>
    %c0_i32 = arith.constant 0 : i32
    %63 = arith.cmpi eq, %arg1, %c0_i32 : i32
    %64 = arith.extui %63 : i1 to i32
    %c0_i32_26 = arith.constant 0 : i32
    %65 = arith.cmpi ne, %64, %c0_i32_26 : i32
    scf.if %65 {
      %c0_29 = arith.constant 0 : index
      %c0_30 = arith.constant 0 : index
      %69 = vector.load %arg8[%c0_29, %c0_30] : memref<1x128xf32, #tpu.memory_space<vmem>>, vector<1x128xf32>
      %70 = vector.broadcast %69 : vector<1x128xf32> to vector<16x128xf32>
      %71 = arith.addf %1, %70 : vector<16x128xf32>
      %72 = arith.addf %71, %62 : vector<16x128xf32>
      %c0_31 = arith.constant 0 : index
      %c0_32 = arith.constant 0 : index
      %c0_33 = arith.constant 0 : index
      %73 = vector.load %arg9[%c0_31, %c0_32, %c0_33] : memref<1x16x128xf32, #tpu.memory_space<vmem>>, vector<1x16x128xf32>
      %74 = vector.shape_cast %73 : vector<1x16x128xf32> to vector<16x128xf32>
      %75 = vector.shape_cast %72 : vector<16x128xf32> to vector<1x16x128xf32>
      tpu.vector_store %arg9[%c0_31, %c0_32, %c0_33], %75 {strides = array<i32>} : memref<1x16x128xf32, #tpu.memory_space<vmem>>, vector<1x16x128xf32>,
    } else {
    }
    %c0_i32_27 = arith.constant 0 : i32
    %66 = arith.cmpi sgt, %arg1, %c0_i32_27 : i32
    %67 = arith.extui %66 : i1 to i32
    %c0_i32_28 = arith.constant 0 : i32
    %68 = arith.cmpi ne, %67, %c0_i32_28 : i32
    scf.if %68 {
      %c0_29 = arith.constant 0 : index
      %c0_30 = arith.constant 0 : index
      %c0_31 = arith.constant 0 : index
      %69 = vector.load %arg9[%c0_29, %c0_30, %c0_31] : memref<1x16x128xf32, #tpu.memory_space<vmem>>, vector<1x16x128xf32>
      %70 = vector.shape_cast %69 : vector<1x16x128xf32> to vector<16x128xf32>
      %71 = arith.addf %70, %62 : vector<16x128xf32>
      %c0_32 = arith.constant 0 : index
      %c0_33 = arith.constant 0 : index
      %c0_34 = arith.constant 0 : index
      %72 = vector.load %arg9[%c0_32, %c0_33, %c0_34] : memref<1x16x128xf32, #tpu.memory_space<vmem>>, vector<1x16x128xf32>
      %73 = vector.shape_cast %72 : vector<1x16x128xf32> to vector<16x128xf32>
      %74 = vector.shape_cast %71 : vector<16x128xf32> to vector<1x16x128xf32>
      tpu.vector_store %arg9[%c0_32, %c0_33, %c0_34], %74 {strides = array<i32>} : memref<1x16x128xf32, #tpu.memory_space<vmem>>, vector<1x16x128xf32>,
    } else {
    }
    return
  }
  func.func @transform_0(%arg0: i32, %arg1: i32) -> (i32, i32, i32) {
    %c0_i32 = arith.constant 0 : i32
    %c0_i32_0 = arith.constant 0 : i32
    %c0_i32_1 = arith.constant 0 : i32
    return %arg0, %c0_i32, %c0_i32_0 : i32, i32, i32
  }
  func.func @transform_1(%arg0: i32, %arg1: i32) -> (i32, i32) {
    %c0_i32 = arith.constant 0 : i32
    %c0_i32_0 = arith.constant 0 : i32
    %c0_i32_1 = arith.constant 0 : i32
    return %c0_i32, %c0_i32_0 : i32, i32
  }
  func.func @transform_2(%arg0: i32, %arg1: i32) -> (i32, i32) {
    %c0_i32 = arith.constant 0 : i32
    %c0_i32_0 = arith.constant 0 : i32
    %c0_i32_1 = arith.constant 0 : i32
    return %c0_i32, %c0_i32_0 : i32, i32
  }
  func.func @transform_3(%arg0: i32, %arg1: i32) -> (i32, i32, i32) {
    %c0_i32 = arith.constant 0 : i32
    %c0_i32_0 = arith.constant 0 : i32
    %c0_i32_1 = arith.constant 0 : i32
    return %arg1, %c0_i32, %c0_i32_0 : i32, i32, i32
  }
  func.func @transform_4(%arg0: i32, %arg1: i32) -> (i32, i32, i32) {
    %c0_i32 = arith.constant 0 : i32
    %c0_i32_0 = arith.constant 0 : i32
    %c0_i32_1 = arith.constant 0 : i32
    return %arg1, %c0_i32, %c0_i32_0 : i32, i32, i32
  }
  func.func @transform_5(%arg0: i32, %arg1: i32) -> (i32, i32, i32) {
    %c0_i32 = arith.constant 0 : i32
    %c0_i32_0 = arith.constant 0 : i32
    %c0_i32_1 = arith.constant 0 : i32
    return %arg1, %c0_i32, %c0_i32_0 : i32, i32, i32
  }
  func.func @transform_6(%arg0: i32, %arg1: i32) -> (i32, i32) {
    %c0_i32 = arith.constant 0 : i32
    %c0_i32_0 = arith.constant 0 : i32
    %c0_i32_1 = arith.constant 0 : i32
    return %c0_i32, %c0_i32_0 : i32, i32
  }
  func.func @transform_7(%arg0: i32, %arg1: i32) -> (i32, i32, i32) {
    %c0_i32 = arith.constant 0 : i32
    %c0_i32_0 = arith.constant 0 : i32
    %c0_i32_1 = arith.constant 0 : i32
    return %arg0, %c0_i32, %c0_i32_0 : i32, i32, i32
  }
}

module attributes {stable_mosaic.version = 11 : i64} {
  func.func @_mlp_kernel(%arg0: i32, %arg1: memref<16x128xf32, #tpu.memory_space<vmem>>, %arg2: memref<1x128xf32, #tpu.memory_space<vmem>>, %arg3: memref<1x128xf32, #tpu.memory_space<vmem>>, %arg4: memref<128x128xbf16, #tpu.memory_space<vmem>>, %arg5: memref<1x128xf32, #tpu.memory_space<vmem>>, %arg6: memref<128x128xbf16, #tpu.memory_space<vmem>>, %arg7: memref<1x128xf32, #tpu.memory_space<vmem>>, %arg8: memref<16x128xf32, #tpu.memory_space<vmem>>) attributes {dimension_semantics = [#tpu.dimension_semantics<parallel>], iteration_bounds = array<i64: 2>, scalar_prefetch = 0 : i64, scratch_operands = 0 : i64, tpu.core_type = #tpu.core_type<tc>, window_params = [{transform_indices = @transform_0, window_bounds = array<i64: 16, 128>}, {pipeline_mode = #tpu.pipeline_mode<synchronous>, transform_indices = @transform_1, window_bounds = array<i64: 1, 128>}, {pipeline_mode = #tpu.pipeline_mode<synchronous>, transform_indices = @transform_2, window_bounds = array<i64: 1, 128>}, {pipeline_mode = #tpu.pipeline_mode<synchronous>, transform_indices = @transform_3, window_bounds = array<i64: 128, 128>}, {pipeline_mode = #tpu.pipeline_mode<synchronous>, transform_indices = @transform_4, window_bounds = array<i64: 1, 128>}, {pipeline_mode = #tpu.pipeline_mode<synchronous>, transform_indices = @transform_5, window_bounds = array<i64: 128, 128>}, {pipeline_mode = #tpu.pipeline_mode<synchronous>, transform_indices = @transform_6, window_bounds = array<i64: 1, 128>}, {transform_indices = @transform_7, window_bounds = array<i64: 16, 128>}]} {
    %c0 = arith.constant 0 : index
    %c0_0 = arith.constant 0 : index
    %0 = vector.load %arg1[%c0, %c0_0] : memref<16x128xf32, #tpu.memory_space<vmem>>, vector<16x128xf32>
    %1 = tpu.iota {dimensions = array<i32: 1>} : vector<1x128xi32>
    %c16_i32 = arith.constant 16 : i32
    %2 = vector.broadcast %c16_i32 : i32 to vector<1x128xi32>
    %3 = arith.cmpi slt, %1, %2 : vector<1x128xi32>
    %4 = arith.extui %3 : vector<1x128xi1> to vector<1x128xi32>
    %5 = arith.sitofp %4 : vector<1x128xi32> to vector<1x128xf32>
    %cst = arith.constant dense<0.000000e+00> : vector<16xf32>
    %6 = vector.multi_reduction <add>, %0, %cst [1] : vector<16x128xf32> to vector<16xf32>
    %7 = vector.shape_cast %6 : vector<16xf32> to vector<16x1xf32>
    %cst_1 = arith.constant 6.250000e-02 : f32
    %8 = vector.broadcast %cst_1 : f32 to vector<16x1xf32>
    %9 = arith.mulf %7, %8 : vector<16x1xf32>
    %10 = vector.broadcast %9 : vector<16x1xf32> to vector<16x128xf32>
    %11 = arith.subf %0, %10 : vector<16x128xf32>
    %12 = vector.broadcast %5 : vector<1x128xf32> to vector<16x128xf32>
    %13 = arith.mulf %11, %12 : vector<16x128xf32>
    %14 = arith.mulf %13, %13 : vector<16x128xf32>
    %cst_2 = arith.constant dense<0.000000e+00> : vector<16xf32>
    %15 = vector.multi_reduction <add>, %14, %cst_2 [1] : vector<16x128xf32> to vector<16xf32>
    %16 = vector.shape_cast %15 : vector<16xf32> to vector<16x1xf32>
    %cst_3 = arith.constant 6.250000e-02 : f32
    %17 = vector.broadcast %cst_3 : f32 to vector<16x1xf32>
    %18 = arith.mulf %16, %17 : vector<16x1xf32>
    %cst_4 = arith.constant 9.99999974E-6 : f32
    %19 = vector.broadcast %cst_4 : f32 to vector<16x1xf32>
    %20 = arith.addf %18, %19 : vector<16x1xf32>
    %21 = math.rsqrt %20 : vector<16x1xf32>
    %22 = vector.broadcast %21 : vector<16x1xf32> to vector<16x128xf32>
    %23 = arith.mulf %13, %22 : vector<16x128xf32>
    %c0_5 = arith.constant 0 : index
    %c0_6 = arith.constant 0 : index
    %24 = vector.load %arg2[%c0_5, %c0_6] : memref<1x128xf32, #tpu.memory_space<vmem>>, vector<1x128xf32>
    %25 = vector.broadcast %24 : vector<1x128xf32> to vector<16x128xf32>
    %26 = arith.mulf %23, %25 : vector<16x128xf32>
    %c0_7 = arith.constant 0 : index
    %c0_8 = arith.constant 0 : index
    %27 = vector.load %arg3[%c0_7, %c0_8] : memref<1x128xf32, #tpu.memory_space<vmem>>, vector<1x128xf32>
    %28 = vector.broadcast %27 : vector<1x128xf32> to vector<16x128xf32>
    %29 = arith.addf %26, %28 : vector<16x128xf32>
    %30 = arith.truncf %29 : vector<16x128xf32> to vector<16x128xbf16>
    %c0_9 = arith.constant 0 : index
    %c0_10 = arith.constant 0 : index
    %31 = vector.load %arg4[%c0_9, %c0_10] : memref<128x128xbf16, #tpu.memory_space<vmem>>, vector<128x128xbf16>
    %cst_11 = arith.constant dense<0.000000e+00> : vector<16x128xf32>
    %32 = tpu.matmul %30, %31, %cst_11 {dimension_numbers = #tpu.dot_dimension_numbers<[1], [0], [0], [1], [0, 0, 1, 1], [], []>} : vector<16x128xbf16>, vector<128x128xbf16>, vector<16x128xf32> -> vector<16x128xf32>
    %c0_12 = arith.constant 0 : index
    %c0_13 = arith.constant 0 : index
    %33 = vector.load %arg5[%c0_12, %c0_13] : memref<1x128xf32, #tpu.memory_space<vmem>>, vector<1x128xf32>
    %34 = vector.broadcast %33 : vector<1x128xf32> to vector<16x128xf32>
    %35 = arith.addf %32, %34 : vector<16x128xf32>
    %36 = arith.mulf %35, %35 : vector<16x128xf32>
    %37 = arith.mulf %35, %36 : vector<16x128xf32>
    %cst_14 = arith.constant 4.471500e-02 : f32
    %38 = vector.broadcast %cst_14 : f32 to vector<16x128xf32>
    %39 = arith.mulf %38, %37 : vector<16x128xf32>
    %40 = arith.addf %35, %39 : vector<16x128xf32>
    %cst_15 = arith.constant 0.797884583 : f32
    %41 = vector.broadcast %cst_15 : f32 to vector<16x128xf32>
    %42 = arith.mulf %41, %40 : vector<16x128xf32>
    %43 = math.tanh %42 : vector<16x128xf32>
    %cst_16 = arith.constant 1.000000e+00 : f32
    %44 = vector.broadcast %cst_16 : f32 to vector<16x128xf32>
    %45 = arith.addf %44, %43 : vector<16x128xf32>
    %cst_17 = arith.constant 5.000000e-01 : f32
    %46 = vector.broadcast %cst_17 : f32 to vector<16x128xf32>
    %47 = arith.mulf %46, %45 : vector<16x128xf32>
    %48 = arith.mulf %35, %47 : vector<16x128xf32>
    %49 = arith.truncf %48 : vector<16x128xf32> to vector<16x128xbf16>
    %c0_18 = arith.constant 0 : index
    %c0_19 = arith.constant 0 : index
    %50 = vector.load %arg6[%c0_18, %c0_19] : memref<128x128xbf16, #tpu.memory_space<vmem>>, vector<128x128xbf16>
    %cst_20 = arith.constant dense<0.000000e+00> : vector<16x128xf32>
    %51 = tpu.matmul %49, %50, %cst_20 {dimension_numbers = #tpu.dot_dimension_numbers<[1], [0], [0], [1], [0, 0, 1, 1], [], []>} : vector<16x128xbf16>, vector<128x128xbf16>, vector<16x128xf32> -> vector<16x128xf32>
    %c0_21 = arith.constant 0 : index
    %c0_22 = arith.constant 0 : index
    %52 = vector.load %arg7[%c0_21, %c0_22] : memref<1x128xf32, #tpu.memory_space<vmem>>, vector<1x128xf32>
    %53 = vector.broadcast %52 : vector<1x128xf32> to vector<16x128xf32>
    %54 = arith.addf %51, %53 : vector<16x128xf32>
    %55 = arith.addf %0, %54 : vector<16x128xf32>
    %c0_23 = arith.constant 0 : index
    %c0_24 = arith.constant 0 : index
    %56 = vector.load %arg8[%c0_23, %c0_24] : memref<16x128xf32, #tpu.memory_space<vmem>>, vector<16x128xf32>
    tpu.vector_store %arg8[%c0_23, %c0_24], %55 {strides = array<i32>} : memref<16x128xf32, #tpu.memory_space<vmem>>, vector<16x128xf32>,
    return
  }
  func.func @transform_0(%arg0: i32) -> (i32, i32) {
    %c0_i32 = arith.constant 0 : i32
    %c0_i32_0 = arith.constant 0 : i32
    return %arg0, %c0_i32 : i32, i32
  }
  func.func @transform_1(%arg0: i32) -> (i32, i32) {
    %c0_i32 = arith.constant 0 : i32
    %c0_i32_0 = arith.constant 0 : i32
    %c0_i32_1 = arith.constant 0 : i32
    return %c0_i32, %c0_i32_0 : i32, i32
  }
  func.func @transform_2(%arg0: i32) -> (i32, i32) {
    %c0_i32 = arith.constant 0 : i32
    %c0_i32_0 = arith.constant 0 : i32
    %c0_i32_1 = arith.constant 0 : i32
    return %c0_i32, %c0_i32_0 : i32, i32
  }
  func.func @transform_3(%arg0: i32) -> (i32, i32) {
    %c0_i32 = arith.constant 0 : i32
    %c0_i32_0 = arith.constant 0 : i32
    %c0_i32_1 = arith.constant 0 : i32
    return %c0_i32, %c0_i32_0 : i32, i32
  }
  func.func @transform_4(%arg0: i32) -> (i32, i32) {
    %c0_i32 = arith.constant 0 : i32
    %c0_i32_0 = arith.constant 0 : i32
    %c0_i32_1 = arith.constant 0 : i32
    return %c0_i32, %c0_i32_0 : i32, i32
  }
  func.func @transform_5(%arg0: i32) -> (i32, i32) {
    %c0_i32 = arith.constant 0 : i32
    %c0_i32_0 = arith.constant 0 : i32
    %c0_i32_1 = arith.constant 0 : i32
    return %c0_i32, %c0_i32_0 : i32, i32
  }
  func.func @transform_6(%arg0: i32) -> (i32, i32) {
    %c0_i32 = arith.constant 0 : i32
    %c0_i32_0 = arith.constant 0 : i32
    %c0_i32_1 = arith.constant 0 : i32
    return %c0_i32, %c0_i32_0 : i32, i32
  }
  func.func @transform_7(%arg0: i32) -> (i32, i32) {
    %c0_i32 = arith.constant 0 : i32
    %c0_i32_0 = arith.constant 0 : i32
    return %arg0, %c0_i32 : i32, i32
  }
}

module attributes {stable_mosaic.version = 11 : i64} {
  func.func @_conv_kernel(%arg0: i32, %arg1: i32, %arg2: memref<1x8x8x128xf32, #tpu.memory_space<vmem>>, %arg3: memref<1152x128xbf16, #tpu.memory_space<vmem>>, %arg4: memref<1x128xf32, #tpu.memory_space<vmem>>, %arg5: memref<1x32x128xf32, #tpu.memory_space<vmem>>, %arg6: memref<10x10x128xf32, #tpu.memory_space<vmem>>) attributes {dimension_semantics = [#tpu.dimension_semantics<parallel>, #tpu.dimension_semantics<arbitrary>], iteration_bounds = array<i64: 2, 2>, scalar_prefetch = 0 : i64, scratch_operands = 1 : i64, tpu.core_type = #tpu.core_type<tc>, window_params = [{transform_indices = @transform_0, window_bounds = array<i64: 1, 8, 8, 128>}, {pipeline_mode = #tpu.pipeline_mode<synchronous>, transform_indices = @transform_1, window_bounds = array<i64: 1152, 128>}, {pipeline_mode = #tpu.pipeline_mode<synchronous>, transform_indices = @transform_2, window_bounds = array<i64: 1, 128>}, {transform_indices = @transform_3, window_bounds = array<i64: 1, 32, 128>}]} {
    %c4_i32 = arith.constant 4 : i32
    %0 = arith.muli %arg1, %c4_i32 : i32
    %cst = arith.constant 0.000000e+00 : f32
    %1 = vector.broadcast %cst : f32 to vector<10x10x128xf32>
    %c0 = arith.constant 0 : index
    %c0_0 = arith.constant 0 : index
    %c0_1 = arith.constant 0 : index
    %2 = vector.load %arg6[%c0, %c0_0, %c0_1] : memref<10x10x128xf32, #tpu.memory_space<vmem>>, vector<10x10x128xf32>
    tpu.vector_store %arg6[%c0, %c0_0, %c0_1], %1 {strides = array<i32>} : memref<10x10x128xf32, #tpu.memory_space<vmem>>, vector<10x10x128xf32>,
    %c0_2 = arith.constant 0 : index
    %c0_3 = arith.constant 0 : index
    %c0_4 = arith.constant 0 : index
    %c0_5 = arith.constant 0 : index
    %3 = vector.load %arg2[%c0_2, %c0_3, %c0_4, %c0_5] : memref<1x8x8x128xf32, #tpu.memory_space<vmem>>, vector<1x8x8x128xf32>
    %4 = vector.shape_cast %3 : vector<1x8x8x128xf32> to vector<8x8x128xf32>
    %c1 = arith.constant 1 : index
    %c1_6 = arith.constant 1 : index
    %c0_7 = arith.constant 0 : index
    %5 = vector.load %arg6[%c1, %c1_6, %c0_7] : memref<10x10x128xf32, #tpu.memory_space<vmem>>, vector<8x8x128xf32>
    tpu.vector_store %arg6[%c1, %c1_6, %c0_7], %4 {strides = array<i32>} : memref<10x10x128xf32, #tpu.memory_space<vmem>>, vector<8x8x128xf32>,
    %c0_i32 = arith.constant 0 : i32
    %6 = arith.addi %0, %c0_i32 : i32
    %7 = arith.index_cast %6 : i32 to index
    %c0_8 = arith.constant 0 : index
    %c0_9 = arith.constant 0 : index
    %8 = vector.load %arg6[%7, %c0_8, %c0_9] : memref<10x10x128xf32, #tpu.memory_space<vmem>>, vector<4x8x128xf32>
    %c0_i32_10 = arith.constant 0 : i32
    %9 = arith.addi %0, %c0_i32_10 : i32
    %10 = arith.index_cast %9 : i32 to index
    %c1_11 = arith.constant 1 : index
    %c0_12 = arith.constant 0 : index
    %11 = vector.load %arg6[%10, %c1_11, %c0_12] : memref<10x10x128xf32, #tpu.memory_space<vmem>>, vector<4x8x128xf32>
    %c0_i32_13 = arith.constant 0 : i32
    %12 = arith.addi %0, %c0_i32_13 : i32
    %13 = arith.index_cast %12 : i32 to index
    %c2 = arith.constant 2 : index
    %c0_14 = arith.constant 0 : index
    %14 = vector.load %arg6[%13, %c2, %c0_14] : memref<10x10x128xf32, #tpu.memory_space<vmem>>, vector<4x8x128xf32>
    %c1_i32 = arith.constant 1 : i32
    %15 = arith.addi %0, %c1_i32 : i32
    %16 = arith.index_cast %15 : i32 to index
    %c0_15 = arith.constant 0 : index
    %c0_16 = arith.constant 0 : index
    %17 = vector.load %arg6[%16, %c0_15, %c0_16] : memref<10x10x128xf32, #tpu.memory_space<vmem>>, vector<4x8x128xf32>
    %c1_i32_17 = arith.constant 1 : i32
    %18 = arith.addi %0, %c1_i32_17 : i32
    %19 = arith.index_cast %18 : i32 to index
    %c1_18 = arith.constant 1 : index
    %c0_19 = arith.constant 0 : index
    %20 = vector.load %arg6[%19, %c1_18, %c0_19] : memref<10x10x128xf32, #tpu.memory_space<vmem>>, vector<4x8x128xf32>
    %c1_i32_20 = arith.constant 1 : i32
    %21 = arith.addi %0, %c1_i32_20 : i32
    %22 = arith.index_cast %21 : i32 to index
    %c2_21 = arith.constant 2 : index
    %c0_22 = arith.constant 0 : index
    %23 = vector.load %arg6[%22, %c2_21, %c0_22] : memref<10x10x128xf32, #tpu.memory_space<vmem>>, vector<4x8x128xf32>
    %c2_i32 = arith.constant 2 : i32
    %24 = arith.addi %0, %c2_i32 : i32
    %25 = arith.index_cast %24 : i32 to index
    %c0_23 = arith.constant 0 : index
    %c0_24 = arith.constant 0 : index
    %26 = vector.load %arg6[%25, %c0_23, %c0_24] : memref<10x10x128xf32, #tpu.memory_space<vmem>>, vector<4x8x128xf32>
    %c2_i32_25 = arith.constant 2 : i32
    %27 = arith.addi %0, %c2_i32_25 : i32
    %28 = arith.index_cast %27 : i32 to index
    %c1_26 = arith.constant 1 : index
    %c0_27 = arith.constant 0 : index
    %29 = vector.load %arg6[%28, %c1_26, %c0_27] : memref<10x10x128xf32, #tpu.memory_space<vmem>>, vector<4x8x128xf32>
    %c2_i32_28 = arith.constant 2 : i32
    %30 = arith.addi %0, %c2_i32_28 : i32
    %31 = arith.index_cast %30 : i32 to index
    %c2_29 = arith.constant 2 : index
    %c0_30 = arith.constant 0 : index
    %32 = vector.load %arg6[%31, %c2_29, %c0_30] : memref<10x10x128xf32, #tpu.memory_space<vmem>>, vector<4x8x128xf32>
    %33 = tpu.concatenate %8, %11, %14, %17, %20, %23, %26, %29, %32 in 2 : vector<4x8x128xf32>, vector<4x8x128xf32>, vector<4x8x128xf32>, vector<4x8x128xf32>, vector<4x8x128xf32>, vector<4x8x128xf32>, vector<4x8x128xf32>, vector<4x8x128xf32>, vector<4x8x128xf32> -> vector<4x8x1152xf32>
    %34 = vector.shape_cast %33 : vector<4x8x1152xf32> to vector<32x1152xf32>
    %35 = arith.truncf %34 : vector<32x1152xf32> to vector<32x1152xbf16>
    %c0_31 = arith.constant 0 : index
    %c0_32 = arith.constant 0 : index
    %36 = vector.load %arg3[%c0_31, %c0_32] : memref<1152x128xbf16, #tpu.memory_space<vmem>>, vector<1152x128xbf16>
    %cst_33 = arith.constant dense<0.000000e+00> : vector<32x128xf32>
    %37 = tpu.matmul %35, %36, %cst_33 {dimension_numbers = #tpu.dot_dimension_numbers<[1], [0], [0], [1], [0, 0, 1, 1], [], []>} : vector<32x1152xbf16>, vector<1152x128xbf16>, vector<32x128xf32> -> vector<32x128xf32>
    %c0_34 = arith.constant 0 : index
    %c0_35 = arith.constant 0 : index
    %38 = vector.load %arg4[%c0_34, %c0_35] : memref<1x128xf32, #tpu.memory_space<vmem>>, vector<1x128xf32>
    %39 = vector.broadcast %38 : vector<1x128xf32> to vector<32x128xf32>
    %40 = arith.addf %37, %39 : vector<32x128xf32>
    %c0_36 = arith.constant 0 : index
    %c0_37 = arith.constant 0 : index
    %c0_38 = arith.constant 0 : index
    %41 = vector.load %arg5[%c0_36, %c0_37, %c0_38] : memref<1x32x128xf32, #tpu.memory_space<vmem>>, vector<1x32x128xf32>
    %42 = vector.shape_cast %41 : vector<1x32x128xf32> to vector<32x128xf32>
    %43 = vector.shape_cast %40 : vector<32x128xf32> to vector<1x32x128xf32>
    tpu.vector_store %arg5[%c0_36, %c0_37, %c0_38], %43 {strides = array<i32>} : memref<1x32x128xf32, #tpu.memory_space<vmem>>, vector<1x32x128xf32>,
    return
  }
  func.func @transform_0(%arg0: i32, %arg1: i32) -> (i32, i32, i32, i32) {
    %c0_i32 = arith.constant 0 : i32
    %c0_i32_0 = arith.constant 0 : i32
    %c0_i32_1 = arith.constant 0 : i32
    %c0_i32_2 = arith.constant 0 : i32
    return %arg0, %c0_i32, %c0_i32_0, %c0_i32_1 : i32, i32, i32, i32
  }
  func.func @transform_1(%arg0: i32, %arg1: i32) -> (i32, i32) {
    %c0_i32 = arith.constant 0 : i32
    %c0_i32_0 = arith.constant 0 : i32
    %c0_i32_1 = arith.constant 0 : i32
    return %c0_i32, %c0_i32_0 : i32, i32
  }
  func.func @transform_2(%arg0: i32, %arg1: i32) -> (i32, i32) {
    %c0_i32 = arith.constant 0 : i32
    %c0_i32_0 = arith.constant 0 : i32
    %c0_i32_1 = arith.constant 0 : i32
    return %c0_i32, %c0_i32_0 : i32, i32
  }
  func.func @transform_3(%arg0: i32, %arg1: i32) -> (i32, i32, i32) {
    %c0_i32 = arith.constant 0 : i32
    %c0_i32_0 = arith.constant 0 : i32
    return %arg0, %arg1, %c0_i32 : i32, i32, i32
  }
}

module attributes {stable_mosaic.version = 11 : i64} {
  func.func @_conv_kernel(%arg0: i32, %arg1: i32, %arg2: memref<1x8x8x128xf32, #tpu.memory_space<vmem>>, %arg3: memref<1x8x8x128xf32, #tpu.memory_space<vmem>>, %arg4: memref<2304x128xbf16, #tpu.memory_space<vmem>>, %arg5: memref<1x128xf32, #tpu.memory_space<vmem>>, %arg6: memref<1x128xf32, #tpu.memory_space<vmem>>, %arg7: memref<1x128xf32, #tpu.memory_space<vmem>>, %arg8: memref<128x128xf32, #tpu.memory_space<vmem>>, %arg9: memref<1x64x128xf32, #tpu.memory_space<vmem>>, %arg10: memref<10x10x128xf32, #tpu.memory_space<vmem>>, %arg11: memref<10x10x128xf32, #tpu.memory_space<vmem>>) attributes {dimension_semantics = [#tpu.dimension_semantics<parallel>, #tpu.dimension_semantics<arbitrary>], iteration_bounds = array<i64: 2, 1>, scalar_prefetch = 0 : i64, scratch_operands = 2 : i64, tpu.core_type = #tpu.core_type<tc>, window_params = [{transform_indices = @transform_0, window_bounds = array<i64: 1, 8, 8, 128>}, {transform_indices = @transform_1, window_bounds = array<i64: 1, 8, 8, 128>}, {pipeline_mode = #tpu.pipeline_mode<synchronous>, transform_indices = @transform_2, window_bounds = array<i64: 2304, 128>}, {pipeline_mode = #tpu.pipeline_mode<synchronous>, transform_indices = @transform_3, window_bounds = array<i64: 1, 128>}, {pipeline_mode = #tpu.pipeline_mode<synchronous>, transform_indices = @transform_4, window_bounds = array<i64: 1, 128>}, {pipeline_mode = #tpu.pipeline_mode<synchronous>, transform_indices = @transform_5, window_bounds = array<i64: 1, 128>}, {pipeline_mode = #tpu.pipeline_mode<synchronous>, transform_indices = @transform_6, window_bounds = array<i64: 128, 128>}, {transform_indices = @transform_7, window_bounds = array<i64: 1, 64, 128>}]} {
    %c8_i32 = arith.constant 8 : i32
    %0 = arith.muli %arg1, %c8_i32 : i32
    %cst = arith.constant 0.000000e+00 : f32
    %1 = vector.broadcast %cst : f32 to vector<10x10x128xf32>
    %c0 = arith.constant 0 : index
    %c0_0 = arith.constant 0 : index
    %c0_1 = arith.constant 0 : index
    %2 = vector.load %arg10[%c0, %c0_0, %c0_1] : memref<10x10x128xf32, #tpu.memory_space<vmem>>, vector<10x10x128xf32>
    tpu.vector_store %arg10[%c0, %c0_0, %c0_1], %1 {strides = array<i32>} : memref<10x10x128xf32, #tpu.memory_space<vmem>>, vector<10x10x128xf32>,
    %c0_2 = arith.constant 0 : index
    %c0_3 = arith.constant 0 : index
    %c0_4 = arith.constant 0 : index
    %c0_5 = arith.constant 0 : index
    %3 = vector.load %arg2[%c0_2, %c0_3, %c0_4, %c0_5] : memref<1x8x8x128xf32, #tpu.memory_space<vmem>>, vector<1x8x8x128xf32>
    %4 = vector.shape_cast %3 : vector<1x8x8x128xf32> to vector<8x8x128xf32>
    %c1 = arith.constant 1 : index
    %c1_6 = arith.constant 1 : index
    %c0_7 = arith.constant 0 : index
    %5 = vector.load %arg10[%c1, %c1_6, %c0_7] : memref<10x10x128xf32, #tpu.memory_space<vmem>>, vector<8x8x128xf32>
    tpu.vector_store %arg10[%c1, %c1_6, %c0_7], %4 {strides = array<i32>} : memref<10x10x128xf32, #tpu.memory_space<vmem>>, vector<8x8x128xf32>,
    %c0_i32 = arith.constant 0 : i32
    %6 = arith.addi %0, %c0_i32 : i32
    %7 = arith.index_cast %6 : i32 to index
    %c0_8 = arith.constant 0 : index
    %c0_9 = arith.constant 0 : index
    %8 = vector.load %arg10[%7, %c0_8, %c0_9] : memref<10x10x128xf32, #tpu.memory_space<vmem>>, vector<8x8x128xf32>
    %c0_i32_10 = arith.constant 0 : i32
    %9 = arith.addi %0, %c0_i32_10 : i32
    %10 = arith.index_cast %9 : i32 to index
    %c1_11 = arith.constant 1 : index
    %c0_12 = arith.constant 0 : index
    %11 = vector.load %arg10[%10, %c1_11, %c0_12] : memref<10x10x128xf32, #tpu.memory_space<vmem>>, vector<8x8x128xf32>
    %c0_i32_13 = arith.constant 0 : i32
    %12 = arith.addi %0, %c0_i32_13 : i32
    %13 = arith.index_cast %12 : i32 to index
    %c2 = arith.constant 2 : index
    %c0_14 = arith.constant 0 : index
    %14 = vector.load %arg10[%13, %c2, %c0_14] : memref<10x10x128xf32, #tpu.memory_space<vmem>>, vector<8x8x128xf32>
    %c1_i32 = arith.constant 1 : i32
    %15 = arith.addi %0, %c1_i32 : i32
    %16 = arith.index_cast %15 : i32 to index
    %c0_15 = arith.constant 0 : index
    %c0_16 = arith.constant 0 : index
    %17 = vector.load %arg10[%16, %c0_15, %c0_16] : memref<10x10x128xf32, #tpu.memory_space<vmem>>, vector<8x8x128xf32>
    %c1_i32_17 = arith.constant 1 : i32
    %18 = arith.addi %0, %c1_i32_17 : i32
    %19 = arith.index_cast %18 : i32 to index
    %c1_18 = arith.constant 1 : index
    %c0_19 = arith.constant 0 : index
    %20 = vector.load %arg10[%19, %c1_18, %c0_19] : memref<10x10x128xf32, #tpu.memory_space<vmem>>, vector<8x8x128xf32>
    %c1_i32_20 = arith.constant 1 : i32
    %21 = arith.addi %0, %c1_i32_20 : i32
    %22 = arith.index_cast %21 : i32 to index
    %c2_21 = arith.constant 2 : index
    %c0_22 = arith.constant 0 : index
    %23 = vector.load %arg10[%22, %c2_21, %c0_22] : memref<10x10x128xf32, #tpu.memory_space<vmem>>, vector<8x8x128xf32>
    %c2_i32 = arith.constant 2 : i32
    %24 = arith.addi %0, %c2_i32 : i32
    %25 = arith.index_cast %24 : i32 to index
    %c0_23 = arith.constant 0 : index
    %c0_24 = arith.constant 0 : index
    %26 = vector.load %arg10[%25, %c0_23, %c0_24] : memref<10x10x128xf32, #tpu.memory_space<vmem>>, vector<8x8x128xf32>
    %c2_i32_25 = arith.constant 2 : i32
    %27 = arith.addi %0, %c2_i32_25 : i32
    %28 = arith.index_cast %27 : i32 to index
    %c1_26 = arith.constant 1 : index
    %c0_27 = arith.constant 0 : index
    %29 = vector.load %arg10[%28, %c1_26, %c0_27] : memref<10x10x128xf32, #tpu.memory_space<vmem>>, vector<8x8x128xf32>
    %c2_i32_28 = arith.constant 2 : i32
    %30 = arith.addi %0, %c2_i32_28 : i32
    %31 = arith.index_cast %30 : i32 to index
    %c2_29 = arith.constant 2 : index
    %c0_30 = arith.constant 0 : index
    %32 = vector.load %arg10[%31, %c2_29, %c0_30] : memref<10x10x128xf32, #tpu.memory_space<vmem>>, vector<8x8x128xf32>
    %cst_31 = arith.constant 0.000000e+00 : f32
    %33 = vector.broadcast %cst_31 : f32 to vector<10x10x128xf32>
    %c0_32 = arith.constant 0 : index
    %c0_33 = arith.constant 0 : index
    %c0_34 = arith.constant 0 : index
    %34 = vector.load %arg11[%c0_32, %c0_33, %c0_34] : memref<10x10x128xf32, #tpu.memory_space<vmem>>, vector<10x10x128xf32>
    tpu.vector_store %arg11[%c0_32, %c0_33, %c0_34], %33 {strides = array<i32>} : memref<10x10x128xf32, #tpu.memory_space<vmem>>, vector<10x10x128xf32>,
    %c0_35 = arith.constant 0 : index
    %c0_36 = arith.constant 0 : index
    %c0_37 = arith.constant 0 : index
    %c0_38 = arith.constant 0 : index
    %35 = vector.load %arg3[%c0_35, %c0_36, %c0_37, %c0_38] : memref<1x8x8x128xf32, #tpu.memory_space<vmem>>, vector<1x8x8x128xf32>
    %36 = vector.shape_cast %35 : vector<1x8x8x128xf32> to vector<8x8x128xf32>
    %c1_39 = arith.constant 1 : index
    %c1_40 = arith.constant 1 : index
    %c0_41 = arith.constant 0 : index
    %37 = vector.load %arg11[%c1_39, %c1_40, %c0_41] : memref<10x10x128xf32, #tpu.memory_space<vmem>>, vector<8x8x128xf32>
    tpu.vector_store %arg11[%c1_39, %c1_40, %c0_41], %36 {strides = array<i32>} : memref<10x10x128xf32, #tpu.memory_space<vmem>>, vector<8x8x128xf32>,
    %c0_i32_42 = arith.constant 0 : i32
    %38 = arith.addi %0, %c0_i32_42 : i32
    %39 = arith.index_cast %38 : i32 to index
    %c0_43 = arith.constant 0 : index
    %c0_44 = arith.constant 0 : index
    %40 = vector.load %arg11[%39, %c0_43, %c0_44] : memref<10x10x128xf32, #tpu.memory_space<vmem>>, vector<8x8x128xf32>
    %c0_i32_45 = arith.constant 0 : i32
    %41 = arith.addi %0, %c0_i32_45 : i32
    %42 = arith.index_cast %41 : i32 to index
    %c1_46 = arith.constant 1 : index
    %c0_47 = arith.constant 0 : index
    %43 = vector.load %arg11[%42, %c1_46, %c0_47] : memref<10x10x128xf32, #tpu.memory_space<vmem>>, vector<8x8x128xf32>
    %c0_i32_48 = arith.constant 0 : i32
    %44 = arith.addi %0, %c0_i32_48 : i32
    %45 = arith.index_cast %44 : i32 to index
    %c2_49 = arith.constant 2 : index
    %c0_50 = arith.constant 0 : index
    %46 = vector.load %arg11[%45, %c2_49, %c0_50] : memref<10x10x128xf32, #tpu.memory_space<vmem>>, vector<8x8x128xf32>
    %c1_i32_51 = arith.constant 1 : i32
    %47 = arith.addi %0, %c1_i32_51 : i32
    %48 = arith.index_cast %47 : i32 to index
    %c0_52 = arith.constant 0 : index
    %c0_53 = arith.constant 0 : index
    %49 = vector.load %arg11[%48, %c0_52, %c0_53] : memref<10x10x128xf32, #tpu.memory_space<vmem>>, vector<8x8x128xf32>
    %c1_i32_54 = arith.constant 1 : i32
    %50 = arith.addi %0, %c1_i32_54 : i32
    %51 = arith.index_cast %50 : i32 to index
    %c1_55 = arith.constant 1 : index
    %c0_56 = arith.constant 0 : index
    %52 = vector.load %arg11[%51, %c1_55, %c0_56] : memref<10x10x128xf32, #tpu.memory_space<vmem>>, vector<8x8x128xf32>
    %c1_i32_57 = arith.constant 1 : i32
    %53 = arith.addi %0, %c1_i32_57 : i32
    %54 = arith.index_cast %53 : i32 to index
    %c2_58 = arith.constant 2 : index
    %c0_59 = arith.constant 0 : index
    %55 = vector.load %arg11[%54, %c2_58, %c0_59] : memref<10x10x128xf32, #tpu.memory_space<vmem>>, vector<8x8x128xf32>
    %c2_i32_60 = arith.constant 2 : i32
    %56 = arith.addi %0, %c2_i32_60 : i32
    %57 = arith.index_cast %56 : i32 to index
    %c0_61 = arith.constant 0 : index
    %c0_62 = arith.constant 0 : index
    %58 = vector.load %arg11[%57, %c0_61, %c0_62] : memref<10x10x128xf32, #tpu.memory_space<vmem>>, vector<8x8x128xf32>
    %c2_i32_63 = arith.constant 2 : i32
    %59 = arith.addi %0, %c2_i32_63 : i32
    %60 = arith.index_cast %59 : i32 to index
    %c1_64 = arith.constant 1 : index
    %c0_65 = arith.constant 0 : index
    %61 = vector.load %arg11[%60, %c1_64, %c0_65] : memref<10x10x128xf32, #tpu.memory_space<vmem>>, vector<8x8x128xf32>
    %c2_i32_66 = arith.constant 2 : i32
    %62 = arith.addi %0, %c2_i32_66 : i32
    %63 = arith.index_cast %62 : i32 to index
    %c2_67 = arith.constant 2 : index
    %c0_68 = arith.constant 0 : index
    %64 = vector.load %arg11[%63, %c2_67, %c0_68] : memref<10x10x128xf32, #tpu.memory_space<vmem>>, vector<8x8x128xf32>
    %65 = tpu.concatenate %8, %11, %14, %17, %20, %23, %26, %29, %32, %40, %43, %46, %49, %52, %55, %58 in 2 : vector<8x8x128xf32>, vector<8x8x128xf32>, vector<8x8x128xf32>, vector<8x8x128xf32>, vector<8x8x128xf32>, vector<8x8x128xf32>, vector<8x8x128xf32>, vector<8x8x128xf32>, vector<8x8x128xf32>, vector<8x8x128xf32>, vector<8x8x128xf32>, vector<8x8x128xf32>, vector<8x8x128xf32>, vector<8x8x128xf32>, vector<8x8x128xf32>, vector<8x8x128xf32> -> vector<8x8x2048xf32>
    %66 = tpu.concatenate %61, %64 in 2 : vector<8x8x128xf32>, vector<8x8x128xf32> -> vector<8x8x256xf32>
    %67 = tpu.concatenate %65, %66 in 2 : vector<8x8x2048xf32>, vector<8x8x256xf32> -> vector<8x8x2304xf32>
    %68 = vector.shape_cast %67 : vector<8x8x2304xf32> to vector<64x2304xf32>
    %69 = arith.truncf %68 : vector<64x2304xf32> to vector<64x2304xbf16>
    %c0_69 = arith.constant 0 : index
    %c0_70 = arith.constant 0 : index
    %70 = vector.load %arg4[%c0_69, %c0_70] : memref<2304x128xbf16, #tpu.memory_space<vmem>>, vector<2304x128xbf16>
    %cst_71 = arith.constant dense<0.000000e+00> : vector<64x128xf32>
    %71 = tpu.matmul %69, %70, %cst_71 {dimension_numbers = #tpu.dot_dimension_numbers<[1], [0], [0], [1], [0, 0, 1, 1], [], []>} : vector<64x2304xbf16>, vector<2304x128xbf16>, vector<64x128xf32> -> vector<64x128xf32>
    %c0_72 = arith.constant 0 : index
    %c0_73 = arith.constant 0 : index
    %72 = vector.load %arg5[%c0_72, %c0_73] : memref<1x128xf32, #tpu.memory_space<vmem>>, vector<1x128xf32>
    %73 = vector.broadcast %72 : vector<1x128xf32> to vector<64x128xf32>
    %74 = arith.addf %71, %73 : vector<64x128xf32>
    %cst_74 = arith.constant dense<0.000000e+00> : vector<128xf32>
    %75 = vector.multi_reduction <add>, %74, %cst_74 [0] : vector<64x128xf32> to vector<128xf32>
    %76 = vector.shape_cast %75 : vector<128xf32> to vector<1x128xf32>
    %c0_75 = arith.constant 0 : index
    %c0_76 = arith.constant 0 : index
    %77 = vector.load %arg8[%c0_75, %c0_76] : memref<128x128xf32, #tpu.memory_space<vmem>>, vector<128x128xf32>
    %cst_77 = arith.constant dense<0.000000e+00> : vector<1x128xf32>
    %78 = tpu.matmul %76, %77, %cst_77 {dimension_numbers = #tpu.dot_dimension_numbers<[1], [0], [0], [1], [0, 0, 1, 1], [], []>} : vector<1x128xf32>, vector<128x128xf32>, vector<1x128xf32> -> vector<1x128xf32>
    %cst_78 = arith.constant 1.562500e-02 : f32
    %79 = vector.broadcast %cst_78 : f32 to vector<1x128xf32>
    %80 = arith.mulf %78, %79 : vector<1x128xf32>
    %81 = vector.broadcast %80 : vector<1x128xf32> to vector<64x128xf32>
    %82 = arith.subf %74, %81 : vector<64x128xf32>
    %83 = arith.mulf %82, %82 : vector<64x128xf32>
    %cst_79 = arith.constant dense<0.000000e+00> : vector<128xf32>
    %84 = vector.multi_reduction <add>, %83, %cst_79 [0] : vector<64x128xf32> to vector<128xf32>
    %85 = vector.shape_cast %84 : vector<128xf32> to vector<1x128xf32>
    %c0_80 = arith.constant 0 : index
    %c0_81 = arith.constant 0 : index
    %86 = vector.load %arg8[%c0_80, %c0_81] : memref<128x128xf32, #tpu.memory_space<vmem>>, vector<128x128xf32>
    %cst_82 = arith.constant dense<0.000000e+00> : vector<1x128xf32>
    %87 = tpu.matmul %85, %86, %cst_82 {dimension_numbers = #tpu.dot_dimension_numbers<[1], [0], [0], [1], [0, 0, 1, 1], [], []>} : vector<1x128xf32>, vector<128x128xf32>, vector<1x128xf32> -> vector<1x128xf32>
    %cst_83 = arith.constant 1.562500e-02 : f32
    %88 = vector.broadcast %cst_83 : f32 to vector<1x128xf32>
    %89 = arith.mulf %87, %88 : vector<1x128xf32>
    %cst_84 = arith.constant 9.99999974E-6 : f32
    %90 = vector.broadcast %cst_84 : f32 to vector<1x128xf32>
    %91 = arith.addf %89, %90 : vector<1x128xf32>
    %92 = math.rsqrt %91 : vector<1x128xf32>
    %93 = vector.broadcast %92 : vector<1x128xf32> to vector<64x128xf32>
    %94 = arith.mulf %82, %93 : vector<64x128xf32>
    %c0_85 = arith.constant 0 : index
    %c0_86 = arith.constant 0 : index
    %95 = vector.load %arg6[%c0_85, %c0_86] : memref<1x128xf32, #tpu.memory_space<vmem>>, vector<1x128xf32>
    %96 = vector.broadcast %95 : vector<1x128xf32> to vector<64x128xf32>
    %97 = arith.mulf %94, %96 : vector<64x128xf32>
    %c0_87 = arith.constant 0 : index
    %c0_88 = arith.constant 0 : index
    %98 = vector.load %arg7[%c0_87, %c0_88] : memref<1x128xf32, #tpu.memory_space<vmem>>, vector<1x128xf32>
    %99 = vector.broadcast %98 : vector<1x128xf32> to vector<64x128xf32>
    %100 = arith.addf %97, %99 : vector<64x128xf32>
    %cst_89 = arith.constant 0.000000e+00 : f32
    %101 = vector.broadcast %cst_89 : f32 to vector<64x128xf32>
    %102 = arith.maximumf %100, %101 : vector<64x128xf32>
    %c0_90 = arith.constant 0 : index
    %c0_91 = arith.constant 0 : index
    %c0_92 = arith.constant 0 : index
    %103 = vector.load %arg9[%c0_90, %c0_91, %c0_92] : memref<1x64x128xf32, #tpu.memory_space<vmem>>, vector<1x64x128xf32>
    %104 = vector.shape_cast %103 : vector<1x64x128xf32> to vector<64x128xf32>
    %105 = vector.shape_cast %102 : vector<64x128xf32> to vector<1x64x128xf32>
    tpu.vector_store %arg9[%c0_90, %c0_91, %c0_92], %105 {strides = array<i32>} : memref<1x64x128xf32, #tpu.memory_space<vmem>>, vector<1x64x128xf32>,
    return
  }
  func.func @transform_0(%arg0: i32, %arg1: i32) -> (i32, i32, i32, i32) {
    %c0_i32 = arith.constant 0 : i32
    %c0_i32_0 = arith.constant 0 : i32
    %c0_i32_1 = arith.constant 0 : i32
    %c0_i32_2 = arith.constant 0 : i32
    return %arg0, %c0_i32, %c0_i32_0, %c0_i32_1 : i32, i32, i32, i32
  }
  func.func @transform_1(%arg0: i32, %arg1: i32) -> (i32, i32, i32, i32) {
    %c0_i32 = arith.constant 0 : i32
    %c0_i32_0 = arith.constant 0 : i32
    %c0_i32_1 = arith.constant 0 : i32
    %c0_i32_2 = arith.constant 0 : i32
    return %arg0, %c0_i32, %c0_i32_0, %c0_i32_1 : i32, i32, i32, i32
  }
  func.func @transform_2(%arg0: i32, %arg1: i32) -> (i32, i32) {
    %c0_i32 = arith.constant 0 : i32
    %c0_i32_0 = arith.constant 0 : i32
    %c0_i32_1 = arith.constant 0 : i32
    return %c0_i32, %c0_i32_0 : i32, i32
  }
  func.func @transform_3(%arg0: i32, %arg1: i32) -> (i32, i32) {
    %c0_i32 = arith.constant 0 : i32
    %c0_i32_0 = arith.constant 0 : i32
    %c0_i32_1 = arith.constant 0 : i32
    return %c0_i32, %c0_i32_0 : i32, i32
  }
  func.func @transform_4(%arg0: i32, %arg1: i32) -> (i32, i32) {
    %c0_i32 = arith.constant 0 : i32
    %c0_i32_0 = arith.constant 0 : i32
    %c0_i32_1 = arith.constant 0 : i32
    return %c0_i32, %c0_i32_0 : i32, i32
  }
  func.func @transform_5(%arg0: i32, %arg1: i32) -> (i32, i32) {
    %c0_i32 = arith.constant 0 : i32
    %c0_i32_0 = arith.constant 0 : i32
    %c0_i32_1 = arith.constant 0 : i32
    return %c0_i32, %c0_i32_0 : i32, i32
  }
  func.func @transform_6(%arg0: i32, %arg1: i32) -> (i32, i32) {
    %c0_i32 = arith.constant 0 : i32
    %c0_i32_0 = arith.constant 0 : i32
    %c0_i32_1 = arith.constant 0 : i32
    return %c0_i32, %c0_i32_0 : i32, i32
  }
  func.func @transform_7(%arg0: i32, %arg1: i32) -> (i32, i32, i32) {
    %c0_i32 = arith.constant 0 : i32
    %c0_i32_0 = arith.constant 0 : i32
    return %arg0, %arg1, %c0_i32 : i32, i32, i32
  }
}

</mosaic_0001>

<bundles_post_ra>
// kernel: transunet_forward.14
= control target key start
LH: loop header
LB: loop body
LE: loop exit
PB: predicated region body
PF: predicated region fallthrough
CT: control target
= control target key end

     0   :  { %s2489_s21 = smov 0   ;;  %s2491_s22 = smov 0   ;;  %s2967_s0 = inlined_call_operand.vmem [shape: f32[2,9,2,9,256], index: 0, kind: input, shape index: {}]   ;;  %s2968_s1 = inlined_call_operand.vmem [shape: bf16[1152,128], index: 1, kind: input, shape index: {}]   ;;  %s2969_s2 = inlined_call_operand.vmem [shape: f32[1,128], index: 2, kind: input, shape index: {}]   ;;  %s2970_s3 = inlined_call_operand.vmem [shape: f32[1,128], index: 3, kind: input, shape index: {}]   ;;  %s2971_s4 = inlined_call_operand.vmem [shape: f32[1,128], index: 4, kind: input, shape index: {}]   ;;  %s2972_s5 = inlined_call_operand.vmem [shape: f32[128,128], index: 5, kind: input, shape index: {}]   ;;  %s2973_s6 = inlined_call_operand.vmem [shape: f32[2,64,128], index: 6, kind: output, shape index: {}]  }
   0x1   :  { %s2493_s23 = smov 0  }
   0x2 LB: > { %s28_s24 = sadd.s32 1, %s2445_s22  ;;  %p1831_p0 = scmp.ge.s32.totalorder %s2449_s23, 1  ;;  %s2449_s23 = sphi %s2493_s23, %s16_s23   ;;  %s2445_s22 = sphi %s2491_s22, %s2975_s22   ;;  %s2441_s21 = sphi %s2489_s21, %s2974_s21  }
   0x3   : > { %p30_p1 = scmp.ge.s32.totalorder %s28_s24, 2  ;;  %p226_p2 = scmp.lt.s32.totalorder %s2449_s23, 3 }
   0x5   : > { %s2977_s24 = smov (%p30_p1, %s28_s24), 0  ;;  %p227_p3 = pnand %p1831_p0, %p226_p2 }
   0x6   : > { %v2353_v0 = vld [vmem:[%s2968_s1 + $0x40] sm:$0xff] (!%p227_p3)   ;;  %v2357_v4 = vld [vmem:[%s2968_s1 + $0x48] sm:$0xff] (!%p227_p3)   ;;  %v2361_v8 = vld [vmem:[%s2968_s1 + $0x50] sm:$0xff] (!%p227_p3)   ;;  %p260_p4 = scmp.lt.s32.totalorder (!%p227_p3), %s2441_s21, 1  ;;  %vm399_vm0 = vcmask (!%p227_p3), 1046528   ;;  %vm2452_vm1 = vmmov (!%p227_p3), 0  }
   0x7   : > { %230 = sbr.rel (%p227_p3) target bundleno = 833 (0x341), region = 44  ;;  %v2354_v1 = vld [vmem:[%s2968_s1] sm:$0xff] (!%p227_p3)   ;;  %1977 = vmatprep.subr.bf16.mxu0 (!%p227_p3), %v2353_v0  ;;  %v2358_v5 = vld [vmem:[%s2968_s1 + $0x8] sm:$0xff] (!%p227_p3)   ;;  %v2362_v9 = vld [vmem:[%s2968_s1 + $0x10] sm:$0xff] (!%p227_p3)  }
   0x8   : > { %v2355_v2 = vld [vmem:[%s2968_s1 + $0xc0] sm:$0xff] (!%p227_p3)   ;;  %1978 = vmatpush3.bf16.msra.mxu0 (!%p227_p3), %v2354_v1  ;;  %v2359_v6 = vld [vmem:[%s2968_s1 + $0xc8] sm:$0xff] (!%p227_p3)   ;;  %v2363_v10 = vld [vmem:[%s2968_s1 + $0xd0] sm:$0xff] (!%p227_p3)  }
   0x9   : > { %v2356_v3 = vld [vmem:[%s2968_s1 + $0x80] sm:$0xff] (!%p227_p3)   ;;  %2017 = vmatprep.subr.bf16.mxu1 (!%p227_p3), %v2355_v2  ;;  %1979 = vmatprep.subr.bf16.mxu0 (!%p227_p3), %v2357_v4  ;;  %v2360_v7 = vld [vmem:[%s2968_s1 + $0x88] sm:$0xff] (!%p227_p3)   ;;  %v2364_v11 = vld [vmem:[%s2968_s1 + $0x90] sm:$0xff] (!%p227_p3)  }
   0xa   : > { %2018 = vmatpush3.bf16.msra.mxu1 (!%p227_p3), %v2356_v3  ;;  %v2365_v12 = vld [vmem:[%s2968_s1 + $0x58] sm:$0xff] (!%p227_p3)   ;;  %v2369_v16 = vld [vmem:[%s2968_s1 + $0x60] sm:$0xff] (!%p227_p3)   ;;  %v2373_v20 = vld [vmem:[%s2968_s1 + $0x68] sm:$0xff] (!%p227_p3)  }
   0xb   : > { %2019 = vmatprep.subr.bf16.mxu1 (!%p227_p3), %v2359_v6  ;;  %v2366_v13 = vld [vmem:[%s2968_s1 + $0x18] sm:$0xff] (!%p227_p3)   ;;  %v2370_v17 = vld [vmem:[%s2968_s1 + $0x20] sm:$0xff] (!%p227_p3)   ;;  %v2374_v21 = vld [vmem:[%s2968_s1 + $0x28] sm:$0xff] (!%p227_p3)  }
   0xc   : > { %1980 = vmatpush3.bf16.msra.mxu0 (!%p227_p3), %v2358_v5  ;;  %v2367_v14 = vld [vmem:[%s2968_s1 + $0xd8] sm:$0xff] (!%p227_p3)   ;;  %v2371_v18 = vld [vmem:[%s2968_s1 + $0xe0] sm:$0xff] (!%p227_p3)   ;;  %v2375_v22 = vld [vmem:[%s2968_s1 + $0xe8] sm:$0xff] (!%p227_p3)  }
   0xd   : > { %1981 = vmatprep.subr.bf16.mxu0 (!%p227_p3), %v2361_v8  ;;  %v2368_v15 = vld [vmem:[%s2968_s1 + $0x98] sm:$0xff] (!%p227_p3)   ;;  %v2372_v19 = vld [vmem:[%s2968_s1 + $0xa0] sm:$0xff] (!%p227_p3)   ;;  %v2376_v23 = vld [vmem:[%s2968_s1 + $0xa8] sm:$0xff] (!%p227_p3)  }
   0xe   : > { %2020 = vmatpush3.bf16.msra.mxu1 %v2360_v7  ;;  %s2979_s21 = smov (!%p260_p4, %s2441_s21), 1  ;;  %v2377_v24 = vld [vmem:[%s2968_s1 + $0x70] sm:$0xff]   ;;  %v2381_v28 = vld [vmem:[%s2968_s1 + $0x78] sm:$0xff]   ;;  %v2385_v38 = vld [vmem:[%s2968_s1 + $0x140] sm:$0xff]  }
   0xf   : > { %2021 = vmatprep.subr.bf16.mxu1 %v2363_v10  ;;  %s2325_s11 = smul.u32 576, %s2979_s21  ;;  %v2378_v25 = vld [vmem:[%s2968_s1 + $0x30] sm:$0xff]   ;;  %v2382_v29 = vld [vmem:[%s2968_s1 + $0x38] sm:$0xff]   ;;  %v2386_v42 = vld [vmem:[%s2968_s1 + $0x100] sm:$0xff]  }
  0x10   : > { %1982 = vmatpush3.bf16.msra.mxu0 %v2362_v9  ;;  %v2379_v26 = vld [vmem:[%s2968_s1 + $0xf0] sm:$0xff]   ;;  %v2383_v30 = vld [vmem:[%s2968_s1 + $0xf8] sm:$0xff]   ;;  %v2387_v50 = vld [vmem:[%s2968_s1 + $0x1c0] sm:$0xff]  }
  0x11   : > { %1983 = vmatprep.subr.bf16.mxu0 %v2365_v12  ;;  %v2380_v27 = vld [vmem:[%s2968_s1 + $0xb0] sm:$0xff]   ;;  %s2604_s26 = scalar_lea.vmem %s2967_s0, %s2325_s11  ;;  %v2384_v34 = vld [vmem:[%s2968_s1 + $0xb8] sm:$0xff]   ;;  %v2388_v52 = vld [vmem:[%s2968_s1 + $0x180] sm:$0xff]   ;;  %s1976_s11 = sshll.u32 %s2979_s21, 6 }
  0x12   : > { %2022 = vmatpush3.bf16.msra.mxu1 %v2364_v11  ;;  %v288_v31 = vld [vmem:[%s2604_s26 + $0x8] sm:$0xff]  ;;  %v280_v35 = vld [vmem:[%s2604_s26] sm:$0xff]  ;;  %v297_v44 = vld [vmem:[%s2604_s26 + $0x10] sm:$0x1]  ;;  %s273_s14 = scalar_lea.vmem %s2973_s6, %s1976_s11 }
  0x13   : > { %2023 = vmatprep.subr.bf16.mxu1 %v2367_v14  ;;  %v2614_v32 = vld [vmem:[%s2604_s26 + $0x48] sm:$0xff]  ;;  %v2622_v36 = vld [vmem:[%s2604_s26 + $0x40] sm:$0xff]  ;;  %v299_v46 = vld [vmem:[%s2604_s26 + $0x50] sm:$0x1]  ;;  %v401_v48 = vrot.slane %v297_v44, 1 }
  0x14   : > { %1984 = vmatpush3.bf16.msra.mxu0 %v2366_v13  ;;  %v529_v33 = vpack.c.bf16 %v2614_v32, %v288_v31  ;;  %v528_v37 = vpack.c.bf16 %v2622_v36, %v280_v35  ;;  %v1835_v39 = vld [vmem:[%s2604_s26 + $0x20] sm:$0xff]  ;;  %v404_v51 = vrot.slane %v299_v46, 1  ;;  %v2389_v55 = vld [vmem:[%s2968_s1 + $0x148] sm:$0xff]   ;;  %v2393_v2 = vld [vmem:[%s2968_s1 + $0x150] sm:$0xff]  }
  0x15   : > { %1985 = vmatprep.subr.bf16.mxu0 %v2369_v16  ;;  %v1836_v40 = vld [vmem:[%s2604_s26 + $0x60] sm:$0xff]  ;;  %v2390_v57 = vld [vmem:[%s2968_s1 + $0x108] sm:$0xff]   ;;  %v2394_v6 = vld [vmem:[%s2968_s1 + $0x110] sm:$0xff]  }
  0x16   : > { %2024 = vmatpush3.bf16.msra.mxu1 %v2368_v15  ;;  %1179 = vmatprep.mubr.bf16.mxu0 %v529_v33  ;;  %v531_v41 = vpack.c.bf16 %v1836_v40, %v1835_v39  ;;  %v296_v43 = vld [vmem:[%s2604_s26] sm:$0xfe]  ;;  %v2391_v58 = vld [vmem:[%s2968_s1 + $0x1c8] sm:$0xff]   ;;  %v301_v8 = vld [vmem:[%s2604_s26 + $0x90] sm:$0x1] }
  0x17   : > { %2025 = vmatprep.subr.bf16.mxu1 %v2371_v18  ;;  %v298_v45 = vld [vmem:[%s2604_s26 + $0x40] sm:$0xfe]  ;;  %v400_v47 = vrot.slane %v296_v43, 1  ;;  %v2655_v59 = vld [vmem:[%s2604_s26 + $0x88] sm:$0xff]  ;;  %v303_v10 = vld [vmem:[%s2604_s26 + $0xd0] sm:$0x1] }
  0x18   : > { %1986 = vmatpush3.bf16.msra.mxu0 %v2370_v17  ;;  %1244 = vmatprep.mubr.bf16.mxu1 %v531_v41  ;;  %v403_v49 = vrot.slane %v298_v45, 1  ;;  %v2658_v60 = vld [vmem:[%s2604_s26 + $0xc8] sm:$0xff]  ;;  %v2666_v63 = vld [vmem:[%s2604_s26 + $0x80] sm:$0xff]  ;;  %v407_v12 = vrot.slane %v301_v8, 1  ;;  %v410_v14 = vrot.slane %v303_v10, 1  ;;  %v2395_v15 = vld [vmem:[%s2968_s1 + $0x1d0] sm:$0xff]  }
  0x19   : > { %1987 = vmatprep.subr.bf16.mxu0 %v2373_v20  ;;  %v402_v53 = vsel %vm399_vm0, %v400_v47, %v401_v48  ;;  %v538_v61 = vpack.c.bf16 %v2658_v60, %v2655_v59  ;;  %v2392_v62 = vld [vmem:[%s2968_s1 + $0x188] sm:$0xff]   ;;  %v2669_v0 = vld [vmem:[%s2604_s26 + $0xc0] sm:$0xff]  ;;  %v2396_v18 = vld [vmem:[%s2968_s1 + $0x190] sm:$0xff]  }
  0x1a   : > { %2026 = vmatpush3.bf16.msra.mxu1 %v2372_v19  ;;  %v405_v54 = vsel %vm399_vm0, %v403_v49, %v404_v51  ;;  %v537_v1 = vpack.c.bf16 %v2669_v0, %v2666_v63  ;;  %v1837_v3 = vld [vmem:[%s2604_s26 + $0xa0] sm:$0xff]  ;;  %v2397_v20 = vld [vmem:[%s2968_s1 + $0x158] sm:$0xff]   ;;  %v307_v40 = vld [vmem:[%s2604_s26 + $0x150] sm:$0x1] }
  0x1b   : > { %2027 = vmatprep.subr.bf16.mxu1 %v2375_v22  ;;  %v530_v56 = vpack.c.bf16 %v405_v54, %v402_v53  ;;  %v1838_v4 = vld [vmem:[%s2604_s26 + $0xe0] sm:$0xff]  ;;  %v2399_v22 = vld [vmem:[%s2968_s1 + $0x1d8] sm:$0xff]   ;;  %v416_v44 = vrot.slane %v307_v40, 1  ;;  %v2406_v51 = vld [vmem:[%s2968_s1 + $0x128] sm:$0xff]  }
  0x1c   : > { %1988 = vmatpush3.bf16.msra.mxu0 %v2374_v21  ;;  %v540_v5 = vpack.c.bf16 %v1838_v4, %v1837_v3  ;;  %v300_v7 = vld [vmem:[%s2604_s26 + $0x80] sm:$0xfe]  ;;  %v2398_v21 = vld [vmem:[%s2968_s1 + $0x118] sm:$0xff]   ;;  %v2751_v53 = vld [vmem:[%s2604_s26 + $0x188] sm:$0xff] }
  0x1d   : > { %1989 = vmatprep.subr.bf16.mxu0 %v2377_v24  ;;  %v302_v9 = vld [vmem:[%s2604_s26 + $0xc0] sm:$0xfe]  ;;  %v406_v11 = vrot.slane %v300_v7, 1  ;;  %v2706_v24 = vld [vmem:[%s2604_s26 + $0x148] sm:$0xff]  ;;  %v2410_v4 = vld [vmem:[%s2968_s1 + $0x130] sm:$0xff]  }
  0x1e   : > { %2028 = vmatpush3.bf16.msra.mxu1 %v2376_v23  ;;  %v409_v13 = vrot.slane %v302_v9, 1  ;;  %v2703_v23 = vld [vmem:[%s2604_s26 + $0x108] sm:$0xff]  ;;  %v1839_v31 = vld [vmem:[%s2604_s26 + $0x120] sm:$0xff]  ;;  %v311_v8 = vld [vmem:[%s2604_s26 + $0x1d0] sm:$0x1] }
  0x1f   : > { %2029 = vmatprep.subr.bf16.mxu1 %v2379_v26  ;;  %v408_v16 = vsel %vm399_vm0, %v406_v11, %v407_v12  ;;  %v2400_v26 = vld [vmem:[%s2968_s1 + $0x198] sm:$0xff]   ;;  %v1840_v33 = vld [vmem:[%s2604_s26 + $0x160] sm:$0xff]  ;;  %v2754_v54 = vld [vmem:[%s2604_s26 + $0x1c8] sm:$0xff]  ;;  %v422_v12 = vrot.slane %v311_v8, 1 }
  0x20   : > { %1990 = vmatpush3.bf16.msra.mxu0 %v2378_v25  ;;  %v411_v17 = vsel %vm399_vm0, %v409_v13, %v410_v14  ;;  %v547_v25 = vpack.c.bf16 %v2706_v24, %v2703_v23  ;;  %v2402_v35 = vld [vmem:[%s2968_s1 + $0x120] sm:$0xff]   ;;  %v2411_v13 = vld [vmem:[%s2968_s1 + $0x1f0] sm:$0xff]  }
  0x21   : > { %1991 = vmatprep.subr.bf16.mxu0 %v2381_v28  ;;  %v539_v19 = vpack.c.bf16 %v411_v17, %v408_v16  ;;  %v2717_v28 = vld [vmem:[%s2604_s26 + $0x140] sm:$0xff]  ;;  %v2412_v16 = vld [vmem:[%s2968_s1 + $0x1b0] sm:$0xff]   ;;  %v535_v17 = vpack.c.bf16 %v2655_v59, %v2614_v32 }
  0x22   : > { %2030 = vmatpush3.bf16.msra.mxu1 %v2380_v27  ;;  %v2714_v27 = vld [vmem:[%s2604_s26 + $0x100] sm:$0xff]  ;;  %v1852_v59 = vld [vmem:[%s2604_s26 + $0x30] sm:$0x1] }
  0x23   : > { %2031 = vmatprep.subr.bf16.mxu1 %v2383_v30  ;;  %v2401_v30 = vld [vmem:[%s2968_s1 + $0x160] sm:$0xff]  }
  0x24   : > { %1992 = vmatpush3.bf16.msra.mxu0 %v2382_v29  ;;  %v546_v29 = vpack.c.bf16 %v2717_v28, %v2714_v27  ;;  %v306_v39 = vld [vmem:[%s2604_s26 + $0x140] sm:$0xfe] }
  0x25   : > { %2057 = vmatprep.subr.bf16.mxu0 %v2385_v38  ;;  %v305_v38 = vld [vmem:[%s2604_s26 + $0x110] sm:$0x1]  ;;  %v415_v43 = vrot.slane %v306_v39, 1  ;;  %v2403_v45 = vld [vmem:[%s2968_s1 + $0x1e0] sm:$0xff]   ;;  %v534_v39 = vpack.c.bf16 %v2666_v63, %v2622_v36 }
  0x26   : > { %2032 = vmatpush3.bf16.msra.mxu1 %v2384_v34  ;;  %v549_v34 = vpack.c.bf16 %v1840_v33, %v1839_v31  ;;  %v2404_v48 = vld [vmem:[%s2968_s1 + $0x1a0] sm:$0xff]   ;;  %v2416_v33 = vld [vmem:[%s2968_s1 + $0x1b8] sm:$0xff]   ;;  %v1858_v63 = vld [vmem:[%s2604_s26 + $0xf0] sm:$0x1] }
  0x27   : > { %1180 = vmatmul.mubr.bf16.vlgmr.msra.gmra.mrb[0].mxu0 %v528_v37  ;;  %2097 = vmatprep.subr.bf16.mxu1 %v2387_v50  ;;  %v304_v37 = vld [vmem:[%s2604_s26 + $0x100] sm:$0xfe]  ;;  %v417_v47 = vsel %vm399_vm0, %v415_v43, %v416_v44  ;;  %v2405_v50 = vld [vmem:[%s2968_s1 + $0x168] sm:$0xff]   ;;  %v544_v43 = vpack.c.bf16 %v2703_v23, %v2658_v60  ;;  %v458_v60 = vrot.slane %v1858_v63, 1 }
  0x28   : > { %2058 = vmatpush3.bf16.msra.mxu0 %v2386_v42  ;;  %1187 = vmatprep.mubr.bf16.mxu0 %v538_v61  ;;  %v412_v41 = vrot.slane %v304_v37, 1  ;;  %v413_v42 = vrot.slane %v305_v38, 1  ;;  %v310_v7 = vld [vmem:[%s2604_s26 + $0x1c0] sm:$0xfe]  ;;  %v1844_v38 = vld [vmem:[%s2604_s26 + $0x68] sm:$0xff] }
  0x29   : > { %2059 = vmatprep.subr.bf16.mxu0 %v2389_v55  ;;  %1245 = vmatmul.mubr.bf16.vlgmr.msra.gmra.mrb[0].mxu1 %v530_v56  ;;  %v556_v55 = vpack.c.bf16 %v2754_v54, %v2751_v53  ;;  %v2408_v56 = vld [vmem:[%s2968_s1 + $0x1a8] sm:$0xff]   ;;  %v421_v11 = vrot.slane %v310_v7, 1  ;;  %v1851_v32 = vld [vmem:[%s2604_s26 + $0x20] sm:$0xfe] }
  0x2a   : > { %2098 = vmatpush3.bf16.msra.mxu1 %v2388_v52  ;;  %1252 = vmatprep.mubr.bf16.mxu1 %v540_v5  ;;  %v414_v46 = vsel %vm399_vm0, %v412_v41, %v413_v42  ;;  %v2407_v52 = vld [vmem:[%s2968_s1 + $0x1e8] sm:$0xff]   ;;  %v308_v5 = vld [vmem:[%s2604_s26 + $0x180] sm:$0xfe] }
  0x2b   : > { %2099 = vmatprep.subr.bf16.mxu1 %v2391_v58  ;;  %v548_v49 = vpack.c.bf16 %v417_v47, %v414_v46  ;;  %v2765_v58 = vld [vmem:[%s2604_s26 + $0x1c0] sm:$0xff]  ;;  %v418_v9 = vrot.slane %v308_v5, 1  ;;  %v2418_v44 = vld [vmem:[%s2968_s1 + $0x208] sm:$0xff]   ;;  %v1856_v46 = vld [vmem:[%s2604_s26 + $0xb0] sm:$0x1] }
  0x2c   : > { %2060 = vmatpush3.bf16.msra.mxu0 %v2390_v57  ;;  %v2762_v57 = vld [vmem:[%s2604_s26 + $0x180] sm:$0xff]  ;;  %v1845_v23 = vld [vmem:[%s2604_s26 + $0xa8] sm:$0xff] }
  0x2d   : > { %2061 = vmatprep.subr.bf16.mxu0 %v2393_v2  ;;  %v555_v61 = vpack.c.bf16 %v2765_v58, %v2762_v57  ;;  %v1842_v2 = vld [vmem:[%s2604_s26 + $0x1e0] sm:$0xff] }
  0x2e   : > { %2100 = vmatpush3.bf16.msra.mxu1 %v2392_v62  ;;  %v2409_v62 = vld [vmem:[%s2968_s1 + $0x170] sm:$0xff]   ;;  %v2417_v42 = vld [vmem:[%s2968_s1 + $0x200] sm:$0xff]  }
  0x2f   : > { %1188 = vmatmul.mubr.bf16.gmra.mrb[4].mxu0 %v537_v1  ;;  %2101 = vmatprep.subr.bf16.mxu1 %v2395_v15  ;;  %v1841_v1 = vld [vmem:[%s2604_s26 + $0x1a0] sm:$0xff]  ;;  %v423_v15 = vsel %vm399_vm0, %v421_v11, %v422_v12 }
  0x30   : > { %2062 = vmatpush3.bf16.msra.mxu0 %v2394_v6  ;;  %1195 = vmatprep.mubr.bf16.mxu0 %v547_v25  ;;  %v558_v3 = vpack.c.bf16 %v1842_v2, %v1841_v1  ;;  %v309_v6 = vld [vmem:[%s2604_s26 + $0x190] sm:$0x1]  ;;  %v1857_v36 = vld [vmem:[%s2604_s26 + $0xe0] sm:$0xfe]  ;;  %v543_v1 = vpack.c.bf16 %v2714_v27, %v2669_v0 }
  0x31   : > { %1253 = vmatmul.mubr.bf16.gmra.mrb[4].mxu1 %v539_v19  ;;  %2063 = vmatprep.subr.bf16.mxu0 %v2397_v20  ;;  %v419_v10 = vrot.slane %v309_v6, 1  ;;  %v2413_v19 = vld [vmem:[%s2968_s1 + $0x178] sm:$0xff]   ;;  %v1854_v25 = vld [vmem:[%s2604_s26 + $0x70] sm:$0x1]  ;;  %v1863_v12 = vld [vmem:[%s2604_s26 + $0x1a0] sm:$0xfe] }
  0x32   : > { %2102 = vmatpush3.bf16.msra.mxu1 %v2396_v18  ;;  %1260 = vmatprep.mubr.bf16.mxu1 %v549_v34  ;;  %v2414_v20 = vld [vmem:[%s2968_s1 + $0x138] sm:$0xff]   ;;  %v452_v31 = vrot.slane %v1854_v25, 1  ;;  %v1843_v34 = vld [vmem:[%s2604_s26 + $0x28] sm:$0xff]  ;;  %v1860_v2 = vld [vmem:[%s2604_s26 + $0x130] sm:$0x1]  ;;  %v552_v25 = vpack.c.bf16 %v2762_v57, %v2717_v28 }
  0x33   : > { %2103 = vmatprep.subr.bf16.mxu1 %v2399_v22  ;;  %v420_v14 = vsel %vm399_vm0, %v418_v9, %v419_v10  ;;  %v1853_v22 = vld [vmem:[%s2604_s26 + $0x60] sm:$0xfe]  ;;  %v532_v41 = vpack.c.bf16 %v1844_v38, %v1843_v34  ;;  %v461_v6 = vrot.slane %v1860_v2, 1  ;;  %v2420_v9 = vld [vmem:[%s2968_s1 + $0x218] sm:$0xff]   ;;  %v553_v10 = vpack.c.bf16 %v2751_v53, %v2706_v24  ;;  %v1886_v34 = vld [vmem:[%s2604_s26 + $0x90] sm:$0x1] }
  0x34   : > { %2064 = vmatpush3.bf16.msra.mxu0 %v2398_v21  ;;  %v557_v18 = vpack.c.bf16 %v423_v15, %v420_v14  ;;  %v2415_v21 = vld [vmem:[%s2968_s1 + $0x1f8] sm:$0xff]   ;;  %v1865_v14 = vld [vmem:[%s2604_s26 + $0x1e0] sm:$0xfe]  ;;  %v1847_v15 = vld [vmem:[%s2604_s26 + $0x128] sm:$0xff]  ;;  %v500_v38 = vrot.slane %v1886_v34, 1 }
  0x35   : > { %2065 = vmatprep.subr.bf16.mxu0 %v2401_v30  ;;  %v451_v30 = vrot.slane %v1853_v22, 1  ;;  %v2421_v53 = vld [vmem:[%s2968_s1 + $0x220] sm:$0xff]  }
  0x36   : > { %2104 = vmatpush3.bf16.msra.mxu1 %v2400_v26  ;;  %v448_v26 = vrot.slane %v1851_v32, 1  ;;  %v1882_v32 = vld [vmem:[%s2604_s26 + $0x208] sm:$0xff]  ;;  %v1891_v63 = vld [vmem:[%s2604_s26 + $0x140] sm:$0xfe] }
  0x37   : > { %1196 = vmatmul.mubr.bf16.gmra.mrb[8].mxu0 %v546_v29  ;;  %2105 = vmatprep.subr.bf16.mxu1 %v2403_v45  ;;  %v449_v29 = vrot.slane %v1852_v59, 1  ;;  %v453_v37 = vsel %vm399_vm0, %v451_v30, %v452_v31  ;;  %v1855_v45 = vld [vmem:[%s2604_s26 + $0xa0] sm:$0xfe] }
  0x38   : > { %2066 = vmatpush3.bf16.msra.mxu0 %v2402_v35  ;;  %1203 = vmatprep.mubr.bf16.mxu0 %v556_v55  ;;  %v454_v47 = vrot.slane %v1855_v45, 1  ;;  %v2419_v55 = vld [vmem:[%s2968_s1 + $0x210] sm:$0xff]   ;;  %v1885_v30 = vld [vmem:[%s2604_s26 + $0x80] sm:$0xfe] }
  0x39   : > { %1261 = vmatmul.mubr.bf16.gmra.mrb[8].mxu1 %v548_v49  ;;  %2067 = vmatprep.subr.bf16.mxu0 %v2405_v50  ;;  %v450_v35 = vsel %vm399_vm0, %v448_v26, %v449_v29  ;;  %v457_v49 = vrot.slane %v1857_v36, 1  ;;  %v1846_v50 = vld [vmem:[%s2604_s26 + $0xe8] sm:$0xff]  ;;  %v1883_v26 = vld [vmem:[%s2604_s26 + $0x40] sm:$0xfe]  ;;  %v1884_v29 = vld [vmem:[%s2604_s26 + $0x50] sm:$0x1] }
  0x3a   : > { %2106 = vmatpush3.bf16.msra.mxu1 %v2404_v48  ;;  %1268 = vmatprep.mubr.bf16.mxu1 %v558_v3  ;;  %v533_v40 = vpack.c.bf16 %v453_v37, %v450_v35  ;;  %v455_v48 = vrot.slane %v1856_v46, 1  ;;  %v1861_v3 = vld [vmem:[%s2604_s26 + $0x160] sm:$0xfe]  ;;  %v2422_v35 = vld [vmem:[%s2968_s1 + $0x228] sm:$0xff]   ;;  %v496_v37 = vrot.slane %v1883_v26, 1  ;;  %v497_v28 = vrot.slane %v1884_v29, 1 }
  0x3b   : > { %2107 = vmatprep.subr.bf16.mxu1 %v2407_v52  ;;  %v459_v52 = vsel %vm399_vm0, %v457_v49, %v458_v60  ;;  %v463_v7 = vrot.slane %v1861_v3, 1  ;;  %v499_v57 = vrot.slane %v1885_v30, 1  ;;  %v1889_v46 = vld [vmem:[%s2604_s26 + $0x100] sm:$0xfe]  ;;  %v1890_v36 = vld [vmem:[%s2604_s26 + $0x110] sm:$0x1] }
  0x3c   : > { %2068 = vmatpush3.bf16.msra.mxu0 %v2406_v51  ;;  %v456_v51 = vsel %vm399_vm0, %v454_v47, %v455_v48  ;;  %v1892_v47 = vld [vmem:[%s2604_s26 + $0x150] sm:$0x1]  ;;  %v1893_v48 = vld [vmem:[%s2604_s26 + $0x180] sm:$0xfe]  ;;  %v1492_v29 = vld [vmem:[%s2972_s5 + $0x38] sm:$0xff] }
  0x3d   : > { %2069 = vmatprep.subr.bf16.mxu0 %v2409_v62  ;;  %v541_v62 = vpack.c.bf16 %v1846_v50, %v1845_v23  ;;  %v501_v45 = vsel %vm399_vm0, %v499_v57, %v500_v38  ;;  %v1894_v49 = vld [vmem:[%s2604_s26 + $0x190] sm:$0x1]  ;;  %v511_v2 = vrot.slane %v1893_v48, 1  ;;  %v1497_v57 = vld [vmem:[%s2972_s5 + $0x60] sm:$0xff]  ;;  %v1498_v38 = vld [vmem:[%s2972_s5 + $0x68] sm:$0xff] }
  0x3e   : > { %2108 = vmatpush3.bf16.msra.mxu1 %v2408_v56  ;;  %v1859_v56 = vld [vmem:[%s2604_s26 + $0x120] sm:$0xfe]  ;;  %v512_v3 = vrot.slane %v1894_v49, 1  ;;  %v1491_v26 = vld [vmem:[%s2972_s5 + $0x30] sm:$0xff] }
  0x3f   : > { %1204 = vmatmul.mubr.bf16.gmra.mrb[12].mxu0 %v555_v61  ;;  %2109 = vmatprep.subr.bf16.mxu1 %v2411_v13  ;;  %v542_v61 = vpack.c.bf16 %v459_v52, %v456_v51  ;;  %v460_v5 = vrot.slane %v1859_v56, 1  ;;  %v1864_v13 = vld [vmem:[%s2604_s26 + $0x1b0] sm:$0x1]  ;;  %v506_v56 = vrot.slane %v1890_v36, 1  ;;  %v2287_v30 = vpack.c.bf16 %v1492_v29, %v1491_v26 }
  0x40   : > { %2070 = vmatpush3.bf16.msra.mxu0 %v2410_v4  ;;  %1309 = vmatprep.mubr.bf16.mxu0 %v533_v40  ;;  %v1862_v4 = vld [vmem:[%s2604_s26 + $0x170] sm:$0x1] }
  0x41   : > { %1269 = vmatmul.mubr.bf16.gmra.mrb[12].mxu1 %v557_v18  ;;  %2071 = vmatprep.subr.bf16.mxu0 %v2413_v19  ;;  %v464_v8 = vrot.slane %v1862_v4, 1  ;;  %v462_v0 = vsel %vm399_vm0, %v460_v5, %v461_v6  ;;  %v467_v18 = vrot.slane %v1864_v13, 1  ;;  %v469_v19 = vrot.slane %v1865_v14, 1  ;;  %v2423_v40 = vld [vmem:[%s2968_s1 + $0x230] sm:$0xff]   ;;  %v1895_v5 = vld [vmem:[%s2604_s26 + $0x1c0] sm:$0xfe] }
  0x42   : > { %2110 = vmatpush3.bf16.msra.mxu1 %v2412_v16  ;;  %1374 = vmatprep.mubr.bf16.mxu1 %v535_v17  ;;  %v1866_v16 = vld [vmem:[%s2604_s26 + $0x1f0] sm:$0x1]  ;;  %v466_v17 = vrot.slane %v1863_v12, 1 }
  0x43   : > { %2111 = vmatprep.subr.bf16.mxu1 %v2415_v21  ;;  %v465_v27 = vsel %vm399_vm0, %v463_v7, %v464_v8  ;;  %v470_v24 = vrot.slane %v1866_v16, 1  ;;  %v513_v7 = vsel %vm399_vm0, %v511_v2, %v512_v3  ;;  %v1896_v8 = vld [vmem:[%s2604_s26 + $0x1d0] sm:$0x1] }
  0x44   : > { %2072 = vmatpush3.bf16.msra.mxu0 %v2414_v20  ;;  %v551_v11 = vpack.c.bf16 %v465_v27, %v462_v0  ;;  %v1848_v20 = vld [vmem:[%s2604_s26 + $0x168] sm:$0xff]  ;;  %v468_v21 = vsel %vm399_vm0, %v466_v17, %v467_v18  ;;  %v1898_v0 = vld [vmem:[%s2604_s26 + $0x210] sm:$0x1]  ;;  %v515_v12 = vrot.slane %v1896_v8, 1  ;;  %v1485_v18 = vld [vmem:[%s2972_s5] sm:$0xff] }
  0x45   : > { %2183 = vmatprep.subr.bf16.mxu0 %v2417_v42  ;;  %v471_v59 = vsel %vm399_vm0, %v469_v19, %v470_v24  ;;  %v550_v22 = vpack.c.bf16 %v1848_v20, %v1847_v15  ;;  %v518_v14 = vrot.slane %v1898_v0, 1  ;;  %v1486_v19 = vld [vmem:[%s2972_s5 + $0x8] sm:$0xff]  ;;  %v2451_v24 = vmov 0.0|0.0  }
  0x46   : > { %2112 = vmatpush3.bf16.msra.mxu1 %v2416_v33  ;;  %v560_v31 = vpack.c.bf16 %v471_v59, %v468_v21  ;;  %v562_v33 = vpack.c.bf16 %v1882_v32, %v2754_v54  ;;  %v1850_v54 = vld [vmem:[%s2604_s26 + $0x1e8] sm:$0xff]  ;;  %v2278_v20 = vpack.c.bf16 %v1486_v19, %v1485_v18  ;;  %v1488_v21 = vld [vmem:[%s2972_s5 + $0x18] sm:$0xff]  ;;  %v1489_v59 = vld [vmem:[%s2972_s5 + $0x20] sm:$0xff] }
  0x47   : > { %1310 = vmatmul.mubr.bf16.vlgmr.msra.gmra.mrb[16].mxu0 %v532_v41  ;;  %v1874_v41 = vld [vmem:[%s2604_s26 + $0x200] sm:$0xff]  ;;  %2277 = vmatprep.subr.bf16.mxu1 %v2451_v24 }
  0x48   : > { %2184 = vmatpush3.bf16.msra.mxu0 %v2417_v42  ;;  %1317 = vmatprep.mubr.bf16.mxu0 %v542_v61  ;;  %v1887_v42 = vld [vmem:[%s2604_s26 + $0xc0] sm:$0xfe]  ;;  %v561_v23 = vpack.c.bf16 %v1874_v41, %v2765_v58  ;;  %v2424_v61 = vld [vmem:[%s2968_s1 + $0x238] sm:$0xff]  }
  0x49   : > { %1375 = vmatmul.mubr.bf16.vlgmr.msra.gmra.mrb[16].mxu1 %v534_v39  ;;  %2185 = vmatprep.subr.bf16.mxu0 %v2418_v44  ;;  %v1849_v39 = vld [vmem:[%s2604_s26 + $0x1a8] sm:$0xff]  ;;  %v502_v50 = vrot.slane %v1887_v42, 1  ;;  %v2453_v42 = vmov 0.0  }
  0x4a   : > { %1382 = vmatprep.mubr.bf16.mxu1 %v544_v43  ;;  %v1888_v43 = vld [vmem:[%s2604_s26 + $0xd0] sm:$0x1]  ;;  %v559_v60 = vpack.c.bf16 %v1850_v54, %v1849_v39  ;;  %2279 = vmatpush3.bf16.msra.mxu1 %v2278_v20  ;;  %v2296_v39 = vpack.c.bf16 %v1498_v38, %v1497_v57 }
  0x4b   : > { %v503_v52 = vrot.slane %v1888_v43, 1  ;;  %2280 = vmatprep.subr.bf16.mxu1 %v2451_v24  ;;  %v1499_v54 = vld [vmem:[%s2972_s5 + $0x70] sm:$0xff] }
  0x4c   : > { %2186 = vmatpush3.bf16.msra.mxu0 %v2418_v44  ;;  %v498_v44 = vsel %vm399_vm0, %v496_v37, %v497_v28  ;;  %v1496_v37 = vld [vmem:[%s2972_s5 + $0x58] sm:$0xff] }
  0x4d   : > { %2187 = vmatprep.subr.bf16.mxu0 %v2419_v55  ;;  %v536_v51 = vpack.c.bf16 %v501_v45, %v498_v44  ;;  %v504_v58 = vsel %vm399_vm0, %v502_v50, %v503_v52 }
  0x4f   : > { %1318 = vmatmul.mubr.bf16.gmra.mrb[20].mxu0 %v541_v62  ;;  %v508_v62 = vrot.slane %v1891_v63, 1  ;;  %v1899_v63 = vld [vmem:[%s2969_s2] ss:$0 sm:$0xff] }
  0x50   : > { %2188 = vmatpush3.bf16.msra.mxu0 %v2419_v55  ;;  %1325 = vmatprep.mubr.bf16.mxu0 %v551_v11  ;;  %v505_v55 = vrot.slane %v1889_v46, 1 }
  0x51   : > { %1383 = vmatmul.mubr.bf16.gmra.mrb[20].mxu1 %v543_v1  ;;  %2189 = vmatprep.subr.bf16.mxu0 %v2420_v9  ;;  %v509_v1 = vrot.slane %v1892_v47, 1 }
  0x52   : > { %1390 = vmatprep.mubr.bf16.mxu1 %v553_v10  ;;  %v507_v4 = vsel %vm399_vm0, %v505_v55, %v506_v56  ;;  %v514_v10 = vrot.slane %v1895_v5, 1 }
  0x53   : > { %v510_v6 = vsel %vm399_vm0, %v508_v62, %v509_v1  ;;  %v545_v27 = vpack.c.bf16 %v507_v4, %v504_v58 }
  0x54   : > { %2190 = vmatpush3.bf16.msra.mxu0 %v2420_v9  ;;  %v1897_v9 = vld [vmem:[%s2604_s26 + $0x200] sm:$0xfe]  ;;  %v554_v11 = vpack.c.bf16 %v513_v7, %v510_v6  ;;  %v516_v15 = vsel %vm399_vm0, %v514_v10, %v515_v12 }
  0x55   : > { %2191 = vmatprep.subr.bf16.mxu0 %v2421_v53  ;;  %v517_v13 = vrot.slane %v1897_v9, 1 }
  0x57   : > { %1326 = vmatmul.mubr.bf16.gmra.mrb[24].mxu0 %v550_v22  ;;  %v519_v16 = vsel %vm399_vm0, %v517_v13, %v518_v14  ;;  %v1490_v22 = vld [vmem:[%s2972_s5 + $0x28] sm:$0xff] }
  0x58   : > { %2192 = vmatpush3.bf16.msra.mxu0 %v2421_v53  ;;  %1333 = vmatprep.mubr.bf16.mxu0 %v560_v31  ;;  %v563_v17 = vpack.c.bf16 %v519_v16, %v516_v15  ;;  %v1487_v53 = vld [vmem:[%s2972_s5 + $0x10] sm:$0xff]  ;;  %v1493_v31 = vld [vmem:[%s2972_s5 + $0x40] sm:$0xff] }
  0x59   : > { %1391 = vmatmul.mubr.bf16.gmra.mrb[24].mxu1 %v552_v25  ;;  %2193 = vmatprep.subr.bf16.mxu0 %v2422_v35  ;;  %v2281_v32 = vpack.c.bf16 %v1488_v21, %v1487_v53  ;;  %v2284_v25 = vpack.c.bf16 %v1490_v22, %v1489_v59 }
  0x5a   : > { %1398 = vmatprep.mubr.bf16.mxu1 %v562_v33  ;;  %v1494_v33 = vld [vmem:[%s2972_s5 + $0x48] sm:$0xff] }
  0x5b   : > { %2282 = vmatpush3.bf16.msra.mxu1 %v2281_v32  ;;  %v2290_v34 = vpack.c.bf16 %v1494_v33, %v1493_v31 }
  0x5c   : > { %2194 = vmatpush3.bf16.msra.mxu0 %v2422_v35  ;;  %2283 = vmatprep.subr.bf16.mxu1 %v2451_v24  ;;  %v1495_v35 = vld [vmem:[%s2972_s5 + $0x50] sm:$0xff] }
  0x5d   : > { %2195 = vmatprep.subr.bf16.mxu0 %v2423_v40  ;;  %v2293_v28 = vpack.c.bf16 %v1496_v37, %v1495_v35 }
  0x5f   : > { %1334 = vmatmul.mubr.bf16.gmra.mrb[28].mxu0 %v559_v60  ;;  %2285 = vmatpush3.bf16.msra.mxu1 %v2284_v25 }
  0x60   : > { %2196 = vmatpush3.bf16.msra.mxu0 %v2423_v40  ;;  %2199 = vmatprep.mubr.bf16.mxu0 %v536_v51  ;;  %v1500_v40 = vld [vmem:[%s2972_s5 + $0x78] sm:$0xff] }
  0x61   : > { %1399 = vmatmul.mubr.bf16.gmra.mrb[28].mxu1 %v561_v23  ;;  %2197 = vmatprep.subr.bf16.mxu0 %v2424_v61  ;;  %v2299_v41 = vpack.c.bf16 %v1500_v40, %v1499_v54 }
  0x62   : > { %2286 = vmatprep.subr.bf16.mxu1 %v2451_v24  ;;  %2239 = vmatprep.mubr.msk.f32.mxu1 %vm2452_vm1, %v2453_v42 }
  0x63   : > { %2288 = vmatpush3.bf16.msra.mxu1 %v2287_v30 }
  0x64   : > { %2198 = vmatpush3.bf16.msra.mxu0 %v2424_v61  ;;  %2289 = vmatprep.subr.bf16.mxu1 %v2451_v24 }
  0x65   : > { %2301 = vmatprep.subr.bf16.mxu0 %v2451_v24 }
  0x67   : > { %2200 = vmatmul.mubr.bf16.vlgmr.msra.gmra.mrb[32].mxu0 %v545_v27  ;;  %2291 = vmatpush3.bf16.msra.mxu1 %v2290_v34 }
  0x68   : > { %2203 = vmatprep.mubr.bf16.mxu0 %v554_v11  ;;  %2303 = vmatpush3.bf16.msra.mxu0 %v2278_v20 }
  0x69   : > { %2304 = vmatprep.subr.bf16.mxu0 %v2451_v24  ;;  %2292 = vmatprep.subr.bf16.mxu1 %v2451_v24 }
  0x6b   : > { %2294 = vmatpush3.bf16.msra.mxu1 %v2293_v28 }
  0x6c   : > { %2306 = vmatpush3.bf16.msra.mxu0 %v2281_v32  ;;  %2295 = vmatprep.subr.bf16.mxu1 %v2451_v24 }
  0x6d   : > { %2307 = vmatprep.subr.bf16.mxu0 %v2451_v24 }
  0x6f   : > { %2204 = vmatmul.mubr.bf16.gmra.mrb[36].mxu0 %v563_v17  ;;  %2297 = vmatpush3.bf16.msra.mxu1 %v2296_v39 }
  0x70   : > { %2309 = vmatpush3.bf16.msra.mxu0 %v2284_v25  ;;  %2298 = vmatprep.subr.bf16.mxu1 %v2451_v24 }
  0x71   : > { %2310 = vmatprep.subr.bf16.mxu0 %v2451_v24  ;;  %2274 = vmatprep.mubr.msk.f32.mxu0 %vm2452_vm1, %v2453_v42 }
  0x73   : > { %2300 = vmatpush3.bf16.msra.mxu1 %v2299_v41 }
  0x74   : > { %2312 = vmatpush3.bf16.msra.mxu0 %v2287_v30 }
  0x75   : > { %2313 = vmatprep.subr.bf16.mxu0 %v2451_v24 }
  0x78   : > { %2315 = vmatpush3.bf16.msra.mxu0 %v2290_v34 }
  0x79   : > { %2316 = vmatprep.subr.bf16.mxu0 %v2451_v24 }
  0x7c   : > { %2318 = vmatpush3.bf16.msra.mxu0 %v2293_v28 }
  0x7d   : > { %2319 = vmatprep.subr.bf16.mxu0 %v2451_v24 }
  0x80   : > { %2321 = vmatpush3.bf16.msra.mxu0 %v2296_v39 }
  0x81   : > { %2322 = vmatprep.subr.bf16.mxu0 %v2451_v24 }
  0x84   : > { %2324 = vmatpush3.bf16.msra.mxu0 %v2299_v41 }
  0xfa   : > { %v1993_v43 = vpop.f32.mrb[0].mxu0 }
  0xfb   : > { %v1994_v44 = vpop.f32.mrb[1].mxu0 }
  0xfc   : > { %v1995_v45 = vadd.f32 %v1994_v44, %v1993_v43  ;;  %v1996_v46 = vpop.f32.mrb[2].mxu0  ;;  %v2033_v49 = vpop.f32.mrb[0].mxu1 }
  0xfd   : > { %v1997_v36 = vpop.f32.mrb[3].mxu0  ;;  %v2034_v60 = vpop.f32.mrb[1].mxu1 }
  0xfe   : > { %v1998_v47 = vadd.f32 %v1997_v36, %v1996_v46  ;;  %v1182_v48 = vadd.f32 %v1995_v45, %v1899_v63  ;;  %v2035_v50 = vadd.f32 %v2034_v60, %v2033_v49  ;;  %v2036_v51 = vpop.f32.mrb[2].mxu1 }
  0xff   : > { %v2037_v52 = vpop.f32.mrb[3].mxu1 }
 0x100   : > { %v1185_v23 = vadd.f32 %v1998_v47, %v1899_v63  ;;  %v1247_v55 = vadd.f32 %v2035_v50, %v1182_v48  ;;  %v2038_v56 = vadd.f32 %v2037_v52, %v2036_v51 }
 0x102   : > { %v1999_v61 = vpop.f32.mrb[4].mxu0  ;;  %v1250_v1 = vadd.f32 %v2038_v56, %v1185_v23 }
 0x103   : > { %v2000_v62 = vpop.f32.mrb[5].mxu0 }
 0x104   : > { %v2001_v2 = vadd.f32 %v2000_v62, %v1999_v61  ;;  %v2002_v3 = vpop.f32.mrb[6].mxu0  ;;  %v2039_v6 = vpop.f32.mrb[4].mxu1 }
 0x105   : > { %v2003_v58 = vpop.f32.mrb[7].mxu0  ;;  %v2040_v7 = vpop.f32.mrb[5].mxu1 }
 0x106   : > { %v2004_v4 = vadd.f32 %v2003_v58, %v2002_v3  ;;  %v1190_v5 = vadd.f32 %v2001_v2, %v1899_v63  ;;  %v2041_v9 = vadd.f32 %v2040_v7, %v2039_v6  ;;  %v2042_v0 = vpop.f32.mrb[6].mxu1 }
 0x107   : > { %v2043_v27 = vpop.f32.mrb[7].mxu1 }
 0x108   : > { %v1193_v8 = vadd.f32 %v2004_v4, %v1899_v63  ;;  %v1255_v10 = vadd.f32 %v2041_v9, %v1190_v5  ;;  %v2044_v11 = vadd.f32 %v2043_v27, %v2042_v0 }
 0x10a   : > { %v2005_v12 = vpop.f32.mrb[8].mxu0  ;;  %v1258_v13 = vadd.f32 %v2044_v11, %v1193_v8 }
 0x10b   : > { %v2006_v14 = vpop.f32.mrb[9].mxu0 }
 0x10c   : > { %v2007_v15 = vadd.f32 %v2006_v14, %v2005_v12  ;;  %v2008_v16 = vpop.f32.mrb[10].mxu0  ;;  %v2045_v20 = vpop.f32.mrb[8].mxu1 }
 0x10d   : > { %v2009_v17 = vpop.f32.mrb[11].mxu0  ;;  %v2046_v24 = vpop.f32.mrb[9].mxu1 }
 0x10e   : > { %v2010_v18 = vadd.f32 %v2009_v17, %v2008_v16  ;;  %v1198_v19 = vadd.f32 %v2007_v15, %v1899_v63  ;;  %v2047_v21 = vadd.f32 %v2046_v24, %v2045_v20  ;;  %v2048_v32 = vpop.f32.mrb[10].mxu1 }
 0x10f   : > { %v2049_v59 = vpop.f32.mrb[11].mxu1 }
 0x110   : > { %v1201_v53 = vadd.f32 %v2010_v18, %v1899_v63  ;;  %v1263_v22 = vadd.f32 %v2047_v21, %v1198_v19  ;;  %v2050_v25 = vadd.f32 %v2049_v59, %v2048_v32 }
 0x112   : > { %v2011_v26 = vpop.f32.mrb[12].mxu0  ;;  %v1266_v29 = vadd.f32 %v2050_v25, %v1201_v53 }
 0x113   : > { %v2012_v30 = vpop.f32.mrb[13].mxu0 }
 0x114   : > { %v2013_v31 = vadd.f32 %v2012_v30, %v2011_v26  ;;  %v2014_v33 = vpop.f32.mrb[14].mxu0  ;;  %v2051_v28 = vpop.f32.mrb[12].mxu1 }
 0x115   : > { %v2015_v34 = vpop.f32.mrb[15].mxu0  ;;  %v2052_v57 = vpop.f32.mrb[13].mxu1 }
 0x116   : > { %v2016_v35 = vadd.f32 %v2015_v34, %v2014_v33  ;;  %v1206_v37 = vadd.f32 %v2013_v31, %v1899_v63  ;;  %v2053_v39 = vadd.f32 %v2052_v57, %v2051_v28  ;;  %v2054_v54 = vpop.f32.mrb[14].mxu1 }
 0x117   : > { %v2055_v40 = vpop.f32.mrb[15].mxu1 }
 0x118   : > { %v1209_v38 = vadd.f32 %v2016_v35, %v1899_v63  ;;  %v1271_v41 = vadd.f32 %v2053_v39, %v1206_v37  ;;  %v2056_v42 = vadd.f32 %v2055_v40, %v2054_v54 }
 0x11a   : > { %v1274_v43 = vadd.f32 %v2056_v42, %v1209_v38  ;;  %v2073_v44 = vpop.f32.mrb[16].mxu0 }
 0x11b   : > { %v2074_v46 = vpop.f32.mrb[17].mxu0 }
 0x11c   : > { %v2113_v45 = vpop.f32.mrb[16].mxu1  ;;  %v2075_v47 = vadd.f32 %v2074_v46, %v2073_v44  ;;  %v2076_v48 = vpop.f32.mrb[18].mxu0 }
 0x11d   : > { %v2114_v36 = vpop.f32.mrb[17].mxu1  ;;  %v2077_v23 = vpop.f32.mrb[19].mxu0 }
 0x11e   : > { %v2115_v49 = vadd.f32 %v2114_v36, %v2113_v45  ;;  %v2116_v60 = vpop.f32.mrb[18].mxu1  ;;  %v1312_v51 = vadd.f32 %v2075_v47, %v1247_v55  ;;  %v2078_v52 = vadd.f32 %v2077_v23, %v2076_v48 }
 0x11f   : > { %v2117_v50 = vpop.f32.mrb[19].mxu1 }
 0x120   : > { %v2118_v56 = vadd.f32 %v2117_v50, %v2116_v60  ;;  %v1315_v63 = vadd.f32 %v2078_v52, %v1250_v1  ;;  %v1377_v61 = vadd.f32 %v2115_v49, %v1312_v51 }
 0x122   : > { %v2079_v62 = vpop.f32.mrb[20].mxu0  ;;  %v1380_v3 = vadd.f32 %v2118_v56, %v1315_v63 }
 0x123   : > { %v2080_v58 = vpop.f32.mrb[21].mxu0 }
 0x124   : > { %v2119_v2 = vpop.f32.mrb[20].mxu1  ;;  %v2081_v5 = vadd.f32 %v2080_v58, %v2079_v62  ;;  %v2082_v6 = vpop.f32.mrb[22].mxu0 }
 0x125   : > { %v2120_v4 = vpop.f32.mrb[21].mxu1  ;;  %v2083_v9 = vpop.f32.mrb[23].mxu0 }
 0x126   : > { %v2121_v7 = vadd.f32 %v2120_v4, %v2119_v2  ;;  %v2122_v8 = vpop.f32.mrb[22].mxu1  ;;  %v1320_v27 = vadd.f32 %v2081_v5, %v1255_v10  ;;  %v2084_v11 = vadd.f32 %v2083_v9, %v2082_v6 }
 0x127   : > { %v2123_v0 = vpop.f32.mrb[23].mxu1 }
 0x128   : > { %v2124_v12 = vadd.f32 %v2123_v0, %v2122_v8  ;;  %v1323_v14 = vadd.f32 %v2084_v11, %v1258_v13  ;;  %v1385_v55 = vadd.f32 %v2121_v7, %v1320_v27 }
 0x12a   : > { %v2085_v15 = vpop.f32.mrb[24].mxu0  ;;  %v1388_v1 = vadd.f32 %v2124_v12, %v1323_v14  ;;  %v1572_v14 = vlaneseq }
 0x12b   : > { %v2086_v17 = vpop.f32.mrb[25].mxu0 }
 0x12c   : > { %v2125_v16 = vpop.f32.mrb[24].mxu1  ;;  %v2087_v19 = vadd.f32 %v2086_v17, %v2085_v15  ;;  %v2088_v20 = vpop.f32.mrb[26].mxu0 }
 0x12d   : > { %v2126_v18 = vpop.f32.mrb[25].mxu1  ;;  %v2089_v21 = vpop.f32.mrb[27].mxu0 }
 0x12e   : > { %v2127_v24 = vadd.f32 %v2126_v18, %v2125_v16  ;;  %v2128_v53 = vpop.f32.mrb[26].mxu1  ;;  %v1328_v59 = vadd.f32 %v2087_v19, %v1263_v22  ;;  %v2090_v25 = vadd.f32 %v2089_v21, %v2088_v20 }
 0x12f   : > { %v2129_v32 = vpop.f32.mrb[27].mxu1 }
 0x130   : > { %v2130_v26 = vadd.f32 %v2129_v32, %v2128_v53  ;;  %v1331_v30 = vadd.f32 %v2090_v25, %v1266_v29  ;;  %v1393_v10 = vadd.f32 %v2127_v24, %v1328_v59 }
 0x132   : > { %v2091_v31 = vpop.f32.mrb[28].mxu0  ;;  %v1396_v13 = vadd.f32 %v2130_v26, %v1331_v30 }
 0x133   : > { %v2092_v34 = vpop.f32.mrb[29].mxu0 }
 0x134   : > { %v2131_v33 = vpop.f32.mrb[28].mxu1  ;;  %v2093_v37 = vadd.f32 %v2092_v34, %v2091_v31  ;;  %v2094_v28 = vpop.f32.mrb[30].mxu0 }
 0x135   : > { %v2132_v35 = vpop.f32.mrb[29].mxu1  ;;  %v2095_v39 = vpop.f32.mrb[31].mxu0 }
 0x136   : > { %v2133_v57 = vadd.f32 %v2132_v35, %v2131_v33  ;;  %v2134_v38 = vpop.f32.mrb[30].mxu1  ;;  %v1336_v40 = vadd.f32 %v2093_v37, %v1271_v41  ;;  %v2096_v42 = vadd.f32 %v2095_v39, %v2094_v28 }
 0x137   : > { %v2135_v54 = vpop.f32.mrb[31].mxu1 }
 0x138   : > { %v2136_v44 = vadd.f32 %v2135_v54, %v2134_v38  ;;  %v1339_v45 = vadd.f32 %v2096_v42, %v1274_v43  ;;  %v1401_v22 = vadd.f32 %v2133_v57, %v1336_v40 }
 0x13a   : > { %v2201_v46 = vpop.f32.mrb[32].mxu0  ;;  %v1404_v36 = vadd.f32 %v2136_v44, %v1339_v45 }
 0x13b   : > { %v1450_v29 = vadd.f32 %v2201_v46, %v1385_v55  ;;  %v1441_v47 = vpop.f32.mrb[33].mxu0  ;;  %v1573_v55 = vshrl.u32 %v1572_v14, 7 }
 0x13c   : > { %v1442_v48 = vadd.f32 %v1441_v47, %v1377_v61  ;;  %v2202_v49 = vpop.f32.mrb[34].mxu0 }
 0x13d   : > { %v1453_v60 = vadd.f32 %v2202_v49, %v1388_v1  ;;  %v1444_v23 = vpop.f32.mrb[35].mxu0  ;;  %v1574_v15 = vsub.s32 0, %v1573_v55 }
 0x13e   : > { %v1445_v50 = vadd.f32 %v1444_v23, %v1380_v3 }
 0x140   : > { %v1472_v51 = vadd.f32 %v1445_v50, %v1442_v48 }
 0x142   : > { %v1473_v52 = vadd.f32 %v1472_v51, %v1450_v29  ;;  %v2205_v56 = vpop.f32.mrb[36].mxu0 }
 0x143   : > { %v1466_v63 = vadd.f32 %v2205_v56, %v1401_v22  ;;  %v1457_v62 = vpop.f32.mrb[37].mxu0 }
 0x144   : > { %v1458_v2 = vadd.f32 %v1457_v62, %v1393_v10  ;;  %v1474_v41 = vadd.f32 %v1473_v52, %v1453_v60  ;;  %v2206_v58 = vpop.f32.mrb[38].mxu0 }
 0x145   : > { %v1469_v4 = vadd.f32 %v2206_v58, %v1404_v36  ;;  %v1460_v43 = vpop.f32.mrb[39].mxu0 }
 0x146   : > { %v1475_v5 = vadd.f32 %v1474_v41, %v1458_v2  ;;  %v1461_v6 = vadd.f32 %v1460_v43, %v1396_v13 }
 0x148   : > { %v1476_v7 = vadd.f32 %v1475_v5, %v1461_v6 }
 0x14a   : > { %v1477_v8 = vadd.f32 %v1476_v7, %v1466_v63 }
 0x14c   : > { %v1478_v9 = vadd.f32 %v1477_v8, %v1469_v4 }
 0x14e   : > { %v1479_v61 = vrot.slane %v1478_v9, 4 }
 0x150   : > { %v1480_v0 = vadd.f32 %v1479_v61, %v1478_v9 }
 0x152   : > { %v1481_v27 = vrot.slane %v1480_v0, 2 }
 0x154   : > { %v1482_v11 = vadd.f32 %v1481_v27, %v1480_v0 }
 0x156   : > { %v1483_v3 = vrot.slane %v1482_v11, 1 }
 0x158   : > { %v1484_v12 = vadd.f32 %v1483_v3, %v1482_v11 }
 0x15a   : > { %2240 = vmatmul.mubr.f32.vlgmr.msra.gmra.mrb[32].mxu1 %v1484_v12 }
 0x22d   : > { %v1567_v16 = vpop.f32.mrb[32].mxu1 }
 0x22e   : > { %v1571_v1 = vmul.f32 0.015625, %v1567_v16  ;;  %v2241_v17 = vpop.f32.mrb[33].mxu1 }
 0x230   : > { %v1575_v18 = vrot.slane %v1571_v1, %v1574_v15 }
 0x232   : > { %v1576_v19 = vsub.f32 %v1442_v48, %v1575_v18  ;;  %v1577_v20 = vsub.f32 %v1445_v50, %v1575_v18  ;;  %v1578_v24 = vsub.f32 %v1450_v29, %v1575_v18  ;;  %v1579_v53 = vsub.f32 %v1453_v60, %v1575_v18  ;;  %v1972_v50 = vld [vmem:[%s2970_s3] ss:$0 sm:$0xff] }
 0x233   : > { %v1580_v59 = vsub.f32 %v1458_v2, %v1575_v18  ;;  %v1581_v30 = vsub.f32 %v1461_v6, %v1575_v18  ;;  %v1582_v33 = vsub.f32 %v1466_v63, %v1575_v18  ;;  %v1583_v35 = vsub.f32 %v1469_v4, %v1575_v18  ;;  %v1973_v4 = vld [vmem:[%s2971_s4] ss:$0 sm:$0xff] }
 0x234   : > { %v1584_v21 = vmul.f32 %v1576_v19, %v1576_v19  ;;  %v1585_v32 = vmul.f32 %v1577_v20, %v1577_v20  ;;  %v1586_v25 = vmul.f32 %v1578_v24, %v1578_v24  ;;  %v1587_v10 = vmul.f32 %v1579_v53, %v1579_v53 }
 0x235   : > { %v1588_v13 = vmul.f32 %v1580_v59, %v1580_v59  ;;  %v1589_v37 = vmul.f32 %v1581_v30, %v1581_v30  ;;  %v1590_v57 = vmul.f32 %v1582_v33, %v1582_v33  ;;  %v1591_v39 = vmul.f32 %v1583_v35, %v1583_v35 }
 0x236   : > { %v1592_v26 = vadd.f32 %v1585_v32, %v1584_v21 }
 0x238   : > { %v1593_v31 = vadd.f32 %v1592_v26, %v1586_v25 }
 0x23a   : > { %v1594_v34 = vadd.f32 %v1593_v31, %v1587_v10 }
 0x23c   : > { %v1595_v28 = vadd.f32 %v1594_v34, %v1588_v13 }
 0x23e   : > { %v1596_v38 = vadd.f32 %v1595_v28, %v1589_v37 }
 0x240   : > { %v1597_v54 = vadd.f32 %v1596_v38, %v1590_v57 }
 0x242   : > { %v1598_v40 = vadd.f32 %v1597_v54, %v1591_v39 }
 0x244   : > { %v1599_v42 = vrot.slane %v1598_v40, 4 }
 0x246   : > { %v1600_v44 = vadd.f32 %v1599_v42, %v1598_v40 }
 0x248   : > { %v1601_v45 = vrot.slane %v1600_v44, 2 }
 0x24a   : > { %v1602_v22 = vadd.f32 %v1601_v45, %v1600_v44 }
 0x24c   : > { %v1603_v46 = vrot.slane %v1602_v22, 1 }
 0x24e   : > { %v1604_v36 = vadd.f32 %v1603_v46, %v1602_v22 }
 0x250   : > { %2275 = vmatmul.mubr.f32.vlgmr.msra.gmra.mrb[40].mxu0 %v1604_v36 }
 0x323   : > { %v1671_v29 = vpop.f32.mrb[40].mxu0 }
 0x324   : > { %v1675_v47 = vmul.f32 0.015625, %v1671_v29  ;;  %v2276_v48 = vpop.f32.mrb[41].mxu0 }
 0x326   : > { %v1676_v49 = vadd.f32 1e-05, %v1675_v47 }
 0x328   : > { %2425 = vrsqrt.f32 %v1676_v49 }
 0x332   : > { %v2426_v60 = vpop.eup %2425 }
 0x333   : > { %v1681_v23 = vrot.slane %v2426_v60, %v1574_v15 }
 0x335   : > { %v1682_v51 = vmul.f32 %v1681_v23, %v1576_v19  ;;  %v1683_v52 = vmul.f32 %v1681_v23, %v1577_v20  ;;  %v1684_v56 = vmul.f32 %v1681_v23, %v1578_v24  ;;  %v1685_v63 = vmul.f32 %v1681_v23, %v1579_v53 }
 0x336   : > { %v1686_v62 = vmul.f32 %v1681_v23, %v1580_v59  ;;  %v1687_v2 = vmul.f32 %v1681_v23, %v1581_v30  ;;  %v1688_v41 = vmul.f32 %v1681_v23, %v1582_v33  ;;  %v1689_v58 = vmul.f32 %v1681_v23, %v1583_v35 }
 0x337   : > { %v1697_v43 = vmul.f32 %v1972_v50, %v1682_v51  ;;  %v1698_v5 = vmul.f32 %v1972_v50, %v1683_v52  ;;  %v1699_v6 = vmul.f32 %v1972_v50, %v1684_v56  ;;  %v1700_v7 = vmul.f32 %v1972_v50, %v1685_v63 }
 0x338   : > { %v1701_v8 = vmul.f32 %v1972_v50, %v1686_v62  ;;  %v1702_v9 = vmul.f32 %v1972_v50, %v1687_v2  ;;  %v1703_v61 = vmul.f32 %v1972_v50, %v1688_v41  ;;  %v1704_v0 = vmul.f32 %v1972_v50, %v1689_v58 }
 0x339   : > { %v1712_v27 = vadd.f32 %v1973_v4, %v1697_v43  ;;  %v1713_v11 = vadd.f32 %v1973_v4, %v1698_v5  ;;  %v1714_v3 = vadd.f32 %v1973_v4, %v1699_v6  ;;  %v1715_v12 = vadd.f32 %v1973_v4, %v1700_v7 }
 0x33a   : > { %v1716_v14 = vadd.f32 %v1973_v4, %v1701_v8  ;;  %v1717_v55 = vadd.f32 %v1973_v4, %v1702_v9  ;;  %v1718_v15 = vadd.f32 %v1973_v4, %v1703_v61  ;;  %v1719_v16 = vadd.f32 %v1973_v4, %v1704_v0 }
 0x33b   : > { %v1720_v1 = vmax.f32 %v1712_v27, 0.0  ;;  %v1721_v17 = vmax.f32 %v1713_v11, 0.0  ;;  %v1722_v18 = vmax.f32 %v1714_v3, 0.0  ;;  %v1723_v19 = vmax.f32 %v1715_v12, 0.0 }
 0x33c   : > { %v1724_v20 = vmax.f32 %v1716_v14, 0.0  ;;  %v1725_v24 = vmax.f32 %v1717_v55, 0.0  ;;  %v1726_v53 = vmax.f32 %v1718_v15, 0.0  ;;  %v1727_v21 = vmax.f32 %v1719_v16, 0.0 }
 0x33d   : > { %1728 = vst [vmem:[%s273_s14] sm:$0xff] %v1720_v1  ;;  %1729 = vst [vmem:[%s273_s14 + $0x8] sm:$0xff] %v1721_v17 }
 0x33e   : > { %1730 = vst [vmem:[%s273_s14 + $0x10] sm:$0xff] %v1722_v18  ;;  %1731 = vst [vmem:[%s273_s14 + $0x18] sm:$0xff] %v1723_v19 }
 0x33f   : > { %1732 = vst [vmem:[%s273_s14 + $0x20] sm:$0xff] %v1724_v20  ;;  %1733 = vst [vmem:[%s273_s14 + $0x28] sm:$0xff] %v1725_v24 }
 0x340   : > { %1734 = vst [vmem:[%s273_s14 + $0x30] sm:$0xff] %v1726_v53  ;;  %1735 = vst [vmem:[%s273_s14 + $0x38] sm:$0xff] %v1727_v21 }
 0x341 PF: > { %s16_s23 = sadd.s32 1, %s2449_s23   ;;  %s2974_s21 = smov %s2445_s22 }
 0x342   : > { %p13_p5 = scmp.ge.s32.totalorder %s16_s23, 4   ;;  %s2975_s22 = smov %s2977_s24 }
 0x344   :  { %15 = sbr.rel (!%p13_p5) target bundleno = 2 (0x2), region = 77 }

// kernel: transunet_forward.12
= control target key start
LH: loop header
LB: loop body
LE: loop exit
PB: predicated region body
PF: predicated region fallthrough
CT: control target
= control target key end

     0   :  { %s3912_s21 = smov 0   ;;  %s3914_s22 = smov 0   ;;  %s5235_s0 = inlined_call_operand.vmem [shape: f32[2,16,16,128], index: 0, kind: input, shape index: {}]   ;;  %s5236_s1 = inlined_call_operand.vmem [shape: bf16[1152,128], index: 1, kind: input, shape index: {}]   ;;  %s5237_s2 = inlined_call_operand.vmem [shape: f32[1,128], index: 2, kind: input, shape index: {}]   ;;  %s5238_s3 = inlined_call_operand.vmem [shape: f32[1,128], index: 3, kind: input, shape index: {}]   ;;  %s5239_s4 = inlined_call_operand.vmem [shape: f32[1,128], index: 4, kind: input, shape index: {}]   ;;  %s5240_s5 = inlined_call_operand.vmem [shape: f32[128,128], index: 5, kind: input, shape index: {}]   ;;  %s5241_s6 = inlined_call_operand.vmem [shape: f32[2,256,128], index: 6, kind: output, shape index: {}]  }
   0x1   :  { %s3916_s23 = smov 0  }
   0x2 LB: > { %s28_s24 = sadd.s32 1, %s3868_s22  ;;  %p2799_p0 = scmp.ge.s32.totalorder %s3872_s23, 1  ;;  %s3872_s23 = sphi %s3916_s23, %s16_s23   ;;  %s3868_s22 = sphi %s3914_s22, %s5243_s22   ;;  %s3864_s21 = sphi %s3912_s21, %s5242_s21  }
   0x3   : > { %p30_p1 = scmp.ge.s32.totalorder %s28_s24, 2  ;;  %p226_p2 = scmp.lt.s32.totalorder %s3872_s23, 3 }
   0x5   : > { %s5245_s24 = smov (%p30_p1, %s28_s24), 0  ;;  %p227_p3 = pnand %p2799_p0, %p226_p2 }
   0x6   : > { %v3774_v0 = vld [vmem:[%s5236_s1 + $0x40] sm:$0xff] (!%p227_p3)   ;;  %v3874_v2 = vmov (!%p227_p3), 0.0   ;;  %v3778_v5 = vld [vmem:[%s5236_s1 + $0x48] sm:$0xff] (!%p227_p3)   ;;  %v3782_v9 = vld [vmem:[%s5236_s1 + $0x50] sm:$0xff] (!%p227_p3)   ;;  %p260_p4 = scmp.lt.s32.totalorder (!%p227_p3), %s3864_s21, 1  ;;  %v3875_v39 = vmov (!%p227_p3), 0.0|0.0  }
   0x7   : > { %230 = sbr.rel (%p227_p3) target bundleno = 1151 (0x47f), region = 44  ;;  %v3775_v1 = vld [vmem:[%s5236_s1] sm:$0xff] (!%p227_p3)   ;;  %277 = vst [vmem:[#allocation2] sm:$0xff] (!%p227_p3), %v3874_v2  ;;  %278 = vst [vmem:[#allocation2 + $0x8] sm:$0xff] (!%p227_p3), %v3874_v2  ;;  %3075 = vmatprep.subr.bf16.mxu0 (!%p227_p3), %v3774_v0  ;;  %v3779_v6 = vld [vmem:[%s5236_s1 + $0x8] sm:$0xff] (!%p227_p3)   ;;  %vm3876_vm0 = vmmov (!%p227_p3), 0  }
   0x8   : > { %279 = vst [vmem:[#allocation2 + $0x10] sm:$0x3] (!%p227_p3), %v3874_v2  ;;  %280 = vst [vmem:[#allocation2 + $0x18] sm:$0xff] (!%p227_p3), %v3874_v2  ;;  %v3776_v3 = vld [vmem:[%s5236_s1 + $0xc0] sm:$0xff] (!%p227_p3)   ;;  %3076 = vmatpush3.bf16.msra.mxu0 (!%p227_p3), %v3775_v1  ;;  %v3780_v7 = vld [vmem:[%s5236_s1 + $0xc8] sm:$0xff] (!%p227_p3)  }
   0x9   : > { %281 = vst [vmem:[#allocation2 + $0x20] sm:$0xff] (!%p227_p3), %v3874_v2  ;;  %282 = vst [vmem:[#allocation2 + $0x28] sm:$0x3] (!%p227_p3), %v3874_v2  ;;  %v3777_v4 = vld [vmem:[%s5236_s1 + $0x80] sm:$0xff] (!%p227_p3)   ;;  %3187 = vmatprep.subr.bf16.mxu1 (!%p227_p3), %v3776_v3  ;;  %3077 = vmatprep.subr.bf16.mxu0 (!%p227_p3), %v3778_v5  ;;  %v3781_v8 = vld [vmem:[%s5236_s1 + $0x88] sm:$0xff] (!%p227_p3)  }
   0xa   : > { %283 = vst [vmem:[#allocation2 + $0x30] sm:$0xff] (!%p227_p3), %v3874_v2  ;;  %284 = vst [vmem:[#allocation2 + $0x38] sm:$0xff] (!%p227_p3), %v3874_v2  ;;  %3188 = vmatpush3.bf16.msra.mxu1 (!%p227_p3), %v3777_v4  ;;  %v3783_v10 = vld [vmem:[%s5236_s1 + $0x10] sm:$0xff] (!%p227_p3)   ;;  %v3786_v13 = vld [vmem:[%s5236_s1 + $0x58] sm:$0xff] (!%p227_p3)  }
   0xb   : > { %285 = vst [vmem:[#allocation2 + $0x40] sm:$0x3] (!%p227_p3), %v3874_v2  ;;  %286 = vst [vmem:[#allocation2 + $0x48] sm:$0xff] (!%p227_p3), %v3874_v2  ;;  %3189 = vmatprep.subr.bf16.mxu1 (!%p227_p3), %v3780_v7  ;;  %v3784_v11 = vld [vmem:[%s5236_s1 + $0xd0] sm:$0xff] (!%p227_p3)   ;;  %v3787_v14 = vld [vmem:[%s5236_s1 + $0x18] sm:$0xff] (!%p227_p3)  }
   0xc   : > { %287 = vst [vmem:[#allocation2 + $0x50] sm:$0xff] (!%p227_p3), %v3874_v2  ;;  %288 = vst [vmem:[#allocation2 + $0x58] sm:$0x3] (!%p227_p3), %v3874_v2  ;;  %3078 = vmatpush3.bf16.msra.mxu0 (!%p227_p3), %v3779_v6  ;;  %v3785_v12 = vld [vmem:[%s5236_s1 + $0x90] sm:$0xff] (!%p227_p3)   ;;  %v3788_v15 = vld [vmem:[%s5236_s1 + $0xd8] sm:$0xff] (!%p227_p3)  }
   0xd   : > { %289 = vst [vmem:[#allocation2 + $0x60] sm:$0xff] (!%p227_p3), %v3874_v2  ;;  %290 = vst [vmem:[#allocation2 + $0x68] sm:$0xff] (!%p227_p3), %v3874_v2  ;;  %3079 = vmatprep.subr.bf16.mxu0 (!%p227_p3), %v3782_v9  ;;  %v3789_v16 = vld [vmem:[%s5236_s1 + $0x98] sm:$0xff] (!%p227_p3)   ;;  %v3790_v17 = vld [vmem:[%s5236_s1 + $0x60] sm:$0xff] (!%p227_p3)  }
   0xe   : > { %291 = vst [vmem:[#allocation2 + $0x70] sm:$0x3] %v3874_v2  ;;  %292 = vst [vmem:[#allocation2 + $0x78] sm:$0xff] %v3874_v2  ;;  %3190 = vmatpush3.bf16.msra.mxu1 %v3781_v8  ;;  %v3791_v18 = vld [vmem:[%s5236_s1 + $0x20] sm:$0xff]   ;;  %v3794_v21 = vld [vmem:[%s5236_s1 + $0x68] sm:$0xff]   ;;  %s5247_s21 = smov (!%p260_p4, %s3864_s21), 1 }
   0xf   : > { %293 = vst [vmem:[#allocation2 + $0x80] sm:$0xff] %v3874_v2  ;;  %294 = vst [vmem:[#allocation2 + $0x88] sm:$0x3] %v3874_v2  ;;  %3191 = vmatprep.subr.bf16.mxu1 %v3784_v11  ;;  %v3792_v19 = vld [vmem:[%s5236_s1 + $0xe0] sm:$0xff]   ;;  %v3795_v22 = vld [vmem:[%s5236_s1 + $0x28] sm:$0xff]   ;;  %s3073_s17 = sshll.u32 %s5247_s21, 8 }
  0x10   : > { %295 = vst [vmem:[#allocation2 + $0x90] sm:$0xff] %v3874_v2  ;;  %296 = vst [vmem:[#allocation2 + $0x98] sm:$0xff] %v3874_v2  ;;  %3080 = vmatpush3.bf16.msra.mxu0 %v3783_v10  ;;  %v3793_v20 = vld [vmem:[%s5236_s1 + $0xa0] sm:$0xff]   ;;  %v3796_v23 = vld [vmem:[%s5236_s1 + $0xe8] sm:$0xff]   ;;  %s4035_s30 = scalar_lea.vmem %s5235_s0, %s3073_s17  ;;  %s5172_s18 = scalar_lea.vmem %s5241_s6, %s3073_s17 }
  0x11   : > { %297 = vst [vmem:[#allocation2 + $0xa0] sm:$0x3] %v3874_v2  ;;  %298 = vst [vmem:[#allocation2 + $0xa8] sm:$0xff] %v3874_v2  ;;  %3081 = vmatprep.subr.bf16.mxu0 %v3786_v13  ;;  %v3797_v24 = vld [vmem:[%s5236_s1 + $0xa8] sm:$0xff]   ;;  %v3798_v25 = vld [vmem:[%s5236_s1 + $0x70] sm:$0xff]  }
  0x12   : > { %299 = vst [vmem:[#allocation2 + $0xb0] sm:$0xff] %v3874_v2  ;;  %300 = vst [vmem:[#allocation2 + $0xb8] sm:$0x3] %v3874_v2  ;;  %3192 = vmatpush3.bf16.msra.mxu1 %v3785_v12  ;;  %v3799_v26 = vld [vmem:[%s5236_s1 + $0x30] sm:$0xff]   ;;  %v3802_v29 = vld [vmem:[%s5236_s1 + $0x78] sm:$0xff]  }
  0x13   : > { %301 = vst [vmem:[#allocation2 + $0xc0] sm:$0xff] %v3874_v2  ;;  %302 = vst [vmem:[#allocation2 + $0xc8] sm:$0xff] %v3874_v2  ;;  %3193 = vmatprep.subr.bf16.mxu1 %v3788_v15  ;;  %v3800_v27 = vld [vmem:[%s5236_s1 + $0xf0] sm:$0xff]   ;;  %v3803_v30 = vld [vmem:[%s5236_s1 + $0x38] sm:$0xff]  }
  0x14   : > { %303 = vst [vmem:[#allocation2 + $0xd0] sm:$0x3] %v3874_v2  ;;  %304 = vst [vmem:[#allocation2 + $0xd8] sm:$0xff] %v3874_v2  ;;  %3082 = vmatpush3.bf16.msra.mxu0 %v3787_v14  ;;  %v3801_v28 = vld [vmem:[%s5236_s1 + $0xb0] sm:$0xff]   ;;  %v3804_v31 = vld [vmem:[%s5236_s1 + $0xf8] sm:$0xff]  }
  0x15   : > { %305 = vst [vmem:[#allocation2 + $0xe0] sm:$0xff] %v3874_v2  ;;  %306 = vst [vmem:[#allocation2 + $0xe8] sm:$0x3] %v3874_v2  ;;  %3083 = vmatprep.subr.bf16.mxu0 %v3790_v17  ;;  %v430_v32 = vld [vmem:[#allocation2 + $0x1] sm:$0xff]  ;;  %v431_v33 = vld [vmem:[#allocation2 + $0x9] sm:$0xff] }
  0x16   : > { %307 = vst [vmem:[#allocation2 + $0xf0] sm:$0xff] %v3874_v2  ;;  %308 = vst [vmem:[#allocation2 + $0xf8] sm:$0xff] %v3874_v2  ;;  %3194 = vmatpush3.bf16.msra.mxu1 %v3789_v16  ;;  %v693_v34 = vpack.c.bf16 %v431_v33, %v430_v32  ;;  %v3805_v35 = vld [vmem:[%s5236_s1 + $0xb8] sm:$0xff]   ;;  %v3806_v36 = vld [vmem:[%s5236_s1 + $0x140] sm:$0xff]  }
  0x17   : > { %309 = vst [vmem:[#allocation2 + $0x100] sm:$0x3] %v3874_v2  ;;  %310 = vst [vmem:[#allocation2 + $0x108] sm:$0xff] %v3874_v2  ;;  %3195 = vmatprep.subr.bf16.mxu1 %v3792_v19  ;;  %v331_v37 = vld [vmem:[%s4035_s30] sm:$0xff]  ;;  %v332_v38 = vld [vmem:[%s4035_s30 + $0x8] sm:$0xff] }
  0x18   : > { %311 = vst [vmem:[#allocation2 + $0x110] sm:$0xff] %v3874_v2  ;;  %312 = vst [vmem:[#allocation2 + $0x118] sm:$0x3] %v3874_v2  ;;  %3084 = vmatpush3.bf16.msra.mxu0 %v3791_v18  ;;  %1451 = vmatprep.mubr.bf16.mxu0 %v693_v34  ;;  %v3807_v40 = vld [vmem:[%s5236_s1 + $0x100] sm:$0xff]   ;;  %v4049_v41 = vpack.c.bf16 %v332_v38, %v331_v37  ;;  %v333_v42 = vld [vmem:[%s4035_s30 + $0x10] sm:$0xff] }
  0x19   : > { %313 = vst [vmem:[#allocation2 + $0x120] sm:$0xff] %v3874_v2  ;;  %314 = vst [vmem:[#allocation2 + $0x128] sm:$0xff] %v3874_v2  ;;  %3085 = vmatprep.subr.bf16.mxu0 %v3794_v21  ;;  %v334_v43 = vld [vmem:[%s4035_s30 + $0x18] sm:$0xff]  ;;  %v462_v44 = vld [vmem:[#allocation2 + $0x2] sm:$0xff] }
  0x1a   : > { %315 = vst [vmem:[#allocation2 + $0x130] sm:$0x3] %v3874_v2  ;;  %316 = vst [vmem:[#allocation2 + $0x138] sm:$0xff] %v3874_v2  ;;  %3196 = vmatpush3.bf16.msra.mxu1 %v3793_v20  ;;  %v463_v45 = vld [vmem:[#allocation2 + $0xa] sm:$0xff]  ;;  %v335_v47 = vld [vmem:[%s4035_s30 + $0x20] sm:$0xff]  ;;  %v4079_v58 = vpack.c.bf16 %v334_v43, %v333_v42 }
  0x1b   : > { %317 = vst [vmem:[#allocation2 + $0x140] sm:$0xff] %v3874_v2  ;;  %318 = vst [vmem:[#allocation2 + $0x148] sm:$0x3] %v3874_v2  ;;  %3197 = vmatprep.subr.bf16.mxu1 %v3796_v23  ;;  %v3808_v46 = vld [vmem:[%s5236_s1 + $0x148] sm:$0xff]   ;;  %v4063_v50 = vld [vmem:[%s4035_s30 + $0x30] sm:$0xff]  ;;  %v694_v57 = vpack.c.bf16 %v463_v45, %v462_v44 }
  0x1c   : > { %319 = vst [vmem:[#allocation2 + $0x150] sm:$0xff] %v3874_v2  ;;  %320 = vst [vmem:[#allocation2 + $0x158] sm:$0xff] %v3874_v2  ;;  %3086 = vmatpush3.bf16.msra.mxu0 %v3795_v22  ;;  %v336_v48 = vld [vmem:[%s4035_s30 + $0x28] sm:$0xff]  ;;  %v4066_v51 = vld [vmem:[%s4035_s30 + $0x38] sm:$0xff] }
  0x1d   : > { %321 = vst [vmem:[#allocation2 + $0x160] sm:$0x3] %v3874_v2  ;;  %322 = vst [vmem:[#allocation2 + $0x168] sm:$0xff] %v3874_v2  ;;  %3087 = vmatprep.subr.bf16.mxu0 %v3798_v25  ;;  %v3809_v49 = vld [vmem:[%s5236_s1 + $0x108] sm:$0xff]   ;;  %v3810_v52 = vld [vmem:[%s5236_s1 + $0x150] sm:$0xff]   ;;  %v4100_v7 = vpack.c.bf16 %v336_v48, %v335_v47 }
  0x1e   : > { %323 = vst [vmem:[#allocation2 + $0x170] sm:$0xff] %v3874_v2  ;;  %324 = vst [vmem:[#allocation2 + $0x178] sm:$0x3] %v3874_v2  ;;  %3198 = vmatpush3.bf16.msra.mxu1 %v3797_v24  ;;  %v4074_v54 = vld [vmem:[%s4035_s30 + $0x40] sm:$0xff]  ;;  %v4077_v55 = vld [vmem:[%s4035_s30 + $0x48] sm:$0xff]  ;;  %v4147_v24 = vpack.c.bf16 %v4066_v51, %v4063_v50 }
  0x1f   : > { %325 = vst [vmem:[#allocation2 + $0x180] sm:$0xff] %v3874_v2  ;;  %326 = vst [vmem:[#allocation2 + $0x188] sm:$0xff] %v3874_v2  ;;  %3199 = vmatprep.subr.bf16.mxu1 %v3800_v27  ;;  %v3811_v60 = vld [vmem:[%s5236_s1 + $0x110] sm:$0xff]   ;;  %v4095_v5 = vld [vmem:[%s4035_s30 + $0x58] sm:$0xff] }
  0x20   : > { %327 = vst [vmem:[#allocation2 + $0x190] sm:$0x3] %v3874_v2  ;;  %328 = vst [vmem:[#allocation2 + $0x198] sm:$0xff] %v3874_v2  ;;  %3088 = vmatpush3.bf16.msra.mxu0 %v3799_v26  ;;  %v4089_v0 = vld [vmem:[%s4035_s30 + $0x50] sm:$0xff]  ;;  %v3812_v8 = vld [vmem:[%s5236_s1 + $0x158] sm:$0xff]  }
  0x21   : > { %329 = vst [vmem:[#allocation2 + $0x1a0] sm:$0xff] %v3874_v2  ;;  %330 = vst [vmem:[#allocation2 + $0x1a8] sm:$0x3] %v3874_v2  ;;  %3089 = vmatprep.subr.bf16.mxu0 %v3802_v29  ;;  %v4108_v10 = vld [vmem:[%s4035_s30 + $0x60] sm:$0xff]  ;;  %v4111_v11 = vld [vmem:[%s4035_s30 + $0x68] sm:$0xff] }
  0x22   : > { %3200 = vmatpush3.bf16.msra.mxu1 %v3801_v28  ;;  %364 = vst [vmem:[#allocation2 + $0x19] sm:$0xff] %v331_v37  ;;  %365 = vst [vmem:[#allocation2 + $0x21] sm:$0xff] %v332_v38  ;;  %v3813_v12 = vld [vmem:[%s5236_s1 + $0x118] sm:$0xff]   ;;  %v4119_v13 = vld [vmem:[%s4035_s30 + $0x70] sm:$0xff]  ;;  %v4180_v37 = vpack.c.bf16 %v4077_v55, %v4074_v54 }
  0x23   : > { %3201 = vmatprep.subr.bf16.mxu1 %v3804_v31  ;;  %366 = vst [vmem:[#allocation2 + $0x31] sm:$0xff] %v333_v42  ;;  %367 = vst [vmem:[#allocation2 + $0x39] sm:$0xff] %v334_v43  ;;  %v4123_v16 = vld [vmem:[%s4035_s30 + $0x78] sm:$0xff]  ;;  %v3814_v17 = vld [vmem:[%s5236_s1 + $0x160] sm:$0xff]  }
  0x24   : > { %3090 = vmatpush3.bf16.msra.mxu0 %v3803_v30  ;;  %368 = vst [vmem:[#allocation2 + $0x49] sm:$0xff] %v335_v47  ;;  %369 = vst [vmem:[#allocation2 + $0x51] sm:$0xff] %v336_v48  ;;  %v3815_v18 = vld [vmem:[%s5236_s1 + $0x1c0] sm:$0xff]   ;;  %v4141_v22 = vld [vmem:[%s4035_s30 + $0x88] sm:$0xff] }
  0x25   : > { %3299 = vmatprep.subr.bf16.mxu0 %v3806_v36  ;;  %370 = vst [vmem:[#allocation2 + $0x61] sm:$0xff] %v4063_v50  ;;  %371 = vst [vmem:[#allocation2 + $0x69] sm:$0xff] %v4066_v51  ;;  %v4137_v19 = vld [vmem:[%s4035_s30 + $0x80] sm:$0xff]  ;;  %v4162_v31 = vld [vmem:[%s4035_s30 + $0x90] sm:$0xff] }
  0x26   : > { %3202 = vmatpush3.bf16.msra.mxu1 %v3805_v35  ;;  %372 = vst [vmem:[#allocation2 + $0x79] sm:$0xff] %v4074_v54  ;;  %373 = vst [vmem:[#allocation2 + $0x81] sm:$0xff] %v4077_v55  ;;  %v3816_v25 = vld [vmem:[%s5236_s1 + $0x120] sm:$0xff]   ;;  %v4165_v32 = vld [vmem:[%s4035_s30 + $0x98] sm:$0xff] }
  0x27   : > { %1452 = vmatmul.mubr.bf16.vlgmr.msra.gmra.mrb[0].mxu0 %v3875_v39  ;;  %374 = vst [vmem:[#allocation2 + $0x91] sm:$0xff] %v4089_v0  ;;  %375 = vst [vmem:[#allocation2 + $0x99] sm:$0xff] %v4095_v5  ;;  %3411 = vmatprep.subr.bf16.mxu1 %v3815_v18  ;;  %v3817_v27 = vld [vmem:[%s5236_s1 + $0x180] sm:$0xff]   ;;  %v3818_v34 = vld [vmem:[%s5236_s1 + $0x168] sm:$0xff]  }
  0x28   : > { %3300 = vmatpush3.bf16.msra.mxu0 %v3807_v40  ;;  %1459 = vmatprep.mubr.bf16.mxu0 %v4049_v41  ;;  %376 = vst [vmem:[#allocation2 + $0xa9] sm:$0xff] %v4108_v10  ;;  %377 = vst [vmem:[#allocation2 + $0xb1] sm:$0xff] %v4111_v11  ;;  %v3819_v35 = vld [vmem:[%s5236_s1 + $0x1c8] sm:$0xff]   ;;  %v4183_v38 = vld [vmem:[%s4035_s30 + $0xa0] sm:$0xff] }
  0x29   : > { %3301 = vmatprep.subr.bf16.mxu0 %v3808_v46  ;;  %v2804_v53 = vld [vmem:[#allocation2 + $0x18] sm:$0xff]  ;;  %v2805_v56 = vld [vmem:[#allocation2 + $0x20] sm:$0xff]  ;;  %378 = vst [vmem:[#allocation2 + $0xc1] sm:$0xff] %v4119_v13  ;;  %379 = vst [vmem:[#allocation2 + $0xc9] sm:$0xff] %v4123_v16 }
  0x2a   : > { %v695_v59 = vpack.c.bf16 %v2805_v56, %v2804_v53  ;;  %v2806_v61 = vld [vmem:[#allocation2 + $0x30] sm:$0xff]  ;;  %v2807_v62 = vld [vmem:[#allocation2 + $0x38] sm:$0xff]  ;;  %v465_v2 = vld [vmem:[#allocation2 + $0x22] sm:$0xff]  ;;  %380 = vst [vmem:[#allocation2 + $0xd9] sm:$0xff] %v4137_v19  ;;  %v4227_v56 = vpack.c.bf16 %v4095_v5, %v4089_v0 }
  0x2b   : > { %v4086_v63 = vpack.c.bf16 %v2807_v62, %v2806_v61  ;;  %v464_v1 = vld [vmem:[#allocation2 + $0x1a] sm:$0xff]  ;;  %v2808_v3 = vld [vmem:[#allocation2 + $0x48] sm:$0xff]  ;;  %v2809_v4 = vld [vmem:[#allocation2 + $0x50] sm:$0xff]  ;;  %381 = vst [vmem:[#allocation2 + $0xe1] sm:$0xff] %v4141_v22 }
  0x2c   : > { %3302 = vmatpush3.bf16.msra.mxu0 %v3809_v49  ;;  %1612 = vmatprep.mubr.bf16.mxu1 %v695_v59  ;;  %v4098_v6 = vpack.c.bf16 %v465_v2, %v464_v1  ;;  %v4105_v9 = vpack.c.bf16 %v2809_v4, %v2808_v3  ;;  %v466_v14 = vld [vmem:[#allocation2 + $0x32] sm:$0xff]  ;;  %v467_v15 = vld [vmem:[#allocation2 + $0x3a] sm:$0xff]  ;;  %v2811_v21 = vld [vmem:[#allocation2 + $0x68] sm:$0xff]  ;;  %382 = vst [vmem:[#allocation2 + $0xf1] sm:$0xff] %v4162_v31 }
  0x2d   : > { %3303 = vmatprep.subr.bf16.mxu0 %v3810_v52  ;;  %1613 = vmatmul.mubr.bf16.vlgmr.msra.gmra.mrb[0].mxu1 %v694_v57  ;;  %v2810_v20 = vld [vmem:[#allocation2 + $0x60] sm:$0xff]  ;;  %v4143_v23 = vpack.c.bf16 %v467_v15, %v466_v14  ;;  %v468_v28 = vld [vmem:[#allocation2 + $0x4a] sm:$0xff]  ;;  %v469_v29 = vld [vmem:[#allocation2 + $0x52] sm:$0xff]  ;;  %383 = vst [vmem:[#allocation2 + $0xf9] sm:$0xff] %v4165_v32 }
  0x2e   : > { %1620 = vmatprep.mubr.bf16.mxu1 %v4086_v63  ;;  %v4153_v26 = vpack.c.bf16 %v2811_v21, %v2810_v20  ;;  %v2812_v30 = vld [vmem:[#allocation2 + $0x78] sm:$0xff]  ;;  %v2813_v33 = vld [vmem:[#allocation2 + $0x80] sm:$0xff]  ;;  %3412 = vmatpush3.bf16.msra.mxu1 %v3817_v27  ;;  %v4176_v36 = vpack.c.bf16 %v469_v29, %v468_v28  ;;  %v4186_v40 = vld [vmem:[%s4035_s30 + $0xa8] sm:$0xff]  ;;  %384 = vst [vmem:[#allocation2 + $0x109] sm:$0xff] %v4183_v38 }
  0x2f   : > { %1460 = vmatmul.mubr.bf16.gmra.mrb[4].mxu0 %v695_v59  ;;  %3413 = vmatprep.subr.bf16.mxu1 %v3819_v35  ;;  %v4188_v42 = vpack.c.bf16 %v2813_v33, %v2812_v30  ;;  %385 = vst [vmem:[#allocation2 + $0x111] sm:$0xff] %v4186_v40  ;;  %v3820_v43 = vld [vmem:[%s5236_s1 + $0x128] sm:$0xff]   ;;  %v4199_v45 = vld [vmem:[%s4035_s30 + $0xb0] sm:$0xff]  ;;  %v4203_v46 = vld [vmem:[%s4035_s30 + $0xb8] sm:$0xff]  ;;  %v4294_v35 = vpack.c.bf16 %v4123_v16, %v4119_v13 }
  0x30   : > { %1467 = vmatprep.mubr.bf16.mxu0 %v4079_v58  ;;  %3304 = vmatpush3.bf16.msra.mxu0 %v3811_v60  ;;  %v3821_v44 = vld [vmem:[%s5236_s1 + $0x188] sm:$0xff]   ;;  %386 = vst [vmem:[#allocation2 + $0x121] sm:$0xff] %v4199_v45  ;;  %v2814_v49 = vld [vmem:[#allocation2 + $0x90] sm:$0xff]  ;;  %387 = vst [vmem:[#allocation2 + $0x129] sm:$0xff] %v4203_v46 }
  0x31   : > { %3305 = vmatprep.subr.bf16.mxu0 %v3812_v8  ;;  %v470_v47 = vld [vmem:[#allocation2 + $0x62] sm:$0xff]  ;;  %v471_v48 = vld [vmem:[#allocation2 + $0x6a] sm:$0xff]  ;;  %v2815_v50 = vld [vmem:[#allocation2 + $0x98] sm:$0xff] }
  0x32   : > { %v3822_v51 = vld [vmem:[%s5236_s1 + $0x170] sm:$0xff]   ;;  %3414 = vmatpush3.bf16.msra.mxu1 %v3821_v44  ;;  %v4217_v53 = vld [vmem:[%s4035_s30 + $0xc0] sm:$0xff]  ;;  %v4220_v54 = vld [vmem:[%s4035_s30 + $0xc8] sm:$0xff]  ;;  %v4223_v55 = vpack.c.bf16 %v471_v48, %v470_v47  ;;  %v4230_v57 = vpack.c.bf16 %v2815_v50, %v2814_v49 }
  0x33   : > { %v3823_v52 = vld [vmem:[%s5236_s1 + $0x1d0] sm:$0xff]   ;;  %388 = vst [vmem:[#allocation2 + $0x139] sm:$0xff] %v4217_v53  ;;  %389 = vst [vmem:[#allocation2 + $0x141] sm:$0xff] %v4220_v54  ;;  %v472_v61 = vld [vmem:[#allocation2 + $0x7a] sm:$0xff] }
  0x34   : > { %3306 = vmatpush3.bf16.msra.mxu0 %v3813_v12  ;;  %3415 = vmatprep.subr.bf16.mxu1 %v3823_v52  ;;  %v3824_v59 = vld [vmem:[%s5236_s1 + $0x130] sm:$0xff]   ;;  %v473_v62 = vld [vmem:[#allocation2 + $0x82] sm:$0xff]  ;;  %v4245_v2 = vld [vmem:[%s4035_s30 + $0xd8] sm:$0xff]  ;;  %v4260_v12 = vpack.c.bf16 %v4111_v11, %v4108_v10 }
  0x35   : > { %1621 = vmatmul.mubr.bf16.gmra.mrb[4].mxu1 %v4098_v6  ;;  %3307 = vmatprep.subr.bf16.mxu0 %v3814_v17  ;;  %v3825_v60 = vld [vmem:[%s5236_s1 + $0x190] sm:$0xff]   ;;  %v2816_v0 = vld [vmem:[#allocation2 + $0xa8] sm:$0xff]  ;;  %391 = vst [vmem:[#allocation2 + $0x159] sm:$0xff] %v4245_v2  ;;  %v3826_v3 = vld [vmem:[%s5236_s1 + $0x1d8] sm:$0xff]   ;;  %v4256_v8 = vpack.c.bf16 %v473_v62, %v472_v61  ;;  %v4331_v62 = vpack.c.bf16 %v4141_v22, %v4137_v19 }
  0x36   : > { %1628 = vmatprep.mubr.bf16.mxu1 %v4105_v9  ;;  %v4242_v1 = vld [vmem:[%s4035_s30 + $0xd0] sm:$0xff]  ;;  %3416 = vmatpush3.bf16.msra.mxu1 %v3825_v60  ;;  %v3827_v5 = vld [vmem:[%s5236_s1 + $0x198] sm:$0xff]   ;;  %v359_v17 = vld [vmem:[%s4035_s30 + $0xe0] sm:$0xff]  ;;  %v4344_v22 = vpack.c.bf16 %v4165_v32, %v4162_v31  ;;  %v4356_v31 = vpack.c.bf16 %v4186_v40, %v4183_v38  ;;  %v4368_v38 = vpack.c.bf16 %v4203_v46, %v4199_v45 }
  0x37   : > { %1468 = vmatmul.mubr.bf16.gmra.mrb[8].mxu0 %v4086_v63  ;;  %390 = vst [vmem:[#allocation2 + $0x151] sm:$0xff] %v4242_v1  ;;  %v2817_v4 = vld [vmem:[#allocation2 + $0xb0] sm:$0xff]  ;;  %3417 = vmatprep.subr.bf16.mxu1 %v3826_v3  ;;  %v3828_v14 = vld [vmem:[%s5236_s1 + $0x178] sm:$0xff]   ;;  %v360_v18 = vld [vmem:[%s4035_s30 + $0xe8] sm:$0xff]  ;;  %v4380_v45 = vpack.c.bf16 %v4220_v54, %v4217_v53  ;;  %v4392_v53 = vpack.c.bf16 %v4245_v2, %v4242_v1 }
  0x38   : > { %1475 = vmatprep.mubr.bf16.mxu0 %v4100_v7  ;;  %3308 = vmatpush3.bf16.msra.mxu0 %v3816_v25  ;;  %v4265_v15 = vpack.c.bf16 %v2817_v4, %v2816_v0  ;;  %392 = vst [vmem:[#allocation2 + $0x169] sm:$0xff] %v359_v17  ;;  %393 = vst [vmem:[#allocation2 + $0x171] sm:$0xff] %v360_v18  ;;  %v3829_v20 = vld [vmem:[%s5236_s1 + $0x138] sm:$0xff]   ;;  %v4272_v21 = vpack.c.bf16 %v360_v18, %v359_v17  ;;  %v3830_v10 = vld [vmem:[%s5236_s1 + $0x1e0] sm:$0xff]  }
  0x39   : > { %3309 = vmatprep.subr.bf16.mxu0 %v3818_v34  ;;  %v474_v11 = vld [vmem:[#allocation2 + $0x92] sm:$0xff]  ;;  %v475_v25 = vld [vmem:[#allocation2 + $0x9a] sm:$0xff]  ;;  %v2819_v28 = vld [vmem:[#allocation2 + $0xc8] sm:$0xff] }
  0x3a   : > { %3418 = vmatpush3.bf16.msra.mxu1 %v3827_v5  ;;  %v2818_v27 = vld [vmem:[#allocation2 + $0xc0] sm:$0xff]  ;;  %v3832_v30 = vld [vmem:[%s5236_s1 + $0x1e8] sm:$0xff]   ;;  %v4290_v34 = vpack.c.bf16 %v475_v25, %v474_v11  ;;  %v4300_v44 = vld [vmem:[%s4035_s30 + $0xf8] sm:$0xff] }
  0x3b   : > { %v3831_v29 = vld [vmem:[%s5236_s1 + $0x1a0] sm:$0xff]   ;;  %3419 = vmatprep.subr.bf16.mxu1 %v3830_v10  ;;  %v3833_v33 = vld [vmem:[%s5236_s1 + $0x1a8] sm:$0xff]   ;;  %v4302_v47 = vpack.c.bf16 %v2819_v28, %v2818_v27  ;;  %395 = vst [vmem:[#allocation2 + $0x189] sm:$0xff] %v4300_v44  ;;  %v3834_v48 = vld [vmem:[%s5236_s1 + $0x1f0] sm:$0xff]  }
  0x3c   : > { %3310 = vmatpush3.bf16.msra.mxu0 %v3820_v43  ;;  %v4297_v43 = vld [vmem:[%s4035_s30 + $0xf0] sm:$0xff]  ;;  %v2820_v50 = vld [vmem:[#allocation2 + $0xd8] sm:$0xff]  ;;  %v2821_v52 = vld [vmem:[#allocation2 + $0xe0] sm:$0xff] }
  0x3d   : > { %1629 = vmatmul.mubr.bf16.gmra.mrb[8].mxu1 %v4143_v23  ;;  %3311 = vmatprep.subr.bf16.mxu0 %v3822_v51  ;;  %394 = vst [vmem:[#allocation2 + $0x181] sm:$0xff] %v4297_v43  ;;  %v476_v49 = vld [vmem:[#allocation2 + $0xaa] sm:$0xff]  ;;  %v477_v13 = vld [vmem:[#allocation2 + $0xb2] sm:$0xff]  ;;  %v4334_v0 = vpack.c.bf16 %v2821_v52, %v2820_v50  ;;  %v478_v3 = vld [vmem:[#allocation2 + $0xc2] sm:$0xff] }
  0x3e   : > { %1636 = vmatprep.mubr.bf16.mxu1 %v4153_v26  ;;  %3420 = vmatpush3.bf16.msra.mxu1 %v3831_v29  ;;  %v3835_v16 = vld [vmem:[%s5236_s1 + $0x1b0] sm:$0xff]   ;;  %v3836_v51 = vld [vmem:[%s5236_s1 + $0x1f8] sm:$0xff]   ;;  %v4327_v61 = vpack.c.bf16 %v477_v13, %v476_v49  ;;  %v2824_v10 = vld [vmem:[#allocation2 + $0x108] sm:$0xff] }
  0x3f   : > { %1476 = vmatmul.mubr.bf16.gmra.mrb[12].mxu0 %v4105_v9  ;;  %3421 = vmatprep.subr.bf16.mxu1 %v3832_v30  ;;  %v3837_v60 = vld [vmem:[%s5236_s1 + $0x1b8] sm:$0xff]   ;;  %v479_v4 = vld [vmem:[#allocation2 + $0xca] sm:$0xff]  ;;  %v2826_v29 = vld [vmem:[#allocation2 + $0x120] sm:$0xff] }
  0x40   : > { %1483 = vmatprep.mubr.bf16.mxu0 %v4147_v24  ;;  %3312 = vmatpush3.bf16.msra.mxu0 %v3824_v59  ;;  %v4322_v59 = vld [vmem:[%s5236_s1 + $0x200] sm:$0xff]   ;;  %v2822_v5 = vld [vmem:[#allocation2 + $0xf0] sm:$0xff]  ;;  %v4340_v19 = vpack.c.bf16 %v479_v4, %v478_v3  ;;  %v2827_v30 = vld [vmem:[#allocation2 + $0x128] sm:$0xff] }
  0x41   : > { %3313 = vmatprep.subr.bf16.mxu0 %v3828_v14  ;;  %v2823_v14 = vld [vmem:[#allocation2 + $0xf8] sm:$0xff]  ;;  %v2825_v11 = vld [vmem:[#allocation2 + $0x110] sm:$0xff]  ;;  %v4370_v40 = vpack.c.bf16 %v2827_v30, %v2826_v29 }
  0x42   : > { %3422 = vmatpush3.bf16.msra.mxu1 %v3833_v33  ;;  %v4346_v17 = vpack.c.bf16 %v2823_v14, %v2822_v5  ;;  %v480_v18 = vld [vmem:[#allocation2 + $0xda] sm:$0xff]  ;;  %v4358_v32 = vpack.c.bf16 %v2825_v11, %v2824_v10  ;;  %v482_v27 = vld [vmem:[#allocation2 + $0xf2] sm:$0xff]  ;;  %v487_v52 = vld [vmem:[#allocation2 + $0x12a] sm:$0xff] }
  0x43   : > { %3423 = vmatprep.subr.bf16.mxu1 %v3834_v48  ;;  %v483_v28 = vld [vmem:[#allocation2 + $0xfa] sm:$0xff]  ;;  %v484_v48 = vld [vmem:[#allocation2 + $0x10a] sm:$0xff]  ;;  %v485_v49 = vld [vmem:[#allocation2 + $0x112] sm:$0xff] }
  0x44   : > { %3314 = vmatpush3.bf16.msra.mxu0 %v3829_v20  ;;  %v481_v20 = vld [vmem:[#allocation2 + $0xe2] sm:$0xff]  ;;  %v4364_v33 = vpack.c.bf16 %v483_v28, %v482_v27  ;;  %v2828_v13 = vld [vmem:[#allocation2 + $0x138] sm:$0xff]  ;;  %v4376_v50 = vpack.c.bf16 %v485_v49, %v484_v48  ;;  %v4414_v48 = vpack.c.bf16 %v4300_v44, %v4297_v43  ;;  %v492_v49 = vld [vmem:[#allocation2 + $0x16a] sm:$0xff] }
  0x45   : > { %1637 = vmatmul.mubr.bf16.gmra.mrb[12].mxu1 %v4176_v36  ;;  %3581 = vmatprep.subr.bf16.mxu0 %v4322_v59  ;;  %v4352_v25 = vpack.c.bf16 %v481_v20, %v480_v18  ;;  %v2831_v3 = vld [vmem:[#allocation2 + $0x158] sm:$0xff]  ;;  %v489_v14 = vld [vmem:[#allocation2 + $0x142] sm:$0xff]  ;;  %v2833_v20 = vld [vmem:[#allocation2 + $0x170] sm:$0xff] }
  0x46   : > { %1644 = vmatprep.mubr.bf16.mxu1 %v4188_v42  ;;  %3424 = vmatpush3.bf16.msra.mxu1 %v3835_v16  ;;  %v2829_v16 = vld [vmem:[#allocation2 + $0x140] sm:$0xff]  ;;  %v2832_v18 = vld [vmem:[#allocation2 + $0x168] sm:$0xff]  ;;  %v490_v1 = vld [vmem:[#allocation2 + $0x152] sm:$0xff] }
  0x47   : > { %1484 = vmatmul.mubr.bf16.gmra.mrb[16].mxu0 %v4153_v26  ;;  %3425 = vmatprep.subr.bf16.mxu1 %v3836_v51  ;;  %v4382_v46 = vpack.c.bf16 %v2829_v16, %v2828_v13  ;;  %v486_v51 = vld [vmem:[#allocation2 + $0x122] sm:$0xff]  ;;  %v488_v5 = vld [vmem:[#allocation2 + $0x13a] sm:$0xff]  ;;  %v4402_v11 = vpack.c.bf16 %v2833_v20, %v2832_v18  ;;  %v493_v13 = vld [vmem:[#allocation2 + $0x172] sm:$0xff] }
  0x48   : > { %1491 = vmatprep.mubr.bf16.mxu0 %v4180_v37  ;;  %v4388_v4 = vpack.c.bf16 %v487_v52, %v486_v51  ;;  %v4400_v10 = vpack.c.bf16 %v489_v14, %v488_v5  ;;  %v491_v2 = vld [vmem:[#allocation2 + $0x15a] sm:$0xff]  ;;  %v2835_v28 = vld [vmem:[#allocation2 + $0x188] sm:$0xff]  ;;  %v4420_v16 = vpack.c.bf16 %v493_v13, %v492_v49 }
  0x49   : > { %v2834_v27 = vld [vmem:[#allocation2 + $0x180] sm:$0xff]  ;;  %v4408_v29 = vpack.c.bf16 %v491_v2, %v490_v1  ;;  %v3839_v51 = vld [vmem:[%s5236_s1 + $0x208] sm:$0xff]   ;;  %v3841_v43 = vld [vmem:[%s5236_s1 + $0x218] sm:$0xff]  }
  0x4a   : > { %3426 = vmatpush3.bf16.msra.mxu1 %v3837_v60  ;;  %v2830_v60 = vld [vmem:[#allocation2 + $0x150] sm:$0xff]  ;;  %v4410_v30 = vpack.c.bf16 %v2835_v28, %v2834_v27  ;;  %v2898_v18 = vld [vmem:[#allocation2 + $0x182] sm:$0xff] }
  0x4b   : > { %v4394_v54 = vpack.c.bf16 %v2831_v3, %v2830_v60  ;;  %v2899_v20 = vld [vmem:[#allocation2 + $0x18a] sm:$0xff]  ;;  %3699 = vmatprep.subr.bf16.mxu1 %v3875_v39 }
  0x4c   : > { %v4518_v13 = vpack.c.bf16 %v2899_v20, %v2898_v18 }
  0x4d   : > { %1645 = vmatmul.mubr.bf16.gmra.mrb[16].mxu1 %v4223_v55 }
  0x4e   : > { %1652 = vmatprep.mubr.bf16.mxu1 %v4230_v57 }
  0x4f   : > { %1492 = vmatmul.mubr.bf16.gmra.mrb[20].mxu0 %v4188_v42 }
  0x50   : > { %1499 = vmatprep.mubr.bf16.mxu0 %v4227_v56 }
  0x55   : > { %1653 = vmatmul.mubr.bf16.gmra.mrb[20].mxu1 %v4256_v8 }
  0x56   : > { %1660 = vmatprep.mubr.bf16.mxu1 %v4265_v15 }
  0x57   : > { %1500 = vmatmul.mubr.bf16.gmra.mrb[24].mxu0 %v4230_v57 }
  0x58   : > { %1507 = vmatprep.mubr.bf16.mxu0 %v4260_v12 }
  0x5d   : > { %1661 = vmatmul.mubr.bf16.gmra.mrb[24].mxu1 %v4290_v34 }
  0x5e   : > { %1668 = vmatprep.mubr.bf16.mxu1 %v4302_v47 }
  0x5f   : > { %1508 = vmatmul.mubr.bf16.gmra.mrb[28].mxu0 %v4265_v15 }
  0x60   : > { %1515 = vmatprep.mubr.bf16.mxu0 %v4294_v35 }
  0x65   : > { %1669 = vmatmul.mubr.bf16.gmra.mrb[28].mxu1 %v4327_v61 }
  0x66   : > { %1676 = vmatprep.mubr.bf16.mxu1 %v4334_v0 }
  0x67   : > { %1516 = vmatmul.mubr.bf16.gmra.mrb[32].mxu0 %v4302_v47 }
  0x68   : > { %1523 = vmatprep.mubr.bf16.mxu0 %v4331_v62 }
  0x6d   : > { %1677 = vmatmul.mubr.bf16.gmra.mrb[32].mxu1 %v4340_v19 }
  0x6e   : > { %1684 = vmatprep.mubr.bf16.mxu1 %v4346_v17 }
  0x6f   : > { %1524 = vmatmul.mubr.bf16.gmra.mrb[36].mxu0 %v4334_v0 }
  0x70   : > { %1531 = vmatprep.mubr.bf16.mxu0 %v4344_v22 }
  0x75   : > { %1685 = vmatmul.mubr.bf16.gmra.mrb[36].mxu1 %v4352_v25 }
  0x76   : > { %1692 = vmatprep.mubr.bf16.mxu1 %v4358_v32 }
  0x77   : > { %1532 = vmatmul.mubr.bf16.gmra.mrb[40].mxu0 %v4346_v17 }
  0x78   : > { %1539 = vmatprep.mubr.bf16.mxu0 %v4356_v31 }
  0x7d   : > { %1693 = vmatmul.mubr.bf16.gmra.mrb[40].mxu1 %v4364_v33 }
  0x7e   : > { %1700 = vmatprep.mubr.bf16.mxu1 %v4370_v40 }
  0x7f   : > { %1540 = vmatmul.mubr.bf16.gmra.mrb[44].mxu0 %v4358_v32 }
  0x80   : > { %1547 = vmatprep.mubr.bf16.mxu0 %v4368_v38 }
  0x85   : > { %1701 = vmatmul.mubr.bf16.gmra.mrb[44].mxu1 %v4376_v50 }
  0x86   : > { %1708 = vmatprep.mubr.bf16.mxu1 %v4382_v46 }
  0x87   : > { %1548 = vmatmul.mubr.bf16.gmra.mrb[48].mxu0 %v4370_v40 }
  0x88   : > { %1555 = vmatprep.mubr.bf16.mxu0 %v4380_v45 }
  0x8d   : > { %1709 = vmatmul.mubr.bf16.gmra.mrb[48].mxu1 %v4388_v4 }
  0x8e   : > { %1716 = vmatprep.mubr.bf16.mxu1 %v4394_v54 }
  0x8f   : > { %1556 = vmatmul.mubr.bf16.gmra.mrb[52].mxu0 %v4382_v46 }
  0x90   : > { %1563 = vmatprep.mubr.bf16.mxu0 %v4392_v53 }
  0x95   : > { %1717 = vmatmul.mubr.bf16.gmra.mrb[52].mxu1 %v4400_v10 }
  0x96   : > { %1724 = vmatprep.mubr.bf16.mxu1 %v4402_v11 }
  0x97   : > { %1564 = vmatmul.mubr.bf16.gmra.mrb[56].mxu0 %v4394_v54 }
  0x98   : > { %1571 = vmatprep.mubr.bf16.mxu0 %v4272_v21 }
  0x9d   : > { %1725 = vmatmul.mubr.bf16.gmra.mrb[56].mxu1 %v4408_v29 }
  0x9e   : > { %1732 = vmatprep.mubr.bf16.mxu1 %v4410_v30 }
  0x9f   : > { %1572 = vmatmul.mubr.bf16.gmra.mrb[60].mxu0 %v4402_v11 }
  0xa0   : > { %1773 = vmatprep.mubr.bf16.mxu0 %v4098_v6  ;;  %v3840_v6 = vld [vmem:[%s5236_s1 + $0x210] sm:$0xff]  }
  0xa5   : > { %1733 = vmatmul.mubr.bf16.gmra.mrb[60].mxu1 %v4420_v16 }
  0xa6   : > { %1934 = vmatprep.mubr.bf16.mxu1 %v4079_v58 }
  0xa7   : > { %1774 = vmatmul.mubr.bf16.vlgmr.msra.gmra.mrb[64].mxu0 %v4049_v41  ;;  %v3842_v41 = vld [vmem:[%s5236_s1 + $0x220] sm:$0xff]  }
  0xa8   : > { %3582 = vmatpush3.bf16.msra.mxu0 %v4322_v59  ;;  %1781 = vmatprep.mubr.bf16.mxu0 %v4143_v23  ;;  %v3843_v23 = vld [vmem:[%s5236_s1 + $0x228] sm:$0xff]  }
  0xa9   : > { %3583 = vmatprep.subr.bf16.mxu0 %v3839_v51 }
  0xac   : > { %3584 = vmatpush3.bf16.msra.mxu0 %v3839_v51 }
  0xad   : > { %3585 = vmatprep.subr.bf16.mxu0 %v3840_v6  ;;  %1935 = vmatmul.mubr.bf16.vlgmr.msra.gmra.mrb[64].mxu1 %v4086_v63  ;;  %v3845_v63 = vld [vmem:[%s5236_s1 + $0x238] sm:$0xff]  }
  0xae   : > { %1942 = vmatprep.mubr.bf16.mxu1 %v4100_v7 }
  0xaf   : > { %1782 = vmatmul.mubr.bf16.gmra.mrb[68].mxu0 %v4079_v58  ;;  %v3844_v58 = vld [vmem:[%s5236_s1 + $0x230] sm:$0xff]  }
  0xb0   : > { %1789 = vmatprep.mubr.bf16.mxu0 %v4176_v36  ;;  %3586 = vmatpush3.bf16.msra.mxu0 %v3840_v6 }
  0xb1   : > { %3587 = vmatprep.subr.bf16.mxu0 %v3841_v43 }
  0xb4   : > { %3588 = vmatpush3.bf16.msra.mxu0 %v3841_v43 }
  0xb5   : > { %3589 = vmatprep.subr.bf16.mxu0 %v3842_v41  ;;  %1943 = vmatmul.mubr.bf16.gmra.mrb[68].mxu1 %v4105_v9 }
  0xb6   : > { %1950 = vmatprep.mubr.bf16.mxu1 %v4147_v24 }
  0xb7   : > { %1790 = vmatmul.mubr.bf16.gmra.mrb[72].mxu0 %v4100_v7 }
  0xb8   : > { %1797 = vmatprep.mubr.bf16.mxu0 %v4223_v55  ;;  %3590 = vmatpush3.bf16.msra.mxu0 %v3842_v41 }
  0xb9   : > { %3591 = vmatprep.subr.bf16.mxu0 %v3843_v23 }
  0xbc   : > { %3592 = vmatpush3.bf16.msra.mxu0 %v3843_v23 }
  0xbd   : > { %3593 = vmatprep.subr.bf16.mxu0 %v3844_v58  ;;  %1951 = vmatmul.mubr.bf16.gmra.mrb[72].mxu1 %v4153_v26 }
  0xbe   : > { %1958 = vmatprep.mubr.bf16.mxu1 %v4180_v37 }
  0xbf   : > { %1798 = vmatmul.mubr.bf16.gmra.mrb[76].mxu0 %v4147_v24 }
  0xc0   : > { %1805 = vmatprep.mubr.bf16.mxu0 %v4256_v8  ;;  %3594 = vmatpush3.bf16.msra.mxu0 %v3844_v58 }
  0xc1   : > { %3595 = vmatprep.subr.bf16.mxu0 %v3845_v63 }
  0xc4   : > { %3596 = vmatpush3.bf16.msra.mxu0 %v3845_v63  ;;  %v2964_v63 = vld [vmem:[#allocation2 + $0x32] sm:$0xff] }
  0xc5   : > { %1959 = vmatmul.mubr.bf16.gmra.mrb[76].mxu1 %v4188_v42  ;;  %v4493_v42 = vld [vmem:[%s5237_s2] ss:$0 sm:$0xff] }
  0xc6   : > { %1966 = vmatprep.mubr.bf16.mxu1 %v4227_v56 }
  0xc7   : > { %1806 = vmatmul.mubr.bf16.gmra.mrb[80].mxu0 %v4180_v37 }
  0xc8   : > { %1813 = vmatprep.mubr.bf16.mxu0 %v4290_v34 }
  0xcd   : > { %1967 = vmatmul.mubr.bf16.gmra.mrb[80].mxu1 %v4230_v57 }
  0xce   : > { %1974 = vmatprep.mubr.bf16.mxu1 %v4260_v12 }
  0xcf   : > { %1814 = vmatmul.mubr.bf16.gmra.mrb[84].mxu0 %v4227_v56 }
  0xd0   : > { %1821 = vmatprep.mubr.bf16.mxu0 %v4327_v61 }
  0xd5   : > { %1975 = vmatmul.mubr.bf16.gmra.mrb[84].mxu1 %v4265_v15 }
  0xd6   : > { %1982 = vmatprep.mubr.bf16.mxu1 %v4294_v35 }
  0xd7   : > { %1822 = vmatmul.mubr.bf16.gmra.mrb[88].mxu0 %v4260_v12 }
  0xd8   : > { %1829 = vmatprep.mubr.bf16.mxu0 %v4340_v19 }
  0xdd   : > { %1983 = vmatmul.mubr.bf16.gmra.mrb[88].mxu1 %v4302_v47 }
  0xde   : > { %1990 = vmatprep.mubr.bf16.mxu1 %v4331_v62 }
  0xdf   : > { %1830 = vmatmul.mubr.bf16.gmra.mrb[92].mxu0 %v4294_v35 }
  0xe0   : > { %1837 = vmatprep.mubr.bf16.mxu0 %v4352_v25 }
  0xe5   : > { %1991 = vmatmul.mubr.bf16.gmra.mrb[92].mxu1 %v4334_v0 }
  0xe6   : > { %1998 = vmatprep.mubr.bf16.mxu1 %v4344_v22 }
  0xe7   : > { %1838 = vmatmul.mubr.bf16.gmra.mrb[96].mxu0 %v4331_v62 }
  0xe8   : > { %1845 = vmatprep.mubr.bf16.mxu0 %v4364_v33 }
  0xed   : > { %1999 = vmatmul.mubr.bf16.gmra.mrb[96].mxu1 %v4346_v17 }
  0xee   : > { %2006 = vmatprep.mubr.bf16.mxu1 %v4356_v31 }
  0xef   : > { %1846 = vmatmul.mubr.bf16.gmra.mrb[100].mxu0 %v4344_v22 }
  0xf0   : > { %1853 = vmatprep.mubr.bf16.mxu0 %v4376_v50 }
  0xf5   : > { %2007 = vmatmul.mubr.bf16.gmra.mrb[100].mxu1 %v4358_v32 }
  0xf6   : > { %2014 = vmatprep.mubr.bf16.mxu1 %v4368_v38 }
  0xf7   : > { %1854 = vmatmul.mubr.bf16.gmra.mrb[104].mxu0 %v4356_v31 }
  0xf8   : > { %1861 = vmatprep.mubr.bf16.mxu0 %v4388_v4 }
  0xfa   : > { %v3091_v7 = vpop.f32.mrb[0].mxu0 }
  0xfb   : > { %v3092_v9 = vpop.f32.mrb[1].mxu0 }
  0xfc   : > { %v3093_v24 = vadd.f32 %v3092_v9, %v3091_v7  ;;  %v3094_v26 = vpop.f32.mrb[2].mxu0  ;;  %v2965_v7 = vld [vmem:[#allocation2 + $0x3a] sm:$0xff] }
  0xfd   : > { %v3095_v36 = vpop.f32.mrb[3].mxu0  ;;  %2015 = vmatmul.mubr.bf16.gmra.mrb[104].mxu1 %v4370_v40 }
  0xfe   : > { %v3096_v37 = vadd.f32 %v3095_v36, %v3094_v26  ;;  %2022 = vmatprep.mubr.bf16.mxu1 %v4380_v45  ;;  %v1454_v56 = vadd.f32 %v3093_v24, %v4493_v42  ;;  %v2962_v24 = vld [vmem:[#allocation2 + $0x199] sm:$0xff]  ;;  %v2963_v26 = vld [vmem:[#allocation2 + $0x1a1] sm:$0xff] }
  0xff   : > { %1862 = vmatmul.mubr.bf16.gmra.mrb[108].mxu0 %v4368_v38 }
 0x100   : > { %1869 = vmatprep.mubr.bf16.mxu0 %v4400_v10  ;;  %v3203_v57 = vpop.f32.mrb[0].mxu1  ;;  %v1457_v35 = vadd.f32 %v3096_v37, %v4493_v42 }
 0x101   : > { %v3204_v12 = vpop.f32.mrb[1].mxu1 }
 0x102   : > { %v3097_v55 = vpop.f32.mrb[4].mxu0  ;;  %v3205_v44 = vadd.f32 %v3204_v12, %v3203_v57  ;;  %v3206_v47 = vpop.f32.mrb[2].mxu1 }
 0x103   : > { %v3098_v8 = vpop.f32.mrb[5].mxu0  ;;  %v3207_v61 = vpop.f32.mrb[3].mxu1 }
 0x104   : > { %v3099_v15 = vadd.f32 %v3098_v8, %v3097_v55  ;;  %v3100_v34 = vpop.f32.mrb[6].mxu0  ;;  %v4499_v0 = vadd.f32 %v3205_v44, %v1454_v56  ;;  %v3208_v19 = vadd.f32 %v3207_v61, %v3206_v47  ;;  %v700_v8 = vpack.c.bf16 %v2965_v7, %v2964_v63 }
 0x105   : > { %v3101_v59 = vpop.f32.mrb[7].mxu0  ;;  %2023 = vmatmul.mubr.bf16.gmra.mrb[108].mxu1 %v4382_v46 }
 0x106   : > { %v3102_v62 = vadd.f32 %v3101_v59, %v3100_v34  ;;  %v4504_v22 = vadd.f32 %v3208_v19, %v1457_v35  ;;  %2030 = vmatprep.mubr.bf16.mxu1 %v4392_v53  ;;  %v1462_v25 = vadd.f32 %v3099_v15, %v4493_v42  ;;  %v834_v35 = vpack.c.bf16 %v2963_v26, %v2962_v24  ;;  %v2967_v19 = vld [vmem:[#allocation2 + $0x52] sm:$0xff] }
 0x107   : > { %1870 = vmatmul.mubr.bf16.gmra.mrb[112].mxu0 %v4380_v45 }
 0x108   : > { %1877 = vmatprep.mubr.bf16.mxu0 %v4408_v29  ;;  %v3209_v31 = vpop.f32.mrb[4].mxu1  ;;  %v1465_v50 = vadd.f32 %v3102_v62, %v4493_v42  ;;  %v2966_v62 = vld [vmem:[#allocation2 + $0x4a] sm:$0xff] }
 0x109   : > { %v3210_v33 = vpop.f32.mrb[5].mxu1 }
 0x10a   : > { %v3103_v17 = vpop.f32.mrb[8].mxu0  ;;  %v3211_v52 = vadd.f32 %v3210_v33, %v3209_v31  ;;  %v3212_v45 = vpop.f32.mrb[6].mxu1  ;;  %v2969_v31 = vld [vmem:[#allocation2 + $0x6a] sm:$0xff] }
 0x10b   : > { %v3104_v32 = vpop.f32.mrb[9].mxu0  ;;  %v3213_v46 = vpop.f32.mrb[7].mxu1 }
 0x10c   : > { %v3105_v38 = vadd.f32 %v3104_v32, %v3103_v17  ;;  %v3106_v40 = vpop.f32.mrb[10].mxu0  ;;  %v4509_v4 = vadd.f32 %v3211_v52, %v1462_v25  ;;  %v3214_v5 = vadd.f32 %v3213_v46, %v3212_v45  ;;  %v2968_v25 = vld [vmem:[#allocation2 + $0x62] sm:$0xff] }
 0x10d   : > { %v3107_v60 = vpop.f32.mrb[11].mxu0  ;;  %2031 = vmatmul.mubr.bf16.gmra.mrb[112].mxu1 %v4394_v54  ;;  %v4538_v45 = vld [vmem:[#allocation2] sm:$0xff]  ;;  %v718_v46 = vpack.c.bf16 %v2969_v31, %v2968_v25 }
 0x10e   : > { %v3108_v3 = vadd.f32 %v3107_v60, %v3106_v40  ;;  %v4514_v14 = vadd.f32 %v3214_v5, %v1465_v50  ;;  %2038 = vmatprep.mubr.bf16.mxu1 %v4272_v21  ;;  %v1470_v1 = vadd.f32 %v3105_v38, %v4493_v42  ;;  %v709_v50 = vpack.c.bf16 %v2967_v19, %v2966_v62 }
 0x10f   : > { %1878 = vmatmul.mubr.bf16.gmra.mrb[116].mxu0 %v4392_v53 }
 0x110   : > { %1885 = vmatprep.mubr.bf16.mxu0 %v4420_v16  ;;  %v3215_v2 = vpop.f32.mrb[8].mxu1  ;;  %v1473_v53 = vadd.f32 %v3108_v3, %v4493_v42 }
 0x111   : > { %v3216_v28 = vpop.f32.mrb[9].mxu1 }
 0x112   : > { %v3109_v10 = vpop.f32.mrb[12].mxu0  ;;  %v3217_v54 = vadd.f32 %v3216_v28, %v3215_v2  ;;  %v3218_v16 = vpop.f32.mrb[10].mxu1  ;;  %v2970_v28 = vld [vmem:[#allocation2 + $0x7a] sm:$0xff] }
 0x113   : > { %v3110_v27 = vpop.f32.mrb[13].mxu0  ;;  %v3219_v6 = vpop.f32.mrb[11].mxu1 }
 0x114   : > { %v3111_v29 = vadd.f32 %v3110_v27, %v3109_v10  ;;  %v3112_v49 = vpop.f32.mrb[14].mxu0  ;;  %v4521_v41 = vadd.f32 %v3217_v54, %v1470_v1  ;;  %v3220_v23 = vadd.f32 %v3219_v6, %v3218_v16  ;;  %v2973_v54 = vld [vmem:[#allocation2 + $0x9a] sm:$0xff] }
 0x115   : > { %v3113_v51 = vpop.f32.mrb[15].mxu0  ;;  %2039 = vmatmul.mubr.bf16.gmra.mrb[116].mxu1 %v4402_v11 }
 0x116   : > { %v3114_v43 = vadd.f32 %v3113_v51, %v3112_v49  ;;  %v4526_v58 = vadd.f32 %v3220_v23, %v1473_v53  ;;  %2046 = vmatprep.mubr.bf16.mxu1 %v4414_v48  ;;  %v1478_v36 = vadd.f32 %v3111_v29, %v4493_v42  ;;  %v2971_v29 = vld [vmem:[#allocation2 + $0x82] sm:$0xff]  ;;  %v2972_v53 = vld [vmem:[#allocation2 + $0x92] sm:$0xff] }
 0x117   : > { %1886 = vmatmul.mubr.bf16.gmra.mrb[120].mxu0 %v4272_v21  ;;  %v727_v23 = vpack.c.bf16 %v2971_v29, %v2970_v28  ;;  %v736_v24 = vpack.c.bf16 %v2973_v54, %v2972_v53 }
 0x118   : > { %1893 = vmatprep.mubr.bf16.mxu0 %v4518_v13  ;;  %v3221_v37 = vpop.f32.mrb[12].mxu1  ;;  %v1481_v11 = vadd.f32 %v3114_v43, %v4493_v42 }
 0x119   : > { %v3222_v56 = vpop.f32.mrb[13].mxu1 }
 0x11a   : > { %v3115_v9 = vpop.f32.mrb[16].mxu0  ;;  %v3223_v12 = vadd.f32 %v3222_v56, %v3221_v37  ;;  %v3224_v15 = vpop.f32.mrb[14].mxu1 }
 0x11b   : > { %v3116_v55 = vpop.f32.mrb[17].mxu0  ;;  %v3225_v44 = vpop.f32.mrb[15].mxu1 }
 0x11c   : > { %v3117_v57 = vadd.f32 %v3116_v55, %v3115_v9  ;;  %v3118_v21 = vpop.f32.mrb[18].mxu0  ;;  %v4531_v59 = vadd.f32 %v3223_v12, %v1478_v36  ;;  %v3226_v61 = vadd.f32 %v3225_v44, %v3224_v15  ;;  %v2975_v12 = vld [vmem:[#allocation2 + $0xb2] sm:$0xff] }
 0x11d   : > { %v3119_v34 = vpop.f32.mrb[19].mxu0  ;;  %2047 = vmatmul.mubr.bf16.gmra.mrb[120].mxu1 %v4410_v30  ;;  %v833_v30 = vpack.c.bf16 %v4538_v45, %v4538_v45 }
 0x11e   : > { %v3120_v47 = vadd.f32 %v3119_v34, %v3118_v21  ;;  %v4535_v17 = vadd.f32 %v3226_v61, %v1481_v11  ;;  %2054 = vmatprep.mubr.bf16.mxu1 %v834_v35  ;;  %v1486_v33 = vadd.f32 %v3117_v57, %v4493_v42  ;;  %v2974_v11 = vld [vmem:[#allocation2 + $0xaa] sm:$0xff]  ;;  %v2976_v34 = vld [vmem:[#allocation2 + $0xc2] sm:$0xff] }
 0x11f   : > { %1894 = vmatmul.mubr.bf16.gmra.mrb[124].mxu0 %v4414_v48  ;;  %v2977_v35 = vld [vmem:[#allocation2 + $0xca] sm:$0xff]  ;;  %v745_v19 = vpack.c.bf16 %v2975_v12, %v2974_v11 }
 0x120   : > { %3597 = vmatprep.mubr.bf16.mxu0 %v700_v8  ;;  %v3227_v38 = vpop.f32.mrb[16].mxu1  ;;  %v1489_v3 = vadd.f32 %v3120_v47, %v4493_v42 }
 0x121   : > { %v3228_v52 = vpop.f32.mrb[17].mxu1 }
 0x122   : > { %v3121_v32 = vpop.f32.mrb[20].mxu0  ;;  %v3229_v5 = vadd.f32 %v3228_v52, %v3227_v38  ;;  %v3230_v18 = vpop.f32.mrb[18].mxu1 }
 0x123   : > { %v3122_v40 = vpop.f32.mrb[21].mxu0  ;;  %v3231_v10 = vpop.f32.mrb[19].mxu1 }
 0x124   : > { %v3123_v48 = vadd.f32 %v3122_v40, %v3121_v32  ;;  %v3124_v60 = vpop.f32.mrb[22].mxu0  ;;  %v4543_v2 = vadd.f32 %v3229_v5, %v1486_v33  ;;  %v3232_v27 = vadd.f32 %v3231_v10, %v3230_v18  ;;  %v754_v33 = vpack.c.bf16 %v2977_v35, %v2976_v34  ;;  %v2979_v5 = vld [vmem:[#allocation2 + $0xe2] sm:$0xff]  ;;  %v2981_v10 = vld [vmem:[#allocation2 + $0xfa] sm:$0xff] }
 0x125   : > { %v3125_v20 = vpop.f32.mrb[23].mxu0  ;;  %2055 = vmatmul.mubr.bf16.gmra.mrb[124].mxu1 %v833_v30 }
 0x126   : > { %v3126_v1 = vadd.f32 %v3125_v20, %v3124_v60  ;;  %v4545_v49 = vadd.f32 %v3232_v27, %v1489_v3  ;;  %v1494_v51 = vadd.f32 %v3123_v48, %v4493_v42  ;;  %v2978_v3 = vld [vmem:[#allocation2 + $0xda] sm:$0xff]  ;;  %v2980_v20 = vld [vmem:[#allocation2 + $0xf2] sm:$0xff]  ;;  %3661 = vmatprep.mubr.msk.f32.mxu1 %vm3876_vm0, %v4538_v45 }
 0x127   : > { %3598 = vmatmul.mubr.bf16.vlgmr.msra.gmra.mrb[128].mxu0 %v709_v50  ;;  %v763_v53 = vpack.c.bf16 %v2979_v5, %v2978_v3  ;;  %v2988_v3 = vld [vmem:[#allocation2 + $0x152] sm:$0xff]  ;;  %v2989_v5 = vld [vmem:[#allocation2 + $0x15a] sm:$0xff] }
 0x128   : > { %3601 = vmatprep.mubr.bf16.mxu0 %v718_v46  ;;  %v3233_v6 = vpop.f32.mrb[20].mxu1  ;;  %v1497_v26 = vadd.f32 %v3126_v1, %v4493_v42 }
 0x129   : > { %v3234_v63 = vpop.f32.mrb[21].mxu1 }
 0x12a   : > { %v3127_v16 = vpop.f32.mrb[24].mxu0  ;;  %v3235_v36 = vadd.f32 %v3234_v63, %v3233_v6  ;;  %v3236_v37 = vpop.f32.mrb[22].mxu1  ;;  %v772_v6 = vpack.c.bf16 %v2981_v10, %v2980_v20 }
 0x12b   : > { %v3128_v43 = vpop.f32.mrb[25].mxu0  ;;  %v3237_v56 = vpop.f32.mrb[23].mxu1 }
 0x12c   : > { %v3129_v7 = vadd.f32 %v3128_v43, %v3127_v16  ;;  %v3130_v9 = vpop.f32.mrb[26].mxu0  ;;  %v4549_v21 = vadd.f32 %v3235_v36, %v1494_v51  ;;  %v3238_v8 = vadd.f32 %v3237_v56, %v3236_v37  ;;  %v2982_v37 = vld [vmem:[#allocation2 + $0x10a] sm:$0xff] }
 0x12d   : > { %v3131_v55 = vpop.f32.mrb[27].mxu0 }
 0x12e   : > { %v3132_v57 = vadd.f32 %v3131_v55, %v3130_v9  ;;  %v4551_v15 = vadd.f32 %v3238_v8, %v1497_v26  ;;  %v1502_v47 = vadd.f32 %v3129_v7, %v4493_v42  ;;  %v2983_v55 = vld [vmem:[#allocation2 + $0x112] sm:$0xff]  ;;  %v2985_v8 = vld [vmem:[#allocation2 + $0x12a] sm:$0xff] }
 0x12f   : > { %3602 = vmatmul.mubr.bf16.gmra.mrb[132].mxu0 %v727_v23 }
 0x130   : > { %3605 = vmatprep.mubr.bf16.mxu0 %v736_v24  ;;  %v3239_v61 = vpop.f32.mrb[24].mxu1  ;;  %v1505_v38 = vadd.f32 %v3132_v57, %v4493_v42  ;;  %v2984_v57 = vld [vmem:[#allocation2 + $0x122] sm:$0xff] }
 0x131   : > { %v3240_v25 = vpop.f32.mrb[25].mxu1 }
 0x132   : > { %v3133_v44 = vpop.f32.mrb[28].mxu0  ;;  %v3241_v40 = vadd.f32 %v3240_v25, %v3239_v61  ;;  %v3242_v50 = vpop.f32.mrb[26].mxu1 }
 0x133   : > { %v3134_v62 = vpop.f32.mrb[29].mxu0  ;;  %v3243_v30 = vpop.f32.mrb[27].mxu1 }
 0x134   : > { %v3135_v31 = vadd.f32 %v3134_v62, %v3133_v44  ;;  %v3136_v32 = vpop.f32.mrb[30].mxu0  ;;  %v4555_v60 = vadd.f32 %v3241_v40, %v1502_v47  ;;  %v3244_v46 = vadd.f32 %v3243_v30, %v3242_v50  ;;  %v781_v44 = vpack.c.bf16 %v2983_v55, %v2982_v37  ;;  %v2986_v30 = vld [vmem:[#allocation2 + $0x13a] sm:$0xff]  ;;  %v2262_v37 = vld [vmem:[%s5240_s5 + $0x8] sm:$0xff] }
 0x135   : > { %v3137_v52 = vpop.f32.mrb[31].mxu0  ;;  %v2990_v55 = vld [vmem:[#allocation2 + $0x16a] sm:$0xff] }
 0x136   : > { %v3138_v48 = vadd.f32 %v3137_v52, %v3136_v32  ;;  %v4557_v18 = vadd.f32 %v3244_v46, %v1505_v38  ;;  %v1510_v27 = vadd.f32 %v3135_v31, %v4493_v42 }
 0x137   : > { %3606 = vmatmul.mubr.bf16.gmra.mrb[136].mxu0 %v745_v19  ;;  %v790_v19 = vpack.c.bf16 %v2985_v8, %v2984_v57  ;;  %v2991_v57 = vld [vmem:[#allocation2 + $0x172] sm:$0xff] }
 0x138   : > { %3609 = vmatprep.mubr.bf16.mxu0 %v754_v33  ;;  %v3245_v28 = vpop.f32.mrb[28].mxu1  ;;  %v1513_v43 = vadd.f32 %v3138_v48, %v4493_v42  ;;  %v2987_v48 = vld [vmem:[#allocation2 + $0x142] sm:$0xff] }
 0x139   : > { %v3246_v54 = vpop.f32.mrb[29].mxu1 }
 0x13a   : > { %v3139_v1 = vpop.f32.mrb[32].mxu0  ;;  %v3247_v23 = vadd.f32 %v3246_v54, %v3245_v28  ;;  %v3248_v63 = vpop.f32.mrb[30].mxu1  ;;  %v799_v28 = vpack.c.bf16 %v2987_v48, %v2986_v30  ;;  %v2994_v48 = vld [vmem:[#allocation2 + $0x19a] sm:$0xff] }
 0x13b   : > { %v3140_v29 = vpop.f32.mrb[33].mxu0  ;;  %v3249_v9 = vpop.f32.mrb[31].mxu1 }
 0x13c   : > { %v3141_v16 = vadd.f32 %v3140_v29, %v3139_v1  ;;  %v3142_v51 = vpop.f32.mrb[34].mxu0  ;;  %v4561_v26 = vadd.f32 %v3247_v23, %v1510_v27  ;;  %v3250_v36 = vadd.f32 %v3249_v9, %v3248_v63 }
 0x13d   : > { %v3143_v7 = vpop.f32.mrb[35].mxu0 }
 0x13e   : > { %v3144_v24 = vadd.f32 %v3143_v7, %v3142_v51  ;;  %v4563_v56 = vadd.f32 %v3250_v36, %v1513_v43  ;;  %v1518_v12 = vadd.f32 %v3141_v16, %v4493_v42  ;;  %v808_v16 = vpack.c.bf16 %v2989_v5, %v2988_v3  ;;  %v2261_v36 = vld [vmem:[%s5240_s5] sm:$0xff] }
 0x13f   : > { %3610 = vmatmul.mubr.bf16.gmra.mrb[140].mxu0 %v763_v53  ;;  %v4582_v8 = vpack.c.bf16 %v2262_v37, %v2261_v36  ;;  %v2995_v3 = vld [vmem:[#allocation2 + $0x1a2] sm:$0xff]  ;;  %v2264_v36 = vld [vmem:[%s5240_s5 + $0x18] sm:$0xff] }
 0x140   : > { %3613 = vmatprep.mubr.bf16.mxu0 %v772_v6  ;;  %v3251_v34 = vpop.f32.mrb[32].mxu1  ;;  %v1521_v25 = vadd.f32 %v3144_v24, %v4493_v42 }
 0x141   : > { %v3252_v47 = vpop.f32.mrb[33].mxu1  ;;  %3701 = vmatpush3.bf16.msra.mxu1 %v4582_v8 }
 0x142   : > { %v3145_v11 = vpop.f32.mrb[36].mxu0  ;;  %v3253_v31 = vadd.f32 %v3252_v47, %v3251_v34  ;;  %v3254_v32 = vpop.f32.mrb[34].mxu1  ;;  %v817_v47 = vpack.c.bf16 %v2991_v57, %v2990_v55  ;;  %3702 = vmatprep.subr.bf16.mxu1 %v3875_v39 }
 0x143   : > { %v3146_v35 = vpop.f32.mrb[37].mxu0  ;;  %v3255_v38 = vpop.f32.mrb[35].mxu1 }
 0x144   : > { %v3147_v61 = vadd.f32 %v3146_v35, %v3145_v11  ;;  %v3148_v62 = vpop.f32.mrb[38].mxu0  ;;  %v4567_v50 = vadd.f32 %v3253_v31, %v1518_v12  ;;  %v3256_v52 = vadd.f32 %v3255_v38, %v3254_v32 }
 0x145   : > { %v3149_v33 = vpop.f32.mrb[39].mxu0 }
 0x146   : > { %v3150_v40 = vadd.f32 %v3149_v33, %v3148_v62  ;;  %v4569_v46 = vadd.f32 %v3256_v52, %v1521_v25  ;;  %v1526_v10 = vadd.f32 %v3147_v61, %v4493_v42 }
 0x147   : > { %3614 = vmatmul.mubr.bf16.gmra.mrb[144].mxu0 %v781_v44 }
 0x148   : > { %3617 = vmatprep.mubr.bf16.mxu0 %v790_v19  ;;  %v3257_v1 = vpop.f32.mrb[36].mxu1  ;;  %v1529_v51 = vadd.f32 %v3150_v40, %v4493_v42 }
 0x149   : > { %v3258_v29 = vpop.f32.mrb[37].mxu1 }
 0x14a   : > { %v3151_v20 = vpop.f32.mrb[40].mxu0  ;;  %v3259_v6 = vadd.f32 %v3258_v29, %v3257_v1  ;;  %v3260_v43 = vpop.f32.mrb[38].mxu1 }
 0x14b   : > { %v3152_v27 = vpop.f32.mrb[41].mxu0  ;;  %v3261_v63 = vpop.f32.mrb[39].mxu1 }
 0x14c   : > { %v3153_v53 = vadd.f32 %v3152_v27, %v3151_v20  ;;  %v3154_v54 = vpop.f32.mrb[42].mxu0  ;;  %v4573_v9 = vadd.f32 %v3259_v6, %v1526_v10  ;;  %v3262_v24 = vadd.f32 %v3261_v63, %v3260_v43 }
 0x14d   : > { %v3155_v23 = vpop.f32.mrb[43].mxu0 }
 0x14e   : > { %v3156_v7 = vadd.f32 %v3155_v23, %v3154_v54  ;;  %v4584_v11 = vadd.f32 %v3262_v24, %v1529_v51  ;;  %v1534_v34 = vadd.f32 %v3153_v53, %v4493_v42  ;;  %v2263_v24 = vld [vmem:[%s5240_s5 + $0x10] sm:$0xff] }
 0x14f   : > { %3618 = vmatmul.mubr.bf16.gmra.mrb[148].mxu0 %v799_v28  ;;  %v835_v28 = vpack.c.bf16 %v2995_v3, %v2994_v48  ;;  %v4605_v37 = vpack.c.bf16 %v2264_v36, %v2263_v24 }
 0x150   : > { %3621 = vmatprep.mubr.bf16.mxu0 %v808_v16  ;;  %v3263_v35 = vpop.f32.mrb[40].mxu1  ;;  %v1537_v25 = vadd.f32 %v3156_v7, %v4493_v42 }
 0x151   : > { %v3264_v61 = vpop.f32.mrb[41].mxu1  ;;  %3704 = vmatpush3.bf16.msra.mxu1 %v4605_v37 }
 0x152   : > { %v3157_v12 = vpop.f32.mrb[44].mxu0  ;;  %v3265_v31 = vadd.f32 %v3264_v61, %v3263_v35  ;;  %v3266_v32 = vpop.f32.mrb[42].mxu1  ;;  %3705 = vmatprep.subr.bf16.mxu1 %v3875_v39 }
 0x153   : > { %v3158_v44 = vpop.f32.mrb[45].mxu0  ;;  %v3267_v38 = vpop.f32.mrb[43].mxu1 }
 0x154   : > { %v3159_v62 = vadd.f32 %v3158_v44, %v3157_v12  ;;  %v3160_v19 = vpop.f32.mrb[46].mxu0  ;;  %v4590_v52 = vadd.f32 %v3265_v31, %v1534_v34  ;;  %v3268_v30 = vadd.f32 %v3267_v38, %v3266_v32 }
 0x155   : > { %v3161_v33 = vpop.f32.mrb[47].mxu0 }
 0x156   : > { %v3162_v40 = vadd.f32 %v3161_v33, %v3160_v19  ;;  %v4593_v5 = vadd.f32 %v3268_v30, %v1537_v25  ;;  %v1542_v10 = vadd.f32 %v3159_v62, %v4493_v42 }
 0x157   : > { %3622 = vmatmul.mubr.bf16.gmra.mrb[152].mxu0 %v817_v47 }
 0x158   : > { %3625 = vmatprep.mubr.bf16.mxu0 %v4518_v13  ;;  %v3269_v1 = vpop.f32.mrb[44].mxu1  ;;  %v1545_v16 = vadd.f32 %v3162_v40, %v4493_v42 }
 0x159   : > { %v3270_v29 = vpop.f32.mrb[45].mxu1 }
 0x15a   : > { %v3163_v20 = vpop.f32.mrb[48].mxu0  ;;  %v3271_v51 = vadd.f32 %v3270_v29, %v3269_v1  ;;  %v3272_v6 = vpop.f32.mrb[46].mxu1 }
 0x15b   : > { %v3164_v27 = vpop.f32.mrb[49].mxu0  ;;  %v3273_v23 = vpop.f32.mrb[47].mxu1 }
 0x15c   : > { %v3165_v53 = vadd.f32 %v3164_v27, %v3163_v20  ;;  %v3166_v54 = vpop.f32.mrb[50].mxu0  ;;  %v4597_v63 = vadd.f32 %v3271_v51, %v1542_v10  ;;  %v3274_v7 = vadd.f32 %v3273_v23, %v3272_v6 }
 0x15d   : > { %v3167_v43 = vpop.f32.mrb[51].mxu0 }
 0x15e   : > { %v3168_v13 = vadd.f32 %v3167_v43, %v3166_v54  ;;  %v4607_v55 = vadd.f32 %v3274_v7, %v1545_v16  ;;  %v1550_v12 = vadd.f32 %v3165_v53, %v4493_v42  ;;  %v2266_v7 = vld [vmem:[%s5240_s5 + $0x28] sm:$0xff] }
 0x15f   : > { %3626 = vmatmul.mubr.bf16.gmra.mrb[156].mxu0 %v835_v28 }
 0x160   : > { %v3275_v34 = vpop.f32.mrb[48].mxu1  ;;  %v1553_v62 = vadd.f32 %v3168_v13, %v4493_v42  ;;  %v2265_v13 = vld [vmem:[%s5240_s5 + $0x20] sm:$0xff] }
 0x161   : > { %v3276_v44 = vpop.f32.mrb[49].mxu1  ;;  %v4627_v24 = vpack.c.bf16 %v2266_v7, %v2265_v13 }
 0x162   : > { %v3169_v57 = vpop.f32.mrb[52].mxu0  ;;  %v3277_v19 = vadd.f32 %v3276_v44, %v3275_v34  ;;  %v3278_v25 = vpop.f32.mrb[50].mxu1 }
 0x163   : > { %v3170_v35 = vpop.f32.mrb[53].mxu0  ;;  %v3279_v32 = vpop.f32.mrb[51].mxu1  ;;  %3707 = vmatpush3.bf16.msra.mxu1 %v4627_v24 }
 0x164   : > { %v3171_v47 = vadd.f32 %v3170_v35, %v3169_v57  ;;  %v3172_v61 = vpop.f32.mrb[54].mxu0  ;;  %v4613_v38 = vadd.f32 %v3277_v19, %v1550_v12  ;;  %v3280_v40 = vadd.f32 %v3279_v32, %v3278_v25  ;;  %3708 = vmatprep.subr.bf16.mxu1 %v3875_v39 }
 0x165   : > { %v3173_v31 = vpop.f32.mrb[55].mxu0 }
 0x166   : > { %v3174_v33 = vadd.f32 %v3173_v31, %v3172_v61  ;;  %v4615_v30 = vadd.f32 %v3280_v40, %v1553_v62  ;;  %v1558_v3 = vadd.f32 %v3171_v47, %v4493_v42 }
 0x168   : > { %v3281_v20 = vpop.f32.mrb[52].mxu1  ;;  %v1561_v29 = vadd.f32 %v3174_v33, %v4493_v42 }
 0x169   : > { %v3282_v1 = vpop.f32.mrb[53].mxu1 }
 0x16a   : > { %v3175_v48 = vpop.f32.mrb[56].mxu0  ;;  %v3283_v53 = vadd.f32 %v3282_v1, %v3281_v20  ;;  %v3284_v54 = vpop.f32.mrb[54].mxu1 }
 0x16b   : > { %v3176_v10 = vpop.f32.mrb[57].mxu0  ;;  %v3285_v51 = vpop.f32.mrb[55].mxu1 }
 0x16c   : > { %v3177_v27 = vadd.f32 %v3176_v10, %v3175_v48  ;;  %v3178_v28 = vpop.f32.mrb[58].mxu0  ;;  %v4619_v43 = vadd.f32 %v3283_v53, %v1558_v3  ;;  %v3286_v23 = vadd.f32 %v3285_v51, %v3284_v54 }
 0x16d   : > { %v3179_v16 = vpop.f32.mrb[59].mxu0 }
 0x16e   : > { %v3180_v6 = vadd.f32 %v3179_v16, %v3178_v28  ;;  %v4629_v36 = vadd.f32 %v3286_v23, %v1561_v29  ;;  %v1566_v12 = vadd.f32 %v3177_v27, %v4493_v42 }
 0x170   : > { %v3287_v34 = vpop.f32.mrb[56].mxu1  ;;  %v1569_v62 = vadd.f32 %v3180_v6, %v4493_v42 }
 0x171   : > { %v3288_v44 = vpop.f32.mrb[57].mxu1 }
 0x172   : > { %v3181_v57 = vpop.f32.mrb[60].mxu0  ;;  %v3289_v19 = vadd.f32 %v3288_v44, %v3287_v34  ;;  %v3290_v25 = vpop.f32.mrb[58].mxu1  ;;  %v2267_v34 = vld [vmem:[%s5240_s5 + $0x30] sm:$0xff] }
 0x173   : > { %v3182_v35 = vpop.f32.mrb[61].mxu0  ;;  %v3291_v32 = vpop.f32.mrb[59].mxu1 }
 0x174   : > { %v3183_v47 = vadd.f32 %v3182_v35, %v3181_v57  ;;  %v3184_v61 = vpop.f32.mrb[62].mxu0  ;;  %v4635_v40 = vadd.f32 %v3289_v19, %v1566_v12  ;;  %v3292_v48 = vadd.f32 %v3291_v32, %v3290_v25  ;;  %v2268_v35 = vld [vmem:[%s5240_s5 + $0x38] sm:$0xff] }
 0x175   : > { %v3185_v31 = vpop.f32.mrb[63].mxu0  ;;  %v4651_v44 = vpack.c.bf16 %v2268_v35, %v2267_v34 }
 0x176   : > { %v3186_v33 = vadd.f32 %v3185_v31, %v3184_v61  ;;  %v4637_v3 = vadd.f32 %v3292_v48, %v1569_v62  ;;  %v1574_v10 = vadd.f32 %v3183_v47, %v4493_v42 }
 0x177   : > { %3710 = vmatpush3.bf16.msra.mxu1 %v4651_v44 }
 0x178   : > { %v3293_v1 = vpop.f32.mrb[60].mxu1  ;;  %v1577_v54 = vadd.f32 %v3186_v33, %v4493_v42  ;;  %3711 = vmatprep.subr.bf16.mxu1 %v3875_v39 }
 0x179   : > { %v3294_v28 = vpop.f32.mrb[61].mxu1 }
 0x17a   : > { %v3315_v20 = vpop.f32.mrb[64].mxu0  ;;  %v3295_v16 = vadd.f32 %v3294_v28, %v3293_v1  ;;  %v3296_v51 = vpop.f32.mrb[62].mxu1 }
 0x17b   : > { %v3316_v27 = vpop.f32.mrb[65].mxu0  ;;  %v3297_v23 = vpop.f32.mrb[63].mxu1 }
 0x17c   : > { %v3317_v29 = vadd.f32 %v3316_v27, %v3315_v20  ;;  %v3318_v53 = vpop.f32.mrb[66].mxu0  ;;  %v4642_v57 = vadd.f32 %v3295_v16, %v1574_v10  ;;  %v3298_v12 = vadd.f32 %v3297_v23, %v3296_v51 }
 0x17d   : > { %v3319_v6 = vpop.f32.mrb[67].mxu0 }
 0x17e   : > { %v1776_v13 = vadd.f32 %v3317_v29, %v4499_v0  ;;  %v3320_v7 = vadd.f32 %v3319_v6, %v3318_v53  ;;  %v4653_v47 = vadd.f32 %v3298_v12, %v1577_v54 }
 0x180   : > { %v1779_v42 = vadd.f32 %v3320_v7, %v4504_v22  ;;  %v3427_v0 = vpop.f32.mrb[64].mxu1 }
 0x181   : > { %v3428_v19 = vpop.f32.mrb[65].mxu1 }
 0x182   : > { %v3321_v61 = vpop.f32.mrb[68].mxu0  ;;  %v3429_v32 = vadd.f32 %v3428_v19, %v3427_v0  ;;  %v3430_v33 = vpop.f32.mrb[66].mxu1 }
 0x183   : > { %v3322_v62 = vpop.f32.mrb[69].mxu0  ;;  %v3431_v20 = vpop.f32.mrb[67].mxu1 }
 0x184   : > { %v3323_v25 = vadd.f32 %v3322_v62, %v3321_v61  ;;  %v3324_v31 = vpop.f32.mrb[70].mxu0  ;;  %v3432_v1 = vadd.f32 %v3431_v20, %v3430_v33  ;;  %v4658_v27 = vadd.f32 %v3429_v32, %v1776_v13  ;;  %v2269_v13 = vld [vmem:[%s5240_s5 + $0x40] sm:$0xff] }
 0x185   : > { %v3325_v48 = vpop.f32.mrb[71].mxu0 }
 0x186   : > { %v1784_v22 = vadd.f32 %v3323_v25, %v4509_v4  ;;  %v3326_v10 = vadd.f32 %v3325_v48, %v3324_v31  ;;  %v4661_v29 = vadd.f32 %v3432_v1, %v1779_v42 }
 0x188   : > { %v1787_v28 = vadd.f32 %v3326_v10, %v4514_v14  ;;  %v3433_v54 = vpop.f32.mrb[68].mxu1  ;;  %v2270_v14 = vld [vmem:[%s5240_s5 + $0x48] sm:$0xff] }
 0x189   : > { %v3434_v51 = vpop.f32.mrb[69].mxu1  ;;  %v4672_v62 = vpack.c.bf16 %v2270_v14, %v2269_v13 }
 0x18a   : > { %v3327_v53 = vpop.f32.mrb[72].mxu0  ;;  %v3435_v7 = vadd.f32 %v3434_v51, %v3433_v54  ;;  %v3436_v12 = vpop.f32.mrb[70].mxu1 }
 0x18b   : > { %v3328_v16 = vpop.f32.mrb[73].mxu0  ;;  %v3437_v35 = vpop.f32.mrb[71].mxu1  ;;  %3713 = vmatpush3.bf16.msra.mxu1 %v4672_v62 }
 0x18c   : > { %v3329_v6 = vadd.f32 %v3328_v16, %v3327_v53  ;;  %v3330_v23 = vpop.f32.mrb[74].mxu0  ;;  %v3438_v42 = vadd.f32 %v3437_v35, %v3436_v12  ;;  %v4670_v0 = vadd.f32 %v3435_v7, %v1784_v22  ;;  %3714 = vmatprep.subr.bf16.mxu1 %v3875_v39 }
 0x18d   : > { %v3331_v34 = vpop.f32.mrb[75].mxu0 }
 0x18e   : > { %v1792_v4 = vadd.f32 %v3329_v6, %v4521_v41  ;;  %v3332_v61 = vadd.f32 %v3331_v34, %v3330_v23  ;;  %v4675_v25 = vadd.f32 %v3438_v42, %v1787_v28 }
 0x190   : > { %v1795_v19 = vadd.f32 %v3332_v61, %v4526_v58  ;;  %v3439_v31 = vpop.f32.mrb[72].mxu1 }
 0x191   : > { %v3440_v33 = vpop.f32.mrb[73].mxu1 }
 0x192   : > { %v3333_v41 = vpop.f32.mrb[76].mxu0  ;;  %v3441_v10 = vadd.f32 %v3440_v33, %v3439_v31  ;;  %v3442_v1 = vpop.f32.mrb[74].mxu1 }
 0x193   : > { %v3334_v32 = vpop.f32.mrb[77].mxu0  ;;  %v3443_v53 = vpop.f32.mrb[75].mxu1 }
 0x194   : > { %v3335_v48 = vadd.f32 %v3334_v32, %v3333_v41  ;;  %v3336_v20 = vpop.f32.mrb[78].mxu0  ;;  %v3444_v58 = vadd.f32 %v3443_v53, %v3442_v1  ;;  %v4680_v28 = vadd.f32 %v3441_v10, %v1792_v4  ;;  %v2271_v4 = vld [vmem:[%s5240_s5 + $0x50] sm:$0xff] }
 0x195   : > { %v3337_v22 = vpop.f32.mrb[79].mxu0 }
 0x196   : > { %v1800_v54 = vadd.f32 %v3335_v48, %v4531_v59  ;;  %v3338_v16 = vadd.f32 %v3337_v22, %v3336_v20  ;;  %v4683_v6 = vadd.f32 %v3444_v58, %v1795_v19 }
 0x198   : > { %v1803_v51 = vadd.f32 %v3338_v16, %v4535_v17  ;;  %v3445_v7 = vpop.f32.mrb[76].mxu1  ;;  %v2272_v17 = vld [vmem:[%s5240_s5 + $0x58] sm:$0xff] }
 0x199   : > { %v3446_v34 = vpop.f32.mrb[77].mxu1  ;;  %v4694_v33 = vpack.c.bf16 %v2272_v17, %v2271_v4 }
 0x19a   : > { %v3339_v23 = vpop.f32.mrb[80].mxu0  ;;  %v3447_v13 = vadd.f32 %v3446_v34, %v3445_v7  ;;  %v3448_v14 = vpop.f32.mrb[78].mxu1 }
 0x19b   : > { %v3340_v12 = vpop.f32.mrb[81].mxu0  ;;  %v3449_v41 = vpop.f32.mrb[79].mxu1  ;;  %3716 = vmatpush3.bf16.msra.mxu1 %v4694_v33 }
 0x19c   : > { %v3341_v35 = vadd.f32 %v3340_v12, %v3339_v23  ;;  %v3342_v61 = vpop.f32.mrb[82].mxu0  ;;  %v3450_v19 = vadd.f32 %v3449_v41, %v3448_v14  ;;  %v4692_v32 = vadd.f32 %v3447_v13, %v1800_v54  ;;  %3717 = vmatprep.subr.bf16.mxu1 %v3875_v39 }
 0x19d   : > { %v3343_v42 = vpop.f32.mrb[83].mxu0 }
 0x19e   : > { %v1808_v59 = vadd.f32 %v3341_v35, %v4543_v2  ;;  %v3344_v31 = vadd.f32 %v3343_v42, %v3342_v61  ;;  %v4697_v20 = vadd.f32 %v3450_v19, %v1803_v51 }
 0x1a0   : > { %v1811_v48 = vadd.f32 %v3344_v31, %v4545_v49  ;;  %v3451_v10 = vpop.f32.mrb[80].mxu1 }
 0x1a1   : > { %v3452_v22 = vpop.f32.mrb[81].mxu1 }
 0x1a2   : > { %v3345_v2 = vpop.f32.mrb[84].mxu0  ;;  %v3453_v58 = vadd.f32 %v3452_v22, %v3451_v10  ;;  %v3454_v23 = vpop.f32.mrb[82].mxu1 }
 0x1a3   : > { %v3346_v1 = vpop.f32.mrb[85].mxu0  ;;  %v3455_v7 = vpop.f32.mrb[83].mxu1 }
 0x1a4   : > { %v3347_v53 = vadd.f32 %v3346_v1, %v3345_v2  ;;  %v3348_v16 = vpop.f32.mrb[86].mxu0  ;;  %v3456_v49 = vadd.f32 %v3455_v7, %v3454_v23  ;;  %v4702_v51 = vadd.f32 %v3453_v58, %v1808_v59  ;;  %v2273_v59 = vld [vmem:[%s5240_s5 + $0x60] sm:$0xff] }
 0x1a5   : > { %v3349_v54 = vpop.f32.mrb[87].mxu0 }
 0x1a6   : > { %v1816_v12 = vadd.f32 %v3347_v53, %v4549_v21  ;;  %v3350_v34 = vadd.f32 %v3349_v54, %v3348_v16  ;;  %v4705_v61 = vadd.f32 %v3456_v49, %v1811_v48 }
 0x1a8   : > { %v1819_v35 = vadd.f32 %v3350_v34, %v4551_v15  ;;  %v3457_v14 = vpop.f32.mrb[84].mxu1  ;;  %v2274_v15 = vld [vmem:[%s5240_s5 + $0x68] sm:$0xff] }
 0x1a9   : > { %v3458_v41 = vpop.f32.mrb[85].mxu1  ;;  %v4716_v53 = vpack.c.bf16 %v2274_v15, %v2273_v59 }
 0x1aa   : > { %v3351_v13 = vpop.f32.mrb[88].mxu0  ;;  %v3459_v17 = vadd.f32 %v3458_v41, %v3457_v14  ;;  %v3460_v19 = vpop.f32.mrb[86].mxu1 }
 0x1ab   : > { %v3352_v42 = vpop.f32.mrb[89].mxu0  ;;  %v3461_v10 = vpop.f32.mrb[87].mxu1  ;;  %3719 = vmatpush3.bf16.msra.mxu1 %v4716_v53 }
 0x1ac   : > { %v3353_v31 = vadd.f32 %v3352_v42, %v3351_v13  ;;  %v3354_v4 = vpop.f32.mrb[90].mxu0  ;;  %v3462_v48 = vadd.f32 %v3461_v10, %v3460_v19  ;;  %v4714_v22 = vadd.f32 %v3459_v17, %v1816_v12  ;;  %3720 = vmatprep.subr.bf16.mxu1 %v3875_v39 }
 0x1ad   : > { %v3355_v2 = vpop.f32.mrb[91].mxu0 }
 0x1ae   : > { %v1824_v21 = vadd.f32 %v3353_v31, %v4555_v60  ;;  %v3356_v1 = vadd.f32 %v3355_v2, %v3354_v4  ;;  %v4719_v58 = vadd.f32 %v3462_v48, %v1819_v35 }
 0x1b0   : > { %v1827_v16 = vadd.f32 %v3356_v1, %v4557_v18  ;;  %v3463_v23 = vpop.f32.mrb[88].mxu1 }
 0x1b1   : > { %v3464_v7 = vpop.f32.mrb[89].mxu1 }
 0x1b2   : > { %v3357_v60 = vpop.f32.mrb[92].mxu0  ;;  %v3465_v13 = vadd.f32 %v3464_v7, %v3463_v23  ;;  %v3466_v14 = vpop.f32.mrb[90].mxu1 }
 0x1b3   : > { %v3358_v54 = vpop.f32.mrb[93].mxu0  ;;  %v3467_v42 = vpop.f32.mrb[91].mxu1 }
 0x1b4   : > { %v3359_v34 = vadd.f32 %v3358_v54, %v3357_v60  ;;  %v3360_v49 = vpop.f32.mrb[94].mxu0  ;;  %v3468_v18 = vadd.f32 %v3467_v42, %v3466_v14  ;;  %v4724_v35 = vadd.f32 %v3465_v13, %v1824_v21 }
 0x1b5   : > { %v3361_v12 = vpop.f32.mrb[95].mxu0 }
 0x1b6   : > { %v1832_v41 = vadd.f32 %v3359_v34, %v4561_v26  ;;  %v3362_v31 = vadd.f32 %v3361_v12, %v3360_v49  ;;  %v4727_v17 = vadd.f32 %v3468_v18, %v1827_v16 }
 0x1b8   : > { %v1835_v4 = vadd.f32 %v3362_v31, %v4563_v56  ;;  %v3469_v2 = vpop.f32.mrb[92].mxu1 }
 0x1b9   : > { %v3470_v1 = vpop.f32.mrb[93].mxu1 }
 0x1ba   : > { %v3363_v19 = vpop.f32.mrb[96].mxu0  ;;  %v3471_v48 = vadd.f32 %v3470_v1, %v3469_v2  ;;  %v3472_v60 = vpop.f32.mrb[94].mxu1 }
 0x1bb   : > { %v3364_v10 = vpop.f32.mrb[97].mxu0  ;;  %v3473_v54 = vpop.f32.mrb[95].mxu1 }
 0x1bc   : > { %v3365_v59 = vadd.f32 %v3364_v10, %v3363_v19  ;;  %v3366_v15 = vpop.f32.mrb[98].mxu0  ;;  %v3474_v34 = vadd.f32 %v3473_v54, %v3472_v60  ;;  %v4730_v21 = vadd.f32 %v3471_v48, %v1832_v41  ;;  %v2275_v41 = vld [vmem:[%s5240_s5 + $0x70] sm:$0xff] }
 0x1bd   : > { %v3367_v23 = vpop.f32.mrb[99].mxu0 }
 0x1be   : > { %v1840_v26 = vadd.f32 %v3365_v59, %v4567_v50  ;;  %v3368_v7 = vadd.f32 %v3367_v23, %v3366_v15  ;;  %v4733_v16 = vadd.f32 %v3474_v34, %v1835_v4 }
 0x1c0   : > { %v1843_v56 = vadd.f32 %v3368_v7, %v4569_v46  ;;  %v3475_v13 = vpop.f32.mrb[96].mxu1  ;;  %v2276_v46 = vld [vmem:[%s5240_s5 + $0x78] sm:$0xff] }
 0x1c1   : > { %v3476_v12 = vpop.f32.mrb[97].mxu1  ;;  %v4744_v15 = vpack.c.bf16 %v2276_v46, %v2275_v41 }
 0x1c2   : > { %v3369_v49 = vpop.f32.mrb[100].mxu0  ;;  %v3477_v18 = vadd.f32 %v3476_v12, %v3475_v13  ;;  %v3478_v19 = vpop.f32.mrb[98].mxu1 }
 0x1c3   : > { %v3370_v14 = vpop.f32.mrb[101].mxu0  ;;  %v3479_v10 = vpop.f32.mrb[99].mxu1  ;;  %3722 = vmatpush3.bf16.msra.mxu1 %v4744_v15 }
 0x1c4   : > { %v3371_v42 = vadd.f32 %v3370_v14, %v3369_v49  ;;  %v3372_v31 = vpop.f32.mrb[102].mxu0  ;;  %v3480_v4 = vadd.f32 %v3479_v10, %v3478_v19  ;;  %v4742_v59 = vadd.f32 %v3477_v18, %v1840_v26  ;;  %3723 = vmatprep.subr.bf16.mxu1 %v3875_v39 }
 0x1c5   : > { %v3373_v2 = vpop.f32.mrb[103].mxu0 }
 0x1c6   : > { %v1848_v50 = vadd.f32 %v3371_v42, %v4573_v9  ;;  %v3374_v1 = vadd.f32 %v3373_v2, %v3372_v31  ;;  %v4749_v48 = vadd.f32 %v3480_v4, %v1843_v56 }
 0x1c8   : > { %v1851_v9 = vadd.f32 %v3374_v1, %v4584_v11  ;;  %v3481_v23 = vpop.f32.mrb[100].mxu1 }
 0x1c9   : > { %v3482_v7 = vpop.f32.mrb[101].mxu1 }
 0x1ca   : > { %v3375_v60 = vpop.f32.mrb[104].mxu0  ;;  %v3483_v49 = vadd.f32 %v3482_v7, %v3481_v23  ;;  %v3484_v13 = vpop.f32.mrb[102].mxu1 }
 0x1cb   : > { %v3376_v54 = vpop.f32.mrb[105].mxu0  ;;  %v3485_v12 = vpop.f32.mrb[103].mxu1 }
 0x1cc   : > { %v3377_v26 = vadd.f32 %v3376_v54, %v3375_v60  ;;  %v3378_v34 = vpop.f32.mrb[106].mxu0  ;;  %v3486_v11 = vadd.f32 %v3485_v12, %v3484_v13  ;;  %v4754_v56 = vadd.f32 %v3483_v49, %v1848_v50 }
 0x1cd   : > { %v3379_v14 = vpop.f32.mrb[107].mxu0 }
 0x1ce   : > { %v1856_v45 = vadd.f32 %v3377_v26, %v4590_v52  ;;  %v3380_v42 = vadd.f32 %v3379_v14, %v3378_v34  ;;  %v4757_v18 = vadd.f32 %v3486_v11, %v1851_v9 }
 0x1d0   : > { %v1859_v31 = vadd.f32 %v3380_v42, %v4593_v5  ;;  %v3487_v2 = vpop.f32.mrb[104].mxu1 }
 0x1d1   : > { %v3488_v1 = vpop.f32.mrb[105].mxu1 }
 0x1d2   : > { %v3381_v19 = vpop.f32.mrb[108].mxu0  ;;  %v3489_v4 = vadd.f32 %v3488_v1, %v3487_v2  ;;  %v3490_v60 = vpop.f32.mrb[106].mxu1 }
 0x1d3   : > { %v3382_v10 = vpop.f32.mrb[109].mxu0  ;;  %v3491_v54 = vpop.f32.mrb[107].mxu1 }
 0x1d4   : > { %v3383_v41 = vadd.f32 %v3382_v10, %v3381_v19  ;;  %v3384_v46 = vpop.f32.mrb[110].mxu0  ;;  %v3492_v26 = vadd.f32 %v3491_v54, %v3490_v60  ;;  %v4760_v50 = vadd.f32 %v3489_v4, %v1856_v45 }
 0x1d5   : > { %v3385_v23 = vpop.f32.mrb[111].mxu0 }
 0x1d6   : > { %v1864_v52 = vadd.f32 %v3383_v41, %v4597_v63  ;;  %v3386_v7 = vadd.f32 %v3385_v23, %v3384_v46  ;;  %v4763_v9 = vadd.f32 %v3492_v26, %v1859_v31 }
 0x1d8   : > { %v1867_v5 = vadd.f32 %v3386_v7, %v4607_v55  ;;  %v3493_v49 = vpop.f32.mrb[108].mxu1 }
 0x1d9   : > { %v3494_v14 = vpop.f32.mrb[109].mxu1 }
 0x1da   : > { %v3387_v34 = vpop.f32.mrb[112].mxu0  ;;  %v3495_v11 = vadd.f32 %v3494_v14, %v3493_v49  ;;  %v3496_v19 = vpop.f32.mrb[110].mxu1 }
 0x1db   : > { %v3388_v13 = vpop.f32.mrb[113].mxu0  ;;  %v3497_v10 = vpop.f32.mrb[111].mxu1 }
 0x1dc   : > { %v3389_v12 = vadd.f32 %v3388_v13, %v3387_v34  ;;  %v3390_v42 = vpop.f32.mrb[114].mxu0  ;;  %v3498_v41 = vadd.f32 %v3497_v10, %v3496_v19  ;;  %v4766_v45 = vadd.f32 %v3495_v11, %v1864_v52 }
 0x1dd   : > { %v3391_v2 = vpop.f32.mrb[115].mxu0 }
 0x1de   : > { %v1872_v63 = vadd.f32 %v3389_v12, %v4613_v38  ;;  %v3392_v1 = vadd.f32 %v3391_v2, %v3390_v42  ;;  %v4769_v31 = vadd.f32 %v3498_v41, %v1867_v5 }
 0x1e0   : > { %v1875_v55 = vadd.f32 %v3392_v1, %v4615_v30  ;;  %v3499_v4 = vpop.f32.mrb[112].mxu1 }
 0x1e1   : > { %v3500_v23 = vpop.f32.mrb[113].mxu1 }
 0x1e2   : > { %v3393_v46 = vpop.f32.mrb[116].mxu0  ;;  %v3501_v26 = vadd.f32 %v3500_v23, %v3499_v4  ;;  %v3502_v34 = vpop.f32.mrb[114].mxu1 }
 0x1e3   : > { %v3394_v60 = vpop.f32.mrb[117].mxu0  ;;  %v3503_v13 = vpop.f32.mrb[115].mxu1 }
 0x1e4   : > { %v3395_v54 = vadd.f32 %v3394_v60, %v3393_v46  ;;  %v3396_v7 = vpop.f32.mrb[118].mxu0  ;;  %v3504_v12 = vadd.f32 %v3503_v13, %v3502_v34  ;;  %v4772_v52 = vadd.f32 %v3501_v26, %v1872_v63 }
 0x1e5   : > { %v3397_v49 = vpop.f32.mrb[119].mxu0 }
 0x1e6   : > { %v1880_v38 = vadd.f32 %v3395_v54, %v4619_v43  ;;  %v3398_v14 = vadd.f32 %v3397_v49, %v3396_v7  ;;  %v4775_v5 = vadd.f32 %v3504_v12, %v1875_v55 }
 0x1e8   : > { %v1883_v30 = vadd.f32 %v3398_v14, %v4629_v36  ;;  %v3505_v11 = vpop.f32.mrb[116].mxu1 }
 0x1e9   : > { %v3506_v2 = vpop.f32.mrb[117].mxu1 }
 0x1ea   : > { %v3399_v42 = vpop.f32.mrb[120].mxu0  ;;  %v3507_v41 = vadd.f32 %v3506_v2, %v3505_v11  ;;  %v3508_v46 = vpop.f32.mrb[118].mxu1 }
 0x1eb   : > { %v3400_v19 = vpop.f32.mrb[121].mxu0  ;;  %v3509_v60 = vpop.f32.mrb[119].mxu1 }
 0x1ec   : > { %v3401_v10 = vadd.f32 %v3400_v19, %v3399_v42  ;;  %v3402_v1 = vpop.f32.mrb[122].mxu0  ;;  %v3510_v54 = vadd.f32 %v3509_v60, %v3508_v46  ;;  %v4778_v63 = vadd.f32 %v3507_v41, %v1880_v38 }
 0x1ed   : > { %v3403_v4 = vpop.f32.mrb[123].mxu0 }
 0x1ee   : > { %v1888_v43 = vadd.f32 %v3401_v10, %v4635_v40  ;;  %v3404_v23 = vadd.f32 %v3403_v4, %v3402_v1  ;;  %v4781_v55 = vadd.f32 %v3510_v54, %v1883_v30 }
 0x1f0   : > { %v1891_v36 = vadd.f32 %v3404_v23, %v4637_v3  ;;  %v3511_v26 = vpop.f32.mrb[120].mxu1 }
 0x1f1   : > { %v3512_v49 = vpop.f32.mrb[121].mxu1 }
 0x1f2   : > { %v3405_v7 = vpop.f32.mrb[124].mxu0  ;;  %v3513_v12 = vadd.f32 %v3512_v49, %v3511_v26  ;;  %v3514_v42 = vpop.f32.mrb[122].mxu1 }
 0x1f3   : > { %v3406_v34 = vpop.f32.mrb[125].mxu0  ;;  %v3515_v19 = vpop.f32.mrb[123].mxu1 }
 0x1f4   : > { %v3407_v13 = vadd.f32 %v3406_v34, %v3405_v7  ;;  %v3408_v14 = vpop.f32.mrb[126].mxu0  ;;  %v3516_v10 = vadd.f32 %v3515_v19, %v3514_v42  ;;  %v4784_v38 = vadd.f32 %v3513_v12, %v1888_v43 }
 0x1f5   : > { %v3409_v11 = vpop.f32.mrb[127].mxu0 }
 0x1f6   : > { %v1896_v40 = vadd.f32 %v3407_v13, %v4642_v57  ;;  %v3410_v2 = vadd.f32 %v3409_v11, %v3408_v14  ;;  %v4787_v30 = vadd.f32 %v3516_v10, %v1891_v36 }
 0x1f8   : > { %v1899_v3 = vadd.f32 %v3410_v2, %v4653_v47  ;;  %v3517_v41 = vpop.f32.mrb[124].mxu1 }
 0x1f9   : > { %v3518_v60 = vpop.f32.mrb[125].mxu1 }
 0x1fa   : > { %v3599_v1 = vpop.f32.mrb[128].mxu0  ;;  %v3519_v57 = vadd.f32 %v3518_v60, %v3517_v41  ;;  %v3520_v7 = vpop.f32.mrb[126].mxu1 }
 0x1fb   : > { %v4790_v46 = vadd.f32 %v3599_v1, %v4670_v0  ;;  %v2097_v4 = vpop.f32.mrb[129].mxu0  ;;  %v3521_v47 = vpop.f32.mrb[127].mxu1 }
 0x1fc   : > { %v4793_v23 = vadd.f32 %v2097_v4, %v4658_v27  ;;  %v3600_v54 = vpop.f32.mrb[130].mxu0  ;;  %v3522_v34 = vadd.f32 %v3521_v47, %v3520_v7  ;;  %v4801_v49 = vadd.f32 %v3519_v57, %v1896_v40 }
 0x1fd   : > { %v4796_v43 = vadd.f32 %v3600_v54, %v4675_v25  ;;  %v2100_v26 = vpop.f32.mrb[131].mxu0 }
 0x1fe   : > { %v4799_v36 = vadd.f32 %v2100_v26, %v4661_v29  ;;  %v4805_v13 = vadd.f32 %v3522_v34, %v1899_v3 }
 0x200   : > { %v2224_v0 = vadd.f32 %v4799_v36, %v4793_v23 }
 0x202   : > { %v2225_v27 = vadd.f32 %v2224_v0, %v4790_v46  ;;  %v3603_v14 = vpop.f32.mrb[132].mxu0 }
 0x203   : > { %v4809_v12 = vadd.f32 %v3603_v14, %v4692_v32  ;;  %v2113_v25 = vpop.f32.mrb[133].mxu0 }
 0x204   : > { %v4812_v42 = vadd.f32 %v2113_v25, %v4680_v28  ;;  %v2226_v29 = vadd.f32 %v2225_v27, %v4796_v43  ;;  %v3604_v11 = vpop.f32.mrb[134].mxu0 }
 0x205   : > { %v4816_v19 = vadd.f32 %v3604_v11, %v4697_v20  ;;  %v2116_v40 = vpop.f32.mrb[135].mxu0 }
 0x206   : > { %v2227_v2 = vadd.f32 %v2226_v29, %v4812_v42  ;;  %v4820_v10 = vadd.f32 %v2116_v40, %v4683_v6 }
 0x208   : > { %v2228_v3 = vadd.f32 %v2227_v2, %v4820_v10 }
 0x20a   : > { %v2229_v32 = vadd.f32 %v2228_v3, %v4809_v12  ;;  %v3607_v1 = vpop.f32.mrb[136].mxu0 }
 0x20b   : > { %v4825_v28 = vadd.f32 %v3607_v1, %v4714_v22  ;;  %v2129_v41 = vpop.f32.mrb[137].mxu0 }
 0x20c   : > { %v4828_v4 = vadd.f32 %v2129_v41, %v4702_v51  ;;  %v2230_v20 = vadd.f32 %v2229_v32, %v4816_v19  ;;  %v3608_v60 = vpop.f32.mrb[138].mxu0 }
 0x20d   : > { %v4832_v54 = vadd.f32 %v3608_v60, %v4719_v58  ;;  %v2132_v6 = vpop.f32.mrb[139].mxu0 }
 0x20e   : > { %v2231_v57 = vadd.f32 %v2230_v20, %v4828_v4  ;;  %v4836_v7 = vadd.f32 %v2132_v6, %v4705_v61 }
 0x210   : > { %v2232_v26 = vadd.f32 %v2231_v57, %v4836_v7 }
 0x212   : > { %v2233_v22 = vadd.f32 %v2232_v26, %v4825_v28  ;;  %v3611_v47 = vpop.f32.mrb[140].mxu0 }
 0x213   : > { %v4841_v51 = vadd.f32 %v3611_v47, %v4730_v21  ;;  %v2145_v34 = vpop.f32.mrb[141].mxu0 }
 0x214   : > { %v4844_v0 = vadd.f32 %v2145_v34, %v4724_v35  ;;  %v2234_v58 = vadd.f32 %v2233_v22, %v4832_v54  ;;  %v3612_v27 = vpop.f32.mrb[142].mxu0 }
 0x215   : > { %v4848_v14 = vadd.f32 %v3612_v27, %v4733_v16  ;;  %v2148_v61 = vpop.f32.mrb[143].mxu0 }
 0x216   : > { %v2235_v25 = vadd.f32 %v2234_v58, %v4844_v0  ;;  %v4852_v29 = vadd.f32 %v2148_v61, %v4727_v17 }
 0x218   : > { %v2236_v11 = vadd.f32 %v2235_v25, %v4852_v29 }
 0x21a   : > { %v2237_v21 = vadd.f32 %v2236_v11, %v4841_v51  ;;  %v3615_v40 = vpop.f32.mrb[144].mxu0 }
 0x21b   : > { %v4857_v35 = vadd.f32 %v3615_v40, %v4754_v56  ;;  %v2161_v2 = vpop.f32.mrb[145].mxu0 }
 0x21c   : > { %v4860_v3 = vadd.f32 %v2161_v2, %v4742_v59  ;;  %v2238_v16 = vadd.f32 %v2237_v21, %v4848_v14  ;;  %v3616_v32 = vpop.f32.mrb[146].mxu0 }
 0x21d   : > { %v4864_v1 = vadd.f32 %v3616_v32, %v4757_v18  ;;  %v2164_v17 = vpop.f32.mrb[147].mxu0 }
 0x21e   : > { %v2239_v41 = vadd.f32 %v2238_v16, %v4860_v3  ;;  %v4868_v20 = vadd.f32 %v2164_v17, %v4749_v48 }
 0x220   : > { %v2240_v60 = vadd.f32 %v2239_v41, %v4868_v20 }
 0x222   : > { %v2241_v56 = vadd.f32 %v2240_v60, %v4857_v35  ;;  %v3619_v6 = vpop.f32.mrb[148].mxu0 }
 0x223   : > { %v4873_v59 = vadd.f32 %v3619_v6, %v4766_v45  ;;  %v2177_v57 = vpop.f32.mrb[149].mxu0 }
 0x224   : > { %v4876_v26 = vadd.f32 %v2177_v57, %v4760_v50  ;;  %v2242_v18 = vadd.f32 %v2241_v56, %v4864_v1  ;;  %v3620_v22 = vpop.f32.mrb[150].mxu0 }
 0x225   : > { %v4880_v47 = vadd.f32 %v3620_v22, %v4769_v31  ;;  %v2180_v48 = vpop.f32.mrb[151].mxu0 }
 0x226   : > { %v2243_v34 = vadd.f32 %v2242_v18, %v4876_v26  ;;  %v4884_v58 = vadd.f32 %v2180_v48, %v4763_v9 }
 0x228   : > { %v2244_v27 = vadd.f32 %v2243_v34, %v4884_v58 }
 0x22a   : > { %v2245_v45 = vadd.f32 %v2244_v27, %v4873_v59  ;;  %v3623_v61 = vpop.f32.mrb[152].mxu0 }
 0x22b   : > { %v4889_v50 = vadd.f32 %v3623_v61, %v4778_v63  ;;  %v2193_v25 = vpop.f32.mrb[153].mxu0 }
 0x22c   : > { %v4892_v11 = vadd.f32 %v2193_v25, %v4772_v52  ;;  %v2246_v31 = vadd.f32 %v2245_v45, %v4880_v47  ;;  %v3624_v21 = vpop.f32.mrb[154].mxu0 }
 0x22d   : > { %v4896_v40 = vadd.f32 %v3624_v21, %v4781_v55  ;;  %v2196_v9 = vpop.f32.mrb[155].mxu0 }
 0x22e   : > { %v2247_v2 = vadd.f32 %v2246_v31, %v4892_v11  ;;  %v4900_v16 = vadd.f32 %v2196_v9, %v4775_v5 }
 0x230   : > { %v2248_v32 = vadd.f32 %v2247_v2, %v4900_v16 }
 0x232   : > { %v2249_v63 = vadd.f32 %v2248_v32, %v4889_v50  ;;  %v3627_v17 = vpop.f32.mrb[156].mxu0 }
 0x233   : > { %v4905_v52 = vadd.f32 %v3627_v17, %v4801_v49  ;;  %v2209_v41 = vpop.f32.mrb[157].mxu0 }
 0x234   : > { %v4908_v60 = vadd.f32 %v2209_v41, %v4784_v38  ;;  %v2250_v55 = vadd.f32 %v2249_v63, %v4896_v40  ;;  %v3628_v56 = vpop.f32.mrb[158].mxu0 }
 0x235   : > { %v4912_v6 = vadd.f32 %v3628_v56, %v4805_v13  ;;  %v2212_v5 = vpop.f32.mrb[159].mxu0  ;;  %v3849_v13 = vld [vmem:[#allocation2] sm:$0xff] }
 0x236   : > { %v2251_v57 = vadd.f32 %v2250_v55, %v4908_v60  ;;  %v4916_v18 = vadd.f32 %v2212_v5, %v4787_v30 }
 0x238   : > { %v2252_v22 = vadd.f32 %v2251_v57, %v4916_v18 }
 0x23a   : > { %v2253_v49 = vadd.f32 %v2252_v22, %v4905_v52 }
 0x23c   : > { %v2254_v48 = vadd.f32 %v2253_v49, %v4912_v6 }
 0x23e   : > { %v2255_v38 = vrot.slane %v2254_v48, 4 }
 0x240   : > { %v2256_v34 = vadd.f32 %v2255_v38, %v2254_v48 }
 0x242   : > { %v2257_v27 = vrot.slane %v2256_v34, 2 }
 0x244   : > { %v2258_v45 = vadd.f32 %v2257_v27, %v2256_v34 }
 0x246   : > { %v2259_v61 = vrot.slane %v2258_v45, 1 }
 0x248   : > { %v2260_v25 = vadd.f32 %v2259_v61, %v2258_v45 }
 0x24a   : > { %3662 = vmatmul.mubr.f32.vlgmr.msra.gmra.mrb[128].mxu1 %v2260_v25 }
 0x24b   : > { %3725 = vmatpush3.bf16.msra.mxu1 %v4582_v8  ;;  %3696 = vmatprep.mubr.msk.f32.mxu1 %vm3876_vm0, %v3849_v13  ;;  %v2348_v8 = vlaneseq }
 0x24c   : > { %3726 = vmatprep.subr.bf16.mxu1 %v3875_v39 }
 0x24f   : > { %3728 = vmatpush3.bf16.msra.mxu1 %v4605_v37 }
 0x250   : > { %3729 = vmatprep.subr.bf16.mxu1 %v3875_v39 }
 0x253   : > { %3731 = vmatpush3.bf16.msra.mxu1 %v4627_v24  ;;  %v4937_v24 = vshrl.u32 %v2348_v8, 7 }
 0x254   : > { %3732 = vmatprep.subr.bf16.mxu1 %v3875_v39 }
 0x257   : > { %3734 = vmatpush3.bf16.msra.mxu1 %v4651_v44 }
 0x258   : > { %3735 = vmatprep.subr.bf16.mxu1 %v3875_v39 }
 0x25b   : > { %3737 = vmatpush3.bf16.msra.mxu1 %v4672_v62  ;;  %v2350_v62 = vsub.s32 0, %v4937_v24 }
 0x25c   : > { %3738 = vmatprep.subr.bf16.mxu1 %v3875_v39 }
 0x25f   : > { %3740 = vmatpush3.bf16.msra.mxu1 %v4694_v33 }
 0x260   : > { %3741 = vmatprep.subr.bf16.mxu1 %v3875_v39 }
 0x263   : > { %3743 = vmatpush3.bf16.msra.mxu1 %v4716_v53 }
 0x264   : > { %3744 = vmatprep.subr.bf16.mxu1 %v3875_v39 }
 0x267   : > { %3746 = vmatpush3.bf16.msra.mxu1 %v4744_v15 }
 0x31d   : > { %v2343_v37 = vpop.f32.mrb[128].mxu1 }
 0x31e   : > { %v3663_v44 = vpop.f32.mrb[129].mxu1  ;;  %v2347_v30 = vmul.f32 0.00390625, %v2343_v37 }
 0x320   : > { %v4942_v31 = vrot.slane %v2347_v30, %v2350_v62 }
 0x322   : > { %v4946_v33 = vsub.f32 %v4793_v23, %v4942_v31  ;;  %v4950_v39 = vsub.f32 %v4799_v36, %v4942_v31  ;;  %v4954_v53 = vsub.f32 %v4790_v46, %v4942_v31  ;;  %v4962_v9 = vsub.f32 %v4796_v43, %v4942_v31 }
 0x323   : > { %v4966_v23 = vsub.f32 %v4812_v42, %v4942_v31  ;;  %v4972_v46 = vsub.f32 %v4820_v10, %v4942_v31  ;;  %v4978_v43 = vsub.f32 %v4809_v12, %v4942_v31  ;;  %v4984_v41 = vsub.f32 %v4816_v19, %v4942_v31 }
 0x324   : > { %v2384_v15 = vmul.f32 %v4946_v33, %v4946_v33  ;;  %v2385_v21 = vmul.f32 %v4950_v39, %v4950_v39  ;;  %v2386_v36 = vmul.f32 %v4954_v53, %v4954_v53  ;;  %v2387_v32 = vmul.f32 %v4962_v9, %v4962_v9 }
 0x325   : > { %v2388_v42 = vmul.f32 %v4966_v23, %v4966_v23  ;;  %v2389_v10 = vmul.f32 %v4972_v46, %v4972_v46  ;;  %v4990_v56 = vsub.f32 %v4828_v4, %v4942_v31  ;;  %v2390_v12 = vmul.f32 %v4978_v43, %v4978_v43 }
 0x326   : > { %v2416_v2 = vadd.f32 %v2385_v21, %v2384_v15  ;;  %v4996_v57 = vsub.f32 %v4836_v7, %v4942_v31  ;;  %v2391_v19 = vmul.f32 %v4984_v41, %v4984_v41  ;;  %v5002_v49 = vsub.f32 %v4825_v28, %v4942_v31 }
 0x327   : > { %v2392_v4 = vmul.f32 %v4990_v56, %v4990_v56  ;;  %v5008_v38 = vsub.f32 %v4832_v54, %v4942_v31  ;;  %v5014_v27 = vsub.f32 %v4844_v0, %v4942_v31  ;;  %v5020_v61 = vsub.f32 %v4852_v29, %v4942_v31 }
 0x328   : > { %v2417_v63 = vadd.f32 %v2416_v2, %v2386_v36  ;;  %v2393_v7 = vmul.f32 %v4996_v57, %v4996_v57  ;;  %v2394_v28 = vmul.f32 %v5002_v49, %v5002_v49  ;;  %v5026_v13 = vsub.f32 %v4841_v51, %v4942_v31 }
 0x329   : > { %v2395_v54 = vmul.f32 %v5008_v38, %v5008_v38  ;;  %v2396_v0 = vmul.f32 %v5014_v27, %v5014_v27  ;;  %v5032_v37 = vsub.f32 %v4848_v14, %v4942_v31  ;;  %v2397_v29 = vmul.f32 %v5020_v61, %v5020_v61 }
 0x32a   : > { %v2418_v17 = vadd.f32 %v2417_v63, %v2387_v32  ;;  %v5038_v30 = vsub.f32 %v4860_v3, %v4942_v31  ;;  %v2398_v51 = vmul.f32 %v5026_v13, %v5026_v13  ;;  %v5044_v21 = vsub.f32 %v4868_v20, %v4942_v31 }
 0x32b   : > { %v2399_v14 = vmul.f32 %v5032_v37, %v5032_v37  ;;  %v5050_v2 = vsub.f32 %v4857_v35, %v4942_v31  ;;  %v5056_v63 = vsub.f32 %v4864_v1, %v4942_v31 }
 0x32c   : > { %v2419_v55 = vadd.f32 %v2418_v17, %v2388_v42  ;;  %v2400_v3 = vmul.f32 %v5038_v30, %v5038_v30  ;;  %v2401_v20 = vmul.f32 %v5044_v21, %v5044_v21  ;;  %v5062_v17 = vsub.f32 %v4876_v26, %v4942_v31 }
 0x32d   : > { %v2402_v35 = vmul.f32 %v5050_v2, %v5050_v2  ;;  %v2403_v1 = vmul.f32 %v5056_v63, %v5056_v63 }
 0x32e   : > { %v2420_v5 = vadd.f32 %v2419_v55, %v2389_v10  ;;  %v5068_v55 = vsub.f32 %v4884_v58, %v4942_v31  ;;  %v2404_v26 = vmul.f32 %v5062_v17, %v5062_v17 }
 0x330   : > { %v2421_v22 = vadd.f32 %v2420_v5, %v2390_v12  ;;  %v5074_v5 = vsub.f32 %v4873_v59, %v4942_v31  ;;  %v2405_v58 = vmul.f32 %v5068_v55, %v5068_v55 }
 0x332   : > { %v2422_v48 = vadd.f32 %v2421_v22, %v2391_v19  ;;  %v5080_v22 = vsub.f32 %v4880_v47, %v4942_v31  ;;  %v2406_v59 = vmul.f32 %v5074_v5, %v5074_v5 }
 0x334   : > { %v2423_v34 = vadd.f32 %v2422_v48, %v2392_v4  ;;  %v5086_v48 = vsub.f32 %v4892_v11, %v4942_v31  ;;  %v2407_v47 = vmul.f32 %v5080_v22, %v5080_v22 }
 0x336   : > { %v2424_v45 = vadd.f32 %v2423_v34, %v2393_v7  ;;  %v5092_v34 = vsub.f32 %v4900_v16, %v4942_v31  ;;  %v2408_v11 = vmul.f32 %v5086_v48, %v5086_v48 }
 0x338   : > { %v2425_v25 = vadd.f32 %v2424_v45, %v2394_v28  ;;  %v5098_v45 = vsub.f32 %v4889_v50, %v4942_v31  ;;  %v2381_v50 = vsub.f32 %v4916_v18, %v4942_v31 }
 0x33a   : > { %v2426_v8 = vadd.f32 %v2425_v25, %v2395_v54  ;;  %v2379_v25 = vsub.f32 %v4896_v40, %v4942_v31 }
 0x33c   : > { %v2427_v44 = vadd.f32 %v2426_v8, %v2396_v0  ;;  %v2409_v0 = vmul.f32 %v5092_v34, %v5092_v34  ;;  %v2380_v8 = vsub.f32 %v4908_v60, %v4942_v31 }
 0x33e   : > { %v2428_v15 = vadd.f32 %v2427_v44, %v2397_v29  ;;  %v2410_v29 = vmul.f32 %v5098_v45, %v5098_v45  ;;  %v2412_v40 = vmul.f32 %v2380_v8, %v2380_v8 }
 0x340   : > { %v2429_v36 = vadd.f32 %v2428_v15, %v2398_v51  ;;  %v2411_v51 = vmul.f32 %v2379_v25, %v2379_v25 }
 0x342   : > { %v2430_v32 = vadd.f32 %v2429_v36, %v2399_v14  ;;  %v2382_v14 = vsub.f32 %v4905_v52, %v4942_v31 }
 0x344   : > { %v2431_v42 = vadd.f32 %v2430_v32, %v2400_v3  ;;  %v2383_v3 = vsub.f32 %v4912_v6, %v4942_v31  ;;  %v2413_v32 = vmul.f32 %v2381_v50, %v2381_v50  ;;  %v2414_v60 = vmul.f32 %v2382_v14, %v2382_v14 }
 0x346   : > { %v2432_v10 = vadd.f32 %v2431_v42, %v2401_v20 }
 0x348   : > { %v2433_v12 = vadd.f32 %v2432_v10, %v2402_v35  ;;  %v2415_v35 = vmul.f32 %v2383_v3, %v2383_v3 }
 0x34a   : > { %v2434_v19 = vadd.f32 %v2433_v12, %v2403_v1 }
 0x34c   : > { %v2435_v4 = vadd.f32 %v2434_v19, %v2404_v26 }
 0x34e   : > { %v2436_v7 = vadd.f32 %v2435_v4, %v2405_v58 }
 0x350   : > { %v2437_v28 = vadd.f32 %v2436_v7, %v2406_v59 }
 0x352   : > { %v2438_v54 = vadd.f32 %v2437_v28, %v2407_v47 }
 0x354   : > { %v2439_v16 = vadd.f32 %v2438_v54, %v2408_v11 }
 0x356   : > { %v2440_v44 = vadd.f32 %v2439_v16, %v2409_v0 }
 0x358   : > { %v2441_v15 = vadd.f32 %v2440_v44, %v2410_v29 }
 0x35a   : > { %v2442_v36 = vadd.f32 %v2441_v15, %v2411_v51 }
 0x35c   : > { %v2443_v20 = vadd.f32 %v2442_v36, %v2412_v40 }
 0x35e   : > { %v2444_v42 = vadd.f32 %v2443_v20, %v2413_v32 }
 0x360   : > { %v2445_v10 = vadd.f32 %v2444_v42, %v2414_v60 }
 0x362   : > { %v2446_v1 = vadd.f32 %v2445_v10, %v2415_v35 }
 0x364   : > { %v2447_v12 = vrot.slane %v2446_v1, 4 }
 0x366   : > { %v2448_v26 = vadd.f32 %v2447_v12, %v2446_v1 }
 0x368   : > { %v2449_v18 = vrot.slane %v2448_v26, 2 }
 0x36a   : > { %v2450_v19 = vadd.f32 %v2449_v18, %v2448_v26 }
 0x36c   : > { %v2451_v58 = vrot.slane %v2450_v19, 1 }
 0x36e   : > { %v2452_v4 = vadd.f32 %v2451_v58, %v2450_v19 }
 0x370   : > { %3697 = vmatmul.mubr.f32.vlgmr.msra.gmra.mrb[130].mxu1 %v2452_v4  ;;  %v3070_v4 = vld [vmem:[%s5239_s4] ss:$0 sm:$0xff] }
 0x443   : > { %v2519_v52 = vpop.f32.mrb[130].mxu1 }
 0x444   : > { %v2523_v59 = vmul.f32 0.00390625, %v2519_v52  ;;  %v3698_v7 = vpop.f32.mrb[131].mxu1 }
 0x446   : > { %v2524_v47 = vadd.f32 1e-05, %v2523_v59 }
 0x448   : > { %3846 = vrsqrt.f32 %v2524_v47 }
 0x452   : > { %v3847_v6 = vpop.eup %3846 }
 0x453   : > { %v2529_v31 = vrot.slane %v3847_v6, %v2350_v62 }
 0x455   : > { %v2530_v28 = vmul.f32 %v2529_v31, %v4946_v33  ;;  %v2531_v11 = vmul.f32 %v2529_v31, %v4950_v39  ;;  %v2532_v54 = vmul.f32 %v2529_v31, %v4954_v53  ;;  %v2533_v0 = vmul.f32 %v2529_v31, %v4962_v9 }
 0x456   : > { %v2534_v16 = vmul.f32 %v2529_v31, %v4966_v23  ;;  %v2535_v29 = vmul.f32 %v2529_v31, %v4972_v46  ;;  %v2536_v44 = vmul.f32 %v2529_v31, %v4978_v43  ;;  %v2537_v51 = vmul.f32 %v2529_v31, %v4984_v41 }
 0x457   : > { %v2538_v15 = vmul.f32 %v2529_v31, %v4990_v56  ;;  %v2539_v24 = vmul.f32 %v2529_v31, %v4996_v57  ;;  %v2540_v62 = vmul.f32 %v2529_v31, %v5002_v49  ;;  %v2541_v33 = vmul.f32 %v2529_v31, %v5008_v38 }
 0x458   : > { %v2542_v39 = vmul.f32 %v2529_v31, %v5014_v27  ;;  %v2543_v53 = vmul.f32 %v2529_v31, %v5020_v61  ;;  %v2544_v9 = vmul.f32 %v2529_v31, %v5026_v13  ;;  %v2545_v23 = vmul.f32 %v2529_v31, %v5032_v37  ;;  %v3069_v61 = vld [vmem:[%s5238_s3] ss:$0 sm:$0xff] }
 0x459   : > { %v2546_v46 = vmul.f32 %v2529_v31, %v5038_v30  ;;  %v2547_v43 = vmul.f32 %v2529_v31, %v5044_v21  ;;  %v2548_v41 = vmul.f32 %v2529_v31, %v5050_v2  ;;  %v2549_v56 = vmul.f32 %v2529_v31, %v5056_v63 }
 0x45a   : > { %v2550_v57 = vmul.f32 %v2529_v31, %v5062_v17  ;;  %v2551_v49 = vmul.f32 %v2529_v31, %v5068_v55  ;;  %v2552_v38 = vmul.f32 %v2529_v31, %v5074_v5  ;;  %v2553_v27 = vmul.f32 %v2529_v31, %v5080_v22 }
 0x45b   : > { %v2554_v13 = vmul.f32 %v2529_v31, %v5086_v48  ;;  %v2555_v37 = vmul.f32 %v2529_v31, %v5092_v34  ;;  %v2556_v30 = vmul.f32 %v2529_v31, %v5098_v45  ;;  %v2557_v21 = vmul.f32 %v2529_v31, %v2379_v25 }
 0x45c   : > { %v2558_v2 = vmul.f32 %v2529_v31, %v2380_v8  ;;  %v2559_v63 = vmul.f32 %v2529_v31, %v2381_v50  ;;  %v2560_v17 = vmul.f32 %v2529_v31, %v2382_v14  ;;  %v2561_v40 = vmul.f32 %v2529_v31, %v2383_v3 }
 0x45d   : > { %v2569_v55 = vmul.f32 %v3069_v61, %v2530_v28  ;;  %v2570_v36 = vmul.f32 %v3069_v61, %v2531_v11  ;;  %v2571_v5 = vmul.f32 %v3069_v61, %v2532_v54  ;;  %v2572_v32 = vmul.f32 %v3069_v61, %v2533_v0 }
 0x45e   : > { %v2573_v22 = vmul.f32 %v3069_v61, %v2534_v16  ;;  %v2574_v20 = vmul.f32 %v3069_v61, %v2535_v29  ;;  %v2575_v60 = vmul.f32 %v3069_v61, %v2536_v44  ;;  %v2576_v42 = vmul.f32 %v3069_v61, %v2537_v51 }
 0x45f   : > { %v2577_v35 = vmul.f32 %v3069_v61, %v2538_v15  ;;  %v2578_v10 = vmul.f32 %v3069_v61, %v2539_v24  ;;  %v2579_v48 = vmul.f32 %v3069_v61, %v2540_v62  ;;  %v2580_v1 = vmul.f32 %v3069_v61, %v2541_v33 }
 0x460   : > { %v2581_v34 = vmul.f32 %v3069_v61, %v2542_v39  ;;  %v2582_v12 = vmul.f32 %v3069_v61, %v2543_v53  ;;  %v2583_v45 = vmul.f32 %v3069_v61, %v2544_v9  ;;  %v2584_v25 = vmul.f32 %v3069_v61, %v2545_v23 }
 0x461   : > { %v2585_v8 = vmul.f32 %v3069_v61, %v2546_v46  ;;  %v2586_v50 = vmul.f32 %v3069_v61, %v2547_v43  ;;  %v2587_v14 = vmul.f32 %v3069_v61, %v2548_v41  ;;  %v2588_v3 = vmul.f32 %v3069_v61, %v2549_v56 }
 0x462   : > { %v2589_v26 = vmul.f32 %v3069_v61, %v2550_v57  ;;  %v2590_v18 = vmul.f32 %v3069_v61, %v2551_v49  ;;  %v2591_v19 = vmul.f32 %v3069_v61, %v2552_v38  ;;  %v2592_v58 = vmul.f32 %v3069_v61, %v2553_v27 }
 0x463   : > { %v2593_v52 = vmul.f32 %v3069_v61, %v2554_v13  ;;  %v2594_v59 = vmul.f32 %v3069_v61, %v2555_v37  ;;  %v2595_v7 = vmul.f32 %v3069_v61, %v2556_v30  ;;  %v2596_v47 = vmul.f32 %v3069_v61, %v2557_v21 }
 0x464   : > { %v2597_v6 = vmul.f32 %v3069_v61, %v2558_v2  ;;  %v2598_v31 = vmul.f32 %v3069_v61, %v2559_v63  ;;  %v2599_v28 = vmul.f32 %v3069_v61, %v2560_v17  ;;  %v2600_v11 = vmul.f32 %v3069_v61, %v2561_v40 }
 0x465   : > { %v2608_v54 = vadd.f32 %v3070_v4, %v2569_v55  ;;  %v2609_v0 = vadd.f32 %v3070_v4, %v2570_v36  ;;  %v2610_v16 = vadd.f32 %v3070_v4, %v2571_v5  ;;  %v2611_v29 = vadd.f32 %v3070_v4, %v2572_v32 }
 0x466   : > { %v2612_v44 = vadd.f32 %v3070_v4, %v2573_v22  ;;  %v2613_v51 = vadd.f32 %v3070_v4, %v2574_v20  ;;  %v2614_v15 = vadd.f32 %v3070_v4, %v2575_v60  ;;  %v2615_v24 = vadd.f32 %v3070_v4, %v2576_v42 }
 0x467   : > { %v2616_v62 = vadd.f32 %v3070_v4, %v2577_v35  ;;  %v2617_v33 = vadd.f32 %v3070_v4, %v2578_v10  ;;  %v2618_v39 = vadd.f32 %v3070_v4, %v2579_v48  ;;  %v2619_v53 = vadd.f32 %v3070_v4, %v2580_v1 }
 0x468   : > { %v2620_v9 = vadd.f32 %v3070_v4, %v2581_v34  ;;  %v2621_v23 = vadd.f32 %v3070_v4, %v2582_v12  ;;  %v2622_v46 = vadd.f32 %v3070_v4, %v2583_v45  ;;  %v2623_v43 = vadd.f32 %v3070_v4, %v2584_v25 }
 0x469   : > { %v2624_v41 = vadd.f32 %v3070_v4, %v2585_v8  ;;  %v2625_v56 = vadd.f32 %v3070_v4, %v2586_v50  ;;  %v2626_v57 = vadd.f32 %v3070_v4, %v2587_v14  ;;  %v2627_v49 = vadd.f32 %v3070_v4, %v2588_v3 }
 0x46a   : > { %v5151_v38 = vadd.f32 %v3070_v4, %v2589_v26  ;;  %v5153_v27 = vadd.f32 %v3070_v4, %v2590_v18  ;;  %v5155_v61 = vadd.f32 %v3070_v4, %v2591_v19  ;;  %v5157_v13 = vadd.f32 %v3070_v4, %v2592_v58 }
 0x46b   : > { %v5159_v37 = vadd.f32 %v3070_v4, %v2593_v52  ;;  %v5161_v30 = vadd.f32 %v3070_v4, %v2594_v59  ;;  %v5163_v21 = vadd.f32 %v3070_v4, %v2595_v7  ;;  %v5165_v2 = vadd.f32 %v3070_v4, %v2596_v47 }
 0x46c   : > { %v5174_v63 = vadd.f32 %v3070_v4, %v2597_v6  ;;  %v5176_v17 = vadd.f32 %v3070_v4, %v2598_v31  ;;  %v5178_v40 = vadd.f32 %v3070_v4, %v2599_v28  ;;  %v5180_v55 = vadd.f32 %v3070_v4, %v2600_v11 }
 0x46d   : > { %v2640_v36 = vmax.f32 %v2608_v54, 0.0  ;;  %v2641_v5 = vmax.f32 %v2609_v0, 0.0  ;;  %v2642_v32 = vmax.f32 %v2610_v16, 0.0  ;;  %v2643_v22 = vmax.f32 %v2611_v29, 0.0 }
 0x46e   : > { %v2644_v20 = vmax.f32 %v2612_v44, 0.0  ;;  %v2645_v60 = vmax.f32 %v2613_v51, 0.0  ;;  %v2646_v42 = vmax.f32 %v2614_v15, 0.0  ;;  %v2647_v35 = vmax.f32 %v2615_v24, 0.0 }
 0x46f   : > { %v2648_v10 = vmax.f32 %v2616_v62, 0.0  ;;  %v2649_v48 = vmax.f32 %v2617_v33, 0.0  ;;  %v2650_v1 = vmax.f32 %v2618_v39, 0.0  ;;  %v2651_v34 = vmax.f32 %v2619_v53, 0.0  ;;  %2672 = vst [vmem:[%s5172_s18] sm:$0xff] %v2640_v36  ;;  %2673 = vst [vmem:[%s5172_s18 + $0x8] sm:$0xff] %v2641_v5 }
 0x470   : > { %2674 = vst [vmem:[%s5172_s18 + $0x10] sm:$0xff] %v2642_v32  ;;  %2675 = vst [vmem:[%s5172_s18 + $0x18] sm:$0xff] %v2643_v22  ;;  %v2652_v12 = vmax.f32 %v2620_v9, 0.0  ;;  %v2653_v45 = vmax.f32 %v2621_v23, 0.0  ;;  %v2654_v25 = vmax.f32 %v2622_v46, 0.0  ;;  %v2655_v8 = vmax.f32 %v2623_v43, 0.0 }
 0x471   : > { %2676 = vst [vmem:[%s5172_s18 + $0x20] sm:$0xff] %v2644_v20  ;;  %2677 = vst [vmem:[%s5172_s18 + $0x28] sm:$0xff] %v2645_v60  ;;  %v2656_v50 = vmax.f32 %v2624_v41, 0.0  ;;  %v2657_v14 = vmax.f32 %v2625_v56, 0.0  ;;  %v2658_v3 = vmax.f32 %v2626_v57, 0.0  ;;  %v2659_v26 = vmax.f32 %v2627_v49, 0.0 }
 0x472   : > { %2678 = vst [vmem:[%s5172_s18 + $0x30] sm:$0xff] %v2646_v42  ;;  %2679 = vst [vmem:[%s5172_s18 + $0x38] sm:$0xff] %v2647_v35  ;;  %v2660_v18 = vmax.f32 %v5151_v38, 0.0  ;;  %v2661_v19 = vmax.f32 %v5153_v27, 0.0  ;;  %v2662_v58 = vmax.f32 %v5155_v61, 0.0  ;;  %v2663_v4 = vmax.f32 %v5157_v13, 0.0 }
 0x473   : > { %2680 = vst [vmem:[%s5172_s18 + $0x40] sm:$0xff] %v2648_v10  ;;  %2681 = vst [vmem:[%s5172_s18 + $0x48] sm:$0xff] %v2649_v48  ;;  %v2664_v52 = vmax.f32 %v5159_v37, 0.0  ;;  %v2665_v59 = vmax.f32 %v5161_v30, 0.0  ;;  %v2666_v7 = vmax.f32 %v5163_v21, 0.0  ;;  %v2667_v47 = vmax.f32 %v5165_v2, 0.0 }
 0x474   : > { %2682 = vst [vmem:[%s5172_s18 + $0x50] sm:$0xff] %v2650_v1  ;;  %2683 = vst [vmem:[%s5172_s18 + $0x58] sm:$0xff] %v2651_v34  ;;  %v2668_v6 = vmax.f32 %v5174_v63, 0.0  ;;  %v2669_v31 = vmax.f32 %v5176_v17, 0.0  ;;  %v2670_v28 = vmax.f32 %v5178_v40, 0.0  ;;  %v2671_v11 = vmax.f32 %v5180_v55, 0.0 }
 0x475   : > { %2684 = vst [vmem:[%s5172_s18 + $0x60] sm:$0xff] %v2652_v12  ;;  %2685 = vst [vmem:[%s5172_s18 + $0x68] sm:$0xff] %v2653_v45 }
 0x476   : > { %2686 = vst [vmem:[%s5172_s18 + $0x70] sm:$0xff] %v2654_v25  ;;  %2687 = vst [vmem:[%s5172_s18 + $0x78] sm:$0xff] %v2655_v8 }
 0x477   : > { %2688 = vst [vmem:[%s5172_s18 + $0x80] sm:$0xff] %v2656_v50  ;;  %2689 = vst [vmem:[%s5172_s18 + $0x88] sm:$0xff] %v2657_v14 }
 0x478   : > { %2690 = vst [vmem:[%s5172_s18 + $0x90] sm:$0xff] %v2658_v3  ;;  %2691 = vst [vmem:[%s5172_s18 + $0x98] sm:$0xff] %v2659_v26 }
 0x479   : > { %2692 = vst [vmem:[%s5172_s18 + $0xa0] sm:$0xff] %v2660_v18  ;;  %2693 = vst [vmem:[%s5172_s18 + $0xa8] sm:$0xff] %v2661_v19 }
 0x47a   : > { %2694 = vst [vmem:[%s5172_s18 + $0xb0] sm:$0xff] %v2662_v58  ;;  %2695 = vst [vmem:[%s5172_s18 + $0xb8] sm:$0xff] %v2663_v4 }
 0x47b   : > { %2696 = vst [vmem:[%s5172_s18 + $0xc0] sm:$0xff] %v2664_v52  ;;  %2697 = vst [vmem:[%s5172_s18 + $0xc8] sm:$0xff] %v2665_v59 }
 0x47c   : > { %2698 = vst [vmem:[%s5172_s18 + $0xd0] sm:$0xff] %v2666_v7  ;;  %2699 = vst [vmem:[%s5172_s18 + $0xd8] sm:$0xff] %v2667_v47 }
 0x47d   : > { %2700 = vst [vmem:[%s5172_s18 + $0xe0] sm:$0xff] %v2668_v6  ;;  %2701 = vst [vmem:[%s5172_s18 + $0xe8] sm:$0xff] %v2669_v31 }
 0x47e   : > { %2702 = vst [vmem:[%s5172_s18 + $0xf0] sm:$0xff] %v2670_v28  ;;  %2703 = vst [vmem:[%s5172_s18 + $0xf8] sm:$0xff] %v2671_v11 }
 0x47f PF: > { %s16_s23 = sadd.s32 1, %s3872_s23   ;;  %s5242_s21 = smov %s3868_s22 }
 0x480   : > { %p13_p5 = scmp.ge.s32.totalorder %s16_s23, 4   ;;  %s5243_s22 = smov %s5245_s24 }
 0x482   :  { %15 = sbr.rel (!%p13_p5) target bundleno = 2 (0x2), region = 78 }

// kernel: transunet_forward.15
= control target key start
LH: loop header
LB: loop body
LE: loop exit
PB: predicated region body
PF: predicated region fallthrough
CT: control target
= control target key end

     0   :  { %s2340_s21 = smov 0   ;;  %s2342_s22 = smov 0   ;;  %s2779_s0 = inlined_call_operand.vmem [shape: f32[2,8,8,128], index: 0, kind: input, shape index: {}]   ;;  %s2780_s1 = inlined_call_operand.vmem [shape: bf16[1152,128], index: 1, kind: input, shape index: {}]   ;;  %s2781_s2 = inlined_call_operand.vmem [shape: f32[1,128], index: 2, kind: input, shape index: {}]   ;;  %s2782_s3 = inlined_call_operand.vmem [shape: f32[1,128], index: 3, kind: input, shape index: {}]   ;;  %s2783_s4 = inlined_call_operand.vmem [shape: f32[1,128], index: 4, kind: input, shape index: {}]   ;;  %s2784_s5 = inlined_call_operand.vmem [shape: f32[128,128], index: 5, kind: input, shape index: {}]   ;;  %s2785_s6 = inlined_call_operand.vmem [shape: f32[2,64,128], index: 6, kind: output, shape index: {}]  }
   0x1   :  { %s2344_s23 = smov 0  }
   0x2 LB: > { %s28_s24 = sadd.s32 1, %s2296_s22  ;;  %p1697_p0 = scmp.ge.s32.totalorder %s2300_s23, 1  ;;  %s2300_s23 = sphi %s2344_s23, %s16_s23   ;;  %s2296_s22 = sphi %s2342_s22, %s2787_s22   ;;  %s2292_s21 = sphi %s2340_s21, %s2786_s21  }
   0x3   : > { %p30_p1 = scmp.ge.s32.totalorder %s28_s24, 2  ;;  %p226_p2 = scmp.lt.s32.totalorder %s2300_s23, 3 }
   0x5   : > { %s2789_s24 = smov (%p30_p1, %s28_s24), 0  ;;  %p227_p3 = pnand %p1697_p0, %p226_p2 }
   0x6   : > { %v2204_v0 = vld [vmem:[%s2780_s1 + $0x40] sm:$0xff] (!%p227_p3)   ;;  %v2302_v3 = vmov (!%p227_p3), 0.0   ;;  %v2208_v5 = vld [vmem:[%s2780_s1 + $0x48] sm:$0xff] (!%p227_p3)   ;;  %v2212_v9 = vld [vmem:[%s2780_s1 + $0x50] sm:$0xff] (!%p227_p3)   ;;  %p260_p4 = scmp.lt.s32.totalorder (!%p227_p3), %s2292_s21, 1  ;;  %vm2304_vm0 = vmmov (!%p227_p3), 0  }
   0x7   : > { %230 = sbr.rel (%p227_p3) target bundleno = 833 (0x341), region = 44  ;;  %v2205_v1 = vld [vmem:[%s2780_s1] sm:$0xff] (!%p227_p3)   ;;  %1829 = vmatprep.subr.bf16.mxu0 (!%p227_p3), %v2204_v0  ;;  %277 = vst [vmem:[#allocation2] sm:$0xff] (!%p227_p3), %v2302_v3  ;;  %278 = vst [vmem:[#allocation2 + $0x8] sm:$0x3] (!%p227_p3), %v2302_v3  ;;  %v2209_v6 = vld [vmem:[%s2780_s1 + $0x8] sm:$0xff] (!%p227_p3)  }
   0x8   : > { %v2206_v2 = vld [vmem:[%s2780_s1 + $0xc0] sm:$0xff] (!%p227_p3)   ;;  %279 = vst [vmem:[#allocation2 + $0x10] sm:$0xff] (!%p227_p3), %v2302_v3  ;;  %280 = vst [vmem:[#allocation2 + $0x18] sm:$0x3] (!%p227_p3), %v2302_v3  ;;  %1830 = vmatpush3.bf16.msra.mxu0 (!%p227_p3), %v2205_v1  ;;  %v2210_v7 = vld [vmem:[%s2780_s1 + $0xc8] sm:$0xff] (!%p227_p3)  }
   0x9   : > { %281 = vst [vmem:[#allocation2 + $0x20] sm:$0xff] (!%p227_p3), %v2302_v3  ;;  %282 = vst [vmem:[#allocation2 + $0x28] sm:$0x3] (!%p227_p3), %v2302_v3  ;;  %v2207_v4 = vld [vmem:[%s2780_s1 + $0x80] sm:$0xff] (!%p227_p3)   ;;  %1869 = vmatprep.subr.bf16.mxu1 (!%p227_p3), %v2206_v2  ;;  %1831 = vmatprep.subr.bf16.mxu0 (!%p227_p3), %v2208_v5  ;;  %v2211_v8 = vld [vmem:[%s2780_s1 + $0x88] sm:$0xff] (!%p227_p3)  }
   0xa   : > { %283 = vst [vmem:[#allocation2 + $0x30] sm:$0xff] (!%p227_p3), %v2302_v3  ;;  %284 = vst [vmem:[#allocation2 + $0x38] sm:$0x3] (!%p227_p3), %v2302_v3  ;;  %1870 = vmatpush3.bf16.msra.mxu1 (!%p227_p3), %v2207_v4  ;;  %v2213_v10 = vld [vmem:[%s2780_s1 + $0x10] sm:$0xff] (!%p227_p3)   ;;  %v2216_v13 = vld [vmem:[%s2780_s1 + $0x58] sm:$0xff] (!%p227_p3)  }
   0xb   : > { %285 = vst [vmem:[#allocation2 + $0x40] sm:$0xff] (!%p227_p3), %v2302_v3  ;;  %286 = vst [vmem:[#allocation2 + $0x48] sm:$0x3] (!%p227_p3), %v2302_v3  ;;  %1871 = vmatprep.subr.bf16.mxu1 (!%p227_p3), %v2210_v7  ;;  %v2214_v11 = vld [vmem:[%s2780_s1 + $0xd0] sm:$0xff] (!%p227_p3)   ;;  %v2217_v14 = vld [vmem:[%s2780_s1 + $0x18] sm:$0xff] (!%p227_p3)  }
   0xc   : > { %287 = vst [vmem:[#allocation2 + $0x50] sm:$0xff] (!%p227_p3), %v2302_v3  ;;  %288 = vst [vmem:[#allocation2 + $0x58] sm:$0x3] (!%p227_p3), %v2302_v3  ;;  %1832 = vmatpush3.bf16.msra.mxu0 (!%p227_p3), %v2209_v6  ;;  %v2215_v12 = vld [vmem:[%s2780_s1 + $0x90] sm:$0xff] (!%p227_p3)   ;;  %v2218_v15 = vld [vmem:[%s2780_s1 + $0xd8] sm:$0xff] (!%p227_p3)  }
   0xd   : > { %289 = vst [vmem:[#allocation2 + $0x60] sm:$0xff] (!%p227_p3), %v2302_v3  ;;  %290 = vst [vmem:[#allocation2 + $0x68] sm:$0x3] (!%p227_p3), %v2302_v3  ;;  %1833 = vmatprep.subr.bf16.mxu0 (!%p227_p3), %v2212_v9  ;;  %v2219_v16 = vld [vmem:[%s2780_s1 + $0x98] sm:$0xff] (!%p227_p3)   ;;  %v2220_v17 = vld [vmem:[%s2780_s1 + $0x60] sm:$0xff] (!%p227_p3)  }
   0xe   : > { %291 = vst [vmem:[#allocation2 + $0x70] sm:$0xff] %v2302_v3  ;;  %292 = vst [vmem:[#allocation2 + $0x78] sm:$0x3] %v2302_v3  ;;  %1872 = vmatpush3.bf16.msra.mxu1 %v2211_v8  ;;  %v2221_v18 = vld [vmem:[%s2780_s1 + $0x20] sm:$0xff]   ;;  %v2224_v21 = vld [vmem:[%s2780_s1 + $0x68] sm:$0xff]   ;;  %s2791_s21 = smov (!%p260_p4, %s2292_s21), 1 }
   0xf   : > { %293 = vst [vmem:[#allocation2 + $0x80] sm:$0xff] %v2302_v3  ;;  %294 = vst [vmem:[#allocation2 + $0x88] sm:$0x3] %v2302_v3  ;;  %1873 = vmatprep.subr.bf16.mxu1 %v2214_v11  ;;  %v2222_v19 = vld [vmem:[%s2780_s1 + $0xe0] sm:$0xff]   ;;  %v2225_v22 = vld [vmem:[%s2780_s1 + $0x28] sm:$0xff]   ;;  %s1827_s13 = sshll.u32 %s2791_s21, 6 }
  0x10   : > { %295 = vst [vmem:[#allocation2 + $0x90] sm:$0xff] %v2302_v3  ;;  %296 = vst [vmem:[#allocation2 + $0x98] sm:$0x3] %v2302_v3  ;;  %1834 = vmatpush3.bf16.msra.mxu0 %v2213_v10  ;;  %v2223_v20 = vld [vmem:[%s2780_s1 + $0xa0] sm:$0xff]   ;;  %v2226_v23 = vld [vmem:[%s2780_s1 + $0xe8] sm:$0xff]   ;;  %s2477_s26 = scalar_lea.vmem %s2779_s0, %s1827_s13  ;;  %s273_s18 = scalar_lea.vmem %s2785_s6, %s1827_s13 }
  0x11   : > { %1835 = vmatprep.subr.bf16.mxu0 %v2216_v13  ;;  %v2227_v24 = vld [vmem:[%s2780_s1 + $0xa8] sm:$0xff]   ;;  %v2228_v25 = vld [vmem:[%s2780_s1 + $0x70] sm:$0xff]   ;;  %v2232_v29 = vld [vmem:[%s2780_s1 + $0x78] sm:$0xff]  }
  0x12   : > { %1874 = vmatpush3.bf16.msra.mxu1 %v2215_v12  ;;  %v2229_v26 = vld [vmem:[%s2780_s1 + $0x30] sm:$0xff]   ;;  %v2233_v30 = vld [vmem:[%s2780_s1 + $0x38] sm:$0xff]   ;;  %v2486_v32 = vld [vmem:[%s2477_s26] sm:$0xff] }
  0x13   : > { %1875 = vmatprep.subr.bf16.mxu1 %v2218_v15  ;;  %v2230_v27 = vld [vmem:[%s2780_s1 + $0xf0] sm:$0xff]   ;;  %v2234_v31 = vld [vmem:[%s2780_s1 + $0xf8] sm:$0xff]   ;;  %v324_v33 = vld [vmem:[#allocation2 + $0x1] sm:$0xff]  ;;  %306 = vst [vmem:[#allocation2 + $0x11] sm:$0xff] %v2486_v32 }
  0x14   : > { %1836 = vmatpush3.bf16.msra.mxu0 %v2217_v14  ;;  %v2231_v28 = vld [vmem:[%s2780_s1 + $0xb0] sm:$0xff]   ;;  %v395_v34 = vpack.c.bf16 %v2486_v32, %v324_v33  ;;  %v2235_v35 = vld [vmem:[%s2780_s1 + $0xb8] sm:$0xff]   ;;  %v2236_v36 = vld [vmem:[%s2780_s1 + $0x140] sm:$0xff]  }
  0x15   : > { %1837 = vmatprep.subr.bf16.mxu0 %v2220_v17  ;;  %v2497_v37 = vld [vmem:[%s2477_s26 + $0x8] sm:$0xff]  ;;  %v2238_v38 = vld [vmem:[%s2780_s1 + $0x1c0] sm:$0xff]   ;;  %v2517_v48 = vld [vmem:[%s2477_s26 + $0x10] sm:$0xff] }
  0x16   : > { %1876 = vmatpush3.bf16.msra.mxu1 %v2219_v16  ;;  %1045 = vmatprep.mubr.bf16.mxu0 %v395_v34  ;;  %307 = vst [vmem:[#allocation2 + $0x21] sm:$0xff] %v2497_v37  ;;  %v332_v39 = vld [vmem:[#allocation2 + $0x2] sm:$0xff]  ;;  %308 = vst [vmem:[#allocation2 + $0x31] sm:$0xff] %v2517_v48  ;;  %v2525_v51 = vpack.c.bf16 %v2517_v48, %v2497_v37  ;;  %v2531_v53 = vld [vmem:[%s2477_s26 + $0x18] sm:$0xff] }
  0x17   : > { %1877 = vmatprep.subr.bf16.mxu1 %v2222_v19  ;;  %v2237_v41 = vld [vmem:[%s2780_s1 + $0x100] sm:$0xff]   ;;  %v2240_v45 = vld [vmem:[%s2780_s1 + $0x148] sm:$0xff]   ;;  %v2244_v55 = vld [vmem:[%s2780_s1 + $0x150] sm:$0xff]   ;;  %309 = vst [vmem:[#allocation2 + $0x41] sm:$0xff] %v2531_v53 }
  0x18   : > { %1838 = vmatpush3.bf16.msra.mxu0 %v2221_v18  ;;  %v2239_v44 = vld [vmem:[%s2780_s1 + $0x180] sm:$0xff]   ;;  %v2241_v50 = vld [vmem:[%s2780_s1 + $0x108] sm:$0xff]   ;;  %v2245_v56 = vld [vmem:[%s2780_s1 + $0x110] sm:$0xff]  }
  0x19   : > { %1839 = vmatprep.subr.bf16.mxu0 %v2224_v21  ;;  %v2242_v52 = vld [vmem:[%s2780_s1 + $0x1c8] sm:$0xff]   ;;  %v2246_v58 = vld [vmem:[%s2780_s1 + $0x1d0] sm:$0xff]   ;;  %v2248_v59 = vld [vmem:[%s2780_s1 + $0x158] sm:$0xff]  }
  0x1a   : > { %1878 = vmatpush3.bf16.msra.mxu1 %v2223_v20  ;;  %v317_v40 = vld [vmem:[#allocation2 + $0x10] sm:$0xff]  ;;  %v2243_v54 = vld [vmem:[%s2780_s1 + $0x188] sm:$0xff]   ;;  %v2249_v0 = vld [vmem:[%s2780_s1 + $0x118] sm:$0xff]  }
  0x1b   : > { %1879 = vmatprep.subr.bf16.mxu1 %v2226_v23  ;;  %v2506_v42 = vld [vmem:[#allocation2 + $0x12] sm:$0xff]  ;;  %v394_v43 = vpack.c.bf16 %v317_v40, %v2302_v3  ;;  %v2567_v4 = vld [vmem:[%s2477_s26 + $0x20] sm:$0xff]  ;;  %v2582_v9 = vld [vmem:[%s2477_s26 + $0x28] sm:$0xff] }
  0x1c   : > { %1840 = vmatpush3.bf16.msra.mxu0 %v2225_v22  ;;  %v396_v47 = vpack.c.bf16 %v2506_v42, %v332_v39  ;;  %v2247_v62 = vld [vmem:[%s2780_s1 + $0x190] sm:$0xff]   ;;  %v2250_v6 = vld [vmem:[%s2780_s1 + $0x1d8] sm:$0xff]   ;;  %310 = vst [vmem:[#allocation2 + $0x51] sm:$0xff] %v2567_v4  ;;  %v2576_v7 = vpack.c.bf16 %v2567_v4, %v2531_v53  ;;  %v2252_v8 = vld [vmem:[%s2780_s1 + $0x160] sm:$0xff]  }
  0x1d   : > { %1841 = vmatprep.subr.bf16.mxu0 %v2228_v25  ;;  %v1703_v46 = vld [vmem:[#allocation2 + $0x20] sm:$0xff]  ;;  %v319_v60 = vld [vmem:[#allocation2 + $0x30] sm:$0xff]  ;;  %v2251_v10 = vld [vmem:[%s2780_s1 + $0x198] sm:$0xff]   ;;  %311 = vst [vmem:[#allocation2 + $0x61] sm:$0xff] %v2582_v9 }
  0x1e   : > { %1880 = vmatpush3.bf16.msra.mxu1 %v2227_v24  ;;  %v397_v49 = vpack.c.bf16 %v1703_v46, %v317_v40  ;;  %v2544_v57 = vld [vmem:[#allocation2 + $0x22] sm:$0xff]  ;;  %v2552_v61 = vld [vmem:[#allocation2 + $0x32] sm:$0xff]  ;;  %v2557_v63 = vpack.c.bf16 %v319_v60, %v1703_v46 }
  0x1f   : > { %1881 = vmatprep.subr.bf16.mxu1 %v2230_v27  ;;  %v1705_v1 = vld [vmem:[#allocation2 + $0x40] sm:$0xff]  ;;  %v2564_v2 = vpack.c.bf16 %v2552_v61, %v2544_v57  ;;  %v2256_v15 = vld [vmem:[%s2780_s1 + $0x168] sm:$0xff]   ;;  %v2619_v23 = vld [vmem:[%s2477_s26 + $0x30] sm:$0xff]  ;;  %v399_v39 = vpack.c.bf16 %v2544_v57, %v2506_v42 }
  0x20   : > { %1842 = vmatpush3.bf16.msra.mxu0 %v2229_v26  ;;  %1110 = vmatprep.mubr.bf16.mxu1 %v397_v49  ;;  %v406_v5 = vpack.c.bf16 %v1705_v1, %v319_v60  ;;  %v2253_v11 = vld [vmem:[%s2780_s1 + $0x120] sm:$0xff]   ;;  %v2257_v18 = vld [vmem:[%s2780_s1 + $0x128] sm:$0xff]   ;;  %312 = vst [vmem:[#allocation2 + $0x71] sm:$0xff] %v2619_v23  ;;  %v2625_v25 = vpack.c.bf16 %v2619_v23, %v2582_v9  ;;  %v2260_v27 = vld [vmem:[%s2780_s1 + $0x170] sm:$0xff]  }
  0x21   : > { %1843 = vmatprep.subr.bf16.mxu0 %v2232_v29  ;;  %v2593_v12 = vld [vmem:[#allocation2 + $0x42] sm:$0xff]  ;;  %v2261_v29 = vld [vmem:[%s2780_s1 + $0x130] sm:$0xff]   ;;  %v2264_v34 = vld [vmem:[%s2780_s1 + $0x178] sm:$0xff]  }
  0x22   : > { %1882 = vmatpush3.bf16.msra.mxu1 %v2231_v28  ;;  %v2254_v13 = vld [vmem:[%s2780_s1 + $0x1e0] sm:$0xff]   ;;  %v2258_v20 = vld [vmem:[%s2780_s1 + $0x1e8] sm:$0xff]   ;;  %v2634_v28 = vld [vmem:[%s2477_s26 + $0x38] sm:$0xff]  ;;  %v408_v49 = vpack.c.bf16 %v2593_v12, %v2552_v61 }
  0x23   : > { %1883 = vmatprep.subr.bf16.mxu1 %v2234_v31  ;;  %v2255_v14 = vld [vmem:[%s2780_s1 + $0x1a0] sm:$0xff]   ;;  %v321_v16 = vld [vmem:[#allocation2 + $0x50] sm:$0xff]  ;;  %v2259_v26 = vld [vmem:[%s2780_s1 + $0x1a8] sm:$0xff]   ;;  %313 = vst [vmem:[#allocation2 + $0x81] sm:$0xff] %v2634_v28  ;;  %v425_v60 = vpack.c.bf16 %v2634_v28, %v2619_v23 }
  0x24   : > { %1844 = vmatpush3.bf16.msra.mxu0 %v2233_v30  ;;  %v2604_v17 = vld [vmem:[#allocation2 + $0x52] sm:$0xff]  ;;  %v2609_v19 = vpack.c.bf16 %v321_v16, %v1705_v1  ;;  %v1707_v21 = vld [vmem:[#allocation2 + $0x60] sm:$0xff]  ;;  %v2273_v57 = vld [vmem:[%s2780_s1 + $0x228] sm:$0xff]  }
  0x25   : > { %1909 = vmatprep.subr.bf16.mxu0 %v2236_v36  ;;  %v2616_v22 = vpack.c.bf16 %v2604_v17, %v2593_v12  ;;  %v415_v24 = vpack.c.bf16 %v1707_v21, %v321_v16  ;;  %v338_v30 = vld [vmem:[#allocation2 + $0x62] sm:$0xff]  ;;  %v2262_v31 = vld [vmem:[%s2780_s1 + $0x1f0] sm:$0xff]   ;;  %v2267_v46 = vld [vmem:[%s2780_s1 + $0x1b8] sm:$0xff]  }
  0x26   : > { %1884 = vmatpush3.bf16.msra.mxu1 %v2235_v35  ;;  %v2263_v33 = vld [vmem:[%s2780_s1 + $0x1b0] sm:$0xff]   ;;  %v2268_v42 = vld [vmem:[%s2780_s1 + $0x200] sm:$0xff]   ;;  %v2275_v61 = vld [vmem:[%s2780_s1 + $0x238] sm:$0xff]  }
  0x27   : > { %1949 = vmatprep.subr.bf16.mxu1 %v2238_v38  ;;  %1046 = vmatmul.mubr.bf16.vlgmr.msra.gmra.mrb[0].mxu0 %v394_v43  ;;  %v323_v35 = vld [vmem:[#allocation2 + $0x70] sm:$0xff]  ;;  %v2265_v38 = vld [vmem:[%s2780_s1 + $0x138] sm:$0xff]   ;;  %v1351_v1 = vld [vmem:[%s2784_s5] sm:$0xff] }
  0x28   : > { %1910 = vmatpush3.bf16.msra.mxu0 %v2237_v41  ;;  %1053 = vmatprep.mubr.bf16.mxu0 %v2525_v51  ;;  %v339_v36 = vld [vmem:[#allocation2 + $0x72] sm:$0xff]  ;;  %v421_v40 = vpack.c.bf16 %v323_v35, %v1707_v21  ;;  %v1360_v16 = vld [vmem:[%s2784_s5 + $0x48] sm:$0xff]  ;;  %v1363_v21 = vld [vmem:[%s2784_s5 + $0x60] sm:$0xff] }
  0x29   : > { %1911 = vmatprep.subr.bf16.mxu0 %v2240_v45  ;;  %1111 = vmatmul.mubr.bf16.vlgmr.msra.gmra.mrb[0].mxu1 %v396_v47  ;;  %v2266_v41 = vld [vmem:[%s2780_s1 + $0x1f8] sm:$0xff]   ;;  %v398_v47 = vpack.c.bf16 %v2497_v37, %v2486_v32  ;;  %v407_v32 = vpack.c.bf16 %v2531_v53, %v2517_v48  ;;  %v417_v37 = vpack.c.bf16 %v338_v30, %v2604_v17  ;;  %v1357_v12 = vld [vmem:[%s2784_s5 + $0x30] sm:$0xff] }
  0x2a   : > { %1950 = vmatpush3.bf16.msra.mxu1 %v2239_v44  ;;  %1118 = vmatprep.mubr.bf16.mxu1 %v406_v5  ;;  %v1709_v43 = vld [vmem:[#allocation2 + $0x80] sm:$0xff]  ;;  %v423_v44 = vpack.c.bf16 %v339_v36, %v338_v30  ;;  %v416_v48 = vpack.c.bf16 %v2582_v9, %v2567_v4  ;;  %v1352_v4 = vld [vmem:[%s2784_s5 + $0x8] sm:$0xff] }
  0x2b   : > { %1951 = vmatprep.subr.bf16.mxu1 %v2242_v52  ;;  %v424_v45 = vpack.c.bf16 %v1709_v43, %v323_v35  ;;  %v2270_v52 = vld [vmem:[%s2780_s1 + $0x210] sm:$0xff]   ;;  %v2130_v5 = vpack.c.bf16 %v1352_v4, %v1351_v1  ;;  %v1355_v9 = vld [vmem:[%s2784_s5 + $0x20] sm:$0xff] }
  0x2c   : > { %1912 = vmatpush3.bf16.msra.mxu0 %v2241_v50  ;;  %v2269_v50 = vld [vmem:[%s2780_s1 + $0x208] sm:$0xff]  }
  0x2d   : > { %1913 = vmatprep.subr.bf16.mxu0 %v2244_v55  ;;  %v1725_v55 = vld [vmem:[#allocation2 + $0x82] sm:$0xff] }
  0x2e   : > { %1952 = vmatpush3.bf16.msra.mxu1 %v2243_v54  ;;  %v2272_v54 = vld [vmem:[%s2780_s1 + $0x220] sm:$0xff]   ;;  %v426_v53 = vpack.c.bf16 %v1725_v55, %v339_v36 }
  0x2f   : > { %1953 = vmatprep.subr.bf16.mxu1 %v2246_v58  ;;  %1054 = vmatmul.mubr.bf16.gmra.mrb[4].mxu0 %v2557_v63 }
  0x30   : > { %1914 = vmatpush3.bf16.msra.mxu0 %v2245_v56  ;;  %1061 = vmatprep.mubr.bf16.mxu0 %v2576_v7  ;;  %v1741_v56 = vld [vmem:[#allocation2 + $0x91] sm:$0xff] }
  0x31   : > { %1915 = vmatprep.subr.bf16.mxu0 %v2248_v59  ;;  %1119 = vmatmul.mubr.bf16.gmra.mrb[4].mxu1 %v2564_v2  ;;  %v428_v58 = vpack.c.bf16 %v1741_v56, %v2634_v28  ;;  %v2274_v59 = vld [vmem:[%s2780_s1 + $0x230] sm:$0xff]   ;;  %v1750_v28 = vld [vmem:[%s2781_s2] ss:$0 sm:$0xff] }
  0x32   : > { %1954 = vmatpush3.bf16.msra.mxu1 %v2247_v62  ;;  %1126 = vmatprep.mubr.bf16.mxu1 %v415_v24  ;;  %v427_v62 = vpack.c.bf16 %v2302_v3, %v1709_v43  ;;  %v1365_v24 = vld [vmem:[%s2784_s5 + $0x70] sm:$0xff] }
  0x33   : > { %1955 = vmatprep.subr.bf16.mxu1 %v2250_v6  ;;  %v2303_v6 = vmov 0.0|0.0  }
  0x34   : > { %1916 = vmatpush3.bf16.msra.mxu0 %v2249_v0 }
  0x35   : > { %1917 = vmatprep.subr.bf16.mxu0 %v2252_v8 }
  0x36   : > { %1956 = vmatpush3.bf16.msra.mxu1 %v2251_v10  ;;  %v1356_v10 = vld [vmem:[%s2784_s5 + $0x28] sm:$0xff] }
  0x37   : > { %1957 = vmatprep.subr.bf16.mxu1 %v2254_v13  ;;  %1062 = vmatmul.mubr.bf16.gmra.mrb[8].mxu0 %v2609_v19  ;;  %v1358_v13 = vld [vmem:[%s2784_s5 + $0x38] sm:$0xff] }
  0x38   : > { %1918 = vmatpush3.bf16.msra.mxu0 %v2253_v11  ;;  %1069 = vmatprep.mubr.bf16.mxu0 %v2625_v25  ;;  %v2136_v11 = vpack.c.bf16 %v1356_v10, %v1355_v9 }
  0x39   : > { %1919 = vmatprep.subr.bf16.mxu0 %v2256_v15  ;;  %1127 = vmatmul.mubr.bf16.gmra.mrb[8].mxu1 %v2616_v22  ;;  %v1359_v15 = vld [vmem:[%s2784_s5 + $0x40] sm:$0xff] }
  0x3a   : > { %1958 = vmatpush3.bf16.msra.mxu1 %v2255_v14  ;;  %1134 = vmatprep.mubr.bf16.mxu1 %v424_v45  ;;  %v2139_v14 = vpack.c.bf16 %v1358_v13, %v1357_v12  ;;  %v2142_v17 = vpack.c.bf16 %v1360_v16, %v1359_v15 }
  0x3b   : > { %1959 = vmatprep.subr.bf16.mxu1 %v2258_v20 }
  0x3c   : > { %1920 = vmatpush3.bf16.msra.mxu0 %v2257_v18  ;;  %v1361_v18 = vld [vmem:[%s2784_s5 + $0x50] sm:$0xff] }
  0x3d   : > { %1921 = vmatprep.subr.bf16.mxu0 %v2260_v27 }
  0x3e   : > { %1960 = vmatpush3.bf16.msra.mxu1 %v2259_v26 }
  0x3f   : > { %1961 = vmatprep.subr.bf16.mxu1 %v2262_v31  ;;  %1070 = vmatmul.mubr.bf16.gmra.mrb[12].mxu0 %v421_v40 }
  0x40   : > { %1922 = vmatpush3.bf16.msra.mxu0 %v2261_v29  ;;  %1175 = vmatprep.mubr.bf16.mxu0 %v399_v39 }
  0x41   : > { %1923 = vmatprep.subr.bf16.mxu0 %v2264_v34  ;;  %1135 = vmatmul.mubr.bf16.gmra.mrb[12].mxu1 %v423_v44 }
  0x42   : > { %1962 = vmatpush3.bf16.msra.mxu1 %v2263_v33  ;;  %1240 = vmatprep.mubr.bf16.mxu1 %v2525_v51  ;;  %v2271_v51 = vld [vmem:[%s2780_s1 + $0x218] sm:$0xff]  }
  0x43   : > { %1963 = vmatprep.subr.bf16.mxu1 %v2266_v41 }
  0x44   : > { %1924 = vmatpush3.bf16.msra.mxu0 %v2265_v38 }
  0x45   : > { %2035 = vmatprep.subr.bf16.mxu0 %v2268_v42 }
  0x46   : > { %1964 = vmatpush3.bf16.msra.mxu1 %v2267_v46 }
  0x47   : > { %1176 = vmatmul.mubr.bf16.vlgmr.msra.gmra.mrb[16].mxu0 %v398_v47  ;;  %2129 = vmatprep.subr.bf16.mxu1 %v2303_v6 }
  0x48   : > { %2036 = vmatpush3.bf16.msra.mxu0 %v2268_v42  ;;  %1183 = vmatprep.mubr.bf16.mxu0 %v408_v49 }
  0x49   : > { %2037 = vmatprep.subr.bf16.mxu0 %v2269_v50  ;;  %1241 = vmatmul.mubr.bf16.vlgmr.msra.gmra.mrb[16].mxu1 %v2557_v63  ;;  %v1749_v63 = vld [vmem:[#allocation2 + $0x92] sm:$0xff] }
  0x4a   : > { %1248 = vmatprep.mubr.bf16.mxu1 %v2576_v7  ;;  %v429_v0 = vpack.c.bf16 %v1749_v63, %v1725_v55  ;;  %2131 = vmatpush3.bf16.msra.mxu1 %v2130_v5  ;;  %v1354_v7 = vld [vmem:[%s2784_s5 + $0x18] sm:$0xff] }
  0x4b   : > { %2132 = vmatprep.subr.bf16.mxu1 %v2303_v6 }
  0x4c   : > { %2038 = vmatpush3.bf16.msra.mxu0 %v2269_v50 }
  0x4d   : > { %2039 = vmatprep.subr.bf16.mxu0 %v2270_v52 }
  0x4f   : > { %1184 = vmatmul.mubr.bf16.gmra.mrb[20].mxu0 %v407_v32 }
  0x50   : > { %2040 = vmatpush3.bf16.msra.mxu0 %v2270_v52  ;;  %1191 = vmatprep.mubr.bf16.mxu0 %v417_v37 }
  0x51   : > { %2041 = vmatprep.subr.bf16.mxu0 %v2271_v51  ;;  %1249 = vmatmul.mubr.bf16.gmra.mrb[20].mxu1 %v2609_v19  ;;  %v1362_v19 = vld [vmem:[%s2784_s5 + $0x58] sm:$0xff] }
  0x52   : > { %1256 = vmatprep.mubr.bf16.mxu1 %v2625_v25  ;;  %v2145_v20 = vpack.c.bf16 %v1362_v19, %v1361_v18  ;;  %v1366_v25 = vld [vmem:[%s2784_s5 + $0x78] sm:$0xff] }
  0x53   : > { %v2151_v26 = vpack.c.bf16 %v1366_v25, %v1365_v24 }
  0x54   : > { %2042 = vmatpush3.bf16.msra.mxu0 %v2271_v51 }
  0x55   : > { %2043 = vmatprep.subr.bf16.mxu0 %v2272_v54 }
  0x57   : > { %1192 = vmatmul.mubr.bf16.gmra.mrb[24].mxu0 %v416_v48 }
  0x58   : > { %2044 = vmatpush3.bf16.msra.mxu0 %v2272_v54  ;;  %1199 = vmatprep.mubr.bf16.mxu0 %v426_v53 }
  0x59   : > { %2045 = vmatprep.subr.bf16.mxu0 %v2273_v57  ;;  %1257 = vmatmul.mubr.bf16.gmra.mrb[24].mxu1 %v421_v40 }
  0x5a   : > { %1264 = vmatprep.mubr.bf16.mxu1 %v428_v58 }
  0x5c   : > { %2046 = vmatpush3.bf16.msra.mxu0 %v2273_v57 }
  0x5d   : > { %2047 = vmatprep.subr.bf16.mxu0 %v2274_v59 }
  0x5f   : > { %1200 = vmatmul.mubr.bf16.gmra.mrb[28].mxu0 %v425_v60 }
  0x60   : > { %2048 = vmatpush3.bf16.msra.mxu0 %v2274_v59  ;;  %2051 = vmatprep.mubr.bf16.mxu0 %v2564_v2  ;;  %v1353_v2 = vld [vmem:[%s2784_s5 + $0x10] sm:$0xff] }
  0x61   : > { %2049 = vmatprep.subr.bf16.mxu0 %v2275_v61  ;;  %1265 = vmatmul.mubr.bf16.gmra.mrb[28].mxu1 %v427_v62  ;;  %v2133_v8 = vpack.c.bf16 %v1354_v7, %v1353_v2 }
  0x62   : > { %2091 = vmatprep.mubr.msk.f32.mxu1 %vm2304_vm0, %v2302_v3 }
  0x63   : > { %2134 = vmatpush3.bf16.msra.mxu1 %v2133_v8 }
  0x64   : > { %2050 = vmatpush3.bf16.msra.mxu0 %v2275_v61  ;;  %2135 = vmatprep.subr.bf16.mxu1 %v2303_v6 }
  0x65   : > { %2153 = vmatprep.subr.bf16.mxu0 %v2303_v6 }
  0x67   : > { %2052 = vmatmul.mubr.bf16.vlgmr.msra.gmra.mrb[32].mxu0 %v2616_v22  ;;  %2137 = vmatpush3.bf16.msra.mxu1 %v2136_v11  ;;  %v1364_v22 = vld [vmem:[%s2784_s5 + $0x68] sm:$0xff] }
  0x68   : > { %2055 = vmatprep.mubr.bf16.mxu0 %v423_v44  ;;  %2155 = vmatpush3.bf16.msra.mxu0 %v2130_v5  ;;  %v2148_v23 = vpack.c.bf16 %v1364_v22, %v1363_v21 }
  0x69   : > { %2156 = vmatprep.subr.bf16.mxu0 %v2303_v6  ;;  %2138 = vmatprep.subr.bf16.mxu1 %v2303_v6 }
  0x6b   : > { %2140 = vmatpush3.bf16.msra.mxu1 %v2139_v14 }
  0x6c   : > { %2158 = vmatpush3.bf16.msra.mxu0 %v2133_v8  ;;  %2141 = vmatprep.subr.bf16.mxu1 %v2303_v6 }
  0x6d   : > { %2159 = vmatprep.subr.bf16.mxu0 %v2303_v6 }
  0x6f   : > { %2056 = vmatmul.mubr.bf16.gmra.mrb[36].mxu0 %v429_v0  ;;  %2143 = vmatpush3.bf16.msra.mxu1 %v2142_v17 }
  0x70   : > { %2161 = vmatpush3.bf16.msra.mxu0 %v2136_v11  ;;  %2144 = vmatprep.subr.bf16.mxu1 %v2303_v6 }
  0x71   : > { %2162 = vmatprep.subr.bf16.mxu0 %v2303_v6  ;;  %2126 = vmatprep.mubr.msk.f32.mxu0 %vm2304_vm0, %v2302_v3 }
  0x73   : > { %2146 = vmatpush3.bf16.msra.mxu1 %v2145_v20 }
  0x74   : > { %2164 = vmatpush3.bf16.msra.mxu0 %v2139_v14  ;;  %2147 = vmatprep.subr.bf16.mxu1 %v2303_v6 }
  0x75   : > { %2165 = vmatprep.subr.bf16.mxu0 %v2303_v6 }
  0x77   : > { %2149 = vmatpush3.bf16.msra.mxu1 %v2148_v23 }
  0x78   : > { %2167 = vmatpush3.bf16.msra.mxu0 %v2142_v17  ;;  %2150 = vmatprep.subr.bf16.mxu1 %v2303_v6 }
  0x79   : > { %2168 = vmatprep.subr.bf16.mxu0 %v2303_v6 }
  0x7b   : > { %2152 = vmatpush3.bf16.msra.mxu1 %v2151_v26 }
  0x7c   : > { %2170 = vmatpush3.bf16.msra.mxu0 %v2145_v20 }
  0x7d   : > { %2171 = vmatprep.subr.bf16.mxu0 %v2303_v6 }
  0x80   : > { %2173 = vmatpush3.bf16.msra.mxu0 %v2148_v23 }
  0x81   : > { %2174 = vmatprep.subr.bf16.mxu0 %v2303_v6 }
  0x84   : > { %2176 = vmatpush3.bf16.msra.mxu0 %v2151_v26 }
  0xfa   : > { %v1845_v27 = vpop.f32.mrb[0].mxu0 }
  0xfb   : > { %v1846_v29 = vpop.f32.mrb[1].mxu0 }
  0xfc   : > { %v1847_v30 = vadd.f32 %v1846_v29, %v1845_v27  ;;  %v1848_v31 = vpop.f32.mrb[2].mxu0  ;;  %v1885_v33 = vpop.f32.mrb[0].mxu1 }
  0xfd   : > { %v1849_v34 = vpop.f32.mrb[3].mxu0  ;;  %v1886_v38 = vpop.f32.mrb[1].mxu1 }
  0xfe   : > { %v1048_v35 = vadd.f32 %v1847_v30, %v1750_v28  ;;  %v1850_v36 = vadd.f32 %v1849_v34, %v1848_v31  ;;  %v1887_v39 = vadd.f32 %v1886_v38, %v1885_v33  ;;  %v1888_v40 = vpop.f32.mrb[2].mxu1 }
  0xff   : > { %v1889_v43 = vpop.f32.mrb[3].mxu1 }
 0x100   : > { %v1051_v41 = vadd.f32 %v1850_v36, %v1750_v28  ;;  %v1113_v3 = vadd.f32 %v1887_v39, %v1048_v35  ;;  %v1890_v44 = vadd.f32 %v1889_v43, %v1888_v40 }
 0x102   : > { %v1116_v45 = vadd.f32 %v1890_v44, %v1051_v41  ;;  %v1851_v46 = vpop.f32.mrb[4].mxu0 }
 0x103   : > { %v1852_v42 = vpop.f32.mrb[5].mxu0 }
 0x104   : > { %v1853_v47 = vadd.f32 %v1852_v42, %v1851_v46  ;;  %v1854_v49 = vpop.f32.mrb[6].mxu0  ;;  %v1891_v50 = vpop.f32.mrb[4].mxu1 }
 0x105   : > { %v1855_v52 = vpop.f32.mrb[7].mxu0  ;;  %v1892_v51 = vpop.f32.mrb[5].mxu1 }
 0x106   : > { %v1056_v32 = vadd.f32 %v1853_v47, %v1750_v28  ;;  %v1856_v37 = vadd.f32 %v1855_v52, %v1854_v49  ;;  %v1893_v54 = vadd.f32 %v1892_v51, %v1891_v50  ;;  %v1894_v55 = vpop.f32.mrb[6].mxu1 }
 0x107   : > { %v1895_v53 = vpop.f32.mrb[7].mxu1 }
 0x108   : > { %v1059_v48 = vadd.f32 %v1856_v37, %v1750_v28  ;;  %v1121_v56 = vadd.f32 %v1893_v54, %v1056_v32  ;;  %v1896_v57 = vadd.f32 %v1895_v53, %v1894_v55 }
 0x10a   : > { %v1124_v58 = vadd.f32 %v1896_v57, %v1059_v48  ;;  %v1857_v59 = vpop.f32.mrb[8].mxu0 }
 0x10b   : > { %v1858_v60 = vpop.f32.mrb[9].mxu0 }
 0x10c   : > { %v1859_v61 = vadd.f32 %v1858_v60, %v1857_v59  ;;  %v1860_v62 = vpop.f32.mrb[10].mxu0  ;;  %v1897_v63 = vpop.f32.mrb[8].mxu1 }
 0x10d   : > { %v1861_v0 = vpop.f32.mrb[11].mxu0  ;;  %v1898_v5 = vpop.f32.mrb[9].mxu1 }
 0x10e   : > { %v1064_v1 = vadd.f32 %v1859_v61, %v1750_v28  ;;  %v1862_v4 = vadd.f32 %v1861_v0, %v1860_v62  ;;  %v1899_v6 = vadd.f32 %v1898_v5, %v1897_v63  ;;  %v1900_v2 = vpop.f32.mrb[10].mxu1 }
 0x10f   : > { %v1901_v8 = vpop.f32.mrb[11].mxu1 }
 0x110   : > { %v1067_v7 = vadd.f32 %v1862_v4, %v1750_v28  ;;  %v1129_v9 = vadd.f32 %v1899_v6, %v1064_v1  ;;  %v1902_v10 = vadd.f32 %v1901_v8, %v1900_v2 }
 0x112   : > { %v1132_v11 = vadd.f32 %v1902_v10, %v1067_v7  ;;  %v1863_v12 = vpop.f32.mrb[12].mxu0 }
 0x113   : > { %v1864_v13 = vpop.f32.mrb[13].mxu0 }
 0x114   : > { %v1865_v14 = vadd.f32 %v1864_v13, %v1863_v12  ;;  %v1866_v15 = vpop.f32.mrb[14].mxu0  ;;  %v1903_v16 = vpop.f32.mrb[12].mxu1 }
 0x115   : > { %v1867_v17 = vpop.f32.mrb[15].mxu0  ;;  %v1904_v20 = vpop.f32.mrb[13].mxu1 }
 0x116   : > { %v1072_v18 = vadd.f32 %v1865_v14, %v1750_v28  ;;  %v1868_v19 = vadd.f32 %v1867_v17, %v1866_v15  ;;  %v1905_v21 = vadd.f32 %v1904_v20, %v1903_v16  ;;  %v1906_v22 = vpop.f32.mrb[14].mxu1 }
 0x117   : > { %v1907_v24 = vpop.f32.mrb[15].mxu1 }
 0x118   : > { %v1075_v23 = vadd.f32 %v1868_v19, %v1750_v28  ;;  %v1137_v25 = vadd.f32 %v1905_v21, %v1072_v18  ;;  %v1908_v26 = vadd.f32 %v1907_v24, %v1906_v22 }
 0x11a   : > { %v1925_v27 = vpop.f32.mrb[16].mxu0  ;;  %v1140_v29 = vadd.f32 %v1908_v26, %v1075_v23 }
 0x11b   : > { %v1926_v30 = vpop.f32.mrb[17].mxu0 }
 0x11c   : > { %v1927_v31 = vadd.f32 %v1926_v30, %v1925_v27  ;;  %v1928_v33 = vpop.f32.mrb[18].mxu0  ;;  %v1965_v34 = vpop.f32.mrb[16].mxu1 }
 0x11d   : > { %v1929_v35 = vpop.f32.mrb[19].mxu0  ;;  %v1966_v39 = vpop.f32.mrb[17].mxu1 }
 0x11e   : > { %v1178_v36 = vadd.f32 %v1927_v31, %v1113_v3  ;;  %v1930_v38 = vadd.f32 %v1929_v35, %v1928_v33  ;;  %v1967_v40 = vadd.f32 %v1966_v39, %v1965_v34  ;;  %v1968_v41 = vpop.f32.mrb[18].mxu1 }
 0x11f   : > { %v1969_v44 = vpop.f32.mrb[19].mxu1 }
 0x120   : > { %v1181_v43 = vadd.f32 %v1930_v38, %v1116_v45  ;;  %v1970_v46 = vadd.f32 %v1969_v44, %v1968_v41  ;;  %v1243_v42 = vadd.f32 %v1967_v40, %v1178_v36 }
 0x122   : > { %v1931_v28 = vpop.f32.mrb[20].mxu0  ;;  %v1246_v49 = vadd.f32 %v1970_v46, %v1181_v43 }
 0x123   : > { %v1932_v47 = vpop.f32.mrb[21].mxu0 }
 0x124   : > { %v1933_v50 = vadd.f32 %v1932_v47, %v1931_v28  ;;  %v1934_v52 = vpop.f32.mrb[22].mxu0  ;;  %v1971_v32 = vpop.f32.mrb[20].mxu1 }
 0x125   : > { %v1935_v37 = vpop.f32.mrb[23].mxu0  ;;  %v1972_v55 = vpop.f32.mrb[21].mxu1 }
 0x126   : > { %v1186_v51 = vadd.f32 %v1933_v50, %v1121_v56  ;;  %v1936_v54 = vadd.f32 %v1935_v37, %v1934_v52  ;;  %v1973_v48 = vadd.f32 %v1972_v55, %v1971_v32  ;;  %v1974_v3 = vpop.f32.mrb[22].mxu1 }
 0x127   : > { %v1975_v57 = vpop.f32.mrb[23].mxu1 }
 0x128   : > { %v1189_v53 = vadd.f32 %v1936_v54, %v1124_v58  ;;  %v1976_v59 = vadd.f32 %v1975_v57, %v1974_v3  ;;  %v1251_v60 = vadd.f32 %v1973_v48, %v1186_v51 }
 0x12a   : > { %v1937_v45 = vpop.f32.mrb[24].mxu0  ;;  %v1254_v62 = vadd.f32 %v1976_v59, %v1189_v53  ;;  %v1438_v59 = vlaneseq }
 0x12b   : > { %v1938_v61 = vpop.f32.mrb[25].mxu0 }
 0x12c   : > { %v1939_v63 = vadd.f32 %v1938_v61, %v1937_v45  ;;  %v1940_v0 = vpop.f32.mrb[26].mxu0  ;;  %v1977_v1 = vpop.f32.mrb[24].mxu1 }
 0x12d   : > { %v1941_v4 = vpop.f32.mrb[27].mxu0  ;;  %v1978_v2 = vpop.f32.mrb[25].mxu1 }
 0x12e   : > { %v1194_v5 = vadd.f32 %v1939_v63, %v1129_v9  ;;  %v1942_v6 = vadd.f32 %v1941_v4, %v1940_v0  ;;  %v1979_v7 = vadd.f32 %v1978_v2, %v1977_v1  ;;  %v1980_v56 = vpop.f32.mrb[26].mxu1 }
 0x12f   : > { %v1981_v10 = vpop.f32.mrb[27].mxu1 }
 0x130   : > { %v1197_v8 = vadd.f32 %v1942_v6, %v1132_v11  ;;  %v1982_v12 = vadd.f32 %v1981_v10, %v1980_v56  ;;  %v1259_v13 = vadd.f32 %v1979_v7, %v1194_v5 }
 0x132   : > { %v1943_v58 = vpop.f32.mrb[28].mxu0  ;;  %v1262_v15 = vadd.f32 %v1982_v12, %v1197_v8 }
 0x133   : > { %v1944_v14 = vpop.f32.mrb[29].mxu0 }
 0x134   : > { %v1945_v16 = vadd.f32 %v1944_v14, %v1943_v58  ;;  %v1946_v17 = vpop.f32.mrb[30].mxu0  ;;  %v1983_v18 = vpop.f32.mrb[28].mxu1 }
 0x135   : > { %v1947_v19 = vpop.f32.mrb[31].mxu0  ;;  %v1984_v22 = vpop.f32.mrb[29].mxu1 }
 0x136   : > { %v1202_v20 = vadd.f32 %v1945_v16, %v1137_v25  ;;  %v1948_v21 = vadd.f32 %v1947_v19, %v1946_v17  ;;  %v1985_v23 = vadd.f32 %v1984_v22, %v1983_v18  ;;  %v1986_v9 = vpop.f32.mrb[30].mxu1 }
 0x137   : > { %v1987_v26 = vpop.f32.mrb[31].mxu1 }
 0x138   : > { %v1205_v24 = vadd.f32 %v1948_v21, %v1140_v29  ;;  %v1988_v27 = vadd.f32 %v1987_v26, %v1986_v9  ;;  %v1267_v30 = vadd.f32 %v1985_v23, %v1202_v20 }
 0x13a   : > { %v2053_v11 = vpop.f32.mrb[32].mxu0  ;;  %v1270_v34 = vadd.f32 %v1988_v27, %v1205_v24 }
 0x13b   : > { %v1316_v31 = vadd.f32 %v2053_v11, %v1251_v60  ;;  %v1307_v33 = vpop.f32.mrb[33].mxu0  ;;  %v1439_v60 = vshrl.u32 %v1438_v59, 7 }
 0x13c   : > { %v1308_v35 = vadd.f32 %v1307_v33, %v1243_v42  ;;  %v2054_v36 = vpop.f32.mrb[34].mxu0 }
 0x13d   : > { %v1319_v38 = vadd.f32 %v2054_v36, %v1254_v62  ;;  %v1310_v39 = vpop.f32.mrb[35].mxu0  ;;  %v1440_v45 = vsub.s32 0, %v1439_v60 }
 0x13e   : > { %v1311_v40 = vadd.f32 %v1310_v39, %v1246_v49 }
 0x140   : > { %v1338_v41 = vadd.f32 %v1311_v40, %v1308_v35 }
 0x142   : > { %v1339_v43 = vadd.f32 %v1338_v41, %v1316_v31  ;;  %v2057_v25 = vpop.f32.mrb[36].mxu0 }
 0x143   : > { %v1332_v44 = vadd.f32 %v2057_v25, %v1267_v30  ;;  %v1323_v46 = vpop.f32.mrb[37].mxu0 }
 0x144   : > { %v1324_v28 = vadd.f32 %v1323_v46, %v1259_v13  ;;  %v1340_v47 = vadd.f32 %v1339_v43, %v1319_v38  ;;  %v2058_v29 = vpop.f32.mrb[38].mxu0 }
 0x145   : > { %v1335_v50 = vadd.f32 %v2058_v29, %v1270_v34  ;;  %v1326_v52 = vpop.f32.mrb[39].mxu0 }
 0x146   : > { %v1341_v32 = vadd.f32 %v1340_v47, %v1324_v28  ;;  %v1327_v37 = vadd.f32 %v1326_v52, %v1262_v15 }
 0x148   : > { %v1342_v51 = vadd.f32 %v1341_v32, %v1327_v37 }
 0x14a   : > { %v1343_v54 = vadd.f32 %v1342_v51, %v1332_v44 }
 0x14c   : > { %v1344_v55 = vadd.f32 %v1343_v54, %v1335_v50 }
 0x14e   : > { %v1345_v42 = vrot.slane %v1344_v55, 4 }
 0x150   : > { %v1346_v48 = vadd.f32 %v1345_v42, %v1344_v55 }
 0x152   : > { %v1347_v3 = vrot.slane %v1346_v48, 2 }
 0x154   : > { %v1348_v53 = vadd.f32 %v1347_v3, %v1346_v48 }
 0x156   : > { %v1349_v49 = vrot.slane %v1348_v53, 1 }
 0x158   : > { %v1350_v57 = vadd.f32 %v1349_v49, %v1348_v53 }
 0x15a   : > { %2092 = vmatmul.mubr.f32.vlgmr.msra.gmra.mrb[32].mxu1 %v1350_v57 }
 0x22d   : > { %v1433_v61 = vpop.f32.mrb[32].mxu1 }
 0x22e   : > { %v1437_v62 = vmul.f32 0.015625, %v1433_v61  ;;  %v2093_v63 = vpop.f32.mrb[33].mxu1 }
 0x230   : > { %v1441_v0 = vrot.slane %v1437_v62, %v1440_v45 }
 0x232   : > { %v1442_v1 = vsub.f32 %v1308_v35, %v1441_v0  ;;  %v1443_v4 = vsub.f32 %v1311_v40, %v1441_v0  ;;  %v1444_v5 = vsub.f32 %v1316_v31, %v1441_v0  ;;  %v1445_v6 = vsub.f32 %v1319_v38, %v1441_v0  ;;  %v1823_v40 = vld [vmem:[%s2782_s3] ss:$0 sm:$0xff] }
 0x233   : > { %v1446_v56 = vsub.f32 %v1324_v28, %v1441_v0  ;;  %v1447_v12 = vsub.f32 %v1327_v37, %v1441_v0  ;;  %v1448_v14 = vsub.f32 %v1332_v44, %v1441_v0  ;;  %v1449_v17 = vsub.f32 %v1335_v50, %v1441_v0  ;;  %v1824_v50 = vld [vmem:[%s2783_s4] ss:$0 sm:$0xff] }
 0x234   : > { %v1450_v2 = vmul.f32 %v1442_v1, %v1442_v1  ;;  %v1451_v7 = vmul.f32 %v1443_v4, %v1443_v4  ;;  %v1452_v8 = vmul.f32 %v1444_v5, %v1444_v5  ;;  %v1453_v13 = vmul.f32 %v1445_v6, %v1445_v6 }
 0x235   : > { %v1454_v15 = vmul.f32 %v1446_v56, %v1446_v56  ;;  %v1455_v18 = vmul.f32 %v1447_v12, %v1447_v12  ;;  %v1456_v20 = vmul.f32 %v1448_v14, %v1448_v14  ;;  %v1457_v22 = vmul.f32 %v1449_v17, %v1449_v17 }
 0x236   : > { %v1458_v10 = vadd.f32 %v1451_v7, %v1450_v2 }
 0x238   : > { %v1459_v58 = vadd.f32 %v1458_v10, %v1452_v8 }
 0x23a   : > { %v1460_v16 = vadd.f32 %v1459_v58, %v1453_v13 }
 0x23c   : > { %v1461_v19 = vadd.f32 %v1460_v16, %v1454_v15 }
 0x23e   : > { %v1462_v21 = vadd.f32 %v1461_v19, %v1455_v18 }
 0x240   : > { %v1463_v23 = vadd.f32 %v1462_v21, %v1456_v20 }
 0x242   : > { %v1464_v9 = vadd.f32 %v1463_v23, %v1457_v22 }
 0x244   : > { %v1465_v24 = vrot.slane %v1464_v9, 4 }
 0x246   : > { %v1466_v26 = vadd.f32 %v1465_v24, %v1464_v9 }
 0x248   : > { %v1467_v27 = vrot.slane %v1466_v26, 2 }
 0x24a   : > { %v1468_v30 = vadd.f32 %v1467_v27, %v1466_v26 }
 0x24c   : > { %v1469_v11 = vrot.slane %v1468_v30, 1 }
 0x24e   : > { %v1470_v31 = vadd.f32 %v1469_v11, %v1468_v30 }
 0x250   : > { %2127 = vmatmul.mubr.f32.vlgmr.msra.gmra.mrb[40].mxu0 %v1470_v31 }
 0x323   : > { %v1537_v33 = vpop.f32.mrb[40].mxu0 }
 0x324   : > { %v1541_v34 = vmul.f32 0.015625, %v1537_v33  ;;  %v2128_v35 = vpop.f32.mrb[41].mxu0 }
 0x326   : > { %v1542_v36 = vadd.f32 1e-05, %v1541_v34 }
 0x328   : > { %2276 = vrsqrt.f32 %v1542_v36 }
 0x332   : > { %v2277_v38 = vpop.eup %2276 }
 0x333   : > { %v1547_v39 = vrot.slane %v2277_v38, %v1440_v45 }
 0x335   : > { %v1548_v41 = vmul.f32 %v1547_v39, %v1442_v1  ;;  %v1549_v43 = vmul.f32 %v1547_v39, %v1443_v4  ;;  %v1550_v25 = vmul.f32 %v1547_v39, %v1444_v5  ;;  %v1551_v44 = vmul.f32 %v1547_v39, %v1445_v6 }
 0x336   : > { %v1552_v46 = vmul.f32 %v1547_v39, %v1446_v56  ;;  %v1553_v28 = vmul.f32 %v1547_v39, %v1447_v12  ;;  %v1554_v47 = vmul.f32 %v1547_v39, %v1448_v14  ;;  %v1555_v29 = vmul.f32 %v1547_v39, %v1449_v17 }
 0x337   : > { %v1563_v52 = vmul.f32 %v1823_v40, %v1548_v41  ;;  %v1564_v32 = vmul.f32 %v1823_v40, %v1549_v43  ;;  %v1565_v37 = vmul.f32 %v1823_v40, %v1550_v25  ;;  %v1566_v51 = vmul.f32 %v1823_v40, %v1551_v44 }
 0x338   : > { %v1567_v54 = vmul.f32 %v1823_v40, %v1552_v46  ;;  %v1568_v55 = vmul.f32 %v1823_v40, %v1553_v28  ;;  %v1569_v42 = vmul.f32 %v1823_v40, %v1554_v47  ;;  %v1570_v48 = vmul.f32 %v1823_v40, %v1555_v29 }
 0x339   : > { %v1578_v3 = vadd.f32 %v1824_v50, %v1563_v52  ;;  %v1579_v53 = vadd.f32 %v1824_v50, %v1564_v32  ;;  %v1580_v49 = vadd.f32 %v1824_v50, %v1565_v37  ;;  %v1581_v57 = vadd.f32 %v1824_v50, %v1566_v51 }
 0x33a   : > { %v1582_v59 = vadd.f32 %v1824_v50, %v1567_v54  ;;  %v1583_v60 = vadd.f32 %v1824_v50, %v1568_v55  ;;  %v1584_v45 = vadd.f32 %v1824_v50, %v1569_v42  ;;  %v1585_v61 = vadd.f32 %v1824_v50, %v1570_v48 }
 0x33b   : > { %v1586_v62 = vmax.f32 %v1578_v3, 0.0  ;;  %v1587_v63 = vmax.f32 %v1579_v53, 0.0  ;;  %v1588_v0 = vmax.f32 %v1580_v49, 0.0  ;;  %v1589_v1 = vmax.f32 %v1581_v57, 0.0 }
 0x33c   : > { %v1590_v4 = vmax.f32 %v1582_v59, 0.0  ;;  %v1591_v5 = vmax.f32 %v1583_v60, 0.0  ;;  %v1592_v6 = vmax.f32 %v1584_v45, 0.0  ;;  %v1593_v2 = vmax.f32 %v1585_v61, 0.0 }
 0x33d   : > { %1594 = vst [vmem:[%s273_s18] sm:$0xff] %v1586_v62  ;;  %1595 = vst [vmem:[%s273_s18 + $0x8] sm:$0xff] %v1587_v63 }
 0x33e   : > { %1596 = vst [vmem:[%s273_s18 + $0x10] sm:$0xff] %v1588_v0  ;;  %1597 = vst [vmem:[%s273_s18 + $0x18] sm:$0xff] %v1589_v1 }
 0x33f   : > { %1598 = vst [vmem:[%s273_s18 + $0x20] sm:$0xff] %v1590_v4  ;;  %1599 = vst [vmem:[%s273_s18 + $0x28] sm:$0xff] %v1591_v5 }
 0x340   : > { %1600 = vst [vmem:[%s273_s18 + $0x30] sm:$0xff] %v1592_v6  ;;  %1601 = vst [vmem:[%s273_s18 + $0x38] sm:$0xff] %v1593_v2 }
 0x341 PF: > { %s16_s23 = sadd.s32 1, %s2300_s23   ;;  %s2786_s21 = smov %s2296_s22 }
 0x342   : > { %p13_p5 = scmp.ge.s32.totalorder %s16_s23, 4   ;;  %s2787_s22 = smov %s2789_s24 }
 0x344   :  { %15 = sbr.rel (!%p13_p5) target bundleno = 2 (0x2), region = 78 }

// kernel: transunet_forward.16
= control target key start
LH: loop header
LB: loop body
LE: loop exit
PB: predicated region body
PF: predicated region fallthrough
CT: control target
= control target key end

     0   :  { %s2080_s21 = smov 0   ;;  %s2082_s22 = smov 0   ;;  %s2446_s0 = inlined_call_operand.vmem [shape: f32[2,5,2,5,256], index: 0, kind: input, shape index: {}]   ;;  %s2447_s1 = inlined_call_operand.vmem [shape: bf16[1152,128], index: 1, kind: input, shape index: {}]   ;;  %s2448_s2 = inlined_call_operand.vmem [shape: f32[1,128], index: 2, kind: input, shape index: {}]   ;;  %s2449_s3 = inlined_call_operand.vmem [shape: f32[1,128], index: 3, kind: input, shape index: {}]   ;;  %s2450_s4 = inlined_call_operand.vmem [shape: f32[1,128], index: 4, kind: input, shape index: {}]   ;;  %s2451_s5 = inlined_call_operand.vmem [shape: f32[128,128], index: 5, kind: input, shape index: {}]   ;;  %s2452_s6 = inlined_call_operand.vmem [shape: f32[2,16,128], index: 6, kind: output, shape index: {}]  }
   0x1   :  { %s2084_s23 = smov 0  }
   0x2 LB: > { %s28_s24 = sadd.s32 1, %s2036_s22  ;;  %p1525_p0 = scmp.ge.s32.totalorder %s2040_s23, 1  ;;  %s2040_s23 = sphi %s2084_s23, %s16_s23   ;;  %s2036_s22 = sphi %s2082_s22, %s2454_s22   ;;  %s2032_s21 = sphi %s2080_s21, %s2453_s21  }
   0x3   : > { %p30_p1 = scmp.ge.s32.totalorder %s28_s24, 2  ;;  %p226_p2 = scmp.lt.s32.totalorder %s2040_s23, 3 }
   0x5   : > { %s2456_s24 = smov (%p30_p1, %s28_s24), 0  ;;  %p227_p3 = pnand %p1525_p0, %p226_p2 }
   0x6   : > { %v1944_v0 = vld [vmem:[%s2447_s1 + $0x40] sm:$0xff] (!%p227_p3)   ;;  %v1948_v4 = vld [vmem:[%s2447_s1 + $0x48] sm:$0xff] (!%p227_p3)   ;;  %v1952_v8 = vld [vmem:[%s2447_s1 + $0x50] sm:$0xff] (!%p227_p3)   ;;  %p260_p4 = scmp.lt.s32.totalorder (!%p227_p3), %s2032_s21, 1  ;;  %vm2043_vm0 = vmmov (!%p227_p3), 0  }
   0x7   : > { %230 = sbr.rel (%p227_p3) target bundleno = 805 (0x325), region = 44  ;;  %v1945_v1 = vld [vmem:[%s2447_s1] sm:$0xff] (!%p227_p3)   ;;  %1647 = vmatprep.subr.bf16.mxu0 (!%p227_p3), %v1944_v0  ;;  %v1949_v5 = vld [vmem:[%s2447_s1 + $0x8] sm:$0xff] (!%p227_p3)   ;;  %v1953_v9 = vld [vmem:[%s2447_s1 + $0x10] sm:$0xff] (!%p227_p3)  }
   0x8   : > { %v1946_v2 = vld [vmem:[%s2447_s1 + $0xc0] sm:$0xff] (!%p227_p3)   ;;  %1648 = vmatpush3.bf16.msra.mxu0 (!%p227_p3), %v1945_v1  ;;  %v1950_v6 = vld [vmem:[%s2447_s1 + $0xc8] sm:$0xff] (!%p227_p3)   ;;  %v1954_v10 = vld [vmem:[%s2447_s1 + $0xd0] sm:$0xff] (!%p227_p3)  }
   0x9   : > { %v1947_v3 = vld [vmem:[%s2447_s1 + $0x80] sm:$0xff] (!%p227_p3)   ;;  %1669 = vmatprep.subr.bf16.mxu1 (!%p227_p3), %v1946_v2  ;;  %1649 = vmatprep.subr.bf16.mxu0 (!%p227_p3), %v1948_v4  ;;  %v1951_v7 = vld [vmem:[%s2447_s1 + $0x88] sm:$0xff] (!%p227_p3)   ;;  %v1955_v11 = vld [vmem:[%s2447_s1 + $0x90] sm:$0xff] (!%p227_p3)  }
   0xa   : > { %1670 = vmatpush3.bf16.msra.mxu1 (!%p227_p3), %v1947_v3  ;;  %v1956_v12 = vld [vmem:[%s2447_s1 + $0x58] sm:$0xff] (!%p227_p3)   ;;  %v1960_v16 = vld [vmem:[%s2447_s1 + $0x60] sm:$0xff] (!%p227_p3)   ;;  %v1964_v20 = vld [vmem:[%s2447_s1 + $0x68] sm:$0xff] (!%p227_p3)  }
   0xb   : > { %1671 = vmatprep.subr.bf16.mxu1 (!%p227_p3), %v1950_v6  ;;  %v1957_v13 = vld [vmem:[%s2447_s1 + $0x18] sm:$0xff] (!%p227_p3)   ;;  %v1961_v17 = vld [vmem:[%s2447_s1 + $0x20] sm:$0xff] (!%p227_p3)   ;;  %v1965_v21 = vld [vmem:[%s2447_s1 + $0x28] sm:$0xff] (!%p227_p3)  }
   0xc   : > { %1650 = vmatpush3.bf16.msra.mxu0 (!%p227_p3), %v1949_v5  ;;  %v1958_v14 = vld [vmem:[%s2447_s1 + $0xd8] sm:$0xff] (!%p227_p3)   ;;  %v1962_v18 = vld [vmem:[%s2447_s1 + $0xe0] sm:$0xff] (!%p227_p3)   ;;  %v1966_v22 = vld [vmem:[%s2447_s1 + $0xe8] sm:$0xff] (!%p227_p3)  }
   0xd   : > { %1651 = vmatprep.subr.bf16.mxu0 (!%p227_p3), %v1952_v8  ;;  %v1959_v15 = vld [vmem:[%s2447_s1 + $0x98] sm:$0xff] (!%p227_p3)   ;;  %v1963_v19 = vld [vmem:[%s2447_s1 + $0xa0] sm:$0xff] (!%p227_p3)   ;;  %v1967_v23 = vld [vmem:[%s2447_s1 + $0xa8] sm:$0xff] (!%p227_p3)  }
   0xe   : > { %1672 = vmatpush3.bf16.msra.mxu1 %v1951_v7  ;;  %s2458_s21 = smov (!%p260_p4, %s2032_s21), 1  ;;  %v1968_v24 = vld [vmem:[%s2447_s1 + $0x70] sm:$0xff]   ;;  %v1972_v28 = vld [vmem:[%s2447_s1 + $0x78] sm:$0xff]   ;;  %v1976_v45 = vld [vmem:[%s2447_s1 + $0x140] sm:$0xff]  }
   0xf   : > { %1673 = vmatprep.subr.bf16.mxu1 %v1954_v10  ;;  %s1916_s11 = smul.u32 160, %s2458_s21  ;;  %v1969_v25 = vld [vmem:[%s2447_s1 + $0x30] sm:$0xff]   ;;  %v1973_v29 = vld [vmem:[%s2447_s1 + $0x38] sm:$0xff]   ;;  %v1977_v53 = vld [vmem:[%s2447_s1 + $0x100] sm:$0xff]  }
  0x10   : > { %1652 = vmatpush3.bf16.msra.mxu0 %v1953_v9  ;;  %v1970_v26 = vld [vmem:[%s2447_s1 + $0xf0] sm:$0xff]   ;;  %v1974_v30 = vld [vmem:[%s2447_s1 + $0xf8] sm:$0xff]   ;;  %v1978_v62 = vld [vmem:[%s2447_s1 + $0x1c0] sm:$0xff]  }
  0x11   : > { %1653 = vmatprep.subr.bf16.mxu0 %v1956_v12  ;;  %v1971_v27 = vld [vmem:[%s2447_s1 + $0xb0] sm:$0xff]   ;;  %s2195_s26 = scalar_lea.vmem %s2446_s0, %s1916_s11  ;;  %v1975_v37 = vld [vmem:[%s2447_s1 + $0xb8] sm:$0xff]   ;;  %v1979_v1 = vld [vmem:[%s2447_s1 + $0x180] sm:$0xff]   ;;  %s1646_s11 = sshll.u32 %s2458_s21, 4 }
  0x12   : > { %1674 = vmatpush3.bf16.msra.mxu1 %v1955_v11  ;;  %v284_v31 = vld [vmem:[%s2195_s26 + $0x8] sm:$0xf]  ;;  %v280_v38 = vld [vmem:[%s2195_s26] sm:$0xf]  ;;  %v1529_v46 = vld [vmem:[%s2195_s26 + $0x10] sm:$0xf]  ;;  %s273_s13 = scalar_lea.vmem %s2452_s6, %s1646_s11 }
  0x13   : > { %1675 = vmatprep.subr.bf16.mxu1 %v1958_v14  ;;  %v285_v32 = vld [vmem:[%s2195_s26 + $0x28] sm:$0xf]  ;;  %v281_v39 = vld [vmem:[%s2195_s26 + $0x20] sm:$0xf]  ;;  %v1530_v47 = vld [vmem:[%s2195_s26 + $0x30] sm:$0xf] }
  0x14   : > { %1654 = vmatpush3.bf16.msra.mxu0 %v1957_v13  ;;  %v286_v33 = vld [vmem:[%s2195_s26 + $0x48] sm:$0xf]  ;;  %v1554_v35 = vcombine.low %v284_v31, %v285_v32  ;;  %v282_v40 = vld [vmem:[%s2195_s26 + $0x40] sm:$0xf]  ;;  %v1553_v42 = vcombine.low %v280_v38, %v281_v39  ;;  %v1531_v48 = vld [vmem:[%s2195_s26 + $0x50] sm:$0xf]  ;;  %v1556_v51 = vcombine.low %v1529_v46, %v1530_v47 }
  0x15   : > { %1655 = vmatprep.subr.bf16.mxu0 %v1960_v16  ;;  %v287_v34 = vld [vmem:[%s2195_s26 + $0x68] sm:$0xf]  ;;  %v283_v41 = vld [vmem:[%s2195_s26 + $0x60] sm:$0xf]  ;;  %v1532_v49 = vld [vmem:[%s2195_s26 + $0x70] sm:$0xf] }
  0x16   : > { %1676 = vmatpush3.bf16.msra.mxu1 %v1959_v15  ;;  %v1562_v36 = vcombine.low %v286_v33, %v287_v34  ;;  %v1561_v44 = vcombine.low %v282_v40, %v283_v41  ;;  %v1564_v52 = vcombine.low %v1531_v48, %v1532_v49  ;;  %v288_v54 = vld [vmem:[%s2195_s26] sm:$0x1e]  ;;  %v1980_v3 = vld [vmem:[%s2447_s1 + $0x148] sm:$0xff]   ;;  %v1984_v8 = vld [vmem:[%s2447_s1 + $0x150] sm:$0xff]   ;;  %v2042_v39 = vmov 0.0  }
  0x17   : > { %1677 = vmatprep.subr.bf16.mxu1 %v1962_v18  ;;  %v289_v55 = vld [vmem:[%s2195_s26 + $0x20] sm:$0x1e]  ;;  %v327_v59 = vrot.slane %v288_v54, 1  ;;  %v1981_v4 = vld [vmem:[%s2447_s1 + $0x108] sm:$0xff]   ;;  %v1985_v9 = vld [vmem:[%s2447_s1 + $0x110] sm:$0xff]  }
  0x18   : > { %1656 = vmatpush3.bf16.msra.mxu0 %v1961_v17  ;;  %v424_v43 = vpack.c.bf16 %v1562_v36, %v1554_v35  ;;  %v423_v50 = vpack.c.bf16 %v1561_v44, %v1553_v42  ;;  %v290_v56 = vld [vmem:[%s2195_s26 + $0x40] sm:$0x1e]  ;;  %v426_v57 = vpack.c.bf16 %v1564_v52, %v1556_v51  ;;  %v328_v60 = vrot.slane %v289_v55, 1  ;;  %v1982_v6 = vld [vmem:[%s2447_s1 + $0x1c8] sm:$0xff]   ;;  %v1986_v10 = vld [vmem:[%s2447_s1 + $0x1d0] sm:$0xff]  }
  0x19   : > { %1657 = vmatprep.subr.bf16.mxu0 %v1964_v20  ;;  %v291_v58 = vld [vmem:[%s2195_s26 + $0x60] sm:$0x1e]  ;;  %v329_v61 = vrot.slane %v290_v56, 1  ;;  %v1983_v7 = vld [vmem:[%s2447_s1 + $0x188] sm:$0xff]   ;;  %v1987_v11 = vld [vmem:[%s2447_s1 + $0x190] sm:$0xff]  }
  0x1a   : > { %1678 = vmatpush3.bf16.msra.mxu1 %v1963_v19  ;;  %1047 = vmatprep.mubr.bf16.mxu0 %v424_v43  ;;  %v330_v63 = vrot.slane %v291_v58, 1  ;;  %v1555_v0 = vcombine.low %v327_v59, %v328_v60  ;;  %v1988_v12 = vld [vmem:[%s2447_s1 + $0x158] sm:$0xff]   ;;  %v1992_v16 = vld [vmem:[%s2447_s1 + $0x160] sm:$0xff]   ;;  %v1996_v20 = vld [vmem:[%s2447_s1 + $0x168] sm:$0xff]  }
  0x1b   : > { %1679 = vmatprep.subr.bf16.mxu1 %v1966_v22  ;;  %1088 = vmatprep.mubr.bf16.mxu1 %v426_v57  ;;  %v1989_v13 = vld [vmem:[%s2447_s1 + $0x118] sm:$0xff]   ;;  %v1993_v17 = vld [vmem:[%s2447_s1 + $0x120] sm:$0xff]   ;;  %v1998_v22 = vld [vmem:[%s2447_s1 + $0x1e8] sm:$0xff]  }
  0x1c   : > { %1658 = vmatpush3.bf16.msra.mxu0 %v1965_v21  ;;  %v1563_v2 = vcombine.low %v329_v61, %v330_v63  ;;  %v1990_v14 = vld [vmem:[%s2447_s1 + $0x1d8] sm:$0xff]   ;;  %v1994_v18 = vld [vmem:[%s2447_s1 + $0x1e0] sm:$0xff]   ;;  %v1997_v21 = vld [vmem:[%s2447_s1 + $0x128] sm:$0xff]  }
  0x1d   : > { %1659 = vmatprep.subr.bf16.mxu0 %v1968_v24  ;;  %v1991_v15 = vld [vmem:[%s2447_s1 + $0x198] sm:$0xff]   ;;  %v1995_v19 = vld [vmem:[%s2447_s1 + $0x1a0] sm:$0xff]   ;;  %v2000_v24 = vld [vmem:[%s2447_s1 + $0x170] sm:$0xff]  }
  0x1e   : > { %1680 = vmatpush3.bf16.msra.mxu1 %v1967_v23  ;;  %v425_v5 = vpack.c.bf16 %v1563_v2, %v1555_v0  ;;  %v1999_v23 = vld [vmem:[%s2447_s1 + $0x1a8] sm:$0xff]   ;;  %v1537_v31 = vld [vmem:[%s2195_s26 + $0x10] sm:$0x1e]  ;;  %v2007_v40 = vld [vmem:[%s2447_s1 + $0x1b8] sm:$0xff]  }
  0x1f   : > { %1681 = vmatprep.subr.bf16.mxu1 %v1970_v26  ;;  %v2002_v26 = vld [vmem:[%s2447_s1 + $0x1f0] sm:$0xff]   ;;  %v335_v35 = vrot.slane %v1537_v31, 1  ;;  %v1533_v41 = vld [vmem:[%s2195_s26 + $0x18] sm:$0xf]  ;;  %v1545_v49 = vld [vmem:[%s2195_s26 + $0x28] sm:$0xf] }
  0x20   : > { %1660 = vmatpush3.bf16.msra.mxu0 %v1969_v25  ;;  %v2001_v25 = vld [vmem:[%s2447_s1 + $0x130] sm:$0xff]   ;;  %v1534_v44 = vld [vmem:[%s2195_s26 + $0x38] sm:$0xf]  ;;  %v1547_v51 = vld [vmem:[%s2195_s26 + $0x68] sm:$0xf] }
  0x21   : > { %1661 = vmatprep.subr.bf16.mxu0 %v1972_v28  ;;  %v2004_v28 = vld [vmem:[%s2447_s1 + $0x178] sm:$0xff]   ;;  %v1538_v32 = vld [vmem:[%s2195_s26 + $0x30] sm:$0x1e]  ;;  %v1557_v47 = vcombine.low %v1533_v41, %v1534_v44  ;;  %v2008_v57 = vld [vmem:[%s2447_s1 + $0x200] sm:$0xff]  }
  0x22   : > { %1682 = vmatpush3.bf16.msra.mxu1 %v1971_v27  ;;  %v2003_v27 = vld [vmem:[%s2447_s1 + $0x1b0] sm:$0xff]   ;;  %v336_v36 = vrot.slane %v1538_v32, 1  ;;  %v1536_v46 = vld [vmem:[%s2195_s26 + $0x78] sm:$0xf]  ;;  %v1541_v58 = vld [vmem:[%s2195_s26 + $0x20] sm:$0xf] }
  0x23   : > { %1683 = vmatprep.subr.bf16.mxu1 %v1974_v30  ;;  %v2006_v30 = vld [vmem:[%s2447_s1 + $0x1f8] sm:$0xff]   ;;  %v1539_v33 = vld [vmem:[%s2195_s26 + $0x50] sm:$0x1e]  ;;  %v1542_v59 = vld [vmem:[%s2195_s26 + $0x40] sm:$0xf] }
  0x24   : > { %1662 = vmatpush3.bf16.msra.mxu0 %v1973_v29  ;;  %v2005_v29 = vld [vmem:[%s2447_s1 + $0x138] sm:$0xff]   ;;  %v1540_v34 = vld [vmem:[%s2195_s26 + $0x70] sm:$0x1e]  ;;  %v1558_v42 = vcombine.low %v335_v35, %v336_v36  ;;  %v1543_v60 = vld [vmem:[%s2195_s26 + $0x60] sm:$0xf] }
  0x25   : > { %1691 = vmatprep.subr.bf16.mxu0 %v1976_v45  ;;  %v338_v38 = vrot.slane %v1540_v34, 1  ;;  %v1535_v45 = vld [vmem:[%s2195_s26 + $0x58] sm:$0xf]  ;;  %v1544_v61 = vld [vmem:[%s2195_s26 + $0x80] sm:$0xf]  ;;  %v1236_v34 = vld [vmem:[%s2451_s5 + $0x48] sm:$0xff] }
  0x26   : > { %1684 = vmatpush3.bf16.msra.mxu1 %v1975_v37  ;;  %v337_v37 = vrot.slane %v1539_v33, 1  ;;  %v1565_v48 = vcombine.low %v1535_v45, %v1536_v46  ;;  %v1567_v0 = vcombine.low %v1543_v60, %v1544_v61  ;;  %v1234_v31 = vld [vmem:[%s2451_s5 + $0x38] sm:$0xff]  ;;  %v1235_v33 = vld [vmem:[%s2451_s5 + $0x40] sm:$0xff]  ;;  %v1237_v36 = vld [vmem:[%s2451_s5 + $0x50] sm:$0xff] }
  0x27   : > { %1048 = vmatmul.mubr.bf16.vlgmr.msra.gmra.mrb[0].mxu0 %v423_v50  ;;  %1713 = vmatprep.subr.bf16.mxu1 %v1978_v62  ;;  %v1546_v50 = vld [vmem:[%s2195_s26 + $0x48] sm:$0xf]  ;;  %v1559_v62 = vcombine.low %v1541_v58, %v1542_v59  ;;  %v1881_v35 = vpack.c.bf16 %v1236_v34, %v1235_v33 }
  0x28   : > { %1692 = vmatpush3.bf16.msra.mxu0 %v1977_v53  ;;  %v1566_v43 = vcombine.low %v337_v37, %v338_v38  ;;  %v1548_v53 = vld [vmem:[%s2195_s26 + $0x88] sm:$0xf]  ;;  %v1560_v54 = vcombine.low %v1545_v49, %v1546_v50  ;;  %v427_v55 = vpack.c.bf16 %v1565_v48, %v1557_v47  ;;  %v1238_v37 = vld [vmem:[%s2451_s5 + $0x58] sm:$0xff]  ;;  %v1569_v50 = vld [vmem:[%s2448_s2] ss:$0 sm:$0xff] }
  0x29   : > { %1693 = vmatprep.subr.bf16.mxu0 %v1980_v3  ;;  %1089 = vmatmul.mubr.bf16.vlgmr.msra.gmra.mrb[0].mxu1 %v425_v5  ;;  %v1568_v56 = vcombine.low %v1547_v51, %v1548_v53  ;;  %v429_v2 = vpack.c.bf16 %v1567_v0, %v1559_v62  ;;  %v2010_v3 = vld [vmem:[%s2447_s1 + $0x210] sm:$0xff]   ;;  %v2012_v5 = vld [vmem:[%s2447_s1 + $0x220] sm:$0xff]   ;;  %v1884_v38 = vpack.c.bf16 %v1238_v37, %v1237_v36 }
  0x2a   : > { %1714 = vmatpush3.bf16.msra.mxu1 %v1979_v1  ;;  %v428_v52 = vpack.c.bf16 %v1566_v43, %v1558_v42  ;;  %v2009_v1 = vld [vmem:[%s2447_s1 + $0x208] sm:$0xff]   ;;  %v1241_v42 = vld [vmem:[%s2451_s5 + $0x70] sm:$0xff]  ;;  %v1242_v43 = vld [vmem:[%s2451_s5 + $0x78] sm:$0xff] }
  0x2b   : > { %1715 = vmatprep.subr.bf16.mxu1 %v1982_v6  ;;  %v430_v63 = vpack.c.bf16 %v1568_v56, %v1560_v54  ;;  %v2013_v6 = vld [vmem:[%s2447_s1 + $0x228] sm:$0xff]   ;;  %v1890_v44 = vpack.c.bf16 %v1242_v43, %v1241_v42 }
  0x2c   : > { %1694 = vmatpush3.bf16.msra.mxu0 %v1981_v4  ;;  %1129 = vmatprep.mubr.bf16.mxu0 %v428_v52  ;;  %v2011_v4 = vld [vmem:[%s2447_s1 + $0x218] sm:$0xff]  }
  0x2d   : > { %1695 = vmatprep.subr.bf16.mxu0 %v1984_v8  ;;  %1170 = vmatprep.mubr.bf16.mxu1 %v430_v63  ;;  %v1550_v8 = vld [vmem:[%s2195_s26 + $0x40] sm:$0x1e] }
  0x2e   : > { %1716 = vmatpush3.bf16.msra.mxu1 %v1983_v7  ;;  %v1549_v7 = vld [vmem:[%s2195_s26 + $0x20] sm:$0x1e] }
  0x2f   : > { %1717 = vmatprep.subr.bf16.mxu1 %v1986_v10  ;;  %v1552_v10 = vld [vmem:[%s2195_s26 + $0x80] sm:$0x1e] }
  0x30   : > { %1696 = vmatpush3.bf16.msra.mxu0 %v1985_v9  ;;  %v1551_v9 = vld [vmem:[%s2195_s26 + $0x60] sm:$0x1e] }
  0x31   : > { %1697 = vmatprep.subr.bf16.mxu0 %v1988_v12  ;;  %v344_v12 = vrot.slane %v1550_v8, 1 }
  0x32   : > { %1718 = vmatpush3.bf16.msra.mxu1 %v1987_v11  ;;  %v343_v11 = vrot.slane %v1549_v7, 1 }
  0x33   : > { %1719 = vmatprep.subr.bf16.mxu1 %v1990_v14  ;;  %v346_v14 = vrot.slane %v1552_v10, 1 }
  0x34   : > { %1698 = vmatpush3.bf16.msra.mxu0 %v1989_v13  ;;  %v345_v13 = vrot.slane %v1551_v9, 1 }
  0x35   : > { %1699 = vmatprep.subr.bf16.mxu0 %v1992_v16  ;;  %v395_v16 = vcombine.low %v343_v11, %v344_v12 }
  0x36   : > { %1720 = vmatpush3.bf16.msra.mxu1 %v1991_v15  ;;  %v2014_v15 = vld [vmem:[%s2447_s1 + $0x230] sm:$0xff]  }
  0x37   : > { %1721 = vmatprep.subr.bf16.mxu1 %v1994_v18  ;;  %v2015_v18 = vld [vmem:[%s2447_s1 + $0x238] sm:$0xff]  }
  0x38   : > { %1700 = vmatpush3.bf16.msra.mxu0 %v1993_v17  ;;  %v404_v17 = vcombine.low %v345_v13, %v346_v14 }
  0x39   : > { %1701 = vmatprep.subr.bf16.mxu0 %v1996_v20  ;;  %v1227_v20 = vld [vmem:[%s2451_s5] sm:$0xff] }
  0x3a   : > { %1722 = vmatpush3.bf16.msra.mxu1 %v1995_v19  ;;  %v431_v19 = vpack.c.bf16 %v404_v17, %v395_v16 }
  0x3b   : > { %1723 = vmatprep.subr.bf16.mxu1 %v1998_v22  ;;  %v1229_v22 = vld [vmem:[%s2451_s5 + $0x10] sm:$0xff] }
  0x3c   : > { %1702 = vmatpush3.bf16.msra.mxu0 %v1997_v21  ;;  %v1228_v21 = vld [vmem:[%s2451_s5 + $0x8] sm:$0xff] }
  0x3d   : > { %1703 = vmatprep.subr.bf16.mxu0 %v2000_v24  ;;  %v1869_v24 = vpack.c.bf16 %v1228_v21, %v1227_v20 }
  0x3e   : > { %1724 = vmatpush3.bf16.msra.mxu1 %v1999_v23  ;;  %v2044_v23 = vmov 0.0|0.0  }
  0x3f   : > { %1725 = vmatprep.subr.bf16.mxu1 %v2002_v26 }
  0x40   : > { %1704 = vmatpush3.bf16.msra.mxu0 %v2001_v25  ;;  %v1230_v25 = vld [vmem:[%s2451_s5 + $0x18] sm:$0xff] }
  0x41   : > { %1705 = vmatprep.subr.bf16.mxu0 %v2004_v28  ;;  %v1872_v26 = vpack.c.bf16 %v1230_v25, %v1229_v22  ;;  %v1232_v28 = vld [vmem:[%s2451_s5 + $0x28] sm:$0xff] }
  0x42   : > { %1726 = vmatpush3.bf16.msra.mxu1 %v2003_v27  ;;  %v1231_v27 = vld [vmem:[%s2451_s5 + $0x20] sm:$0xff] }
  0x43   : > { %1727 = vmatprep.subr.bf16.mxu1 %v2006_v30  ;;  %v1233_v30 = vld [vmem:[%s2451_s5 + $0x30] sm:$0xff] }
  0x44   : > { %1706 = vmatpush3.bf16.msra.mxu0 %v2005_v29  ;;  %v1875_v29 = vpack.c.bf16 %v1232_v28, %v1231_v27  ;;  %v1878_v32 = vpack.c.bf16 %v1234_v31, %v1233_v30  ;;  %v1314_v27 = vlaneseq }
  0x45   : > { %1778 = vmatprep.subr.bf16.mxu0 %v2042_v39 }
  0x46   : > { %1728 = vmatpush3.bf16.msra.mxu1 %v2007_v40  ;;  %v1240_v40 = vld [vmem:[%s2451_s5 + $0x68] sm:$0xff]  ;;  %v1315_v28 = vshrl.u32 %v1314_v27, 7 }
  0x47   : > { %1130 = vmatmul.mubr.bf16.vlgmr.msra.gmra.mrb[4].mxu0 %v427_v55  ;;  %1868 = vmatprep.subr.bf16.mxu1 %v2044_v23 }
  0x48   : > { %1779 = vmatpush3.bf16.msra.mxu0 %v2008_v57  ;;  %1794 = vmatprep.mubr.msk.bf16.mxu0 %vm2043_vm0, %v2042_v39 }
  0x49   : > { %1780 = vmatprep.subr.bf16.mxu0 %v2042_v39  ;;  %1171 = vmatmul.mubr.bf16.vlgmr.msra.gmra.mrb[4].mxu1 %v429_v2 }
  0x4a   : > { %1830 = vmatprep.mubr.msk.f32.mxu1 %vm2043_vm0, %v2042_v39  ;;  %1870 = vmatpush3.bf16.msra.mxu1 %v1869_v24 }
  0x4b   : > { %1871 = vmatprep.subr.bf16.mxu1 %v2044_v23 }
  0x4c   : > { %1781 = vmatpush3.bf16.msra.mxu0 %v2009_v1 }
  0x4d   : > { %1782 = vmatprep.subr.bf16.mxu0 %v2042_v39 }
  0x4e   : > { %1873 = vmatpush3.bf16.msra.mxu1 %v1872_v26 }
  0x4f   : > { %1874 = vmatprep.subr.bf16.mxu1 %v2044_v23 }
  0x50   : > { %1783 = vmatpush3.bf16.msra.mxu0 %v2010_v3 }
  0x51   : > { %1784 = vmatprep.subr.bf16.mxu0 %v2042_v39 }
  0x52   : > { %1876 = vmatpush3.bf16.msra.mxu1 %v1875_v29 }
  0x53   : > { %1877 = vmatprep.subr.bf16.mxu1 %v2044_v23 }
  0x54   : > { %1785 = vmatpush3.bf16.msra.mxu0 %v2011_v4 }
  0x55   : > { %1786 = vmatprep.subr.bf16.mxu0 %v2042_v39 }
  0x56   : > { %1879 = vmatpush3.bf16.msra.mxu1 %v1878_v32 }
  0x57   : > { %1880 = vmatprep.subr.bf16.mxu1 %v2044_v23 }
  0x58   : > { %1787 = vmatpush3.bf16.msra.mxu0 %v2012_v5 }
  0x59   : > { %1788 = vmatprep.subr.bf16.mxu0 %v2042_v39 }
  0x5a   : > { %1882 = vmatpush3.bf16.msra.mxu1 %v1881_v35 }
  0x5b   : > { %1883 = vmatprep.subr.bf16.mxu1 %v2044_v23 }
  0x5c   : > { %1789 = vmatpush3.bf16.msra.mxu0 %v2013_v6 }
  0x5d   : > { %1790 = vmatprep.subr.bf16.mxu0 %v2042_v39 }
  0x5e   : > { %1885 = vmatpush3.bf16.msra.mxu1 %v1884_v38 }
  0x5f   : > { %1886 = vmatprep.subr.bf16.mxu1 %v2044_v23 }
  0x60   : > { %1791 = vmatpush3.bf16.msra.mxu0 %v2014_v15 }
  0x61   : > { %1792 = vmatprep.subr.bf16.mxu0 %v2042_v39 }
  0x64   : > { %1793 = vmatpush3.bf16.msra.mxu0 %v2015_v18 }
  0x65   : > { %1892 = vmatprep.subr.bf16.mxu0 %v2044_v23 }
  0x67   : > { %1795 = vmatmul.mubr.bf16.vlgmr.msra.gmra.mrb[8].mxu0 %v431_v19 }
  0x68   : > { %1865 = vmatprep.mubr.msk.f32.mxu0 %vm2043_vm0, %v2042_v39  ;;  %1894 = vmatpush3.bf16.msra.mxu0 %v1869_v24  ;;  %v1239_v39 = vld [vmem:[%s2451_s5 + $0x60] sm:$0xff] }
  0x69   : > { %1895 = vmatprep.subr.bf16.mxu0 %v2044_v23  ;;  %v1887_v41 = vpack.c.bf16 %v1240_v40, %v1239_v39 }
  0x6b   : > { %1888 = vmatpush3.bf16.msra.mxu1 %v1887_v41 }
  0x6c   : > { %1897 = vmatpush3.bf16.msra.mxu0 %v1872_v26  ;;  %1889 = vmatprep.subr.bf16.mxu1 %v2044_v23 }
  0x6d   : > { %1898 = vmatprep.subr.bf16.mxu0 %v2044_v23 }
  0x6f   : > { %1891 = vmatpush3.bf16.msra.mxu1 %v1890_v44 }
  0x70   : > { %1900 = vmatpush3.bf16.msra.mxu0 %v1875_v29  ;;  %v1316_v29 = vsub.s32 0, %v1315_v28 }
  0x71   : > { %1901 = vmatprep.subr.bf16.mxu0 %v2044_v23 }
  0x74   : > { %1903 = vmatpush3.bf16.msra.mxu0 %v1878_v32 }
  0x75   : > { %1904 = vmatprep.subr.bf16.mxu0 %v2044_v23 }
  0x78   : > { %1906 = vmatpush3.bf16.msra.mxu0 %v1881_v35 }
  0x79   : > { %1907 = vmatprep.subr.bf16.mxu0 %v2044_v23 }
  0x7c   : > { %1909 = vmatpush3.bf16.msra.mxu0 %v1884_v38 }
  0x7d   : > { %1910 = vmatprep.subr.bf16.mxu0 %v2044_v23 }
  0x80   : > { %1912 = vmatpush3.bf16.msra.mxu0 %v1887_v41 }
  0x81   : > { %1913 = vmatprep.subr.bf16.mxu0 %v2044_v23 }
  0x84   : > { %1915 = vmatpush3.bf16.msra.mxu0 %v1890_v44 }
  0xfa   : > { %v1663_v45 = vpop.f32.mrb[0].mxu0 }
  0xfb   : > { %v1664_v46 = vpop.f32.mrb[1].mxu0 }
  0xfc   : > { %v1665_v47 = vadd.f32 %v1664_v46, %v1663_v45  ;;  %v1666_v48 = vpop.f32.mrb[2].mxu0  ;;  %v1685_v53 = vpop.f32.mrb[0].mxu1 }
  0xfd   : > { %v1667_v49 = vpop.f32.mrb[3].mxu0  ;;  %v1686_v54 = vpop.f32.mrb[1].mxu1 }
  0xfe   : > { %v1668_v51 = vadd.f32 %v1667_v49, %v1666_v48  ;;  %v1050_v52 = vadd.f32 %v1665_v47, %v1569_v50  ;;  %v1687_v56 = vadd.f32 %v1686_v54, %v1685_v53  ;;  %v1688_v57 = vpop.f32.mrb[2].mxu1  ;;  %v1643_v54 = vld [vmem:[%s2450_s4] ss:$0 sm:$0xff] }
  0xff   : > { %v1689_v58 = vpop.f32.mrb[3].mxu1 }
 0x100   : > { %v1053_v55 = vadd.f32 %v1668_v51, %v1569_v50  ;;  %v1091_v59 = vadd.f32 %v1687_v56, %v1050_v52  ;;  %v1690_v60 = vadd.f32 %v1689_v58, %v1688_v57  ;;  %v1642_v51 = vld [vmem:[%s2449_s3] ss:$0 sm:$0xff] }
 0x102   : > { %v1094_v61 = vadd.f32 %v1690_v60, %v1053_v55 }
 0x11a   : > { %v1707_v62 = vpop.f32.mrb[4].mxu0 }
 0x11b   : > { %v1708_v63 = vpop.f32.mrb[5].mxu0 }
 0x11c   : > { %v1709_v0 = vadd.f32 %v1708_v63, %v1707_v62  ;;  %v1710_v1 = vpop.f32.mrb[6].mxu0  ;;  %v1729_v4 = vpop.f32.mrb[4].mxu1 }
 0x11d   : > { %v1711_v2 = vpop.f32.mrb[7].mxu0  ;;  %v1730_v6 = vpop.f32.mrb[5].mxu1 }
 0x11e   : > { %v1132_v3 = vadd.f32 %v1709_v0, %v1091_v59  ;;  %v1712_v5 = vadd.f32 %v1711_v2, %v1710_v1  ;;  %v1731_v8 = vadd.f32 %v1730_v6, %v1729_v4  ;;  %v1732_v9 = vpop.f32.mrb[6].mxu1 }
 0x11f   : > { %v1733_v10 = vpop.f32.mrb[7].mxu1 }
 0x120   : > { %v1135_v7 = vadd.f32 %v1712_v5, %v1094_v61  ;;  %v1734_v11 = vadd.f32 %v1733_v10, %v1732_v9  ;;  %v1173_v12 = vadd.f32 %v1731_v8, %v1132_v3 }
 0x122   : > { %v1176_v13 = vadd.f32 %v1734_v11, %v1135_v7 }
 0x13a   : > { %v1213_v14 = vpop.f32.mrb[8].mxu0 }
 0x13b   : > { %v1214_v15 = vadd.f32 %v1213_v14, %v1173_v12  ;;  %v1796_v16 = vpop.f32.mrb[9].mxu0 }
 0x13c   : > { %v1216_v17 = vpop.f32.mrb[10].mxu0 }
 0x13d   : > { %v1217_v18 = vadd.f32 %v1216_v17, %v1176_v13  ;;  %v1797_v19 = vpop.f32.mrb[11].mxu0 }
 0x13f   : > { %v1220_v20 = vadd.f32 %v1217_v18, %v1214_v15 }
 0x141   : > { %v1221_v21 = vrot.slane %v1220_v20, 4 }
 0x143   : > { %v1222_v22 = vadd.f32 %v1221_v21, %v1220_v20 }
 0x145   : > { %v1223_v23 = vrot.slane %v1222_v22, 2 }
 0x147   : > { %v1224_v24 = vadd.f32 %v1223_v23, %v1222_v22 }
 0x149   : > { %v1225_v25 = vrot.slane %v1224_v24, 1 }
 0x14b   : > { %v1226_v26 = vadd.f32 %v1225_v25, %v1224_v24 }
 0x14d   : > { %1831 = vmatmul.mubr.f32.vlgmr.msra.gmra.mrb[8].mxu1 %v1226_v26 }
 0x220   : > { %v1309_v30 = vpop.f32.mrb[8].mxu1 }
 0x221   : > { %v1313_v31 = vmul.f32 0.0625, %v1309_v30  ;;  %v1832_v32 = vpop.f32.mrb[9].mxu1 }
 0x223   : > { %v1317_v33 = vrot.slane %v1313_v31, %v1316_v29 }
 0x225   : > { %v1318_v34 = vsub.f32 %v1214_v15, %v1317_v33  ;;  %v1319_v35 = vsub.f32 %v1217_v18, %v1317_v33 }
 0x227   : > { %v1320_v36 = vmul.f32 %v1318_v34, %v1318_v34  ;;  %v1321_v37 = vmul.f32 %v1319_v35, %v1319_v35 }
 0x229   : > { %v1322_v38 = vadd.f32 %v1321_v37, %v1320_v36 }
 0x22b   : > { %v1323_v39 = vrot.slane %v1322_v38, 4 }
 0x22d   : > { %v1324_v40 = vadd.f32 %v1323_v39, %v1322_v38 }
 0x22f   : > { %v1325_v41 = vrot.slane %v1324_v40, 2 }
 0x231   : > { %v1326_v42 = vadd.f32 %v1325_v41, %v1324_v40 }
 0x233   : > { %v1327_v43 = vrot.slane %v1326_v42, 1 }
 0x235   : > { %v1328_v44 = vadd.f32 %v1327_v43, %v1326_v42 }
 0x237   : > { %1866 = vmatmul.mubr.f32.vlgmr.msra.gmra.mrb[12].mxu0 %v1328_v44 }
 0x30a   : > { %v1395_v45 = vpop.f32.mrb[12].mxu0 }
 0x30b   : > { %v1399_v46 = vmul.f32 0.0625, %v1395_v45  ;;  %v1867_v47 = vpop.f32.mrb[13].mxu0 }
 0x30d   : > { %v1400_v48 = vadd.f32 1e-05, %v1399_v46 }
 0x30f   : > { %2016 = vrsqrt.f32 %v1400_v48 }
 0x319   : > { %v2017_v49 = vpop.eup %2016 }
 0x31a   : > { %v1405_v50 = vrot.slane %v2017_v49, %v1316_v29 }
 0x31c   : > { %v1406_v52 = vmul.f32 %v1405_v50, %v1318_v34  ;;  %v1407_v53 = vmul.f32 %v1405_v50, %v1319_v35 }
 0x31e   : > { %v1415_v55 = vmul.f32 %v1642_v51, %v1406_v52  ;;  %v1416_v56 = vmul.f32 %v1642_v51, %v1407_v53 }
 0x320   : > { %v1424_v57 = vadd.f32 %v1643_v54, %v1415_v55  ;;  %v1425_v58 = vadd.f32 %v1643_v54, %v1416_v56 }
 0x322   : > { %v1426_v59 = vmax.f32 %v1424_v57, 0.0  ;;  %v1427_v60 = vmax.f32 %v1425_v58, 0.0 }
 0x324   : > { %1428 = vst [vmem:[%s273_s13] sm:$0xff] %v1426_v59  ;;  %1429 = vst [vmem:[%s273_s13 + $0x8] sm:$0xff] %v1427_v60 }
 0x325 PF: > { %s16_s23 = sadd.s32 1, %s2040_s23   ;;  %s2453_s21 = smov %s2036_s22 }
 0x326   : > { %p13_p5 = scmp.ge.s32.totalorder %s16_s23, 4   ;;  %s2454_s22 = smov %s2456_s24 }
 0x328   :  { %15 = sbr.rel (!%p13_p5) target bundleno = 2 (0x2), region = 77 }

// kernel: transunet_forward.17
= control target key start
LH: loop header
LB: loop body
LE: loop exit
PB: predicated region body
PF: predicated region fallthrough
CT: control target
= control target key end

     0   :  { %s1319_s24 = smov 0   ;;  %s1321_s25 = smov 0   ;;  %s1497_s0 = inlined_call_operand.vmem [shape: f32[2,16,128], index: 0, kind: input, shape index: {}]   ;;  %s1498_s1 = inlined_call_operand.vmem [shape: f32[1,128], index: 1, kind: input, shape index: {}]   ;;  %s1499_s2 = inlined_call_operand.vmem [shape: f32[1,128], index: 2, kind: input, shape index: {}]   ;;  %s1500_s3 = inlined_call_operand.vmem [shape: bf16[2,128,384], index: 3, kind: input, shape index: {}]   ;;  %s1501_s4 = inlined_call_operand.vmem [shape: f32[2,1,384], index: 4, kind: input, shape index: {}]   ;;  %s1502_s5 = inlined_call_operand.vmem [shape: bf16[2,128,128], index: 5, kind: input, shape index: {}]   ;;  %s1503_s6 = inlined_call_operand.vmem [shape: f32[1,128], index: 6, kind: input, shape index: {}]   ;;  %s1504_s7 = inlined_call_operand.vmem [shape: f32[2,16,128], index: 7, kind: output, shape index: {}]  }
   0x1   :  { %s1323_s26 = smov 0   ;;  %s1325_s27 = smov 0  }
   0x2   :  { %s1327_s28 = smov 0  }
   0x3 LB: > { %s26_s29 = sadd.s32 1, %s1266_s26  ;;  %s29_s30 = sadd.s32 1, %s1270_s27  ;;  %s1274_s28 = sphi %s1327_s28, %s17_s28   ;;  %s1270_s27 = sphi %s1325_s27, %s1508_s27   ;;  %s1266_s26 = sphi %s1323_s26, %s1507_s26   ;;  %s1262_s25 = sphi %s1321_s25, %s1506_s25   ;;  %s1258_s24 = sphi %s1319_s24, %s1505_s24  }
   0x4   : > { %p27_p0 = scmp.ge.s32.totalorder %s26_s29, 2  ;;  %p1013_p1 = scmp.ge.s32.totalorder %s1274_s28, 1 }
   0x5   : > { %p278_p2 = scmp.lt.s32.totalorder %s1274_s28, 5 }
   0x6   : > { %s1510_s29 = smov (%p27_p0, %s26_s29), 0  ;;  %s1512_s30 = smov (!%p27_p0, %s29_s30), %s1270_s27 }
   0x7   : > { %p279_p3 = pnand %p1013_p1, %p278_p2  ;;  %p31_p4 = scmp.ge.s32.totalorder %s1512_s30, 2 }
   0x8   : > { %p324_p5 = scmp.lt.s32.totalorder (!%p279_p3), %s1262_s25, 1  ;;  %v1276_v2 = vmov (!%p279_p3), 0.0   ;;  %p329_p6 = scmp.lt.s32.totalorder (!%p279_p3), %s1258_s24, 1  ;;  %v351_v7 = vlaneseq (!%p279_p3)  ;;  %v1277_v35 = vmov (!%p279_p3), 0   ;;  %vm1278_vm1 = vmmov (!%p279_p3), 0  }
   0x9   : > { %s1514_s30 = smov (%p31_p4, %s1512_s30), 0  ;;  %282 = sbr.rel (%p279_p3) target bundleno = 1540 (0x604), region = 48 }
   0xa   : > { %1087 = vmatprep.subr.bf16.mxu1 (!%p279_p3), %v1276_v2  ;;  %v352_v8 = vand.u32 (!%p279_p3), 127, %v351_v7  ;;  %608 = vmatprep.mubr.bf16.mxu0 (!%p279_p3), %v1277_v35  ;;  %v1022_v49 = vld [vmem:[%s1498_s1] ss:$0 sm:$0xff] (!%p279_p3)  ;;  %v434_v58 = vshrl.u32 (!%p279_p3), %v351_v7, 7  ;;  %vm705_vm2 = vcmask (!%p279_p3), 130048   ;;  %p1057_p7 = scmp.ne.s32.totalorder (!%p279_p3), %s1258_s24, 0 }
   0xb   : > { %1103 = vmatprep.mubr.msk.bf16.mxu1 (!%p279_p3), %vm1278_vm1, %v1276_v2  ;;  %v1023_v53 = vld [vmem:[%s1499_s2] ss:$0 sm:$0xff] (!%p279_p3) }
   0xc   : > { %vm353_vm0 = vcmp.lt.s32.totalorder (!%p279_p3), %v352_v8, 16  ;;  %v435_v59 = vsub.s32 (!%p279_p3), 0, %v434_v58  ;;  %v443_v60 = vsub.s32 (!%p279_p3), 2, %v434_v58  ;;  %v439_v62 = vsub.s32 (!%p279_p3), 1, %v434_v58 }
   0xd   : > { %v1021_v11 = vsel (!%p279_p3), %vm353_vm0, 1.0, %v1276_v2 }
  0x10   : > { %s1516_s25 = smov (!%p324_p5, %s1262_s25), 1 }
  0x11   : > { %s1062_s8 = sshll.u32 %s1516_s25, 4 }
  0x12   : > { %s328_s11 = scalar_lea.vmem %s1497_s0, %s1062_s8  ;;  %s1357_s14 = scalar_lea.vmem %s1504_s7, %s1062_s8 }
  0x13   : > { %v1359_v0 = vld [vmem:[%s328_s11] sm:$0xff]  ;;  %v1362_v1 = vld [vmem:[%s328_s11 + $0x8] sm:$0xff]  ;;  %s1368_s15 = scalar_select %p329_p6, %s1258_s24, 1 }
  0x14   : > { %356 = vadd.xlane.f32.xlu0 %v1359_v0 }
  0x15   : > { %s1139_s16 = smul.u32 192, %s1368_s15  ;;  %s1063_s11 = sshll.u32 %s1368_s15, 6 }
  0x16   : > { %s1140_s25 = smul.u32 3, %s1368_s15 }
  0x17   : > { %s1374_s19 = scalar_lea.vmem %s1500_s3, %s1139_s16  ;;  %s1451_s16 = scalar_lea.vmem %s1502_s5, %s1063_s11 }
  0x18   : > { %358 = vadd.xlane.f32.xlu0 %v1362_v1  ;;  %v1184_v3 = vld [vmem:[%s1374_s19 + $0x4] ss:$12 sps:$4 sm:$0xff]   ;;  %v1186_v4 = vld [vmem:[%s1374_s19] ss:$12 sps:$4 sm:$0xff]   ;;  %v1187_v5 = vld [vmem:[%s1374_s19 + $0x8] ss:$12 sps:$4 sm:$0xff]   ;;  %s337_s10 = scalar_lea.vmem %s1501_s4, %s1140_s25 }
  0x19   : > { %576 = vmatprep.subr.bf16.mxu0 %v1184_v3  ;;  %v1188_v6 = vld [vmem:[%s1374_s19 + $0x1c] ss:$12 sps:$4 sm:$0xff]   ;;  %1088 = vmatpush3.bf16.msra.mxu1 %v1187_v5  ;;  %v1190_v20 = vld [vmem:[%s1374_s19 + $0x18] ss:$12 sps:$4 sm:$0xff]   ;;  %v1191_v21 = vld [vmem:[%s1374_s19 + $0x20] ss:$12 sps:$4 sm:$0xff]  }
  0x1a   : > { %577 = vmatpush1.bf16.msra.mxu0 %v1186_v4  ;;  %1089 = vmatprep.subr.bf16.mxu1 %v1276_v2  ;;  %v1192_v22 = vld [vmem:[%s1374_s19 + $0x34] ss:$12 sps:$4 sm:$0xff]   ;;  %v1194_v23 = vld [vmem:[%s1374_s19 + $0x30] ss:$12 sps:$4 sm:$0xff]   ;;  %v1195_v24 = vld [vmem:[%s1374_s19 + $0x38] ss:$12 sps:$4 sm:$0xff]  }
  0x1b   : > { %578 = vmatprep.subr.bf16.mxu0 %v1188_v6  ;;  %v1196_v25 = vld [vmem:[%s1374_s19 + $0x4c] ss:$12 sps:$4 sm:$0xff]   ;;  %v1198_v26 = vld [vmem:[%s1374_s19 + $0x48] ss:$12 sps:$4 sm:$0xff]   ;;  %v1199_v27 = vld [vmem:[%s1374_s19 + $0x50] ss:$12 sps:$4 sm:$0xff]  }
  0x1c   : > { %v1200_v28 = vld [vmem:[%s1374_s19 + $0x64] ss:$12 sps:$4 sm:$0xff]   ;;  %v1202_v29 = vld [vmem:[%s1374_s19 + $0x60] ss:$12 sps:$4 sm:$0xff]   ;;  %v1203_v30 = vld [vmem:[%s1374_s19 + $0x68] ss:$12 sps:$4 sm:$0xff]  }
  0x1d   : > { %1090 = vmatpush3.bf16.msra.mxu1 %v1191_v21  ;;  %v1204_v31 = vld [vmem:[%s1374_s19 + $0x7c] ss:$12 sps:$4 sm:$0xff]   ;;  %v1206_v32 = vld [vmem:[%s1374_s19 + $0x78] ss:$12 sps:$4 sm:$0xff]   ;;  %v1207_v33 = vld [vmem:[%s1374_s19 + $0x80] ss:$12 sps:$4 sm:$0xff]  }
  0x1e   : > { %579 = vmatpush1.bf16.msra.mxu0 %v1190_v20  ;;  %1091 = vmatprep.subr.bf16.mxu1 %v1276_v2  ;;  %v1208_v34 = vld [vmem:[%s1374_s19 + $0x94] ss:$12 sps:$4 sm:$0xff]   ;;  %v1210_v36 = vld [vmem:[%s1374_s19 + $0x90] ss:$12 sps:$4 sm:$0xff]   ;;  %v1211_v37 = vld [vmem:[%s1374_s19 + $0x98] ss:$12 sps:$4 sm:$0xff]  }
  0x1f   : > { %580 = vmatprep.subr.bf16.mxu0 %v1192_v22  ;;  %v1212_v38 = vld [vmem:[%s1374_s19 + $0xac] ss:$12 sps:$4 sm:$0xff]   ;;  %v1214_v39 = vld [vmem:[%s1374_s19 + $0xa8] ss:$12 sps:$4 sm:$0xff]   ;;  %v1215_v40 = vld [vmem:[%s1374_s19 + $0xb0] ss:$12 sps:$4 sm:$0xff]  }
  0x20   : > { %v431_v61 = vld [vmem:[%s337_s10] sm:$0x7] }
  0x21   : > { %1092 = vmatpush3.bf16.msra.mxu1 %v1195_v24  ;;  %v436_v63 = vrot.slane %v431_v61, %v435_v59  ;;  %v444_v3 = vrot.slane %v431_v61, %v443_v60  ;;  %v440_v4 = vrot.slane %v431_v61, %v439_v62 }
  0x22   : > { %581 = vmatpush1.bf16.msra.mxu0 %v1194_v23  ;;  %1093 = vmatprep.subr.bf16.mxu1 %v1276_v2 }
  0x23   : > { %582 = vmatprep.subr.bf16.mxu0 %v1196_v25 }
  0x25   : > { %1094 = vmatpush3.bf16.msra.mxu1 %v1199_v27 }
  0x26   : > { %583 = vmatpush1.bf16.msra.mxu0 %v1198_v26  ;;  %1095 = vmatprep.subr.bf16.mxu1 %v1276_v2 }
  0x27   : > { %584 = vmatprep.subr.bf16.mxu0 %v1200_v28 }
  0x29   : > { %1096 = vmatpush3.bf16.msra.mxu1 %v1203_v30 }
  0x2a   : > { %585 = vmatpush1.bf16.msra.mxu0 %v1202_v29  ;;  %1097 = vmatprep.subr.bf16.mxu1 %v1276_v2 }
  0x2b   : > { %586 = vmatprep.subr.bf16.mxu0 %v1204_v31 }
  0x2d   : > { %1098 = vmatpush3.bf16.msra.mxu1 %v1207_v33 }
  0x2e   : > { %587 = vmatpush1.bf16.msra.mxu0 %v1206_v32  ;;  %1099 = vmatprep.subr.bf16.mxu1 %v1276_v2 }
  0x2f   : > { %588 = vmatprep.subr.bf16.mxu0 %v1208_v34 }
  0x31   : > { %1100 = vmatpush3.bf16.msra.mxu1 %v1211_v37 }
  0x32   : > { %589 = vmatpush1.bf16.msra.mxu0 %v1210_v36  ;;  %1101 = vmatprep.subr.bf16.mxu1 %v1276_v2 }
  0x33   : > { %590 = vmatprep.subr.bf16.mxu0 %v1212_v38 }
  0x35   : > { %1102 = vmatpush3.bf16.msra.mxu1 %v1215_v40  ;;  %v1216_v40 = vld [vmem:[%s1451_s16] sm:$0xff]  }
  0x36   : > { %591 = vmatpush1.bf16.msra.mxu0 %v1214_v39  ;;  %1107 = vmatprep.subr.bf16.mxu1 %v1276_v2 }
  0x37   : > { %1119 = vmatprep.subr.bf16.mxu0 %v1276_v2 }
  0xa1   : > { %v357_v9 = vpop.xlane.xlu0 %356 }
  0xa2   : > { %v360_v10 = vmul.f32 0.0625, %v357_v9 }
  0xa4   : > { %v362_v12 = vsub.f32 %v1359_v0, %v360_v10 }
  0xa5   : > { %v359_v13 = vpop.xlane.xlu0 %358 }
  0xa6   : > { %v361_v14 = vmul.f32 0.0625, %v359_v13  ;;  %v1384_v15 = vmul.f32 %v1021_v11, %v362_v12 }
  0xa8   : > { %v363_v16 = vsub.f32 %v1362_v1, %v361_v14  ;;  %v366_v17 = vmul.f32 %v1384_v15, %v1384_v15 }
  0xaa   : > { %368 = vadd.xlane.f32.xlu1 %v366_v17  ;;  %v1389_v18 = vmul.f32 %v1021_v11, %v363_v16 }
  0xac   : > { %v367_v19 = vmul.f32 %v1389_v18, %v1389_v18 }
  0xae   : > { %370 = vadd.xlane.f32.xlu1 %v367_v19 }
 0x137   : > { %v369_v41 = vpop.xlane.xlu1 %368 }
 0x138   : > { %v372_v42 = vmul.f32 0.0625, %v369_v41  ;;  %v1217_v41 = vld [vmem:[%s1451_s16 + $0x8] sm:$0xff]  }
 0x13a   : > { %v374_v43 = vadd.f32 1e-05, %v372_v42  ;;  %v1218_v42 = vld [vmem:[%s1451_s16 + $0x10] sm:$0xff]  }
 0x13b   : > { %v371_v44 = vpop.xlane.xlu1 %370 }
 0x13c   : > { %1224 = vrsqrt.f32 %v374_v43  ;;  %v373_v45 = vmul.f32 0.0625, %v371_v44  ;;  %v1219_v43 = vld [vmem:[%s1451_s16 + $0x18] sm:$0xff]   ;;  %v1220_v44 = vld [vmem:[%s1451_s16 + $0x20] sm:$0xff]  }
 0x13e   : > { %v375_v46 = vadd.f32 1e-05, %v373_v45  ;;  %v1221_v45 = vld [vmem:[%s1451_s16 + $0x28] sm:$0xff]  }
 0x140   : > { %1226 = vrsqrt.f32 %v375_v46  ;;  %v1222_v46 = vld [vmem:[%s1451_s16 + $0x30] sm:$0xff]  }
 0x146   : > { %v1225_v47 = vpop.eup %1224 }
 0x147   : > { %v378_v48 = vmul.f32 %v1225_v47, %v1384_v15 }
 0x149   : > { %v387_v52 = vmul.f32 %v1022_v49, %v378_v48 }
 0x14a   : > { %v1227_v50 = vpop.eup %1226 }
 0x14b   : > { %v379_v51 = vmul.f32 %v1227_v50, %v1389_v18  ;;  %v396_v55 = vadd.f32 %v1023_v53, %v387_v52 }
 0x14d   : > { %v388_v54 = vmul.f32 %v1022_v49, %v379_v51 }
 0x14f   : > { %v397_v56 = vadd.f32 %v1023_v53, %v388_v54  ;;  %v1223_v54 = vld [vmem:[%s1451_s16 + $0x38] sm:$0xff]  }
 0x151   : > { %v398_v57 = vpack.c.bf16 %v397_v56, %v396_v55 }
 0x153   : > { %609 = vmatmul.mubr.bf16.vlgmr.msra.gmra.mrb[0].mxu0 %v398_v57  ;;  %1104 = vmatmul.mubr.bf16.vlgmr.msra.gmra.mrb[0].mxu1 %v398_v57 }
 0x154   : > { %1109 = vmatprep.mubr.msk.bf16.mxu1 %vm1278_vm1, %v1276_v2  ;;  %1135 = vmatprep.mubr.msk.bf16.mxu0 %vm1278_vm1, %v1276_v2 }
 0x155   : > { %1120 = vmatpush3.bf16.msra.mxu0 %v1216_v40 }
 0x156   : > { %1121 = vmatprep.subr.bf16.mxu0 %v1276_v2 }
 0x159   : > { %1122 = vmatpush3.bf16.msra.mxu0 %v1217_v41 }
 0x15a   : > { %1123 = vmatprep.subr.bf16.mxu0 %v1276_v2 }
 0x15d   : > { %1124 = vmatpush3.bf16.msra.mxu0 %v1218_v42 }
 0x15e   : > { %1125 = vmatprep.subr.bf16.mxu0 %v1276_v2 }
 0x161   : > { %1126 = vmatpush3.bf16.msra.mxu0 %v1219_v43 }
 0x162   : > { %1127 = vmatprep.subr.bf16.mxu0 %v1276_v2 }
 0x165   : > { %1128 = vmatpush3.bf16.msra.mxu0 %v1220_v44 }
 0x166   : > { %1129 = vmatprep.subr.bf16.mxu0 %v1276_v2 }
 0x169   : > { %1130 = vmatpush3.bf16.msra.mxu0 %v1221_v45 }
 0x16a   : > { %1131 = vmatprep.subr.bf16.mxu0 %v1276_v2 }
 0x16d   : > { %1132 = vmatpush3.bf16.msra.mxu0 %v1222_v46 }
 0x16e   : > { %1133 = vmatprep.subr.bf16.mxu0 %v1276_v2 }
 0x171   : > { %1134 = vmatpush3.bf16.msra.mxu0 %v1223_v54 }
 0x226   : > { %v610_v5 = vpop.f32.mrb[0].mxu0  ;;  %v653_v6 = vpop.f32.mrb[0].mxu1 }
 0x227   : > { %v611_v8 = vadd.f32 %v610_v5, %v436_v63  ;;  %v654_v9 = vadd.f32 %v653_v6, %v444_v3  ;;  %v612_v10 = vpop.f32.mrb[1].mxu0  ;;  %v1105_v11 = vpop.f32.mrb[1].mxu1 }
 0x228   : > { %v613_v12 = vadd.f32 %v612_v10, %v440_v4  ;;  %v614_v13 = vpop.f32.mrb[2].mxu0  ;;  %v656_v7 = vpop.f32.mrb[2].mxu1 }
 0x229   : > { %v615_v14 = vadd.f32 %v614_v13, %v436_v63  ;;  %v657_v15 = vadd.f32 %v656_v7, %v444_v3  ;;  %v616_v16 = vpop.f32.mrb[3].mxu0  ;;  %v1106_v17 = vpop.f32.mrb[3].mxu1  ;;  %v1058_v63 = vld [vmem:[%s1503_s6] ss:$0 sm:$0xff] (!%p1057_p7) }
 0x22a   : > { %v617_v18 = vadd.f32 %v616_v16, %v440_v4  ;;  %v891_v3 = vadd.f32 (!%p1057_p7), %v1058_v63, %v1359_v0  ;;  %v892_v4 = vadd.f32 (!%p1057_p7), %v1058_v63, %v1362_v1 }
 0x22b   : > { %v660_v19 = vpack.c.bf16 %v615_v14, %v611_v8  ;;  %v729_v20 = vpack.c.bf16 %v657_v15, %v654_v9 }
 0x22c   : > { %v661_v21 = vpack.c.bf16 %v617_v18, %v613_v12 }
 0x22e   : > { %1108 = vmatpush3.bf16.xpose.msra.mxu1 %v661_v21 }
 0x22f   : > { %1113 = vmatprep.subr.bf16.mxu1 %v1276_v2 }
 0x235   : > { %1110 = vmatmul.mubr.bf16.vlgmr.msra.gmra.mrb[4].mxu1 %v660_v19 }
 0x236   : > { %1114 = vmatpush3.bf16.msra.mxu1 %v729_v20  ;;  %1115 = vmatprep.mubr.msk.bf16.mxu1 %vm1278_vm1, %v1276_v2 }
 0x308   : > { %v696_v22 = vpop.f32.mrb[4].mxu1 }
 0x309   : > { %v703_v23 = vmul.f32 0.35355338, %v696_v22  ;;  %v1111_v24 = vpop.f32.mrb[5].mxu1 }
 0x30a   : > { %v699_v25 = vpop.f32.mrb[6].mxu1 }
 0x30b   : > { %v704_v26 = vmul.f32 0.35355338, %v699_v25  ;;  %v1112_v27 = vpop.f32.mrb[7].mxu1  ;;  %v706_v28 = vsel %vm705_vm2, %v703_v23, -inf }
 0x30c   : > { %707 = vmax.xlane.f32.xlu0 %v706_v28 }
 0x30d   : > { %v709_v29 = vsel %vm705_vm2, %v704_v26, -inf }
 0x30e   : > { %710 = vmax.xlane.f32.xlu1 %v709_v29 }
 0x399   : > { %v708_v30 = vpop.xlane.xlu0 %707 }
 0x39a   : > { %v712_v31 = vsub.f32 %v703_v23, %v708_v30 }
 0x39b   : > { %v711_v32 = vpop.xlane.xlu1 %710 }
 0x39c   : > { %v714_v33 = vmul.f32 1.442695, %v712_v31  ;;  %v713_v34 = vsub.f32 %v704_v26, %v711_v32 }
 0x39e   : > { %1228 = vpow2.f32 %v714_v33  ;;  %v716_v35 = vmul.f32 1.442695, %v713_v34 }
 0x3a0   : > { %1230 = vpow2.f32 %v716_v35 }
 0x3a8   : > { %v1229_v36 = vpop.eup %1228 }
 0x3a9   : > { %v718_v37 = vsel %vm705_vm2, %v1229_v36, 0.0 }
 0x3aa   : > { %v1231_v38 = vpop.eup %1230  ;;  %719 = vadd.xlane.f32.xlu0 %v718_v37 }
 0x3ab   : > { %v721_v39 = vsel %vm705_vm2, %v1231_v38, 0.0 }
 0x3ac   : > { %722 = vadd.xlane.f32.xlu1 %v721_v39 }
 0x437   : > { %v720_v47 = vpop.xlane.xlu0 %719 }
 0x438   : > { %1232 = vrcp.f32 %v720_v47 }
 0x439   : > { %v723_v48 = vpop.xlane.xlu1 %722 }
 0x43a   : > { %1234 = vrcp.f32 %v723_v48 }
 0x442   : > { %v1233_v49 = vpop.eup %1232 }
 0x443   : > { %v725_v51 = vmul.f32 %v1233_v49, %v1229_v36 }
 0x444   : > { %v1235_v50 = vpop.eup %1234 }
 0x445   : > { %v727_v52 = vmul.f32 %v1235_v50, %v1231_v38 }
 0x447   : > { %v728_v53 = vpack.c.bf16 %v727_v52, %v725_v51 }
 0x449   : > { %1116 = vmatmul.mubr.msk.bf16.vlgmr.msra.gmra.mrb[8].mxu1 %vm705_vm2, %v728_v53 }
 0x51c   : > { %v767_v55 = vpop.f32.mrb[8].mxu1 }
 0x51d   : > { %v1117_v56 = vpop.f32.mrb[9].mxu1 }
 0x51e   : > { %v770_v57 = vpop.f32.mrb[10].mxu1 }
 0x51f   : > { %v774_v58 = vpack.c.bf16 %v770_v57, %v767_v55  ;;  %v1118_v59 = vpop.f32.mrb[11].mxu1 }
 0x521   : > { %1136 = vmatmul.mubr.bf16.vlgmr.msra.gmra.mrb[4].mxu0 %v774_v58 }
 0x5f1   : > { %883 = sbr.rel (%p1057_p7) target bundleno = 1530 (0x5fa), region = 52 }
 0x5f4   : > { %v873_v2 = vpop.f32.mrb[4].mxu0 }
 0x5f5   : > { %v1137_v60 = vpop.f32.mrb[5].mxu0  ;;  %v893_v5 = vadd.f32 (!%p1057_p7), %v891_v3, %v873_v2 }
 0x5f6   : > { %v876_v61 = vpop.f32.mrb[6].mxu0 }
 0x5f7   : > { %v1138_v62 = vpop.f32.mrb[7].mxu0  ;;  %v894_v6 = vadd.f32 (!%p1057_p7), %v892_v4, %v876_v61  ;;  %895 = vst [vmem:[%s1357_s14] sm:$0xff] (!%p1057_p7), %v893_v5 }
 0x5f9   : > { %896 = vst [vmem:[%s1357_s14 + $0x8] sm:$0xff] %v894_v6 }
 0x5fa PF: > { %p1059_p8 = scmp.le.s32.totalorder %s1258_s24, 0 }
 0x5fc   : > { %900 = sbr.rel (%p1059_p8) target bundleno = 1540 (0x604), region = 56 }
 0x600   : > { %v901_v8 = vld [vmem:[%s1357_s14] sm:$0xff] (!%p1059_p8)  ;;  %v902_v9 = vld [vmem:[%s1357_s14 + $0x8] sm:$0xff] (!%p1059_p8) }
 0x601   : > { %v903_v10 = vadd.f32 (!%p1059_p8), %v901_v8, %v873_v2  ;;  %v904_v11 = vadd.f32 (!%p1059_p8), %v902_v9, %v876_v61 }
 0x603   : > { %905 = vst [vmem:[%s1357_s14] sm:$0xff] %v903_v10  ;;  %906 = vst [vmem:[%s1357_s14 + $0x8] sm:$0xff] %v904_v11 }
 0x604 PF: > { %s17_s28 = sadd.s32 1, %s1274_s28   ;;  %s1505_s24 = smov %s1266_s26 }
 0x605   : > { %p14_p9 = scmp.ge.s32.totalorder %s17_s28, 6   ;;  %s1506_s25 = smov %s1270_s27 }
 0x606   : > { %s1507_s26 = smov %s1510_s29  ;;  %s1508_s27 = smov %s1514_s30 }
 0x607   :  { %16 = sbr.rel (!%p14_p9) target bundleno = 3 (0x3), region = 95 }

// kernel: transunet_forward.18
= control target key start
LH: loop header
LB: loop body
LE: loop exit
PB: predicated region body
PF: predicated region fallthrough
CT: control target
= control target key end

     0   :  { %s810_s24 = smov 0   ;;  %s923_s0 = inlined_call_operand.vmem [shape: f32[32,128], index: 0, kind: input, shape index: {}]   ;;  %s924_s1 = inlined_call_operand.vmem [shape: f32[1,128], index: 1, kind: input, shape index: {}]   ;;  %s925_s2 = inlined_call_operand.vmem [shape: f32[1,128], index: 2, kind: input, shape index: {}]   ;;  %s926_s3 = inlined_call_operand.vmem [shape: bf16[128,128], index: 3, kind: input, shape index: {}]   ;;  %s927_s4 = inlined_call_operand.vmem [shape: f32[1,128], index: 4, kind: input, shape index: {}]   ;;  %s928_s5 = inlined_call_operand.vmem [shape: bf16[128,128], index: 5, kind: input, shape index: {}]   ;;  %s929_s6 = inlined_call_operand.vmem [shape: f32[1,128], index: 6, kind: input, shape index: {}]   ;;  %s930_s7 = inlined_call_operand.vmem [shape: f32[32,128], index: 7, kind: output, shape index: {}]  }
   0x1 LB: > { %s636_s25 = sadd.s32 4294967295, %s766_s24   ;;  %p640_p0 = scmp.ge.s32.totalorder %s766_s24, 1  ;;  %s766_s24 = sphi %s810_s24, %s17_s24  }
   0x2   : > { %p238_p1 = scmp.lt.s32.totalorder %s766_s24, 3 }
   0x4   : > { %p239_p2 = pnand %p640_p0, %p238_p1 }
   0x5   : > { %s641_s26 = sshll.u32 (!%p239_p2), %s636_s25, 1  ;;  %v768_v2 = vmov (!%p239_p2), 0.0   ;;  %v736_v3 = vld [vmem:[%s926_s3] sm:$0xff] (!%p239_p2)   ;;  %v285_v4 = vlaneseq (!%p239_p2)  ;;  %v737_v17 = vld [vmem:[%s926_s3 + $0x8] sm:$0xff] (!%p239_p2)   ;;  %v738_v18 = vld [vmem:[%s926_s3 + $0x10] sm:$0xff] (!%p239_p2)   ;;  %vm769_vm1 = vmmov (!%p239_p2), 0  }
   0x6   : > { %242 = sbr.rel (%p239_p2) target bundleno = 800 (0x320), region = 48  ;;  %p271_p3 = scmp.lt.s32.totalorder (!%p239_p2), %s641_s26, 3  ;;  %686 = vmatprep.subr.bf16.mxu0 (!%p239_p2), %v768_v2  ;;  %706 = vmatprep.subr.bf16.mxu1 (!%p239_p2), %v768_v2  ;;  %v739_v19 = vld [vmem:[%s926_s3 + $0x18] sm:$0xff] (!%p239_p2)   ;;  %v740_v20 = vld [vmem:[%s926_s3 + $0x20] sm:$0xff] (!%p239_p2)   ;;  %v741_v21 = vld [vmem:[%s926_s3 + $0x28] sm:$0xff] (!%p239_p2)  }
   0x7   : > { %687 = vmatpush3.bf16.msra.mxu0 (!%p239_p2), %v736_v3  ;;  %v286_v5 = vand.u32 (!%p239_p2), 127, %v285_v4  ;;  %702 = vmatprep.mubr.msk.bf16.mxu0 (!%p239_p2), %vm769_vm1, %v768_v2  ;;  %v742_v22 = vld [vmem:[%s926_s3 + $0x30] sm:$0xff] (!%p239_p2)   ;;  %v743_v23 = vld [vmem:[%s926_s3 + $0x38] sm:$0xff] (!%p239_p2)   ;;  %v646_v32 = vld [vmem:[%s924_s1] ss:$0 sm:$0xff] (!%p239_p2) }
   0x8   : > { %688 = vmatprep.subr.bf16.mxu0 (!%p239_p2), %v768_v2  ;;  %722 = vmatprep.mubr.msk.bf16.mxu1 (!%p239_p2), %vm769_vm1, %v768_v2  ;;  %v647_v36 = vld [vmem:[%s925_s2] ss:$0 sm:$0xff] (!%p239_p2)  ;;  %v745_v42 = vld [vmem:[%s928_s5 + $0x8] sm:$0xff] (!%p239_p2)   ;;  %v746_v43 = vld [vmem:[%s928_s5 + $0x10] sm:$0xff] (!%p239_p2)  }
   0x9   : > { %vm287_vm0 = vcmp.lt.s32.totalorder (!%p239_p2), %v286_v5, 16  ;;  %v744_v41 = vld [vmem:[%s928_s5] sm:$0xff] (!%p239_p2)   ;;  %v747_v44 = vld [vmem:[%s928_s5 + $0x18] sm:$0xff] (!%p239_p2)   ;;  %v749_v46 = vld [vmem:[%s928_s5 + $0x28] sm:$0xff] (!%p239_p2)  }
   0xa   : > { %v645_v8 = vsel (!%p239_p2), %vm287_vm0, 1.0, %v768_v2  ;;  %707 = vmatpush3.bf16.msra.mxu1 (!%p239_p2), %v744_v41  ;;  %v748_v45 = vld [vmem:[%s928_s5 + $0x20] sm:$0xff] (!%p239_p2)   ;;  %v750_v47 = vld [vmem:[%s928_s5 + $0x30] sm:$0xff] (!%p239_p2)   ;;  %v751_v48 = vld [vmem:[%s928_s5 + $0x38] sm:$0xff] (!%p239_p2)  }
   0xb   : > { %689 = vmatpush3.bf16.msra.mxu0 (!%p239_p2), %v737_v17  ;;  %708 = vmatprep.subr.bf16.mxu1 (!%p239_p2), %v768_v2  ;;  %v648_v49 = vld [vmem:[%s927_s4] ss:$0 sm:$0xff] (!%p239_p2) }
   0xc   : > { %690 = vmatprep.subr.bf16.mxu0 (!%p239_p2), %v768_v2 }
   0xd   : > { %s932_s26 = smov (!%p271_p3, %s641_s26), 3 }
   0xe   : > { %s642_s27 = sshll.u32 %s932_s26, 3  ;;  %709 = vmatpush3.bf16.msra.mxu1 %v745_v42 }
   0xf   : > { %s274_s30 = scalar_lea.vmem %s923_s0, %s642_s27  ;;  %691 = vmatpush3.bf16.msra.mxu0 %v738_v18  ;;  %710 = vmatprep.subr.bf16.mxu1 %v768_v2  ;;  %s280_s10 = scalar_lea.vmem %s930_s7, %s642_s27 }
  0x10   : > { %v826_v0 = vld [vmem:[%s274_s30] sm:$0xff]  ;;  %v828_v1 = vld [vmem:[%s274_s30 + $0x8] sm:$0xff]  ;;  %692 = vmatprep.subr.bf16.mxu0 %v768_v2 }
  0x11   : > { %290 = vadd.xlane.f32.xlu0 %v826_v0 }
  0x12   : > { %711 = vmatpush3.bf16.msra.mxu1 %v746_v43 }
  0x13   : > { %693 = vmatpush3.bf16.msra.mxu0 %v739_v19  ;;  %712 = vmatprep.subr.bf16.mxu1 %v768_v2 }
  0x14   : > { %694 = vmatprep.subr.bf16.mxu0 %v768_v2 }
  0x15   : > { %292 = vadd.xlane.f32.xlu0 %v828_v1 }
  0x16   : > { %713 = vmatpush3.bf16.msra.mxu1 %v747_v44 }
  0x17   : > { %695 = vmatpush3.bf16.msra.mxu0 %v740_v20  ;;  %714 = vmatprep.subr.bf16.mxu1 %v768_v2 }
  0x18   : > { %696 = vmatprep.subr.bf16.mxu0 %v768_v2 }
  0x1a   : > { %715 = vmatpush3.bf16.msra.mxu1 %v748_v45 }
  0x1b   : > { %697 = vmatpush3.bf16.msra.mxu0 %v741_v21  ;;  %716 = vmatprep.subr.bf16.mxu1 %v768_v2 }
  0x1c   : > { %698 = vmatprep.subr.bf16.mxu0 %v768_v2 }
  0x1e   : > { %717 = vmatpush3.bf16.msra.mxu1 %v749_v46 }
  0x1f   : > { %699 = vmatpush3.bf16.msra.mxu0 %v742_v22  ;;  %718 = vmatprep.subr.bf16.mxu1 %v768_v2 }
  0x20   : > { %700 = vmatprep.subr.bf16.mxu0 %v768_v2 }
  0x22   : > { %719 = vmatpush3.bf16.msra.mxu1 %v750_v47 }
  0x23   : > { %701 = vmatpush3.bf16.msra.mxu0 %v743_v23  ;;  %720 = vmatprep.subr.bf16.mxu1 %v768_v2 }
  0x26   : > { %721 = vmatpush3.bf16.msra.mxu1 %v751_v48 }
  0x9e   : > { %v291_v6 = vpop.xlane.xlu0 %290 }
  0x9f   : > { %v294_v7 = vmul.f32 0.0625, %v291_v6 }
  0xa1   : > { %v296_v9 = vsub.f32 %v826_v0, %v294_v7 }
  0xa2   : > { %v293_v10 = vpop.xlane.xlu0 %292 }
  0xa3   : > { %v295_v11 = vmul.f32 0.0625, %v293_v10  ;;  %v298_v12 = vmul.f32 %v645_v8, %v296_v9 }
  0xa5   : > { %v297_v13 = vsub.f32 %v828_v1, %v295_v11  ;;  %v300_v14 = vmul.f32 %v298_v12, %v298_v12 }
  0xa7   : > { %302 = vadd.xlane.f32.xlu1 %v300_v14  ;;  %v299_v15 = vmul.f32 %v645_v8, %v297_v13  ;;  %v657_v13 = vld [vmem:[%s929_s6] ss:$0 sm:$0xff] }
  0xa9   : > { %v301_v16 = vmul.f32 %v299_v15, %v299_v15 }
  0xab   : > { %304 = vadd.xlane.f32.xlu1 %v301_v16 }
 0x134   : > { %v303_v24 = vpop.xlane.xlu1 %302 }
 0x135   : > { %v306_v25 = vmul.f32 0.0625, %v303_v24 }
 0x137   : > { %v308_v26 = vadd.f32 1e-05, %v306_v25 }
 0x138   : > { %v305_v27 = vpop.xlane.xlu1 %304 }
 0x139   : > { %752 = vrsqrt.f32 %v308_v26  ;;  %v307_v28 = vmul.f32 0.0625, %v305_v27 }
 0x13b   : > { %v309_v29 = vadd.f32 1e-05, %v307_v28 }
 0x13d   : > { %754 = vrsqrt.f32 %v309_v29 }
 0x143   : > { %v753_v30 = vpop.eup %752 }
 0x144   : > { %v312_v31 = vmul.f32 %v753_v30, %v298_v12 }
 0x146   : > { %v321_v35 = vmul.f32 %v646_v32, %v312_v31 }
 0x147   : > { %v755_v33 = vpop.eup %754 }
 0x148   : > { %v313_v34 = vmul.f32 %v755_v33, %v299_v15  ;;  %v330_v38 = vadd.f32 %v647_v36, %v321_v35 }
 0x14a   : > { %v322_v37 = vmul.f32 %v646_v32, %v313_v34 }
 0x14c   : > { %v331_v39 = vadd.f32 %v647_v36, %v322_v37 }
 0x14e   : > { %v332_v40 = vpack.c.bf16 %v331_v39, %v330_v38 }
 0x150   : > { %703 = vmatmul.mubr.bf16.vlgmr.msra.gmra.mrb[0].mxu0 %v332_v40 }
 0x223   : > { %v438_v50 = vpop.f32.mrb[0].mxu0 }
 0x224   : > { %v439_v51 = vadd.f32 %v648_v49, %v438_v50  ;;  %v704_v52 = vpop.f32.mrb[1].mxu0 }
 0x225   : > { %v441_v53 = vpop.f32.mrb[2].mxu0 }
 0x226   : > { %v445_v54 = vmul.f32 %v439_v51, %v439_v51  ;;  %v442_v55 = vadd.f32 %v648_v49, %v441_v53  ;;  %v705_v56 = vpop.f32.mrb[3].mxu0 }
 0x228   : > { %v447_v57 = vmul.f32 %v445_v54, %v439_v51  ;;  %v446_v58 = vmul.f32 %v442_v55, %v442_v55 }
 0x22a   : > { %v449_v59 = vmul.f32 0.044715, %v447_v57  ;;  %v448_v60 = vmul.f32 %v446_v58, %v442_v55 }
 0x22c   : > { %v451_v61 = vadd.f32 %v449_v59, %v439_v51  ;;  %v450_v62 = vmul.f32 0.044715, %v448_v60 }
 0x22e   : > { %v453_v63 = vmul.f32 0.7978846, %v451_v61  ;;  %v452_v2 = vadd.f32 %v450_v62, %v442_v55 }
 0x230   : > { %756 = vtanh.f32 %v453_v63  ;;  %v454_v3 = vmul.f32 0.7978846, %v452_v2 }
 0x232   : > { %758 = vtanh.f32 %v454_v3 }
 0x23a   : > { %v757_v4 = vpop.eup %756 }
 0x23b   : > { %v457_v5 = vadd.f32 1.0, %v757_v4 }
 0x23c   : > { %v759_v6 = vpop.eup %758 }
 0x23d   : > { %v458_v7 = vadd.f32 1.0, %v759_v6  ;;  %v459_v8 = vmul.f32 0.5, %v457_v5 }
 0x23f   : > { %v460_v9 = vmul.f32 0.5, %v458_v7  ;;  %v461_v10 = vmul.f32 %v459_v8, %v439_v51 }
 0x241   : > { %v462_v11 = vmul.f32 %v460_v9, %v442_v55 }
 0x243   : > { %v463_v12 = vpack.c.bf16 %v462_v11, %v461_v10 }
 0x245   : > { %723 = vmatmul.mubr.bf16.vlgmr.msra.gmra.mrb[0].mxu1 %v463_v12 }
 0x318   : > { %v569_v14 = vpop.f32.mrb[0].mxu1 }
 0x319   : > { %v570_v15 = vadd.f32 %v657_v13, %v569_v14  ;;  %v724_v16 = vpop.f32.mrb[1].mxu1 }
 0x31a   : > { %v572_v17 = vpop.f32.mrb[2].mxu1 }
 0x31b   : > { %v576_v18 = vadd.f32 %v570_v15, %v826_v0  ;;  %v573_v19 = vadd.f32 %v657_v13, %v572_v17  ;;  %v725_v20 = vpop.f32.mrb[3].mxu1 }
 0x31d   : > { %578 = vst [vmem:[%s280_s10] sm:$0xff] %v576_v18  ;;  %v577_v21 = vadd.f32 %v573_v19, %v828_v1 }
 0x31f   : > { %579 = vst [vmem:[%s280_s10 + $0x8] sm:$0xff] %v577_v21 }
 0x320 PF: > { %s17_s24 = sadd.s32 1, %s766_s24  }
 0x321   : > { %p14_p4 = scmp.ge.s32.totalorder %s17_s24, 4  }
 0x323   :  { %16 = sbr.rel (!%p14_p4) target bundleno = 1 (0x1), region = 78 }

// kernel: transunet_forward.21
= control target key start
LH: loop header
LB: loop body
LE: loop exit
PB: predicated region body
PF: predicated region fallthrough
CT: control target
= control target key end

     0   :  { %s1656_s12 = smov 0   ;;  %s1658_s13 = smov 0   ;;  %s1970_s0 = inlined_call_operand.vmem [shape: f32[2,8,8,128], index: 0, kind: input, shape index: {}]   ;;  %s1971_s1 = inlined_call_operand.vmem [shape: bf16[1152,128], index: 1, kind: input, shape index: {}]   ;;  %s1972_s2 = inlined_call_operand.vmem [shape: f32[1,128], index: 2, kind: input, shape index: {}]   ;;  %s1973_s3 = inlined_call_operand.vmem [shape: f32[2,64,128], index: 3, kind: output, shape index: {}]  }
   0x1   :  { %s1660_s14 = smov 0   ;;  %s1662_s15 = smov 0  }
   0x2   :  { %s1664_s16 = smov 0  }
   0x3 LB: > { %s22_s17 = sadd.s32 1, %s1625_s14  ;;  %s25_s18 = sadd.s32 1, %s1629_s15  ;;  %s1633_s16 = sphi %s1664_s16, %s13_s16   ;;  %s1629_s15 = sphi %s1662_s15, %s1977_s15   ;;  %s1625_s14 = sphi %s1660_s14, %s1976_s14   ;;  %s1621_s13 = sphi %s1658_s13, %s1975_s13   ;;  %s1617_s12 = sphi %s1656_s12, %s1974_s12  }
   0x4   : > { %p23_p0 = scmp.ge.s32.totalorder %s22_s17, 2  ;;  %p1225_p1 = scmp.ge.s32.totalorder %s1633_s16, 1 }
   0x5   : > { %p151_p2 = scmp.lt.s32.totalorder %s1633_s16, 5 }
   0x6   : > { %s1979_s17 = smov (%p23_p0, %s22_s17), 0  ;;  %s1981_s18 = smov (!%p23_p0, %s25_s18), %s1629_s15 }
   0x7   : > { %p152_p3 = pnand %p1225_p1, %p151_p2  ;;  %p27_p4 = scmp.ge.s32.totalorder %s1981_s18, 2 }
   0x8   : > { %v1523_v0 = vld [vmem:[%s1971_s1 + $0x40] sm:$0xff] (!%p152_p3)   ;;  %v1635_v3 = vmov (!%p152_p3), 0.0   ;;  %v1527_v5 = vld [vmem:[%s1971_s1 + $0x48] sm:$0xff] (!%p152_p3)   ;;  %v1531_v9 = vld [vmem:[%s1971_s1 + $0x50] sm:$0xff] (!%p152_p3)   ;;  %p179_p5 = scmp.lt.s32.totalorder (!%p152_p3), %s1621_s13, 1  ;;  %s1337_s27 = sshll.u32 (!%p152_p3), %s1617_s12, 6 }
   0x9   : > { %s1983_s18 = smov (%p27_p4, %s1981_s18), 0  ;;  %155 = sbr.rel (%p152_p3) target bundleno = 324 (0x144), region = 32 }
   0xa   : > { %v1524_v1 = vld [vmem:[%s1971_s1] sm:$0xff] (!%p152_p3)   ;;  %1340 = vmatprep.subr.bf16.mxu0 (!%p152_p3), %v1523_v0  ;;  %196 = vst [vmem:[#allocation2] sm:$0xff] (!%p152_p3), %v1635_v3  ;;  %197 = vst [vmem:[#allocation2 + $0x8] sm:$0x3] (!%p152_p3), %v1635_v3  ;;  %v1528_v6 = vld [vmem:[%s1971_s1 + $0x8] sm:$0xff] (!%p152_p3)   ;;  %s1804_s7 = scalar_lea.vmem (!%p152_p3), [#allocation2], %s1337_s27 }
   0xb   : > { %v1525_v2 = vld [vmem:[%s1971_s1 + $0xc0] sm:$0xff] (!%p152_p3)   ;;  %198 = vst [vmem:[#allocation2 + $0x10] sm:$0xff] (!%p152_p3), %v1635_v3  ;;  %199 = vst [vmem:[#allocation2 + $0x18] sm:$0x3] (!%p152_p3), %v1635_v3  ;;  %1341 = vmatpush3.bf16.msra.mxu0 (!%p152_p3), %v1524_v1  ;;  %v1529_v7 = vld [vmem:[%s1971_s1 + $0xc8] sm:$0xff] (!%p152_p3)  }
   0xc   : > { %200 = vst [vmem:[#allocation2 + $0x20] sm:$0xff] (!%p152_p3), %v1635_v3  ;;  %201 = vst [vmem:[#allocation2 + $0x28] sm:$0x3] (!%p152_p3), %v1635_v3  ;;  %v1526_v4 = vld [vmem:[%s1971_s1 + $0x80] sm:$0xff] (!%p152_p3)   ;;  %1368 = vmatprep.subr.bf16.mxu1 (!%p152_p3), %v1525_v2  ;;  %1342 = vmatprep.subr.bf16.mxu0 (!%p152_p3), %v1527_v5  ;;  %v1530_v8 = vld [vmem:[%s1971_s1 + $0x88] sm:$0xff] (!%p152_p3)  }
   0xd   : > { %202 = vst [vmem:[#allocation2 + $0x30] sm:$0xff] (!%p152_p3), %v1635_v3  ;;  %203 = vst [vmem:[#allocation2 + $0x38] sm:$0x3] (!%p152_p3), %v1635_v3  ;;  %1369 = vmatpush3.bf16.msra.mxu1 (!%p152_p3), %v1526_v4  ;;  %v1532_v10 = vld [vmem:[%s1971_s1 + $0x10] sm:$0xff] (!%p152_p3)   ;;  %v1535_v13 = vld [vmem:[%s1971_s1 + $0x58] sm:$0xff] (!%p152_p3)  }
   0xe   : > { %204 = vst [vmem:[#allocation2 + $0x40] sm:$0xff] (!%p152_p3), %v1635_v3  ;;  %205 = vst [vmem:[#allocation2 + $0x48] sm:$0x3] (!%p152_p3), %v1635_v3  ;;  %1370 = vmatprep.subr.bf16.mxu1 (!%p152_p3), %v1529_v7  ;;  %v1533_v11 = vld [vmem:[%s1971_s1 + $0xd0] sm:$0xff] (!%p152_p3)   ;;  %v1536_v14 = vld [vmem:[%s1971_s1 + $0x18] sm:$0xff] (!%p152_p3)  }
   0xf   : > { %206 = vst [vmem:[#allocation2 + $0x50] sm:$0xff] (!%p152_p3), %v1635_v3  ;;  %207 = vst [vmem:[#allocation2 + $0x58] sm:$0x3] (!%p152_p3), %v1635_v3  ;;  %1343 = vmatpush3.bf16.msra.mxu0 (!%p152_p3), %v1528_v6  ;;  %v1534_v12 = vld [vmem:[%s1971_s1 + $0x90] sm:$0xff] (!%p152_p3)   ;;  %v1537_v15 = vld [vmem:[%s1971_s1 + $0xd8] sm:$0xff] (!%p152_p3)  }
  0x10   : > { %208 = vst [vmem:[#allocation2 + $0x60] sm:$0xff] %v1635_v3  ;;  %209 = vst [vmem:[#allocation2 + $0x68] sm:$0x3] %v1635_v3  ;;  %1344 = vmatprep.subr.bf16.mxu0 %v1531_v9  ;;  %v1538_v16 = vld [vmem:[%s1971_s1 + $0x98] sm:$0xff]   ;;  %v1539_v17 = vld [vmem:[%s1971_s1 + $0x60] sm:$0xff]   ;;  %s1985_s13 = smov (!%p179_p5, %s1621_s13), 1 }
  0x11   : > { %210 = vst [vmem:[#allocation2 + $0x70] sm:$0xff] %v1635_v3  ;;  %211 = vst [vmem:[#allocation2 + $0x78] sm:$0x3] %v1635_v3  ;;  %1371 = vmatpush3.bf16.msra.mxu1 %v1530_v8  ;;  %v1540_v18 = vld [vmem:[%s1971_s1 + $0x20] sm:$0xff]   ;;  %v1543_v21 = vld [vmem:[%s1971_s1 + $0x68] sm:$0xff]   ;;  %s1336_s4 = sshll.u32 %s1985_s13, 6 }
  0x12   : > { %212 = vst [vmem:[#allocation2 + $0x80] sm:$0xff] %v1635_v3  ;;  %213 = vst [vmem:[#allocation2 + $0x88] sm:$0x3] %v1635_v3  ;;  %1372 = vmatprep.subr.bf16.mxu1 %v1533_v11  ;;  %v1541_v19 = vld [vmem:[%s1971_s1 + $0xe0] sm:$0xff]   ;;  %v1544_v22 = vld [vmem:[%s1971_s1 + $0x28] sm:$0xff]   ;;  %s183_s20 = scalar_lea.vmem %s1970_s0, %s1336_s4  ;;  %s1229_s8 = sshll.u32 %s1985_s13, 3 }
  0x13   : > { %214 = vst [vmem:[#allocation2 + $0x90] sm:$0xff] %v1635_v3  ;;  %215 = vst [vmem:[#allocation2 + $0x98] sm:$0x3] %v1635_v3  ;;  %1345 = vmatpush3.bf16.msra.mxu0 %v1532_v10  ;;  %v1542_v20 = vld [vmem:[%s1971_s1 + $0xa0] sm:$0xff]   ;;  %v1545_v23 = vld [vmem:[%s1971_s1 + $0xe8] sm:$0xff]  }
  0x14   : > { %1346 = vmatprep.subr.bf16.mxu0 %v1535_v13  ;;  %v1546_v24 = vld [vmem:[%s1971_s1 + $0xa8] sm:$0xff]   ;;  %v1547_v25 = vld [vmem:[%s1971_s1 + $0x70] sm:$0xff]   ;;  %v1551_v29 = vld [vmem:[%s1971_s1 + $0x78] sm:$0xff]  }
  0x15   : > { %1373 = vmatpush3.bf16.msra.mxu1 %v1534_v12  ;;  %v1548_v26 = vld [vmem:[%s1971_s1 + $0x30] sm:$0xff]   ;;  %v1552_v30 = vld [vmem:[%s1971_s1 + $0x38] sm:$0xff]   ;;  %v216_v32 = vld [vmem:[%s183_s20] sm:$0xff] }
  0x16   : > { %1374 = vmatprep.subr.bf16.mxu1 %v1537_v15  ;;  %v1549_v27 = vld [vmem:[%s1971_s1 + $0xf0] sm:$0xff]   ;;  %v1553_v31 = vld [vmem:[%s1971_s1 + $0xf8] sm:$0xff]   ;;  %v217_v33 = vld [vmem:[%s183_s20 + $0x8] sm:$0xff]  ;;  %225 = vst [vmem:[#allocation2 + $0x11] sm:$0xff] %v216_v32 }
  0x17   : > { %1347 = vmatpush3.bf16.msra.mxu0 %v1536_v14  ;;  %v1550_v28 = vld [vmem:[%s1971_s1 + $0xb0] sm:$0xff]   ;;  %v219_v35 = vld [vmem:[%s183_s20 + $0x18] sm:$0xff]  ;;  %v220_v36 = vld [vmem:[%s183_s20 + $0x20] sm:$0xff]  ;;  %226 = vst [vmem:[#allocation2 + $0x21] sm:$0xff] %v217_v33 }
  0x18   : > { %1348 = vmatprep.subr.bf16.mxu0 %v1539_v17  ;;  %v218_v34 = vld [vmem:[%s183_s20 + $0x10] sm:$0xff]  ;;  %v221_v37 = vld [vmem:[%s183_s20 + $0x28] sm:$0xff]  ;;  %v223_v39 = vld [vmem:[%s183_s20 + $0x38] sm:$0xff]  ;;  %228 = vst [vmem:[#allocation2 + $0x41] sm:$0xff] %v219_v35 }
  0x19   : > { %1375 = vmatpush3.bf16.msra.mxu1 %v1538_v16  ;;  %227 = vst [vmem:[#allocation2 + $0x31] sm:$0xff] %v218_v34  ;;  %v222_v38 = vld [vmem:[%s183_s20 + $0x30] sm:$0xff]  ;;  %229 = vst [vmem:[#allocation2 + $0x51] sm:$0xff] %v220_v36  ;;  %v1554_v40 = vld [vmem:[%s1971_s1 + $0xb8] sm:$0xff]  }
  0x1a   : > { %1376 = vmatprep.subr.bf16.mxu1 %v1541_v19  ;;  %230 = vst [vmem:[#allocation2 + $0x61] sm:$0xff] %v221_v37  ;;  %231 = vst [vmem:[#allocation2 + $0x71] sm:$0xff] %v222_v38  ;;  %v1555_v41 = vld [vmem:[%s1971_s1 + $0x140] sm:$0xff]   ;;  %v1559_v55 = vld [vmem:[%s1971_s1 + $0x148] sm:$0xff]  }
  0x1b   : > { %1349 = vmatpush3.bf16.msra.mxu0 %v1540_v18  ;;  %232 = vst [vmem:[#allocation2 + $0x81] sm:$0xff] %v223_v39  ;;  %v1557_v42 = vld [vmem:[%s1971_s1 + $0x1c0] sm:$0xff]   ;;  %v1561_v57 = vld [vmem:[%s1971_s1 + $0x1c8] sm:$0xff]   ;;  %v1563_v60 = vld [vmem:[%s1971_s1 + $0x150] sm:$0xff]  }
  0x1c   : > { %1350 = vmatprep.subr.bf16.mxu0 %v1543_v21  ;;  %v1556_v43 = vld [vmem:[%s1971_s1 + $0x100] sm:$0xff]   ;;  %v1560_v58 = vld [vmem:[%s1971_s1 + $0x108] sm:$0xff]   ;;  %v1565_v61 = vld [vmem:[%s1971_s1 + $0x1d0] sm:$0xff]  }
  0x1d   : > { %1377 = vmatpush3.bf16.msra.mxu1 %v1542_v20  ;;  %v1558_v47 = vld [vmem:[%s1971_s1 + $0x180] sm:$0xff]   ;;  %v1562_v59 = vld [vmem:[%s1971_s1 + $0x188] sm:$0xff]   ;;  %v1564_v62 = vld [vmem:[%s1971_s1 + $0x110] sm:$0xff]  }
  0x1e   : > { %1378 = vmatprep.subr.bf16.mxu1 %v1545_v23  ;;  %v1566_v63 = vld [vmem:[%s1971_s1 + $0x190] sm:$0xff]   ;;  %v1567_v0 = vld [vmem:[%s1971_s1 + $0x158] sm:$0xff]   ;;  %v1571_v4 = vld [vmem:[%s1971_s1 + $0x160] sm:$0xff]  }
  0x1f   : > { %1351 = vmatpush3.bf16.msra.mxu0 %v1544_v22  ;;  %v1569_v1 = vld [vmem:[%s1971_s1 + $0x1d8] sm:$0xff]   ;;  %v1572_v5 = vld [vmem:[%s1971_s1 + $0x120] sm:$0xff]   ;;  %v1575_v10 = vld [vmem:[%s1971_s1 + $0x168] sm:$0xff]  }
  0x20   : > { %1352 = vmatprep.subr.bf16.mxu0 %v1547_v25  ;;  %v1568_v2 = vld [vmem:[%s1971_s1 + $0x118] sm:$0xff]   ;;  %v1573_v6 = vld [vmem:[%s1971_s1 + $0x1e0] sm:$0xff]   ;;  %v1576_v13 = vld [vmem:[%s1971_s1 + $0x128] sm:$0xff]  }
  0x21   : > { %1379 = vmatpush3.bf16.msra.mxu1 %v1546_v24  ;;  %v1570_v3 = vld [vmem:[%s1971_s1 + $0x198] sm:$0xff]   ;;  %v1574_v7 = vld [vmem:[%s1971_s1 + $0x1a0] sm:$0xff]   ;;  %v1577_v15 = vld [vmem:[%s1971_s1 + $0x1e8] sm:$0xff]  }
  0x22   : > { %1380 = vmatprep.subr.bf16.mxu1 %v1549_v27  ;;  %v239_v44 = vld [vmem:[%s1804_s7 + $0x1] sm:$0xff]  ;;  %v1808_v45 = vld [vmem:[%s1804_s7 + $0x11] sm:$0xff] }
  0x23   : > { %1353 = vmatpush3.bf16.msra.mxu0 %v1548_v26  ;;  %v235_v46 = vld [vmem:[%s1804_s7] sm:$0xff]  ;;  %v278_v48 = vpack.c.bf16 %v1808_v45, %v239_v44  ;;  %v236_v49 = vld [vmem:[%s1804_s7 + $0x10] sm:$0xff]  ;;  %v1578_v18 = vld [vmem:[%s1971_s1 + $0x1a8] sm:$0xff]  }
  0x24   : > { %1354 = vmatprep.subr.bf16.mxu0 %v1551_v29  ;;  %v1236_v50 = vld [vmem:[%s1804_s7 + $0x20] sm:$0xff]  ;;  %v277_v52 = vpack.c.bf16 %v236_v49, %v235_v46  ;;  %v1819_v54 = vld [vmem:[%s1804_s7 + $0x12] sm:$0xff]  ;;  %v1588_v36 = vld [vmem:[%s1971_s1 + $0x208] sm:$0xff]  }
  0x25   : > { %1381 = vmatpush3.bf16.msra.mxu1 %v1550_v28  ;;  %v243_v51 = vld [vmem:[%s1804_s7 + $0x2] sm:$0xff]  ;;  %v280_v53 = vpack.c.bf16 %v1236_v50, %v236_v49  ;;  %910 = vmatprep.mubr.bf16.mxu0 %v278_v48  ;;  %v1872_v9 = vld [vmem:[%s1804_s7 + $0x31] sm:$0xff] }
  0x26   : > { %1382 = vmatprep.subr.bf16.mxu1 %v1553_v31  ;;  %v279_v56 = vpack.c.bf16 %v1819_v54, %v243_v51  ;;  %v241_v8 = vld [vmem:[%s1804_s7 + $0x21] sm:$0xff]  ;;  %v238_v12 = vld [vmem:[%s1804_s7 + $0x30] sm:$0xff]  ;;  %v1583_v27 = vld [vmem:[%s1971_s1 + $0x178] sm:$0xff]  }
  0x27   : > { %1355 = vmatpush3.bf16.msra.mxu0 %v1552_v30  ;;  %959 = vmatprep.mubr.bf16.mxu1 %v280_v53  ;;  %v287_v11 = vpack.c.bf16 %v1872_v9, %v241_v8  ;;  %v286_v14 = vpack.c.bf16 %v238_v12, %v1236_v50  ;;  %v1238_v16 = vld [vmem:[%s1804_s7 + $0x40] sm:$0xff]  ;;  %v246_v20 = vld [vmem:[%s1804_s7 + $0x32] sm:$0xff]  ;;  %v281_v32 = vpack.c.bf16 %v241_v8, %v1808_v45  ;;  %v1592_v45 = vld [vmem:[%s1971_s1 + $0x228] sm:$0xff]  }
  0x28   : > { %1396 = vmatprep.subr.bf16.mxu0 %v1555_v41  ;;  %v289_v17 = vpack.c.bf16 %v1238_v16, %v238_v12  ;;  %v245_v19 = vld [vmem:[%s1804_s7 + $0x22] sm:$0xff]  ;;  %v1579_v22 = vld [vmem:[%s1971_s1 + $0x170] sm:$0xff]   ;;  %v1584_v28 = vld [vmem:[%s1971_s1 + $0x138] sm:$0xff]  }
  0x29   : > { %1383 = vmatpush3.bf16.msra.mxu1 %v1554_v40  ;;  %v288_v21 = vpack.c.bf16 %v246_v20, %v245_v19  ;;  %v282_v23 = vpack.c.bf16 %v245_v19, %v1819_v54  ;;  %v1580_v24 = vld [vmem:[%s1971_s1 + $0x130] sm:$0xff]   ;;  %v1585_v29 = vld [vmem:[%s1971_s1 + $0x1f8] sm:$0xff]   ;;  %v1587_v31 = vld [vmem:[%s1971_s1 + $0x200] sm:$0xff]  }
  0x2a   : > { %1424 = vmatprep.subr.bf16.mxu1 %v1557_v42  ;;  %911 = vmatmul.mubr.bf16.vlgmr.msra.gmra.mrb[0].mxu0 %v277_v52  ;;  %v1581_v25 = vld [vmem:[%s1971_s1 + $0x1f0] sm:$0xff]   ;;  %v1586_v30 = vld [vmem:[%s1971_s1 + $0x1b8] sm:$0xff]   ;;  %v1246_v33 = vld [vmem:[%s1804_s7 + $0x42] sm:$0xff] }
  0x2b   : > { %1397 = vmatpush3.bf16.msra.mxu0 %v1556_v43  ;;  %918 = vmatprep.mubr.bf16.mxu0 %v287_v11  ;;  %v1582_v26 = vld [vmem:[%s1971_s1 + $0x1b0] sm:$0xff]   ;;  %v1242_v34 = vld [vmem:[%s1804_s7 + $0x41] sm:$0xff]  ;;  %v291_v37 = vpack.c.bf16 %v1246_v33, %v246_v20  ;;  %v1590_v43 = vld [vmem:[%s1971_s1 + $0x218] sm:$0xff]  }
  0x2c   : > { %960 = vmatmul.mubr.bf16.vlgmr.msra.gmra.mrb[0].mxu1 %v279_v56  ;;  %1398 = vmatprep.subr.bf16.mxu0 %v1559_v55  ;;  %v1256_v35 = vld [vmem:[%s1804_s7 + $0x51] sm:$0xff]  ;;  %v290_v41 = vpack.c.bf16 %v1242_v34, %v1872_v9  ;;  %v1591_v44 = vld [vmem:[%s1971_s1 + $0x220] sm:$0xff]  }
  0x2d   : > { %1425 = vmatpush3.bf16.msra.mxu1 %v1558_v47  ;;  %967 = vmatprep.mubr.bf16.mxu1 %v289_v17  ;;  %v293_v38 = vpack.c.bf16 %v1256_v35, %v1242_v34  ;;  %v1589_v39 = vld [vmem:[%s1971_s1 + $0x210] sm:$0xff]   ;;  %v1594_v47 = vld [vmem:[%s1971_s1 + $0x238] sm:$0xff]   ;;  %v1261_v51 = vld [vmem:[%s1972_s2] ss:$0 sm:$0xff] }
  0x2e   : > { %1426 = vmatprep.subr.bf16.mxu1 %v1561_v57  ;;  %v1252_v40 = vld [vmem:[%s1804_s7 + $0x50] sm:$0xff] }
  0x2f   : > { %1399 = vmatpush3.bf16.msra.mxu0 %v1560_v58  ;;  %v292_v42 = vpack.c.bf16 %v1252_v40, %v1238_v16  ;;  %v1593_v46 = vld [vmem:[%s1971_s1 + $0x230] sm:$0xff]  }
  0x30   : > { %1400 = vmatprep.subr.bf16.mxu0 %v1563_v60  ;;  %v1260_v48 = vld [vmem:[%s1804_s7 + $0x52] sm:$0xff]  ;;  %s1228_s7 = sshll.u32 %s1617_s12, 2 }
  0x31   : > { %1427 = vmatpush3.bf16.msra.mxu1 %v1562_v59  ;;  %v294_v49 = vpack.c.bf16 %v1260_v48, %v1246_v33  ;;  %p187_p6 = scmp.lt.s32.totalorder %s1228_s7, 7 }
  0x32   : > { %1428 = vmatprep.subr.bf16.mxu1 %v1565_v61  ;;  %919 = vmatmul.mubr.bf16.gmra.mrb[4].mxu0 %v286_v14 }
  0x33   : > { %1401 = vmatpush3.bf16.msra.mxu0 %v1564_v62  ;;  %1008 = vmatprep.mubr.bf16.mxu0 %v282_v23  ;;  %s1987_s7 = smov (!%p187_p6, %s1228_s7), 7 }
  0x34   : > { %1402 = vmatprep.subr.bf16.mxu0 %v1567_v0  ;;  %968 = vmatmul.mubr.bf16.gmra.mrb[4].mxu1 %v288_v21  ;;  %s190_s9 = sadd.s32 %s1229_s8, %s1987_s7 }
  0x35   : > { %1429 = vmatpush3.bf16.msra.mxu1 %v1566_v63  ;;  %1057 = vmatprep.mubr.bf16.mxu1 %v287_v11  ;;  %s1230_s10 = sshll.u32 %s190_s9, 3 }
  0x36   : > { %1430 = vmatprep.subr.bf16.mxu1 %v1569_v1  ;;  %s192_s20 = scalar_lea.vmem %s1973_s3, %s1230_s10 }
  0x37   : > { %1403 = vmatpush3.bf16.msra.mxu0 %v1568_v2 }
  0x38   : > { %1404 = vmatprep.subr.bf16.mxu0 %v1571_v4 }
  0x39   : > { %1431 = vmatpush3.bf16.msra.mxu1 %v1570_v3 }
  0x3a   : > { %1432 = vmatprep.subr.bf16.mxu1 %v1573_v6 }
  0x3b   : > { %1405 = vmatpush3.bf16.msra.mxu0 %v1572_v5 }
  0x3c   : > { %1406 = vmatprep.subr.bf16.mxu0 %v1575_v10 }
  0x3d   : > { %1433 = vmatpush3.bf16.msra.mxu1 %v1574_v7 }
  0x3e   : > { %1434 = vmatprep.subr.bf16.mxu1 %v1577_v15 }
  0x3f   : > { %1407 = vmatpush3.bf16.msra.mxu0 %v1576_v13 }
  0x40   : > { %1408 = vmatprep.subr.bf16.mxu0 %v1579_v22 }
  0x41   : > { %1435 = vmatpush3.bf16.msra.mxu1 %v1578_v18 }
  0x42   : > { %1436 = vmatprep.subr.bf16.mxu1 %v1581_v25 }
  0x43   : > { %1409 = vmatpush3.bf16.msra.mxu0 %v1580_v24 }
  0x44   : > { %1410 = vmatprep.subr.bf16.mxu0 %v1583_v27 }
  0x45   : > { %1437 = vmatpush3.bf16.msra.mxu1 %v1582_v26 }
  0x46   : > { %1438 = vmatprep.subr.bf16.mxu1 %v1585_v29 }
  0x47   : > { %1411 = vmatpush3.bf16.msra.mxu0 %v1584_v28 }
  0x48   : > { %1462 = vmatprep.subr.bf16.mxu0 %v1587_v31 }
  0x49   : > { %1439 = vmatpush3.bf16.msra.mxu1 %v1586_v30 }
  0x4a   : > { %1009 = vmatmul.mubr.bf16.vlgmr.msra.gmra.mrb[8].mxu0 %v281_v32 }
  0x4b   : > { %1463 = vmatpush3.bf16.msra.mxu0 %v1587_v31  ;;  %1016 = vmatprep.mubr.bf16.mxu0 %v291_v37 }
  0x4c   : > { %1058 = vmatmul.mubr.bf16.vlgmr.msra.gmra.mrb[8].mxu1 %v286_v14  ;;  %1464 = vmatprep.subr.bf16.mxu0 %v1588_v36 }
  0x4d   : > { %1065 = vmatprep.mubr.bf16.mxu1 %v293_v38 }
  0x4f   : > { %1465 = vmatpush3.bf16.msra.mxu0 %v1588_v36 }
  0x50   : > { %1466 = vmatprep.subr.bf16.mxu0 %v1589_v39 }
  0x52   : > { %1017 = vmatmul.mubr.bf16.gmra.mrb[12].mxu0 %v290_v41 }
  0x53   : > { %1467 = vmatpush3.bf16.msra.mxu0 %v1589_v39  ;;  %1478 = vmatprep.mubr.bf16.mxu0 %v288_v21 }
  0x54   : > { %1066 = vmatmul.mubr.bf16.gmra.mrb[12].mxu1 %v292_v42  ;;  %1468 = vmatprep.subr.bf16.mxu0 %v1590_v43 }
  0x57   : > { %1469 = vmatpush3.bf16.msra.mxu0 %v1590_v43 }
  0x58   : > { %1470 = vmatprep.subr.bf16.mxu0 %v1591_v44 }
  0x5b   : > { %1471 = vmatpush3.bf16.msra.mxu0 %v1591_v44 }
  0x5c   : > { %1472 = vmatprep.subr.bf16.mxu0 %v1592_v45 }
  0x5f   : > { %1473 = vmatpush3.bf16.msra.mxu0 %v1592_v45 }
  0x60   : > { %1474 = vmatprep.subr.bf16.mxu0 %v1593_v46 }
  0x63   : > { %1475 = vmatpush3.bf16.msra.mxu0 %v1593_v46 }
  0x64   : > { %1476 = vmatprep.subr.bf16.mxu0 %v1594_v47 }
  0x67   : > { %1477 = vmatpush3.bf16.msra.mxu0 %v1594_v47 }
  0x6a   : > { %1479 = vmatmul.mubr.bf16.vlgmr.msra.gmra.mrb[16].mxu0 %v294_v49 }
  0xfd   : > { %v1356_v50 = vpop.f32.mrb[0].mxu0 }
  0xfe   : > { %v1357_v52 = vpop.f32.mrb[1].mxu0 }
  0xff   : > { %v1384_v53 = vpop.f32.mrb[0].mxu1  ;;  %v1358_v54 = vadd.f32 %v1357_v52, %v1356_v50  ;;  %v1359_v55 = vpop.f32.mrb[2].mxu0 }
 0x100   : > { %v1385_v56 = vpop.f32.mrb[1].mxu1  ;;  %v1360_v57 = vpop.f32.mrb[3].mxu0 }
 0x101   : > { %v1386_v58 = vadd.f32 %v1385_v56, %v1384_v53  ;;  %v1387_v59 = vpop.f32.mrb[2].mxu1  ;;  %v913_v60 = vadd.f32 %v1358_v54, %v1261_v51  ;;  %v1361_v61 = vadd.f32 %v1360_v57, %v1359_v55 }
 0x102   : > { %v1388_v62 = vpop.f32.mrb[3].mxu1 }
 0x103   : > { %v1389_v63 = vadd.f32 %v1388_v62, %v1387_v59  ;;  %v916_v0 = vadd.f32 %v1361_v61, %v1261_v51  ;;  %v962_v1 = vadd.f32 %v1386_v58, %v913_v60 }
 0x105   : > { %v965_v2 = vadd.f32 %v1389_v63, %v916_v0  ;;  %v1362_v3 = vpop.f32.mrb[4].mxu0 }
 0x106   : > { %v1363_v4 = vpop.f32.mrb[5].mxu0 }
 0x107   : > { %v1364_v5 = vadd.f32 %v1363_v4, %v1362_v3  ;;  %v1365_v6 = vpop.f32.mrb[6].mxu0  ;;  %v1390_v7 = vpop.f32.mrb[4].mxu1 }
 0x108   : > { %v1366_v8 = vpop.f32.mrb[7].mxu0  ;;  %v1391_v9 = vpop.f32.mrb[5].mxu1 }
 0x109   : > { %v921_v10 = vadd.f32 %v1364_v5, %v1261_v51  ;;  %v1367_v11 = vadd.f32 %v1366_v8, %v1365_v6  ;;  %v1392_v12 = vadd.f32 %v1391_v9, %v1390_v7  ;;  %v1393_v13 = vpop.f32.mrb[6].mxu1 }
 0x10a   : > { %v1394_v14 = vpop.f32.mrb[7].mxu1 }
 0x10b   : > { %v924_v15 = vadd.f32 %v1367_v11, %v1261_v51  ;;  %v970_v16 = vadd.f32 %v1392_v12, %v921_v10  ;;  %v1395_v17 = vadd.f32 %v1394_v14, %v1393_v13 }
 0x10d   : > { %v973_v18 = vadd.f32 %v1395_v17, %v924_v15 }
 0x11d   : > { %v1412_v19 = vpop.f32.mrb[8].mxu0 }
 0x11e   : > { %v1413_v20 = vpop.f32.mrb[9].mxu0 }
 0x11f   : > { %v1440_v21 = vpop.f32.mrb[8].mxu1  ;;  %v1414_v22 = vadd.f32 %v1413_v20, %v1412_v19  ;;  %v1415_v23 = vpop.f32.mrb[10].mxu0 }
 0x120   : > { %v1441_v24 = vpop.f32.mrb[9].mxu1  ;;  %v1416_v25 = vpop.f32.mrb[11].mxu0 }
 0x121   : > { %v1442_v26 = vadd.f32 %v1441_v24, %v1440_v21  ;;  %v1443_v27 = vpop.f32.mrb[10].mxu1  ;;  %v1011_v28 = vadd.f32 %v1414_v22, %v962_v1  ;;  %v1417_v29 = vadd.f32 %v1416_v25, %v1415_v23 }
 0x122   : > { %v1444_v30 = vpop.f32.mrb[11].mxu1 }
 0x123   : > { %v1445_v31 = vadd.f32 %v1444_v30, %v1443_v27  ;;  %v1014_v32 = vadd.f32 %v1417_v29, %v965_v2  ;;  %v1060_v33 = vadd.f32 %v1442_v26, %v1011_v28 }
 0x125   : > { %v1418_v34 = vpop.f32.mrb[12].mxu0  ;;  %v1063_v35 = vadd.f32 %v1445_v31, %v1014_v32 }
 0x126   : > { %v1419_v36 = vpop.f32.mrb[13].mxu0 }
 0x127   : > { %v1446_v37 = vpop.f32.mrb[12].mxu1  ;;  %v1420_v38 = vadd.f32 %v1419_v36, %v1418_v34  ;;  %v1421_v39 = vpop.f32.mrb[14].mxu0 }
 0x128   : > { %v1447_v40 = vpop.f32.mrb[13].mxu1  ;;  %v1422_v41 = vpop.f32.mrb[15].mxu0 }
 0x129   : > { %v1448_v42 = vadd.f32 %v1447_v40, %v1446_v37  ;;  %v1449_v43 = vpop.f32.mrb[14].mxu1  ;;  %v1019_v44 = vadd.f32 %v1420_v38, %v970_v16  ;;  %v1423_v45 = vadd.f32 %v1422_v41, %v1421_v39 }
 0x12a   : > { %v1450_v46 = vpop.f32.mrb[15].mxu1 }
 0x12b   : > { %v1451_v47 = vadd.f32 %v1450_v46, %v1449_v43  ;;  %v1022_v48 = vadd.f32 %v1423_v45, %v973_v18  ;;  %v1068_v49 = vadd.f32 %v1448_v42, %v1019_v44 }
 0x12d   : > { %v1071_v50 = vadd.f32 %v1451_v47, %v1022_v48 }
 0x13d   : > { %v1480_v51 = vpop.f32.mrb[16].mxu0 }
 0x13e   : > { %v1117_v52 = vadd.f32 %v1480_v51, %v1068_v49  ;;  %v1108_v53 = vpop.f32.mrb[17].mxu0 }
 0x13f   : > { %v1109_v54 = vadd.f32 %v1108_v53, %v1060_v33  ;;  %v1481_v55 = vpop.f32.mrb[18].mxu0 }
 0x140   : > { %1125 = vst [vmem:[%s192_s20 + $0x10] sm:$0xff] %v1117_v52  ;;  %v1120_v56 = vadd.f32 %v1481_v55, %v1071_v50  ;;  %v1111_v57 = vpop.f32.mrb[19].mxu0 }
 0x141   : > { %1123 = vst [vmem:[%s192_s20] sm:$0xff] %v1109_v54  ;;  %v1112_v58 = vadd.f32 %v1111_v57, %v1063_v35 }
 0x142   : > { %1126 = vst [vmem:[%s192_s20 + $0x18] sm:$0xff] %v1120_v56 }
 0x143   : > { %1124 = vst [vmem:[%s192_s20 + $0x8] sm:$0xff] %v1112_v58 }
 0x144 PF: > { %s13_s16 = sadd.s32 1, %s1633_s16   ;;  %s1974_s12 = smov %s1625_s14 }
 0x145   : > { %p10_p7 = scmp.ge.s32.totalorder %s13_s16, 6   ;;  %s1975_s13 = smov %s1629_s15 }
 0x146   : > { %s1976_s14 = smov %s1979_s17  ;;  %s1977_s15 = smov %s1983_s18 }
 0x147   :  { %12 = sbr.rel (!%p10_p7) target bundleno = 3 (0x3), region = 66 }

// kernel: transunet_forward.22
= control target key start
LH: loop header
LB: loop body
LE: loop exit
PB: predicated region body
PF: predicated region fallthrough
CT: control target
= control target key end

     0   :  { %s3758_s24 = smov 0   ;;  %s3760_s25 = smov 0   ;;  %s4656_s0 = inlined_call_operand.vmem [shape: f32[2,8,8,128], index: 0, kind: input, shape index: {}]   ;;  %s4657_s1 = inlined_call_operand.vmem [shape: f32[2,8,8,128], index: 1, kind: input, shape index: {}]   ;;  %s4658_s2 = inlined_call_operand.vmem [shape: bf16[2304,128], index: 2, kind: input, shape index: {}]   ;;  %s4659_s3 = inlined_call_operand.vmem [shape: f32[1,128], index: 3, kind: input, shape index: {}]   ;;  %s4660_s4 = inlined_call_operand.vmem [shape: f32[1,128], index: 4, kind: input, shape index: {}]   ;;  %s4661_s5 = inlined_call_operand.vmem [shape: f32[1,128], index: 5, kind: input, shape index: {}]   ;;  %s4662_s6 = inlined_call_operand.vmem [shape: f32[128,128], index: 6, kind: input, shape index: {}]   ;;  %s4663_s7 = inlined_call_operand.vmem [shape: f32[2,64,128], index: 7, kind: output, shape index: {}]  }
   0x1   :  { %s3762_s26 = smov 0  }
   0x2 LB: > { %s29_s27 = sadd.s32 1, %s3709_s25  ;;  %p2750_p0 = scmp.ge.s32.totalorder %s3713_s26, 1  ;;  %s3713_s26 = sphi %s3762_s26, %s17_s26   ;;  %s3709_s25 = sphi %s3760_s25, %s4665_s25   ;;  %s3705_s24 = sphi %s3758_s24, %s4664_s24  }
   0x3   : > { %p31_p1 = scmp.ge.s32.totalorder %s29_s27, 2  ;;  %p261_p2 = scmp.lt.s32.totalorder %s3713_s26, 3 }
   0x5   : > { %s4667_s27 = smov (%p31_p1, %s29_s27), 0  ;;  %p262_p3 = pnand %p2750_p0, %p261_p2 }
   0x6   : > { %v3544_v0 = vld [vmem:[%s4658_s2 + $0x40] sm:$0xff] (!%p262_p3)   ;;  %v3715_v3 = vmov (!%p262_p3), 0.0   ;;  %v3548_v5 = vld [vmem:[%s4658_s2 + $0x48] sm:$0xff] (!%p262_p3)   ;;  %v3552_v9 = vld [vmem:[%s4658_s2 + $0x50] sm:$0xff] (!%p262_p3)   ;;  %p302_p4 = scmp.lt.s32.totalorder (!%p262_p3), %s3705_s24, 1  ;;  %vm3717_vm0 = vmmov (!%p262_p3), 0  }
   0x7   : > { %265 = sbr.rel (%p262_p3) target bundleno = 911 (0x38f), region = 48  ;;  %v3545_v1 = vld [vmem:[%s4658_s2] sm:$0xff] (!%p262_p3)   ;;  %3005 = vmatprep.subr.bf16.mxu0 (!%p262_p3), %v3544_v0  ;;  %324 = vst [vmem:[#allocation2] sm:$0xff] (!%p262_p3), %v3715_v3  ;;  %325 = vst [vmem:[#allocation2 + $0x8] sm:$0x3] (!%p262_p3), %v3715_v3  ;;  %v3549_v6 = vld [vmem:[%s4658_s2 + $0x8] sm:$0xff] (!%p262_p3)  }
   0x8   : > { %v3546_v2 = vld [vmem:[%s4658_s2 + $0xc0] sm:$0xff] (!%p262_p3)   ;;  %326 = vst [vmem:[#allocation2 + $0x10] sm:$0xff] (!%p262_p3), %v3715_v3  ;;  %327 = vst [vmem:[#allocation2 + $0x18] sm:$0x3] (!%p262_p3), %v3715_v3  ;;  %3006 = vmatpush3.bf16.msra.mxu0 (!%p262_p3), %v3545_v1  ;;  %v3550_v7 = vld [vmem:[%s4658_s2 + $0xc8] sm:$0xff] (!%p262_p3)  }
   0x9   : > { %328 = vst [vmem:[#allocation2 + $0x20] sm:$0xff] (!%p262_p3), %v3715_v3  ;;  %329 = vst [vmem:[#allocation2 + $0x28] sm:$0x3] (!%p262_p3), %v3715_v3  ;;  %v3547_v4 = vld [vmem:[%s4658_s2 + $0x80] sm:$0xff] (!%p262_p3)   ;;  %3045 = vmatprep.subr.bf16.mxu1 (!%p262_p3), %v3546_v2  ;;  %3007 = vmatprep.subr.bf16.mxu0 (!%p262_p3), %v3548_v5  ;;  %v3551_v8 = vld [vmem:[%s4658_s2 + $0x88] sm:$0xff] (!%p262_p3)  }
   0xa   : > { %330 = vst [vmem:[#allocation2 + $0x30] sm:$0xff] (!%p262_p3), %v3715_v3  ;;  %331 = vst [vmem:[#allocation2 + $0x38] sm:$0x3] (!%p262_p3), %v3715_v3  ;;  %3046 = vmatpush3.bf16.msra.mxu1 (!%p262_p3), %v3547_v4  ;;  %v3553_v10 = vld [vmem:[%s4658_s2 + $0x10] sm:$0xff] (!%p262_p3)   ;;  %v3556_v13 = vld [vmem:[%s4658_s2 + $0x58] sm:$0xff] (!%p262_p3)  }
   0xb   : > { %332 = vst [vmem:[#allocation2 + $0x40] sm:$0xff] (!%p262_p3), %v3715_v3  ;;  %333 = vst [vmem:[#allocation2 + $0x48] sm:$0x3] (!%p262_p3), %v3715_v3  ;;  %3047 = vmatprep.subr.bf16.mxu1 (!%p262_p3), %v3550_v7  ;;  %v3554_v11 = vld [vmem:[%s4658_s2 + $0xd0] sm:$0xff] (!%p262_p3)   ;;  %v3557_v14 = vld [vmem:[%s4658_s2 + $0x18] sm:$0xff] (!%p262_p3)  }
   0xc   : > { %334 = vst [vmem:[#allocation2 + $0x50] sm:$0xff] (!%p262_p3), %v3715_v3  ;;  %335 = vst [vmem:[#allocation2 + $0x58] sm:$0x3] (!%p262_p3), %v3715_v3  ;;  %3008 = vmatpush3.bf16.msra.mxu0 (!%p262_p3), %v3549_v6  ;;  %v3555_v12 = vld [vmem:[%s4658_s2 + $0x90] sm:$0xff] (!%p262_p3)   ;;  %v3558_v15 = vld [vmem:[%s4658_s2 + $0xd8] sm:$0xff] (!%p262_p3)  }
   0xd   : > { %336 = vst [vmem:[#allocation2 + $0x60] sm:$0xff] (!%p262_p3), %v3715_v3  ;;  %337 = vst [vmem:[#allocation2 + $0x68] sm:$0x3] (!%p262_p3), %v3715_v3  ;;  %3009 = vmatprep.subr.bf16.mxu0 (!%p262_p3), %v3552_v9  ;;  %v3559_v16 = vld [vmem:[%s4658_s2 + $0x98] sm:$0xff] (!%p262_p3)   ;;  %v3560_v17 = vld [vmem:[%s4658_s2 + $0x60] sm:$0xff] (!%p262_p3)  }
   0xe   : > { %338 = vst [vmem:[#allocation2 + $0x70] sm:$0xff] %v3715_v3  ;;  %339 = vst [vmem:[#allocation2 + $0x78] sm:$0x3] %v3715_v3  ;;  %3048 = vmatpush3.bf16.msra.mxu1 %v3551_v8  ;;  %v3561_v18 = vld [vmem:[%s4658_s2 + $0x20] sm:$0xff]   ;;  %v3564_v21 = vld [vmem:[%s4658_s2 + $0x68] sm:$0xff]   ;;  %s4669_s24 = smov (!%p302_p4, %s3705_s24), 1 }
   0xf   : > { %340 = vst [vmem:[#allocation2 + $0x80] sm:$0xff] %v3715_v3  ;;  %341 = vst [vmem:[#allocation2 + $0x88] sm:$0x3] %v3715_v3  ;;  %3049 = vmatprep.subr.bf16.mxu1 %v3554_v11  ;;  %v3562_v19 = vld [vmem:[%s4658_s2 + $0xe0] sm:$0xff]   ;;  %v3565_v22 = vld [vmem:[%s4658_s2 + $0x28] sm:$0xff]   ;;  %s3898_s19 = sshll.u32 %s4669_s24, 6 }
  0x10   : > { %342 = vst [vmem:[#allocation2 + $0x90] sm:$0xff] %v3715_v3  ;;  %343 = vst [vmem:[#allocation2 + $0x98] sm:$0x3] %v3715_v3  ;;  %3010 = vmatpush3.bf16.msra.mxu0 %v3553_v10  ;;  %v3563_v20 = vld [vmem:[%s4658_s2 + $0xa0] sm:$0xff]   ;;  %v3566_v23 = vld [vmem:[%s4658_s2 + $0xe8] sm:$0xff]   ;;  %s3913_s24 = scalar_lea.vmem %s4656_s0, %s3898_s19  ;;  %s4217_s28 = scalar_lea.vmem %s4657_s1, %s3898_s19 }
  0x11   : > { %441 = vst [vmem:[#allocation3] sm:$0xff] %v3715_v3  ;;  %442 = vst [vmem:[#allocation3 + $0x8] sm:$0x3] %v3715_v3  ;;  %3011 = vmatprep.subr.bf16.mxu0 %v3556_v13  ;;  %v3567_v24 = vld [vmem:[%s4658_s2 + $0xa8] sm:$0xff]   ;;  %v3568_v25 = vld [vmem:[%s4658_s2 + $0x70] sm:$0xff]   ;;  %s320_s22 = scalar_lea.vmem %s4663_s7, %s3898_s19 }
  0x12   : > { %443 = vst [vmem:[#allocation3 + $0x10] sm:$0xff] %v3715_v3  ;;  %444 = vst [vmem:[#allocation3 + $0x18] sm:$0x3] %v3715_v3  ;;  %3050 = vmatpush3.bf16.msra.mxu1 %v3555_v12  ;;  %v3569_v26 = vld [vmem:[%s4658_s2 + $0x30] sm:$0xff]   ;;  %v3572_v29 = vld [vmem:[%s4658_s2 + $0x78] sm:$0xff]  }
  0x13   : > { %445 = vst [vmem:[#allocation3 + $0x20] sm:$0xff] %v3715_v3  ;;  %446 = vst [vmem:[#allocation3 + $0x28] sm:$0x3] %v3715_v3  ;;  %3051 = vmatprep.subr.bf16.mxu1 %v3558_v15  ;;  %v3570_v27 = vld [vmem:[%s4658_s2 + $0xf0] sm:$0xff]   ;;  %v3573_v30 = vld [vmem:[%s4658_s2 + $0x38] sm:$0xff]  }
  0x14   : > { %447 = vst [vmem:[#allocation3 + $0x30] sm:$0xff] %v3715_v3  ;;  %448 = vst [vmem:[#allocation3 + $0x38] sm:$0x3] %v3715_v3  ;;  %3012 = vmatpush3.bf16.msra.mxu0 %v3557_v14  ;;  %v3571_v28 = vld [vmem:[%s4658_s2 + $0xb0] sm:$0xff]   ;;  %v3574_v31 = vld [vmem:[%s4658_s2 + $0xf8] sm:$0xff]  }
  0x15   : > { %449 = vst [vmem:[#allocation3 + $0x40] sm:$0xff] %v3715_v3  ;;  %450 = vst [vmem:[#allocation3 + $0x48] sm:$0x3] %v3715_v3  ;;  %3013 = vmatprep.subr.bf16.mxu0 %v3560_v17  ;;  %v3922_v32 = vld [vmem:[%s3913_s24] sm:$0xff]  ;;  %v3575_v35 = vld [vmem:[%s4658_s2 + $0xb8] sm:$0xff]  }
  0x16   : > { %451 = vst [vmem:[#allocation3 + $0x50] sm:$0xff] %v3715_v3  ;;  %452 = vst [vmem:[#allocation3 + $0x58] sm:$0x3] %v3715_v3  ;;  %3052 = vmatpush3.bf16.msra.mxu1 %v3559_v16  ;;  %v371_v33 = vld [vmem:[#allocation2 + $0x1] sm:$0xff]  ;;  %v3953_v48 = vld [vmem:[%s3913_s24 + $0x10] sm:$0xff] }
  0x17   : > { %453 = vst [vmem:[#allocation3 + $0x60] sm:$0xff] %v3715_v3  ;;  %454 = vst [vmem:[#allocation3 + $0x68] sm:$0x3] %v3715_v3  ;;  %3053 = vmatprep.subr.bf16.mxu1 %v3562_v19  ;;  %v554_v34 = vpack.c.bf16 %v3922_v32, %v371_v33  ;;  %v3576_v36 = vld [vmem:[%s4658_s2 + $0x140] sm:$0xff]   ;;  %v3933_v37 = vld [vmem:[%s3913_s24 + $0x8] sm:$0xff] }
  0x18   : > { %455 = vst [vmem:[#allocation3 + $0x70] sm:$0xff] %v3715_v3  ;;  %456 = vst [vmem:[#allocation3 + $0x78] sm:$0x3] %v3715_v3  ;;  %3014 = vmatpush3.bf16.msra.mxu0 %v3561_v18  ;;  %v3578_v38 = vld [vmem:[%s4658_s2 + $0x1c0] sm:$0xff]   ;;  %v3580_v45 = vld [vmem:[%s4658_s2 + $0x148] sm:$0xff]   ;;  %v3961_v51 = vpack.c.bf16 %v3953_v48, %v3933_v37 }
  0x19   : > { %457 = vst [vmem:[#allocation3 + $0x80] sm:$0xff] %v3715_v3  ;;  %458 = vst [vmem:[#allocation3 + $0x88] sm:$0x3] %v3715_v3  ;;  %3015 = vmatprep.subr.bf16.mxu0 %v3564_v21  ;;  %1816 = vmatprep.mubr.bf16.mxu0 %v554_v34  ;;  %v379_v39 = vld [vmem:[#allocation2 + $0x2] sm:$0xff]  ;;  %v3967_v53 = vld [vmem:[%s3913_s24 + $0x18] sm:$0xff] }
  0x1a   : > { %459 = vst [vmem:[#allocation3 + $0x90] sm:$0xff] %v3715_v3  ;;  %460 = vst [vmem:[#allocation3 + $0x98] sm:$0x3] %v3715_v3  ;;  %3054 = vmatpush3.bf16.msra.mxu1 %v3563_v20  ;;  %v3577_v41 = vld [vmem:[%s4658_s2 + $0x100] sm:$0xff]   ;;  %v3581_v50 = vld [vmem:[%s4658_s2 + $0x108] sm:$0xff]  }
  0x1b   : > { %3055 = vmatprep.subr.bf16.mxu1 %v3566_v23  ;;  %353 = vst [vmem:[#allocation2 + $0x11] sm:$0xff] %v3922_v32  ;;  %354 = vst [vmem:[#allocation2 + $0x21] sm:$0xff] %v3933_v37  ;;  %v3579_v44 = vld [vmem:[%s4658_s2 + $0x180] sm:$0xff]   ;;  %v3582_v52 = vld [vmem:[%s4658_s2 + $0x1c8] sm:$0xff]  }
  0x1c   : > { %3016 = vmatpush3.bf16.msra.mxu0 %v3565_v22  ;;  %355 = vst [vmem:[#allocation2 + $0x31] sm:$0xff] %v3953_v48  ;;  %v3583_v54 = vld [vmem:[%s4658_s2 + $0x188] sm:$0xff]   ;;  %v3584_v55 = vld [vmem:[%s4658_s2 + $0x150] sm:$0xff]   ;;  %356 = vst [vmem:[#allocation2 + $0x41] sm:$0xff] %v3967_v53 }
  0x1d   : > { %3017 = vmatprep.subr.bf16.mxu0 %v3568_v25  ;;  %v3585_v56 = vld [vmem:[%s4658_s2 + $0x110] sm:$0xff]   ;;  %v3588_v59 = vld [vmem:[%s4658_s2 + $0x158] sm:$0xff]   ;;  %v4003_v4 = vld [vmem:[%s3913_s24 + $0x20] sm:$0xff] }
  0x1e   : > { %3056 = vmatpush3.bf16.msra.mxu1 %v3567_v24  ;;  %v3586_v58 = vld [vmem:[%s4658_s2 + $0x1d0] sm:$0xff]   ;;  %v3589_v0 = vld [vmem:[%s4658_s2 + $0x118] sm:$0xff]   ;;  %357 = vst [vmem:[#allocation2 + $0x51] sm:$0xff] %v4003_v4  ;;  %v4012_v7 = vpack.c.bf16 %v4003_v4, %v3967_v53  ;;  %v3592_v8 = vld [vmem:[%s4658_s2 + $0x160] sm:$0xff]  }
  0x1f   : > { %3057 = vmatprep.subr.bf16.mxu1 %v3570_v27  ;;  %v3587_v62 = vld [vmem:[%s4658_s2 + $0x190] sm:$0xff]   ;;  %v3590_v6 = vld [vmem:[%s4658_s2 + $0x1d8] sm:$0xff]   ;;  %v4018_v9 = vld [vmem:[%s3913_s24 + $0x28] sm:$0xff] }
  0x20   : > { %3018 = vmatpush3.bf16.msra.mxu0 %v3569_v26  ;;  %v3591_v10 = vld [vmem:[%s4658_s2 + $0x198] sm:$0xff]   ;;  %358 = vst [vmem:[#allocation2 + $0x61] sm:$0xff] %v4018_v9  ;;  %v3593_v11 = vld [vmem:[%s4658_s2 + $0x120] sm:$0xff]   ;;  %v3596_v15 = vld [vmem:[%s4658_s2 + $0x168] sm:$0xff]  }
  0x21   : > { %3019 = vmatprep.subr.bf16.mxu0 %v3572_v29  ;;  %v3594_v13 = vld [vmem:[%s4658_s2 + $0x1e0] sm:$0xff]   ;;  %v3597_v18 = vld [vmem:[%s4658_s2 + $0x128] sm:$0xff]   ;;  %v4055_v23 = vld [vmem:[%s3913_s24 + $0x30] sm:$0xff] }
  0x22   : > { %3058 = vmatpush3.bf16.msra.mxu1 %v3571_v28  ;;  %v364_v40 = vld [vmem:[#allocation2 + $0x10] sm:$0xff]  ;;  %v2758_v46 = vld [vmem:[#allocation2 + $0x20] sm:$0xff]  ;;  %v3598_v20 = vld [vmem:[%s4658_s2 + $0x1e8] sm:$0xff]   ;;  %359 = vst [vmem:[#allocation2 + $0x71] sm:$0xff] %v4055_v23  ;;  %v4061_v25 = vpack.c.bf16 %v4055_v23, %v4018_v9 }
  0x23   : > { %3059 = vmatprep.subr.bf16.mxu1 %v3574_v31  ;;  %v3942_v42 = vld [vmem:[#allocation2 + $0x12] sm:$0xff]  ;;  %v553_v43 = vpack.c.bf16 %v364_v40, %v3715_v3  ;;  %v556_v49 = vpack.c.bf16 %v2758_v46, %v364_v40  ;;  %v3980_v57 = vld [vmem:[#allocation2 + $0x22] sm:$0xff] }
  0x24   : > { %3020 = vmatpush3.bf16.msra.mxu0 %v3573_v30  ;;  %v555_v47 = vpack.c.bf16 %v3942_v42, %v379_v39  ;;  %v366_v60 = vld [vmem:[#allocation2 + $0x30] sm:$0xff]  ;;  %v2760_v1 = vld [vmem:[#allocation2 + $0x40] sm:$0xff]  ;;  %v3599_v26 = vld [vmem:[%s4658_s2 + $0x1a8] sm:$0xff]   ;;  %v558_v39 = vpack.c.bf16 %v3980_v57, %v3942_v42 }
  0x25   : > { %3085 = vmatprep.subr.bf16.mxu0 %v3576_v36  ;;  %1881 = vmatprep.mubr.bf16.mxu1 %v556_v49  ;;  %v3988_v61 = vld [vmem:[#allocation2 + $0x32] sm:$0xff]  ;;  %v3993_v63 = vpack.c.bf16 %v366_v60, %v2758_v46  ;;  %v574_v5 = vpack.c.bf16 %v2760_v1, %v366_v60  ;;  %v4029_v12 = vld [vmem:[#allocation2 + $0x42] sm:$0xff]  ;;  %v557_v49 = vpack.c.bf16 %v3933_v37, %v3922_v32 }
  0x26   : > { %3060 = vmatpush3.bf16.msra.mxu1 %v3575_v35  ;;  %v4000_v2 = vpack.c.bf16 %v3988_v61, %v3980_v57  ;;  %v3595_v14 = vld [vmem:[%s4658_s2 + $0x1a0] sm:$0xff]   ;;  %v368_v16 = vld [vmem:[#allocation2 + $0x50] sm:$0xff]  ;;  %v4070_v28 = vld [vmem:[%s3913_s24 + $0x38] sm:$0xff]  ;;  %v575_v57 = vpack.c.bf16 %v3967_v53, %v3953_v48 }
  0x27   : > { %3125 = vmatprep.subr.bf16.mxu1 %v3578_v38  ;;  %1817 = vmatmul.mubr.bf16.vlgmr.msra.gmra.mrb[0].mxu0 %v553_v43  ;;  %v4040_v17 = vld [vmem:[#allocation2 + $0x52] sm:$0xff]  ;;  %v4045_v19 = vpack.c.bf16 %v368_v16, %v2760_v1  ;;  %v2762_v21 = vld [vmem:[#allocation2 + $0x60] sm:$0xff]  ;;  %360 = vst [vmem:[#allocation2 + $0x81] sm:$0xff] %v4070_v28  ;;  %v3613_v32 = vld [vmem:[%s4658_s2 + $0x208] sm:$0xff]   ;;  %v593_v1 = vpack.c.bf16 %v4018_v9, %v4003_v4 }
  0x28   : > { %3086 = vmatpush3.bf16.msra.mxu0 %v3577_v41  ;;  %1824 = vmatprep.mubr.bf16.mxu0 %v3961_v51  ;;  %v4052_v22 = vpack.c.bf16 %v4040_v17, %v4029_v12  ;;  %v592_v24 = vpack.c.bf16 %v2762_v21, %v368_v16  ;;  %v3600_v27 = vld [vmem:[%s4658_s2 + $0x170] sm:$0xff]   ;;  %v385_v30 = vld [vmem:[#allocation2 + $0x62] sm:$0xff]  ;;  %v3604_v34 = vld [vmem:[%s4658_s2 + $0x178] sm:$0xff]   ;;  %v611_v16 = vpack.c.bf16 %v4070_v28, %v4055_v23 }
  0x29   : > { %3087 = vmatprep.subr.bf16.mxu0 %v3580_v45  ;;  %1882 = vmatmul.mubr.bf16.vlgmr.msra.gmra.mrb[0].mxu1 %v555_v47  ;;  %v3601_v29 = vld [vmem:[%s4658_s2 + $0x130] sm:$0xff]   ;;  %v3605_v38 = vld [vmem:[%s4658_s2 + $0x138] sm:$0xff]   ;;  %v3608_v46 = vld [vmem:[%s4658_s2 + $0x240] sm:$0xff]  }
  0x2a   : > { %3126 = vmatpush3.bf16.msra.mxu1 %v3579_v44  ;;  %1889 = vmatprep.mubr.bf16.mxu1 %v574_v5  ;;  %v3602_v31 = vld [vmem:[%s4658_s2 + $0x1f0] sm:$0xff]   ;;  %v3606_v41 = vld [vmem:[%s4658_s2 + $0x1f8] sm:$0xff]   ;;  %v3610_v47 = vld [vmem:[%s4658_s2 + $0x2c0] sm:$0xff]  }
  0x2b   : > { %3127 = vmatprep.subr.bf16.mxu1 %v3582_v52  ;;  %v3603_v33 = vld [vmem:[%s4658_s2 + $0x1b0] sm:$0xff]   ;;  %v3607_v42 = vld [vmem:[%s4658_s2 + $0x1b8] sm:$0xff]   ;;  %v576_v52 = vpack.c.bf16 %v4029_v12, %v3988_v61  ;;  %v3614_v37 = vld [vmem:[%s4658_s2 + $0x2c8] sm:$0xff]   ;;  %v594_v61 = vpack.c.bf16 %v385_v30, %v4040_v17 }
  0x2c   : > { %3088 = vmatpush3.bf16.msra.mxu0 %v3581_v50  ;;  %v370_v35 = vld [vmem:[#allocation2 + $0x70] sm:$0xff]  ;;  %v3609_v50 = vld [vmem:[%s4658_s2 + $0x200] sm:$0xff]   ;;  %v3620_v60 = vld [vmem:[%s4658_s2 + $0x258] sm:$0xff]  }
  0x2d   : > { %3089 = vmatprep.subr.bf16.mxu0 %v3584_v55  ;;  %v4087_v36 = vld [vmem:[#allocation2 + $0x72] sm:$0xff]  ;;  %v4094_v40 = vpack.c.bf16 %v370_v35, %v2762_v21  ;;  %v3611_v55 = vld [vmem:[%s4658_s2 + $0x280] sm:$0xff]   ;;  %v3629_v9 = vld [vmem:[%s4658_s2 + $0x228] sm:$0xff]  }
  0x2e   : > { %3128 = vmatpush3.bf16.msra.mxu1 %v3583_v54  ;;  %v4099_v43 = vld [vmem:[#allocation2 + $0x80] sm:$0xff]  ;;  %v4102_v44 = vpack.c.bf16 %v4087_v36, %v385_v30  ;;  %v3612_v54 = vld [vmem:[%s4658_s2 + $0x248] sm:$0xff]   ;;  %v3619_v48 = vld [vmem:[%s4658_s2 + $0x290] sm:$0xff]  }
  0x2f   : > { %3129 = vmatprep.subr.bf16.mxu1 %v3586_v58  ;;  %1825 = vmatmul.mubr.bf16.gmra.mrb[4].mxu0 %v3993_v63  ;;  %v610_v45 = vpack.c.bf16 %v4099_v43, %v370_v35  ;;  %v3617_v58 = vld [vmem:[%s4658_s2 + $0x210] sm:$0xff]   ;;  %v3621_v53 = vld [vmem:[%s4658_s2 + $0x218] sm:$0xff]   ;;  %v3625_v5 = vld [vmem:[%s4658_s2 + $0x220] sm:$0xff]   ;;  %v613_v21 = vpack.c.bf16 %v3715_v3, %v4099_v43 }
  0x30   : > { %3090 = vmatpush3.bf16.msra.mxu0 %v3585_v56  ;;  %1832 = vmatprep.mubr.bf16.mxu0 %v4012_v7  ;;  %v3615_v56 = vld [vmem:[%s4658_s2 + $0x288] sm:$0xff]   ;;  %v3627_v4 = vld [vmem:[%s4658_s2 + $0x2a0] sm:$0xff]   ;;  %v2796_v12 = vld [vmem:[#allocation2 + $0x91] sm:$0xff] }
  0x31   : > { %3091 = vmatprep.subr.bf16.mxu0 %v3588_v59  ;;  %1890 = vmatmul.mubr.bf16.gmra.mrb[4].mxu1 %v4000_v2  ;;  %v3618_v59 = vld [vmem:[%s4658_s2 + $0x2d0] sm:$0xff]   ;;  %v3637_v23 = vld [vmem:[%s4658_s2 + $0x238] sm:$0xff]   ;;  %v3640_v3 = vld [vmem:[%s4658_s2 + $0x340] sm:$0xff]  }
  0x32   : > { %3130 = vmatpush3.bf16.msra.mxu1 %v3587_v62  ;;  %1897 = vmatprep.mubr.bf16.mxu1 %v592_v24  ;;  %v3622_v62 = vld [vmem:[%s4658_s2 + $0x2d8] sm:$0xff]   ;;  %v3633_v17 = vld [vmem:[%s4658_s2 + $0x230] sm:$0xff]   ;;  %v4231_v24 = vld [vmem:[%s4217_s28] sm:$0xff] }
  0x33   : > { %3131 = vmatprep.subr.bf16.mxu1 %v3590_v6  ;;  %v3626_v6 = vld [vmem:[%s4658_s2 + $0x2e0] sm:$0xff]   ;;  %470 = vst [vmem:[#allocation3 + $0x11] sm:$0xff] %v4231_v24  ;;  %v4269_v43 = vld [vmem:[%s4217_s28 + $0x8] sm:$0xff] }
  0x34   : > { %3092 = vmatpush3.bf16.msra.mxu0 %v3589_v0  ;;  %v3623_v0 = vld [vmem:[%s4658_s2 + $0x298] sm:$0xff]   ;;  %v3641_v30 = vld [vmem:[%s4658_s2 + $0x300] sm:$0xff]   ;;  %471 = vst [vmem:[#allocation3 + $0x21] sm:$0xff] %v4269_v43 }
  0x35   : > { %3093 = vmatprep.subr.bf16.mxu0 %v3592_v8  ;;  %v4187_v8 = vld [vmem:[#allocation2 + $0x82] sm:$0xff] }
  0x36   : > { %3132 = vmatpush3.bf16.msra.mxu1 %v3591_v10  ;;  %v612_v10 = vpack.c.bf16 %v4187_v8, %v4087_v36  ;;  %v3644_v36 = vld [vmem:[%s4658_s2 + $0x348] sm:$0xff]  }
  0x37   : > { %3133 = vmatprep.subr.bf16.mxu1 %v3594_v13  ;;  %1833 = vmatmul.mubr.bf16.gmra.mrb[8].mxu0 %v4045_v19  ;;  %v3632_v13 = vld [vmem:[%s4658_s2 + $0x270] sm:$0xff]  }
  0x38   : > { %3094 = vmatpush3.bf16.msra.mxu0 %v3593_v11  ;;  %1840 = vmatprep.mubr.bf16.mxu0 %v4061_v25  ;;  %v3630_v11 = vld [vmem:[%s4658_s2 + $0x2e8] sm:$0xff]  }
  0x39   : > { %3095 = vmatprep.subr.bf16.mxu0 %v3596_v15  ;;  %1898 = vmatmul.mubr.bf16.gmra.mrb[8].mxu1 %v4052_v22  ;;  %v3631_v15 = vld [vmem:[%s4658_s2 + $0x2a8] sm:$0xff]  }
  0x3a   : > { %3134 = vmatpush3.bf16.msra.mxu1 %v3595_v14  ;;  %1905 = vmatprep.mubr.bf16.mxu1 %v610_v45  ;;  %v614_v14 = vpack.c.bf16 %v2796_v12, %v4070_v28  ;;  %v3642_v28 = vld [vmem:[%s4658_s2 + $0x3c0] sm:$0xff]   ;;  %v4272_v45 = vld [vmem:[%s4217_s28 + $0x10] sm:$0xff]  ;;  %v4378_v12 = vld [vmem:[%s4217_s28 + $0x28] sm:$0xff] }
  0x3b   : > { %3135 = vmatprep.subr.bf16.mxu1 %v3598_v20  ;;  %v3636_v20 = vld [vmem:[%s4658_s2 + $0x278] sm:$0xff]   ;;  %472 = vst [vmem:[#allocation3 + $0x31] sm:$0xff] %v4272_v45  ;;  %475 = vst [vmem:[#allocation3 + $0x61] sm:$0xff] %v4378_v12 }
  0x3c   : > { %3096 = vmatpush3.bf16.msra.mxu0 %v3597_v18  ;;  %v3634_v18 = vld [vmem:[%s4658_s2 + $0x2f0] sm:$0xff]  }
  0x3d   : > { %3097 = vmatprep.subr.bf16.mxu0 %v3600_v27  ;;  %v487_v27 = vld [vmem:[#allocation3 + $0x1] sm:$0xff] }
  0x3e   : > { %3136 = vmatpush3.bf16.msra.mxu1 %v3599_v26  ;;  %v3639_v26 = vld [vmem:[%s4658_s2 + $0x2b8] sm:$0xff]   ;;  %v563_v35 = vpack.c.bf16 %v4231_v24, %v487_v27 }
  0x3f   : > { %3137 = vmatprep.subr.bf16.mxu1 %v3602_v31  ;;  %1841 = vmatmul.mubr.bf16.gmra.mrb[12].mxu0 %v4094_v40  ;;  %v3643_v31 = vld [vmem:[%s4658_s2 + $0x380] sm:$0xff]  }
  0x40   : > { %3098 = vmatpush3.bf16.msra.mxu0 %v3601_v29  ;;  %1946 = vmatprep.mubr.bf16.mxu0 %v558_v39  ;;  %v495_v29 = vld [vmem:[#allocation3 + $0x2] sm:$0xff] }
  0x41   : > { %3099 = vmatprep.subr.bf16.mxu0 %v3604_v34  ;;  %1906 = vmatmul.mubr.bf16.gmra.mrb[12].mxu1 %v4102_v44  ;;  %v4254_v34 = vld [vmem:[#allocation3 + $0x12] sm:$0xff] }
  0x42   : > { %3138 = vmatpush3.bf16.msra.mxu1 %v3603_v33  ;;  %2011 = vmatprep.mubr.bf16.mxu1 %v3961_v51  ;;  %v3616_v51 = vld [vmem:[%s4658_s2 + $0x250] sm:$0xff]  }
  0x43   : > { %3139 = vmatprep.subr.bf16.mxu1 %v3606_v41  ;;  %v4252_v33 = vld [vmem:[#allocation3 + $0x10] sm:$0xff]  ;;  %v3646_v41 = vld [vmem:[%s4658_s2 + $0x3c8] sm:$0xff]  }
  0x44   : > { %3100 = vmatpush3.bf16.msra.mxu0 %v3605_v38  ;;  %v4260_v38 = vld [vmem:[#allocation2] sm:$0xff] }
  0x45   : > { %3165 = vmatprep.subr.bf16.mxu0 %v3608_v46  ;;  %v562_v39 = vpack.c.bf16 %v4252_v33, %v4260_v38  ;;  %v3647_v46 = vld [vmem:[%s4658_s2 + $0x388] sm:$0xff]  }
  0x46   : > { %3140 = vmatpush3.bf16.msra.mxu1 %v3607_v42  ;;  %v3645_v42 = vld [vmem:[%s4658_s2 + $0x308] sm:$0xff]  }
  0x47   : > { %3205 = vmatprep.subr.bf16.mxu1 %v3610_v47  ;;  %1947 = vmatmul.mubr.bf16.vlgmr.msra.gmra.mrb[16].mxu0 %v557_v49  ;;  %v3648_v47 = vld [vmem:[%s4658_s2 + $0x350] sm:$0xff]  }
  0x48   : > { %3166 = vmatpush3.bf16.msra.mxu0 %v3609_v50  ;;  %1954 = vmatprep.mubr.bf16.mxu0 %v576_v52  ;;  %v3650_v49 = vld [vmem:[%s4658_s2 + $0x3d0] sm:$0xff]   ;;  %v4291_v50 = vld [vmem:[#allocation3 + $0x22] sm:$0xff] }
  0x49   : > { %3167 = vmatprep.subr.bf16.mxu0 %v3612_v54  ;;  %2012 = vmatmul.mubr.bf16.vlgmr.msra.gmra.mrb[16].mxu1 %v3993_v63  ;;  %v3624_v63 = vld [vmem:[%s4658_s2 + $0x260] sm:$0xff]   ;;  %v3649_v52 = vld [vmem:[%s4658_s2 + $0x310] sm:$0xff]  }
  0x4a   : > { %3206 = vmatpush3.bf16.msra.mxu1 %v3611_v55  ;;  %2019 = vmatprep.mubr.bf16.mxu1 %v4012_v7  ;;  %v3628_v7 = vld [vmem:[%s4658_s2 + $0x268] sm:$0xff]   ;;  %v3651_v54 = vld [vmem:[%s4658_s2 + $0x390] sm:$0xff]  }
  0x4b   : > { %3207 = vmatprep.subr.bf16.mxu1 %v3614_v37  ;;  %v4299_v55 = vld [vmem:[#allocation3 + $0x30] sm:$0xff]  ;;  %v4305_v37 = vpack.c.bf16 %v4272_v45, %v4269_v43 }
  0x4c   : > { %3168 = vmatpush3.bf16.msra.mxu0 %v3613_v32  ;;  %v4301_v32 = vld [vmem:[#allocation3 + $0x32] sm:$0xff] }
  0x4d   : > { %3169 = vmatprep.subr.bf16.mxu0 %v3616_v51  ;;  %v3652_v51 = vld [vmem:[%s4658_s2 + $0x358] sm:$0xff]  }
  0x4e   : > { %3208 = vmatpush3.bf16.msra.mxu1 %v3615_v56 }
  0x4f   : > { %1955 = vmatmul.mubr.bf16.gmra.mrb[20].mxu0 %v575_v57  ;;  %3209 = vmatprep.subr.bf16.mxu1 %v3618_v59  ;;  %v4316_v57 = vpack.c.bf16 %v4301_v32, %v4291_v50  ;;  %v4322_v59 = vld [vmem:[%s4217_s28 + $0x18] sm:$0xff] }
  0x50   : > { %3170 = vmatpush3.bf16.msra.mxu0 %v3617_v58  ;;  %1962 = vmatprep.mubr.bf16.mxu0 %v594_v61  ;;  %v3654_v58 = vld [vmem:[%s4658_s2 + $0x3d8] sm:$0xff]   ;;  %473 = vst [vmem:[#allocation3 + $0x41] sm:$0xff] %v4322_v59 }
  0x51   : > { %3171 = vmatprep.subr.bf16.mxu0 %v3620_v60  ;;  %2020 = vmatmul.mubr.bf16.gmra.mrb[20].mxu1 %v4045_v19  ;;  %v3635_v19 = vld [vmem:[%s4658_s2 + $0x2b0] sm:$0xff]   ;;  %v4325_v60 = vld [vmem:[%s4217_s28 + $0x20] sm:$0xff]  ;;  %v3653_v61 = vld [vmem:[%s4658_s2 + $0x318] sm:$0xff]  }
  0x52   : > { %3210 = vmatpush3.bf16.msra.mxu1 %v3619_v48  ;;  %2027 = vmatprep.mubr.bf16.mxu1 %v4061_v25  ;;  %v3638_v25 = vld [vmem:[%s4658_s2 + $0x2f8] sm:$0xff]   ;;  %474 = vst [vmem:[#allocation3 + $0x51] sm:$0xff] %v4325_v60 }
  0x53   : > { %3211 = vmatprep.subr.bf16.mxu1 %v3622_v62  ;;  %v3655_v48 = vld [vmem:[%s4658_s2 + $0x398] sm:$0xff]   ;;  %v3658_v62 = vld [vmem:[%s4658_s2 + $0x3e0] sm:$0xff]  }
  0x54   : > { %3172 = vmatpush3.bf16.msra.mxu0 %v3621_v53  ;;  %v3656_v53 = vld [vmem:[%s4658_s2 + $0x360] sm:$0xff]  }
  0x55   : > { %3173 = vmatprep.subr.bf16.mxu0 %v3624_v63 }
  0x56   : > { %3212 = vmatpush3.bf16.msra.mxu1 %v3623_v0  ;;  %v3657_v0 = vld [vmem:[%s4658_s2 + $0x320] sm:$0xff]  }
  0x57   : > { %1963 = vmatmul.mubr.bf16.gmra.mrb[24].mxu0 %v593_v1  ;;  %3213 = vmatprep.subr.bf16.mxu1 %v3626_v6  ;;  %v4347_v63 = vld [vmem:[#allocation3 + $0x42] sm:$0xff] }
  0x58   : > { %3174 = vmatpush3.bf16.msra.mxu0 %v3625_v5  ;;  %1970 = vmatprep.mubr.bf16.mxu0 %v612_v10  ;;  %v3659_v1 = vld [vmem:[%s4658_s2 + $0x3a0] sm:$0xff]  }
  0x59   : > { %3175 = vmatprep.subr.bf16.mxu0 %v3628_v7  ;;  %2028 = vmatmul.mubr.bf16.gmra.mrb[24].mxu1 %v4094_v40  ;;  %v564_v40 = vpack.c.bf16 %v4254_v34, %v495_v29  ;;  %v4355_v5 = vld [vmem:[#allocation3 + $0x50] sm:$0xff]  ;;  %v4361_v7 = vpack.c.bf16 %v4325_v60, %v4322_v59  ;;  %v3670_v29 = vld [vmem:[%s4658_s2 + $0x3f8] sm:$0xff]  }
  0x5a   : > { %3214 = vmatpush3.bf16.msra.mxu1 %v3627_v4  ;;  %2035 = vmatprep.mubr.bf16.mxu1 %v614_v14  ;;  %v4357_v6 = vld [vmem:[#allocation3 + $0x52] sm:$0xff]  ;;  %v3660_v4 = vld [vmem:[%s4658_s2 + $0x368] sm:$0xff]  }
  0x5b   : > { %3215 = vmatprep.subr.bf16.mxu1 %v3630_v11  ;;  %v4372_v10 = vpack.c.bf16 %v4357_v6, %v4347_v63  ;;  %v3662_v11 = vld [vmem:[%s4658_s2 + $0x3e8] sm:$0xff]  }
  0x5c   : > { %3176 = vmatpush3.bf16.msra.mxu0 %v3629_v9  ;;  %v3661_v14 = vld [vmem:[%s4658_s2 + $0x328] sm:$0xff]  }
  0x5d   : > { %3177 = vmatprep.subr.bf16.mxu0 %v3632_v13  ;;  %v4381_v13 = vld [vmem:[%s4217_s28 + $0x30] sm:$0xff] }
  0x5e   : > { %3216 = vmatpush3.bf16.msra.mxu1 %v3631_v15  ;;  %476 = vst [vmem:[#allocation3 + $0x71] sm:$0xff] %v4381_v13  ;;  %v3663_v15 = vld [vmem:[%s4658_s2 + $0x3a8] sm:$0xff]  }
  0x5f   : > { %1971 = vmatmul.mubr.bf16.gmra.mrb[28].mxu0 %v611_v16  ;;  %3217 = vmatprep.subr.bf16.mxu1 %v3634_v18  ;;  %v3664_v16 = vld [vmem:[%s4658_s2 + $0x370] sm:$0xff]  }
  0x60   : > { %3178 = vmatpush3.bf16.msra.mxu0 %v3633_v17  ;;  %2076 = vmatprep.mubr.bf16.mxu0 %v562_v39  ;;  %v3666_v17 = vld [vmem:[%s4658_s2 + $0x3f0] sm:$0xff]   ;;  %v567_v39 = vpack.c.bf16 %v4291_v50, %v4254_v34  ;;  %v3679_v50 = vld [vmem:[%s4658_s2 + $0x418] sm:$0xff]  }
  0x61   : > { %3179 = vmatprep.subr.bf16.mxu0 %v3636_v20  ;;  %2036 = vmatmul.mubr.bf16.gmra.mrb[28].mxu1 %v613_v21  ;;  %v2804_v18 = vld [vmem:[#allocation2 + $0x92] sm:$0xff] }
  0x62   : > { %3218 = vmatpush3.bf16.msra.mxu1 %v3635_v19  ;;  %2141 = vmatprep.mubr.bf16.mxu1 %v564_v40  ;;  %v4403_v19 = vld [vmem:[#allocation3 + $0x62] sm:$0xff]  ;;  %v3665_v20 = vld [vmem:[%s4658_s2 + $0x330] sm:$0xff]  }
  0x63   : > { %3219 = vmatprep.subr.bf16.mxu1 %v3638_v25  ;;  %v3673_v40 = vld [vmem:[%s4658_s2 + $0x400] sm:$0xff]   ;;  %v3676_v34 = vld [vmem:[%s4658_s2 + $0x450] sm:$0xff]  }
  0x64   : > { %3180 = vmatpush3.bf16.msra.mxu0 %v3637_v23  ;;  %v615_v23 = vpack.c.bf16 %v2804_v18, %v4187_v8  ;;  %v3668_v8 = vld [vmem:[%s4658_s2 + $0x378] sm:$0xff]  }
  0x65   : > { %3245 = vmatprep.subr.bf16.mxu0 %v3640_v3  ;;  %v4408_v21 = vld [vmem:[#allocation3 + $0x70] sm:$0xff]  ;;  %v4415_v3 = vpack.c.bf16 %v4381_v13, %v4378_v12 }
  0x66   : > { %3220 = vmatpush3.bf16.msra.mxu1 %v3639_v26  ;;  %v4411_v25 = vld [vmem:[#allocation3 + $0x72] sm:$0xff] }
  0x67   : > { %3285 = vmatprep.subr.bf16.mxu1 %v3642_v28  ;;  %2077 = vmatmul.mubr.bf16.vlgmr.msra.gmra.mrb[32].mxu0 %v4000_v2  ;;  %v4289_v2 = vld [vmem:[#allocation3 + $0x20] sm:$0xff]  ;;  %v3667_v26 = vld [vmem:[%s4658_s2 + $0x3b0] sm:$0xff]   ;;  %v4424_v28 = vpack.c.bf16 %v4411_v25, %v4403_v19 }
  0x68   : > { %3246 = vmatpush3.bf16.msra.mxu0 %v3641_v30  ;;  %v4312_v56 = vpack.c.bf16 %v4299_v55, %v4289_v2  ;;  %v566_v30 = vpack.c.bf16 %v4269_v43, %v4231_v24  ;;  %v565_v24 = vpack.c.bf16 %v4289_v2, %v4252_v33  ;;  %v3674_v43 = vld [vmem:[%s4658_s2 + $0x448] sm:$0xff]   ;;  %v3678_v2 = vld [vmem:[%s4658_s2 + $0x458] sm:$0xff]  }
  0x69   : > { %2142 = vmatmul.mubr.bf16.vlgmr.msra.gmra.mrb[32].mxu1 %v563_v35  ;;  %3247 = vmatprep.subr.bf16.mxu0 %v3644_v36  ;;  %v3671_v35 = vld [vmem:[%s4658_s2 + $0x3b8] sm:$0xff]   ;;  %v3672_v36 = vld [vmem:[%s4658_s2 + $0x440] sm:$0xff]   ;;  %v3675_v33 = vld [vmem:[%s4658_s2 + $0x408] sm:$0xff]  }
  0x6a   : > { %3286 = vmatpush3.bf16.msra.mxu1 %v3643_v31  ;;  %2084 = vmatprep.mubr.bf16.mxu0 %v4312_v56  ;;  %v3669_v31 = vld [vmem:[%s4658_s2 + $0x338] sm:$0xff]  }
  0x6b   : > { %3287 = vmatprep.subr.bf16.mxu1 %v3646_v41  ;;  %2149 = vmatprep.mubr.bf16.mxu1 %v4316_v57  ;;  %v584_v41 = vpack.c.bf16 %v4322_v59, %v4272_v45  ;;  %v468_v45 = vld [vmem:[%s4217_s28 + $0x38] sm:$0xff] }
  0x6c   : > { %3248 = vmatpush3.bf16.msra.mxu0 %v3645_v42  ;;  %477 = vst [vmem:[#allocation3 + $0x81] sm:$0xff] %v468_v45 }
  0x6d   : > { %3249 = vmatprep.subr.bf16.mxu0 %v3648_v47  ;;  %v3677_v47 = vld [vmem:[%s4658_s2 + $0x410] sm:$0xff]  }
  0x6e   : > { %3288 = vmatpush3.bf16.msra.mxu1 %v3647_v46  ;;  %v585_v46 = vpack.c.bf16 %v4347_v63, %v4301_v32  ;;  %v603_v32 = vpack.c.bf16 %v4403_v19, %v4357_v6  ;;  %v3686_v63 = vld [vmem:[%s4658_s2 + $0x478] sm:$0xff]  }
  0x6f   : > { %3289 = vmatprep.subr.bf16.mxu1 %v3650_v49  ;;  %2085 = vmatmul.mubr.bf16.gmra.mrb[36].mxu0 %v4052_v22  ;;  %v4345_v22 = vld [vmem:[#allocation3 + $0x40] sm:$0xff]  ;;  %v602_v49 = vpack.c.bf16 %v4378_v12, %v4325_v60  ;;  %v3683_v60 = vld [vmem:[%s4658_s2 + $0x428] sm:$0xff]   ;;  %v2844_v6 = vld [vmem:[#allocation3 + $0x91] sm:$0xff] }
  0x70   : > { %3250 = vmatpush3.bf16.msra.mxu0 %v3649_v52  ;;  %v4368_v9 = vpack.c.bf16 %v4355_v5, %v4345_v22  ;;  %v583_v42 = vpack.c.bf16 %v4345_v22, %v4299_v55  ;;  %v3680_v52 = vld [vmem:[%s4658_s2 + $0x460] sm:$0xff]   ;;  %v3685_v22 = vld [vmem:[%s4658_s2 + $0x430] sm:$0xff]  }
  0x71   : > { %2150 = vmatmul.mubr.bf16.gmra.mrb[36].mxu1 %v4305_v37  ;;  %3251 = vmatprep.subr.bf16.mxu0 %v3652_v51  ;;  %v3681_v51 = vld [vmem:[%s4658_s2 + $0x420] sm:$0xff]  }
  0x72   : > { %3290 = vmatpush3.bf16.msra.mxu1 %v3651_v54  ;;  %2092 = vmatprep.mubr.bf16.mxu0 %v4368_v9 }
  0x73   : > { %3291 = vmatprep.subr.bf16.mxu1 %v3654_v58  ;;  %2157 = vmatprep.mubr.bf16.mxu1 %v4372_v10  ;;  %v2812_v54 = vld [vmem:[#allocation3 + $0x80] sm:$0xff]  ;;  %v3682_v58 = vld [vmem:[%s4658_s2 + $0x468] sm:$0xff]  }
  0x74   : > { %3252 = vmatpush3.bf16.msra.mxu0 %v3653_v61  ;;  %v622_v59 = vpack.c.bf16 %v4260_v38, %v2812_v54  ;;  %v2828_v61 = vld [vmem:[#allocation3 + $0x82] sm:$0xff] }
  0x75   : > { %3253 = vmatprep.subr.bf16.mxu0 %v3656_v53  ;;  %v619_v53 = vpack.c.bf16 %v2812_v54, %v4408_v21 }
  0x76   : > { %3292 = vmatpush3.bf16.msra.mxu1 %v3655_v48  ;;  %v3684_v48 = vld [vmem:[%s4658_s2 + $0x470] sm:$0xff]  }
  0x77   : > { %3293 = vmatprep.subr.bf16.mxu1 %v3658_v62  ;;  %2093 = vmatmul.mubr.bf16.gmra.mrb[40].mxu0 %v4102_v44  ;;  %v4401_v44 = vld [vmem:[#allocation3 + $0x60] sm:$0xff]  ;;  %v621_v62 = vpack.c.bf16 %v2828_v61, %v4411_v25 }
  0x78   : > { %3254 = vmatpush3.bf16.msra.mxu0 %v3657_v0  ;;  %v616_v27 = vpack.c.bf16 %v4408_v21, %v4401_v44  ;;  %v601_v55 = vpack.c.bf16 %v4401_v44, %v4355_v5  ;;  %v3687_v0 = vld [vmem:[%s4658_s2 + $0x438] sm:$0xff]  }
  0x79   : > { %2158 = vmatmul.mubr.bf16.gmra.mrb[40].mxu1 %v4361_v7  ;;  %3255 = vmatprep.subr.bf16.mxu0 %v3660_v4  ;;  %v623_v4 = vpack.c.bf16 %v2844_v6, %v468_v45 }
  0x7a   : > { %3294 = vmatpush3.bf16.msra.mxu1 %v3659_v1  ;;  %2100 = vmatprep.mubr.bf16.mxu0 %v616_v27  ;;  %v2852_v1 = vld [vmem:[#allocation3 + $0x92] sm:$0xff] }
  0x7b   : > { %3295 = vmatprep.subr.bf16.mxu1 %v3662_v11  ;;  %2165 = vmatprep.mubr.bf16.mxu1 %v4424_v28  ;;  %v624_v5 = vpack.c.bf16 %v2852_v1, %v2828_v61 }
  0x7c   : > { %3256 = vmatpush3.bf16.msra.mxu0 %v3661_v14 }
  0x7d   : > { %3257 = vmatprep.subr.bf16.mxu0 %v3664_v16 }
  0x7e   : > { %3296 = vmatpush3.bf16.msra.mxu1 %v3663_v15 }
  0x7f   : > { %3297 = vmatprep.subr.bf16.mxu1 %v3666_v17  ;;  %2101 = vmatmul.mubr.bf16.gmra.mrb[44].mxu0 %v615_v23 }
  0x80   : > { %3258 = vmatpush3.bf16.msra.mxu0 %v3665_v20  ;;  %2206 = vmatprep.mubr.bf16.mxu0 %v566_v30 }
  0x81   : > { %2166 = vmatmul.mubr.bf16.gmra.mrb[44].mxu1 %v4415_v3  ;;  %3259 = vmatprep.subr.bf16.mxu0 %v3668_v8 }
  0x82   : > { %3298 = vmatpush3.bf16.msra.mxu1 %v3667_v26  ;;  %2271 = vmatprep.mubr.bf16.mxu1 %v4312_v56  ;;  %v620_v56 = vpack.c.bf16 %v468_v45, %v4381_v13 }
  0x83   : > { %3299 = vmatprep.subr.bf16.mxu1 %v3670_v29 }
  0x84   : > { %3260 = vmatpush3.bf16.msra.mxu0 %v3669_v31 }
  0x85   : > { %3325 = vmatprep.subr.bf16.mxu0 %v3672_v36 }
  0x86   : > { %3300 = vmatpush3.bf16.msra.mxu1 %v3671_v35 }
  0x87   : > { %2207 = vmatmul.mubr.bf16.vlgmr.msra.gmra.mrb[48].mxu0 %v565_v24 }
  0x88   : > { %3326 = vmatpush3.bf16.msra.mxu0 %v3673_v40  ;;  %2214 = vmatprep.mubr.bf16.mxu0 %v584_v41 }
  0x89   : > { %2272 = vmatmul.mubr.bf16.vlgmr.msra.gmra.mrb[48].mxu1 %v567_v39  ;;  %3327 = vmatprep.subr.bf16.mxu0 %v3674_v43 }
  0x8a   : > { %2279 = vmatprep.mubr.bf16.mxu1 %v4368_v9 }
  0x8c   : > { %3328 = vmatpush3.bf16.msra.mxu0 %v3675_v33 }
  0x8d   : > { %3329 = vmatprep.subr.bf16.mxu0 %v3676_v34 }
  0x8f   : > { %2215 = vmatmul.mubr.bf16.gmra.mrb[52].mxu0 %v583_v42 }
  0x90   : > { %3330 = vmatpush3.bf16.msra.mxu0 %v3677_v47  ;;  %2222 = vmatprep.mubr.bf16.mxu0 %v602_v49 }
  0x91   : > { %2280 = vmatmul.mubr.bf16.gmra.mrb[52].mxu1 %v585_v46  ;;  %3331 = vmatprep.subr.bf16.mxu0 %v3678_v2 }
  0x92   : > { %2287 = vmatprep.mubr.bf16.mxu1 %v616_v27 }
  0x94   : > { %3332 = vmatpush3.bf16.msra.mxu0 %v3679_v50 }
  0x95   : > { %3333 = vmatprep.subr.bf16.mxu0 %v3680_v52 }
  0x97   : > { %2223 = vmatmul.mubr.bf16.gmra.mrb[56].mxu0 %v601_v55 }
  0x98   : > { %3334 = vmatpush3.bf16.msra.mxu0 %v3681_v51  ;;  %2230 = vmatprep.mubr.bf16.mxu0 %v620_v56  ;;  %v2382_v56 = vld [vmem:[%s4662_s6] sm:$0xff] }
  0x99   : > { %2288 = vmatmul.mubr.bf16.gmra.mrb[56].mxu1 %v603_v32  ;;  %3335 = vmatprep.subr.bf16.mxu0 %v3682_v58  ;;  %v2383_v58 = vld [vmem:[%s4662_s6 + $0x8] sm:$0xff] }
  0x9a   : > { %2295 = vmatprep.mubr.bf16.mxu1 %v622_v59 }
  0x9c   : > { %3336 = vmatpush3.bf16.msra.mxu0 %v3683_v60  ;;  %v3470_v60 = vpack.c.bf16 %v2383_v58, %v2382_v56 }
  0x9d   : > { %3337 = vmatprep.subr.bf16.mxu0 %v3684_v48  ;;  %v3716_v48 = vmov 0.0|0.0  }
  0x9e   : > { %3469 = vmatprep.subr.bf16.mxu1 %v3716_v48 }
  0x9f   : > { %2231 = vmatmul.mubr.bf16.gmra.mrb[60].mxu0 %v619_v53  ;;  %3471 = vmatpush3.bf16.msra.mxu1 %v3470_v60 }
  0xa0   : > { %3338 = vmatpush3.bf16.msra.mxu0 %v3685_v22  ;;  %2336 = vmatprep.mubr.bf16.mxu0 %v4316_v57  ;;  %v4522_v57 = vld [vmem:[%s4659_s3] ss:$0 sm:$0xff] }
  0xa1   : > { %2296 = vmatmul.mubr.bf16.gmra.mrb[60].mxu1 %v621_v62  ;;  %3339 = vmatprep.subr.bf16.mxu0 %v3686_v63  ;;  %v2384_v63 = vld [vmem:[%s4662_s6 + $0x10] sm:$0xff] }
  0xa2   : > { %3472 = vmatprep.subr.bf16.mxu1 %v3716_v48  ;;  %3431 = vmatprep.mubr.msk.f32.mxu1 %vm3717_vm0, %v4260_v38 }
  0xa4   : > { %3340 = vmatpush3.bf16.msra.mxu0 %v3687_v0  ;;  %v2385_v0 = vld [vmem:[%s4662_s6 + $0x18] sm:$0xff] }
  0xa5   : > { %3493 = vmatprep.subr.bf16.mxu0 %v3716_v48  ;;  %v3473_v6 = vpack.c.bf16 %v2385_v0, %v2384_v63 }
  0xa7   : > { %2337 = vmatmul.mubr.bf16.vlgmr.msra.gmra.mrb[64].mxu0 %v4305_v37  ;;  %3474 = vmatpush3.bf16.msra.mxu1 %v3473_v6 }
  0xa8   : > { %2344 = vmatprep.mubr.bf16.mxu0 %v4372_v10  ;;  %3495 = vmatpush3.bf16.msra.mxu0 %v3470_v60 }
  0xa9   : > { %3496 = vmatprep.subr.bf16.mxu0 %v3716_v48  ;;  %3475 = vmatprep.subr.bf16.mxu1 %v3716_v48 }
  0xac   : > { %3498 = vmatpush3.bf16.msra.mxu0 %v3473_v6 }
  0xad   : > { %3499 = vmatprep.subr.bf16.mxu0 %v3716_v48 }
  0xaf   : > { %2345 = vmatmul.mubr.bf16.gmra.mrb[68].mxu0 %v4361_v7 }
  0xb0   : > { %2352 = vmatprep.mubr.bf16.mxu0 %v4424_v28 }
  0xb7   : > { %2353 = vmatmul.mubr.bf16.gmra.mrb[72].mxu0 %v4415_v3 }
  0xb8   : > { %2360 = vmatprep.mubr.bf16.mxu0 %v624_v5 }
  0xbf   : > { %2361 = vmatmul.mubr.bf16.gmra.mrb[76].mxu0 %v623_v4 }
  0xc0   : > { %3466 = vmatprep.mubr.msk.f32.mxu0 %vm3717_vm0, %v4260_v38 }
  0xfa   : > { %v3021_v9 = vpop.f32.mrb[0].mxu0 }
  0xfb   : > { %v3022_v37 = vpop.f32.mrb[1].mxu0 }
  0xfc   : > { %v3023_v10 = vadd.f32 %v3022_v37, %v3021_v9  ;;  %v3024_v11 = vpop.f32.mrb[2].mxu0  ;;  %v3061_v7 = vpop.f32.mrb[0].mxu1 }
  0xfd   : > { %v3025_v12 = vpop.f32.mrb[3].mxu0  ;;  %v3062_v15 = vpop.f32.mrb[1].mxu1 }
  0xfe   : > { %v1819_v13 = vadd.f32 %v3023_v10, %v4522_v57  ;;  %v3026_v14 = vadd.f32 %v3025_v12, %v3024_v11  ;;  %v3063_v16 = vadd.f32 %v3062_v15, %v3061_v7  ;;  %v3064_v17 = vpop.f32.mrb[2].mxu1 }
  0xff   : > { %v3065_v44 = vpop.f32.mrb[3].mxu1 }
 0x100   : > { %v1822_v18 = vadd.f32 %v3026_v14, %v4522_v57  ;;  %v4526_v19 = vadd.f32 %v3063_v16, %v1819_v13  ;;  %v3066_v20 = vadd.f32 %v3065_v44, %v3064_v17  ;;  %v2386_v13 = vld [vmem:[%s4662_s6 + $0x20] sm:$0xff]  ;;  %v2387_v14 = vld [vmem:[%s4662_s6 + $0x28] sm:$0xff] }
 0x101   : > { %v3476_v17 = vpack.c.bf16 %v2387_v14, %v2386_v13 }
 0x102   : > { %v4528_v21 = vadd.f32 %v3066_v20, %v1822_v18  ;;  %v3027_v23 = vpop.f32.mrb[4].mxu0 }
 0x103   : > { %v3028_v25 = vpop.f32.mrb[5].mxu0  ;;  %3477 = vmatpush3.bf16.msra.mxu1 %v3476_v17  ;;  %3501 = vmatpush3.bf16.msra.mxu0 %v3476_v17 }
 0x104   : > { %v3029_v3 = vadd.f32 %v3028_v25, %v3027_v23  ;;  %v3030_v26 = vpop.f32.mrb[6].mxu0  ;;  %v3067_v27 = vpop.f32.mrb[4].mxu1  ;;  %3478 = vmatprep.subr.bf16.mxu1 %v3716_v48  ;;  %v2388_v25 = vld [vmem:[%s4662_s6 + $0x30] sm:$0xff]  ;;  %3502 = vmatprep.subr.bf16.mxu0 %v3716_v48 }
 0x105   : > { %v3031_v28 = vpop.f32.mrb[7].mxu0  ;;  %v3068_v30 = vpop.f32.mrb[5].mxu1 }
 0x106   : > { %v1827_v8 = vadd.f32 %v3029_v3, %v4522_v57  ;;  %v3032_v29 = vadd.f32 %v3031_v28, %v3030_v26  ;;  %v3069_v31 = vadd.f32 %v3068_v30, %v3067_v27  ;;  %v3070_v35 = vpop.f32.mrb[6].mxu1  ;;  %v2389_v3 = vld [vmem:[%s4662_s6 + $0x38] sm:$0xff] }
 0x107   : > { %v3071_v24 = vpop.f32.mrb[7].mxu1  ;;  %v3479_v28 = vpack.c.bf16 %v2389_v3, %v2388_v25 }
 0x108   : > { %v1830_v36 = vadd.f32 %v3032_v29, %v4522_v57  ;;  %v4532_v39 = vadd.f32 %v3069_v31, %v1827_v8  ;;  %v3072_v40 = vadd.f32 %v3071_v24, %v3070_v35 }
 0x109   : > { %3480 = vmatpush3.bf16.msra.mxu1 %v3479_v28  ;;  %3504 = vmatpush3.bf16.msra.mxu0 %v3479_v28 }
 0x10a   : > { %v4534_v41 = vadd.f32 %v3072_v40, %v1830_v36  ;;  %v3033_v43 = vpop.f32.mrb[8].mxu0  ;;  %3481 = vmatprep.subr.bf16.mxu1 %v3716_v48  ;;  %v2390_v40 = vld [vmem:[%s4662_s6 + $0x40] sm:$0xff]  ;;  %3505 = vmatprep.subr.bf16.mxu0 %v3716_v48 }
 0x10b   : > { %v3034_v33 = vpop.f32.mrb[9].mxu0 }
 0x10c   : > { %v3035_v34 = vadd.f32 %v3034_v33, %v3033_v43  ;;  %v3036_v45 = vpop.f32.mrb[10].mxu0  ;;  %v3073_v42 = vpop.f32.mrb[8].mxu1  ;;  %v2391_v43 = vld [vmem:[%s4662_s6 + $0x48] sm:$0xff] }
 0x10d   : > { %v3037_v46 = vpop.f32.mrb[11].mxu0  ;;  %v3074_v2 = vpop.f32.mrb[9].mxu1 }
 0x10e   : > { %v1835_v47 = vadd.f32 %v3035_v34, %v4522_v57  ;;  %v3038_v49 = vadd.f32 %v3037_v46, %v3036_v45  ;;  %v3075_v50 = vadd.f32 %v3074_v2, %v3073_v42  ;;  %v3076_v52 = vpop.f32.mrb[10].mxu1  ;;  %v3482_v34 = vpack.c.bf16 %v2391_v43, %v2390_v40  ;;  %v2393_v2 = vld [vmem:[%s4662_s6 + $0x58] sm:$0xff] }
 0x10f   : > { %v3077_v55 = vpop.f32.mrb[11].mxu1 }
 0x110   : > { %v1838_v54 = vadd.f32 %v3038_v49, %v4522_v57  ;;  %v4538_v32 = vadd.f32 %v3075_v50, %v1835_v47  ;;  %v3078_v51 = vadd.f32 %v3077_v55, %v3076_v52  ;;  %3483 = vmatpush3.bf16.msra.mxu1 %v3482_v34  ;;  %3507 = vmatpush3.bf16.msra.mxu0 %v3482_v34  ;;  %v2392_v49 = vld [vmem:[%s4662_s6 + $0x50] sm:$0xff] }
 0x111   : > { %3484 = vmatprep.subr.bf16.mxu1 %v3716_v48  ;;  %3508 = vmatprep.subr.bf16.mxu0 %v3716_v48 }
 0x112   : > { %v4546_v59 = vadd.f32 %v3078_v51, %v1838_v54  ;;  %v3039_v61 = vpop.f32.mrb[12].mxu0  ;;  %v3485_v54 = vpack.c.bf16 %v2393_v2, %v2392_v49 }
 0x113   : > { %v3040_v53 = vpop.f32.mrb[13].mxu0 }
 0x114   : > { %v3041_v62 = vadd.f32 %v3040_v53, %v3039_v61  ;;  %v3042_v22 = vpop.f32.mrb[14].mxu0  ;;  %v3079_v1 = vpop.f32.mrb[12].mxu1  ;;  %3486 = vmatpush3.bf16.msra.mxu1 %v3485_v54  ;;  %3510 = vmatpush3.bf16.msra.mxu0 %v3485_v54 }
 0x115   : > { %v3043_v5 = vpop.f32.mrb[15].mxu0  ;;  %v3080_v37 = vpop.f32.mrb[13].mxu1  ;;  %3487 = vmatprep.subr.bf16.mxu1 %v3716_v48  ;;  %3511 = vmatprep.subr.bf16.mxu0 %v3716_v48 }
 0x116   : > { %v1843_v4 = vadd.f32 %v3041_v62, %v4522_v57  ;;  %v3044_v9 = vadd.f32 %v3043_v5, %v3042_v22  ;;  %v3081_v10 = vadd.f32 %v3080_v37, %v3079_v1  ;;  %v3082_v11 = vpop.f32.mrb[14].mxu1  ;;  %v2394_v62 = vld [vmem:[%s4662_s6 + $0x60] sm:$0xff]  ;;  %v2395_v22 = vld [vmem:[%s4662_s6 + $0x68] sm:$0xff]  ;;  %v2397_v37 = vld [vmem:[%s4662_s6 + $0x78] sm:$0xff] }
 0x117   : > { %v3083_v12 = vpop.f32.mrb[15].mxu1  ;;  %v3488_v0 = vpack.c.bf16 %v2395_v22, %v2394_v62 }
 0x118   : > { %v1846_v7 = vadd.f32 %v3044_v9, %v4522_v57  ;;  %v4568_v15 = vadd.f32 %v3081_v10, %v1843_v4  ;;  %v3084_v16 = vadd.f32 %v3083_v12, %v3082_v11  ;;  %v2396_v9 = vld [vmem:[%s4662_s6 + $0x70] sm:$0xff] }
 0x119   : > { %3489 = vmatpush3.bf16.msra.mxu1 %v3488_v0  ;;  %3513 = vmatpush3.bf16.msra.mxu0 %v3488_v0 }
 0x11a   : > { %v3101_v18 = vpop.f32.mrb[16].mxu0  ;;  %v4570_v44 = vadd.f32 %v3084_v16, %v1846_v7  ;;  %3490 = vmatprep.subr.bf16.mxu1 %v3716_v48  ;;  %3514 = vmatprep.subr.bf16.mxu0 %v3716_v48  ;;  %v3491_v7 = vpack.c.bf16 %v2397_v37, %v2396_v9 }
 0x11b   : > { %v3102_v57 = vpop.f32.mrb[17].mxu0 }
 0x11c   : > { %v3103_v20 = vadd.f32 %v3102_v57, %v3101_v18  ;;  %v3104_v23 = vpop.f32.mrb[18].mxu0  ;;  %v3141_v26 = vpop.f32.mrb[16].mxu1 }
 0x11d   : > { %v3105_v27 = vpop.f32.mrb[19].mxu0  ;;  %v3142_v30 = vpop.f32.mrb[17].mxu1  ;;  %3492 = vmatpush3.bf16.msra.mxu1 %v3491_v7  ;;  %3516 = vmatpush3.bf16.msra.mxu0 %v3491_v7 }
 0x11e   : > { %v1949_v8 = vadd.f32 %v3103_v20, %v4526_v19  ;;  %v3106_v29 = vadd.f32 %v3105_v27, %v3104_v23  ;;  %v3143_v31 = vadd.f32 %v3142_v30, %v3141_v26  ;;  %v3144_v35 = vpop.f32.mrb[18].mxu1 }
 0x11f   : > { %v3145_v24 = vpop.f32.mrb[19].mxu1 }
 0x120   : > { %v1952_v36 = vadd.f32 %v3106_v29, %v4528_v21  ;;  %v4590_v19 = vadd.f32 %v3143_v31, %v1949_v8  ;;  %v3146_v33 = vadd.f32 %v3145_v24, %v3144_v35 }
 0x122   : > { %v3107_v45 = vpop.f32.mrb[20].mxu0  ;;  %v4592_v42 = vadd.f32 %v3146_v33, %v1952_v36 }
 0x123   : > { %v3108_v21 = vpop.f32.mrb[21].mxu0 }
 0x124   : > { %v3109_v46 = vadd.f32 %v3108_v21, %v3107_v45  ;;  %v3110_v47 = vpop.f32.mrb[22].mxu0  ;;  %v3147_v50 = vpop.f32.mrb[20].mxu1 }
 0x125   : > { %v3111_v52 = vpop.f32.mrb[23].mxu0  ;;  %v3148_v56 = vpop.f32.mrb[21].mxu1 }
 0x126   : > { %v1957_v55 = vadd.f32 %v3109_v46, %v4532_v39  ;;  %v3112_v51 = vadd.f32 %v3111_v52, %v3110_v47  ;;  %v3149_v58 = vadd.f32 %v3148_v56, %v3147_v50  ;;  %v3150_v60 = vpop.f32.mrb[22].mxu1 }
 0x127   : > { %v3151_v53 = vpop.f32.mrb[23].mxu1 }
 0x128   : > { %v1960_v61 = vadd.f32 %v3112_v51, %v4534_v41  ;;  %v4612_v39 = vadd.f32 %v3149_v58, %v1957_v55  ;;  %v3152_v63 = vadd.f32 %v3151_v53, %v3150_v60 }
 0x12a   : > { %v3113_v1 = vpop.f32.mrb[24].mxu0  ;;  %v4614_v5 = vadd.f32 %v3152_v63, %v1960_v61 }
 0x12b   : > { %v3114_v41 = vpop.f32.mrb[25].mxu0 }
 0x12c   : > { %v3115_v6 = vadd.f32 %v3114_v41, %v3113_v1  ;;  %v3116_v4 = vpop.f32.mrb[26].mxu0  ;;  %v3153_v10 = vpop.f32.mrb[24].mxu1 }
 0x12d   : > { %v3117_v11 = vpop.f32.mrb[27].mxu0  ;;  %v3154_v14 = vpop.f32.mrb[25].mxu1 }
 0x12e   : > { %v1965_v12 = vadd.f32 %v3115_v6, %v4538_v32  ;;  %v3118_v13 = vadd.f32 %v3117_v11, %v3116_v4  ;;  %v3155_v16 = vadd.f32 %v3154_v14, %v3153_v10  ;;  %v3156_v17 = vpop.f32.mrb[26].mxu1 }
 0x12f   : > { %v3157_v57 = vpop.f32.mrb[27].mxu1 }
 0x130   : > { %v1968_v18 = vadd.f32 %v3118_v13, %v4546_v59  ;;  %v4626_v20 = vadd.f32 %v3155_v16, %v1965_v12  ;;  %v3158_v23 = vadd.f32 %v3157_v57, %v3156_v17 }
 0x132   : > { %v3119_v48 = vpop.f32.mrb[28].mxu0  ;;  %v2033_v25 = vadd.f32 %v3158_v23, %v1968_v18 }
 0x133   : > { %v3120_v32 = vpop.f32.mrb[29].mxu0 }
 0x134   : > { %v3121_v3 = vadd.f32 %v3120_v32, %v3119_v48  ;;  %v3122_v26 = vpop.f32.mrb[30].mxu0  ;;  %v3159_v27 = vpop.f32.mrb[28].mxu1 }
 0x135   : > { %v3123_v28 = vpop.f32.mrb[31].mxu0  ;;  %v3160_v59 = vpop.f32.mrb[29].mxu1 }
 0x136   : > { %v1973_v8 = vadd.f32 %v3121_v3, %v4568_v15  ;;  %v3124_v29 = vadd.f32 %v3123_v28, %v3122_v26  ;;  %v3161_v30 = vadd.f32 %v3160_v59, %v3159_v27  ;;  %v3162_v31 = vpop.f32.mrb[30].mxu1 }
 0x137   : > { %v3163_v36 = vpop.f32.mrb[31].mxu1 }
 0x138   : > { %v1976_v35 = vadd.f32 %v3124_v29, %v4570_v44  ;;  %v2038_v24 = vadd.f32 %v3161_v30, %v1973_v8  ;;  %v3164_v40 = vadd.f32 %v3163_v36, %v3162_v31 }
 0x13a   : > { %v2041_v43 = vadd.f32 %v3164_v40, %v1976_v35  ;;  %v3181_v38 = vpop.f32.mrb[32].mxu0 }
 0x13b   : > { %v3182_v34 = vpop.f32.mrb[33].mxu0 }
 0x13c   : > { %v3221_v33 = vpop.f32.mrb[32].mxu1  ;;  %v3183_v21 = vadd.f32 %v3182_v34, %v3181_v38  ;;  %v3184_v46 = vpop.f32.mrb[34].mxu0 }
 0x13d   : > { %v3222_v45 = vpop.f32.mrb[33].mxu1  ;;  %v3185_v2 = vpop.f32.mrb[35].mxu0 }
 0x13e   : > { %v3223_v47 = vadd.f32 %v3222_v45, %v3221_v33  ;;  %v3224_v49 = vpop.f32.mrb[34].mxu1  ;;  %v2079_v50 = vadd.f32 %v3183_v21, %v4590_v19  ;;  %v3186_v52 = vadd.f32 %v3185_v2, %v3184_v46 }
 0x13f   : > { %v3225_v15 = vpop.f32.mrb[35].mxu1 }
 0x140   : > { %v3226_v54 = vadd.f32 %v3225_v15, %v3224_v49  ;;  %v2082_v44 = vadd.f32 %v3186_v52, %v4592_v42  ;;  %v2144_v55 = vadd.f32 %v3223_v47, %v2079_v50 }
 0x142   : > { %v2147_v51 = vadd.f32 %v3226_v54, %v2082_v44  ;;  %v3187_v56 = vpop.f32.mrb[36].mxu0 }
 0x143   : > { %v3188_v60 = vpop.f32.mrb[37].mxu0 }
 0x144   : > { %v3227_v58 = vpop.f32.mrb[36].mxu1  ;;  %v3189_v53 = vadd.f32 %v3188_v60, %v3187_v56  ;;  %v3190_v62 = vpop.f32.mrb[38].mxu0 }
 0x145   : > { %v3228_v61 = vpop.f32.mrb[37].mxu1  ;;  %v3191_v0 = vpop.f32.mrb[39].mxu0 }
 0x146   : > { %v3229_v22 = vadd.f32 %v3228_v61, %v3227_v58  ;;  %v3230_v63 = vpop.f32.mrb[38].mxu1  ;;  %v2087_v41 = vadd.f32 %v3189_v53, %v4612_v39  ;;  %v3192_v6 = vadd.f32 %v3191_v0, %v3190_v62 }
 0x147   : > { %v3231_v1 = vpop.f32.mrb[39].mxu1 }
 0x148   : > { %v3232_v19 = vadd.f32 %v3231_v1, %v3230_v63  ;;  %v2090_v4 = vadd.f32 %v3192_v6, %v4614_v5  ;;  %v2152_v9 = vadd.f32 %v3229_v22, %v2087_v41 }
 0x14a   : > { %v2155_v42 = vadd.f32 %v3232_v19, %v2090_v4  ;;  %v3193_v37 = vpop.f32.mrb[40].mxu0 }
 0x14b   : > { %v3194_v11 = vpop.f32.mrb[41].mxu0 }
 0x14c   : > { %v3233_v10 = vpop.f32.mrb[40].mxu1  ;;  %v3195_v12 = vadd.f32 %v3194_v11, %v3193_v37  ;;  %v3196_v13 = vpop.f32.mrb[42].mxu0 }
 0x14d   : > { %v3234_v7 = vpop.f32.mrb[41].mxu1  ;;  %v3197_v17 = vpop.f32.mrb[43].mxu0 }
 0x14e   : > { %v3235_v14 = vadd.f32 %v3234_v7, %v3233_v10  ;;  %v3236_v16 = vpop.f32.mrb[42].mxu1  ;;  %v2095_v57 = vadd.f32 %v3195_v12, %v4626_v20  ;;  %v3198_v23 = vadd.f32 %v3197_v17, %v3196_v13 }
 0x14f   : > { %v3237_v18 = vpop.f32.mrb[43].mxu1 }
 0x150   : > { %v3238_v39 = vadd.f32 %v3237_v18, %v3236_v16  ;;  %v2098_v48 = vadd.f32 %v3198_v23, %v2033_v25  ;;  %v2160_v32 = vadd.f32 %v3235_v14, %v2095_v57 }
 0x152   : > { %v2163_v3 = vadd.f32 %v3238_v39, %v2098_v48  ;;  %v3199_v5 = vpop.f32.mrb[44].mxu0 }
 0x153   : > { %v3200_v27 = vpop.f32.mrb[45].mxu0 }
 0x154   : > { %v3239_v26 = vpop.f32.mrb[44].mxu1  ;;  %v3201_v8 = vadd.f32 %v3200_v27, %v3199_v5  ;;  %v3202_v29 = vpop.f32.mrb[46].mxu0 }
 0x155   : > { %v3240_v28 = vpop.f32.mrb[45].mxu1  ;;  %v3203_v31 = vpop.f32.mrb[47].mxu0 }
 0x156   : > { %v3241_v59 = vadd.f32 %v3240_v28, %v3239_v26  ;;  %v3242_v30 = vpop.f32.mrb[46].mxu1  ;;  %v2103_v36 = vadd.f32 %v3201_v8, %v2038_v24  ;;  %v3204_v40 = vadd.f32 %v3203_v31, %v3202_v29 }
 0x157   : > { %v3243_v35 = vpop.f32.mrb[47].mxu1 }
 0x158   : > { %v3244_v38 = vadd.f32 %v3243_v35, %v3242_v30  ;;  %v2106_v33 = vadd.f32 %v3204_v40, %v2041_v43  ;;  %v2168_v20 = vadd.f32 %v3241_v59, %v2103_v36 }
 0x15a   : > { %v2171_v34 = vadd.f32 %v3244_v38, %v2106_v33  ;;  %v3261_v45 = vpop.f32.mrb[48].mxu0 }
 0x15b   : > { %v3262_v21 = vpop.f32.mrb[49].mxu0 }
 0x15c   : > { %v3301_v25 = vpop.f32.mrb[48].mxu1  ;;  %v3263_v47 = vadd.f32 %v3262_v21, %v3261_v45  ;;  %v3264_v49 = vpop.f32.mrb[50].mxu0 }
 0x15d   : > { %v3302_v46 = vpop.f32.mrb[49].mxu1  ;;  %v3265_v50 = vpop.f32.mrb[51].mxu0 }
 0x15e   : > { %v3303_v2 = vadd.f32 %v3302_v46, %v3301_v25  ;;  %v3304_v15 = vpop.f32.mrb[50].mxu1  ;;  %v2209_v54 = vadd.f32 %v3263_v47, %v2144_v55  ;;  %v3266_v44 = vadd.f32 %v3265_v50, %v3264_v49 }
 0x15f   : > { %v3305_v52 = vpop.f32.mrb[51].mxu1 }
 0x160   : > { %v3306_v56 = vadd.f32 %v3305_v52, %v3304_v15  ;;  %v2212_v58 = vadd.f32 %v3266_v44, %v2147_v51  ;;  %v2274_v24 = vadd.f32 %v3303_v2, %v2209_v54 }
 0x162   : > { %v2277_v60 = vadd.f32 %v3306_v56, %v2212_v58  ;;  %v3267_v61 = vpop.f32.mrb[52].mxu0 }
 0x163   : > { %v3268_v53 = vpop.f32.mrb[53].mxu0 }
 0x164   : > { %v3307_v43 = vpop.f32.mrb[52].mxu1  ;;  %v3269_v22 = vadd.f32 %v3268_v53, %v3267_v61  ;;  %v3270_v63 = vpop.f32.mrb[54].mxu0 }
 0x165   : > { %v3308_v62 = vpop.f32.mrb[53].mxu1  ;;  %v3271_v41 = vpop.f32.mrb[55].mxu0 }
 0x166   : > { %v3309_v0 = vadd.f32 %v3308_v62, %v3307_v43  ;;  %v3310_v1 = vpop.f32.mrb[54].mxu1  ;;  %v2217_v19 = vadd.f32 %v3269_v22, %v2152_v9  ;;  %v3272_v4 = vadd.f32 %v3271_v41, %v3270_v63 }
 0x167   : > { %v3311_v6 = vpop.f32.mrb[55].mxu1 }
 0x168   : > { %v3312_v37 = vadd.f32 %v3311_v6, %v3310_v1  ;;  %v2220_v10 = vadd.f32 %v3272_v4, %v2155_v42  ;;  %v2282_v55 = vadd.f32 %v3309_v0, %v2217_v19 }
 0x16a   : > { %v2285_v11 = vadd.f32 %v3312_v37, %v2220_v10  ;;  %v3273_v7 = vpop.f32.mrb[56].mxu0 }
 0x16b   : > { %v3274_v12 = vpop.f32.mrb[57].mxu0 }
 0x16c   : > { %v3313_v51 = vpop.f32.mrb[56].mxu1  ;;  %v3275_v14 = vadd.f32 %v3274_v12, %v3273_v7  ;;  %v3276_v16 = vpop.f32.mrb[58].mxu0 }
 0x16d   : > { %v3314_v13 = vpop.f32.mrb[57].mxu1  ;;  %v3277_v57 = vpop.f32.mrb[59].mxu0 }
 0x16e   : > { %v3315_v17 = vadd.f32 %v3314_v13, %v3313_v51  ;;  %v3316_v18 = vpop.f32.mrb[58].mxu1  ;;  %v2225_v39 = vadd.f32 %v3275_v14, %v2160_v32  ;;  %v3278_v48 = vadd.f32 %v3277_v57, %v3276_v16 }
 0x16f   : > { %v3317_v23 = vpop.f32.mrb[59].mxu1 }
 0x170   : > { %v3318_v5 = vadd.f32 %v3317_v23, %v3316_v18  ;;  %v2228_v26 = vadd.f32 %v3278_v48, %v2163_v3  ;;  %v2290_v9 = vadd.f32 %v3315_v17, %v2225_v39 }
 0x172   : > { %v2293_v27 = vadd.f32 %v3318_v5, %v2228_v26  ;;  %v3279_v28 = vpop.f32.mrb[60].mxu0  ;;  %v2469_v26 = vlaneseq }
 0x173   : > { %v3280_v8 = vpop.f32.mrb[61].mxu0 }
 0x174   : > { %v3319_v42 = vpop.f32.mrb[60].mxu1  ;;  %v3281_v59 = vadd.f32 %v3280_v8, %v3279_v28  ;;  %v3282_v30 = vpop.f32.mrb[62].mxu0 }
 0x175   : > { %v3320_v29 = vpop.f32.mrb[61].mxu1  ;;  %v3283_v36 = vpop.f32.mrb[63].mxu0 }
 0x176   : > { %v3321_v31 = vadd.f32 %v3320_v29, %v3319_v42  ;;  %v3322_v35 = vpop.f32.mrb[62].mxu1  ;;  %v2233_v38 = vadd.f32 %v3281_v59, %v2168_v20  ;;  %v3284_v33 = vadd.f32 %v3283_v36, %v3282_v30 }
 0x177   : > { %v3323_v40 = vpop.f32.mrb[63].mxu1 }
 0x178   : > { %v3324_v45 = vadd.f32 %v3323_v40, %v3322_v35  ;;  %v2236_v25 = vadd.f32 %v3284_v33, %v2171_v34  ;;  %v2298_v32 = vadd.f32 %v3321_v31, %v2233_v38 }
 0x17a   : > { %v2301_v21 = vadd.f32 %v3324_v45, %v2236_v25  ;;  %v3341_v46 = vpop.f32.mrb[64].mxu0 }
 0x17b   : > { %v3342_v3 = vpop.f32.mrb[65].mxu0 }
 0x17c   : > { %v3343_v47 = vadd.f32 %v3342_v3, %v3341_v46  ;;  %v3344_v49 = vpop.f32.mrb[66].mxu0 }
 0x17d   : > { %v3345_v2 = vpop.f32.mrb[67].mxu0 }
 0x17e   : > { %v2339_v15 = vadd.f32 %v3343_v47, %v2274_v24  ;;  %v3346_v50 = vadd.f32 %v3345_v2, %v3344_v49 }
 0x180   : > { %v2342_v52 = vadd.f32 %v3346_v50, %v2277_v60 }
 0x182   : > { %v3347_v54 = vpop.f32.mrb[68].mxu0  ;;  %v2369_v62 = vadd.f32 %v2342_v52, %v2339_v15 }
 0x183   : > { %v3348_v44 = vpop.f32.mrb[69].mxu0 }
 0x184   : > { %v3349_v56 = vadd.f32 %v3348_v44, %v3347_v54  ;;  %v3350_v58 = vpop.f32.mrb[70].mxu0 }
 0x185   : > { %v3351_v61 = vpop.f32.mrb[71].mxu0 }
 0x186   : > { %v2347_v43 = vadd.f32 %v3349_v56, %v2282_v55  ;;  %v3352_v20 = vadd.f32 %v3351_v61, %v3350_v58 }
 0x188   : > { %v2350_v53 = vadd.f32 %v3352_v20, %v2285_v11  ;;  %v2370_v63 = vadd.f32 %v2369_v62, %v2347_v43 }
 0x18a   : > { %v3353_v34 = vpop.f32.mrb[72].mxu0  ;;  %v2371_v24 = vadd.f32 %v2370_v63, %v2350_v53 }
 0x18b   : > { %v3354_v22 = vpop.f32.mrb[73].mxu0 }
 0x18c   : > { %v3355_v0 = vadd.f32 %v3354_v22, %v3353_v34  ;;  %v3356_v1 = vpop.f32.mrb[74].mxu0 }
 0x18d   : > { %v3357_v41 = vpop.f32.mrb[75].mxu0 }
 0x18e   : > { %v2355_v6 = vadd.f32 %v3355_v0, %v2290_v9  ;;  %v3358_v19 = vadd.f32 %v3357_v41, %v3356_v1  ;;  %v2470_v9 = vshrl.u32 %v2469_v26, 7 }
 0x190   : > { %v2358_v4 = vadd.f32 %v3358_v19, %v2293_v27  ;;  %v2372_v60 = vadd.f32 %v2371_v24, %v2355_v6  ;;  %v2471_v27 = vsub.s32 0, %v2470_v9 }
 0x192   : > { %v3359_v37 = vpop.f32.mrb[76].mxu0  ;;  %v2373_v55 = vadd.f32 %v2372_v60, %v2358_v4 }
 0x193   : > { %v3360_v10 = vpop.f32.mrb[77].mxu0 }
 0x194   : > { %v3361_v7 = vadd.f32 %v3360_v10, %v3359_v37  ;;  %v3362_v51 = vpop.f32.mrb[78].mxu0 }
 0x195   : > { %v3363_v12 = vpop.f32.mrb[79].mxu0 }
 0x196   : > { %v2363_v13 = vadd.f32 %v3361_v7, %v2298_v32  ;;  %v3364_v11 = vadd.f32 %v3363_v12, %v3362_v51  ;;  %v2999_v12 = vld [vmem:[%s4661_s5] ss:$0 sm:$0xff] }
 0x198   : > { %v2374_v14 = vadd.f32 %v2373_v55, %v2363_v13  ;;  %v2366_v16 = vadd.f32 %v3364_v11, %v2301_v21 }
 0x19a   : > { %v2375_v17 = vadd.f32 %v2374_v14, %v2366_v16 }
 0x19c   : > { %v2376_v18 = vrot.slane %v2375_v17, 4 }
 0x19e   : > { %v2377_v57 = vadd.f32 %v2376_v18, %v2375_v17 }
 0x1a0   : > { %v2378_v23 = vrot.slane %v2377_v57, 2 }
 0x1a2   : > { %v2379_v39 = vadd.f32 %v2378_v23, %v2377_v57 }
 0x1a4   : > { %v2380_v48 = vrot.slane %v2379_v39, 1 }
 0x1a6   : > { %v2381_v5 = vadd.f32 %v2380_v48, %v2379_v39 }
 0x1a8   : > { %3432 = vmatmul.mubr.f32.vlgmr.msra.gmra.mrb[64].mxu1 %v2381_v5 }
 0x27b   : > { %v2464_v28 = vpop.f32.mrb[64].mxu1 }
 0x27c   : > { %v2468_v42 = vmul.f32 0.015625, %v2464_v28  ;;  %v3433_v8 = vpop.f32.mrb[65].mxu1 }
 0x27e   : > { %v2472_v29 = vrot.slane %v2468_v42, %v2471_v27 }
 0x280   : > { %v2473_v59 = vsub.f32 %v2339_v15, %v2472_v29  ;;  %v2474_v30 = vsub.f32 %v2342_v52, %v2472_v29  ;;  %v2475_v31 = vsub.f32 %v2347_v43, %v2472_v29  ;;  %v2476_v35 = vsub.f32 %v2350_v53, %v2472_v29 }
 0x281   : > { %v2477_v38 = vsub.f32 %v2355_v6, %v2472_v29  ;;  %v2478_v25 = vsub.f32 %v2358_v4, %v2472_v29  ;;  %v2479_v46 = vsub.f32 %v2363_v13, %v2472_v29  ;;  %v2480_v49 = vsub.f32 %v2366_v16, %v2472_v29  ;;  %v2998_v6 = vld [vmem:[%s4660_s4] ss:$0 sm:$0xff] }
 0x282   : > { %v2481_v36 = vmul.f32 %v2473_v59, %v2473_v59  ;;  %v2482_v40 = vmul.f32 %v2474_v30, %v2474_v30  ;;  %v2483_v33 = vmul.f32 %v2475_v31, %v2475_v31  ;;  %v2484_v32 = vmul.f32 %v2476_v35, %v2476_v35 }
 0x283   : > { %v2485_v3 = vmul.f32 %v2477_v38, %v2477_v38  ;;  %v2486_v2 = vmul.f32 %v2478_v25, %v2478_v25  ;;  %v2487_v54 = vmul.f32 %v2479_v46, %v2479_v46  ;;  %v2488_v15 = vmul.f32 %v2480_v49, %v2480_v49 }
 0x284   : > { %v2489_v45 = vadd.f32 %v2482_v40, %v2481_v36 }
 0x286   : > { %v2490_v21 = vadd.f32 %v2489_v45, %v2483_v33 }
 0x288   : > { %v2491_v47 = vadd.f32 %v2490_v21, %v2484_v32 }
 0x28a   : > { %v2492_v50 = vadd.f32 %v2491_v47, %v2485_v3 }
 0x28c   : > { %v2493_v44 = vadd.f32 %v2492_v50, %v2486_v2 }
 0x28e   : > { %v2494_v52 = vadd.f32 %v2493_v44, %v2487_v54 }
 0x290   : > { %v2495_v56 = vadd.f32 %v2494_v52, %v2488_v15 }
 0x292   : > { %v2496_v58 = vrot.slane %v2495_v56, 4 }
 0x294   : > { %v2497_v61 = vadd.f32 %v2496_v58, %v2495_v56 }
 0x296   : > { %v2498_v43 = vrot.slane %v2497_v61, 2 }
 0x298   : > { %v2499_v20 = vadd.f32 %v2498_v43, %v2497_v61 }
 0x29a   : > { %v2500_v53 = vrot.slane %v2499_v20, 1 }
 0x29c   : > { %v2501_v62 = vadd.f32 %v2500_v53, %v2499_v20 }
 0x29e   : > { %3467 = vmatmul.mubr.f32.vlgmr.msra.gmra.mrb[80].mxu0 %v2501_v62 }
 0x371   : > { %v2568_v34 = vpop.f32.mrb[80].mxu0 }
 0x372   : > { %v2572_v22 = vmul.f32 0.015625, %v2568_v34  ;;  %v3468_v63 = vpop.f32.mrb[81].mxu0 }
 0x374   : > { %v2573_v0 = vadd.f32 1e-05, %v2572_v22 }
 0x376   : > { %3688 = vrsqrt.f32 %v2573_v0 }
 0x380   : > { %v3689_v1 = vpop.eup %3688 }
 0x381   : > { %v2578_v41 = vrot.slane %v3689_v1, %v2471_v27 }
 0x383   : > { %v2579_v19 = vmul.f32 %v2578_v41, %v2473_v59  ;;  %v2580_v24 = vmul.f32 %v2578_v41, %v2474_v30  ;;  %v2581_v4 = vmul.f32 %v2578_v41, %v2475_v31  ;;  %v2582_v60 = vmul.f32 %v2578_v41, %v2476_v35 }
 0x384   : > { %v2583_v37 = vmul.f32 %v2578_v41, %v2477_v38  ;;  %v2584_v10 = vmul.f32 %v2578_v41, %v2478_v25  ;;  %v2585_v7 = vmul.f32 %v2578_v41, %v2479_v46  ;;  %v2586_v51 = vmul.f32 %v2578_v41, %v2480_v49 }
 0x385   : > { %v2594_v55 = vmul.f32 %v2998_v6, %v2579_v19  ;;  %v2595_v13 = vmul.f32 %v2998_v6, %v2580_v24  ;;  %v2596_v11 = vmul.f32 %v2998_v6, %v2581_v4  ;;  %v2597_v14 = vmul.f32 %v2998_v6, %v2582_v60 }
 0x386   : > { %v2598_v16 = vmul.f32 %v2998_v6, %v2583_v37  ;;  %v2599_v17 = vmul.f32 %v2998_v6, %v2584_v10  ;;  %v2600_v18 = vmul.f32 %v2998_v6, %v2585_v7  ;;  %v2601_v57 = vmul.f32 %v2998_v6, %v2586_v51 }
 0x387   : > { %v2609_v23 = vadd.f32 %v2999_v12, %v2594_v55  ;;  %v2610_v39 = vadd.f32 %v2999_v12, %v2595_v13  ;;  %v2611_v48 = vadd.f32 %v2999_v12, %v2596_v11  ;;  %v2612_v5 = vadd.f32 %v2999_v12, %v2597_v14 }
 0x388   : > { %v2613_v26 = vadd.f32 %v2999_v12, %v2598_v16  ;;  %v2614_v9 = vadd.f32 %v2999_v12, %v2599_v17  ;;  %v2615_v27 = vadd.f32 %v2999_v12, %v2600_v18  ;;  %v2616_v28 = vadd.f32 %v2999_v12, %v2601_v57 }
 0x389   : > { %v2617_v42 = vmax.f32 %v2609_v23, 0.0  ;;  %v2618_v8 = vmax.f32 %v2610_v39, 0.0  ;;  %v2619_v29 = vmax.f32 %v2611_v48, 0.0  ;;  %v2620_v59 = vmax.f32 %v2612_v5, 0.0 }
 0x38a   : > { %v2621_v30 = vmax.f32 %v2613_v26, 0.0  ;;  %v2622_v31 = vmax.f32 %v2614_v9, 0.0  ;;  %v2623_v35 = vmax.f32 %v2615_v27, 0.0  ;;  %v2624_v36 = vmax.f32 %v2616_v28, 0.0 }
 0x38b   : > { %2625 = vst [vmem:[%s320_s22] sm:$0xff] %v2617_v42  ;;  %2626 = vst [vmem:[%s320_s22 + $0x8] sm:$0xff] %v2618_v8 }
 0x38c   : > { %2627 = vst [vmem:[%s320_s22 + $0x10] sm:$0xff] %v2619_v29  ;;  %2628 = vst [vmem:[%s320_s22 + $0x18] sm:$0xff] %v2620_v59 }
 0x38d   : > { %2629 = vst [vmem:[%s320_s22 + $0x20] sm:$0xff] %v2621_v30  ;;  %2630 = vst [vmem:[%s320_s22 + $0x28] sm:$0xff] %v2622_v31 }
 0x38e   : > { %2631 = vst [vmem:[%s320_s22 + $0x30] sm:$0xff] %v2623_v35  ;;  %2632 = vst [vmem:[%s320_s22 + $0x38] sm:$0xff] %v2624_v36 }
 0x38f PF: > { %s17_s26 = sadd.s32 1, %s3713_s26   ;;  %s4664_s24 = smov %s3709_s25 }
 0x390   : > { %p14_p5 = scmp.ge.s32.totalorder %s17_s26, 4   ;;  %s4665_s25 = smov %s4667_s27 }
 0x392   :  { %16 = sbr.rel (!%p14_p5) target bundleno = 2 (0x2), region = 89 }

</bundles_post_ra>
